<compile_context>
chip_gen: v7x
topology: tpu7x:2x2x1
jax: 0.10.0
libtpu: 0.0.40
codegen_flags: <defaults>
</compile_context>

<pallas_src>
import math
import functools

import jax
import jax.numpy as jnp
from jax.experimental import pallas as pl
from jax.experimental.pallas import tpu as pltpu

_HP = jax.lax.Precision.HIGHEST


def _layernorm(x, g, b, eps=1e-5):
    mu = jnp.mean(x, axis=-1, keepdims=True)
    var = jnp.mean((x - mu) ** 2, axis=-1, keepdims=True)
    return (x - mu) * jax.lax.rsqrt(var + eps) * g + b


def _gelu_exact(x):
    # torch.nn.functional.gelu default = exact (erf) gelu
    return 0.5 * x * (1.0 + jax.lax.erf(x * (1.0 / math.sqrt(2.0))))


def gpt2_layer_kernel(num_heads, dim_head, tq,
                      x_ref, mask_ref,
                      wq_ref, wk_ref, wv_ref, wo_ref, bo_ref,
                      ln1g_ref, ln1b_ref,
                      w1_ref, b1_ref, w2_ref, b2_ref,
                      ln2g_ref, ln2b_ref,
                      out_ref, attnp_ref,
                      k_scratch, v_scratch, av_scratch):
    qi = pl.program_id(1)

    # --- K/V for the full sequence: computed once per batch, reused by all q-tiles ---
    @pl.when(qi == 0)
    def _():
        xf = x_ref[0]                                            # (S, D)
        k_scratch[...] = jnp.dot(xf, wk_ref[...],
                                 preferred_element_type=jnp.float32, precision=_HP)
        v_scratch[...] = jnp.dot(xf, wv_ref[...],
                                 preferred_element_type=jnp.float32, precision=_HP)

    # --- query tile ---
    q0 = pl.multiple_of(qi * tq, tq)
    xq = x_ref[0, pl.ds(q0, tq), :]                              # (tq, D)
    q = jnp.dot(xq, wq_ref[...],
                preferred_element_type=jnp.float32, precision=_HP)

    mask_q = mask_ref[0] != 0                                    # hoisted out of head loop
    scale = 1.0 / math.sqrt(dim_head)

    for h in range(num_heads):                                   # static unroll over heads
        sl = slice(h * dim_head, (h + 1) * dim_head)
        qh = q[:, sl]                                            # (tq, dh)
        kh = k_scratch[:, sl]                                    # (S, dh)
        vh = v_scratch[:, sl]                                    # (S, dh)

        # Contraction depth = dim_head (< MXU depth): inherent underutilization of this
        # per-head attention formulation; kept per-head to preserve exact attn_p.
        scores = jax.lax.dot_general(qh, kh, (((1,), (1,)), ((), ())),
                                     preferred_element_type=jnp.float32,
                                     precision=_HP) * scale
        scores = jnp.where(mask_q, jnp.float32(-1e9), scores)

        # softmax -> returned attention probabilities (kept f32, checked at 1e-5)
        m = jnp.max(scores, axis=-1, keepdims=True)
        e = jnp.exp(scores - m)
        denom = jnp.sum(e, axis=-1, keepdims=True)
        attnp_ref[0, h] = e * pl.reciprocal(denom, approx=False)

        # NB: reference multiplies raw (scaled, masked) scores by V, not softmax(p).
        av_scratch[:, sl] = jnp.dot(scores, vh,
                                    preferred_element_type=jnp.float32, precision=_HP)

    attn_out = jnp.dot(av_scratch[...], wo_ref[...],
                       preferred_element_type=jnp.float32, precision=_HP) + bo_ref[0]
    # TODO(synk): nn.Dropout is identity here (p=0 / eval-mode semantics)

    h1 = _layernorm(xq + attn_out, ln1g_ref[0], ln1b_ref[0])

    # --- FFN: Conv1d(k=1) == Linear; bf16 inputs, f32 accumulation ---
    f = jnp.dot(h1.astype(jnp.bfloat16), w1_ref[...],
                preferred_element_type=jnp.float32) + b1_ref[0]
    f = _gelu_exact(f)
    f = jnp.dot(f.astype(jnp.bfloat16), w2_ref[...],
                preferred_element_type=jnp.float32) + b2_ref[0]

    out_ref[0] = _layernorm(h1 + f, ln2g_ref[0], ln2b_ref[0])


def gpt2_decoder_layer(x, mask, params, num_heads, dim_head, dim_ffn, q_tile=64):
    B, S, D = x.shape
    tq = min(q_tile, S)
    assert S % tq == 0 and tq % 8 == 0, "q-tile must divide S and be sublane-aligned"
    nq = S // tq

    (wq, wk, wv, wo, bo, g1, be1, w1, bf1, w2, bf2, g2, be2) = params
    # FFN weights in bf16 (f32 accumulation in-kernel). Attention weights stay f32.
    w1 = w1.astype(jnp.bfloat16)
    w2 = w2.astype(jnp.bfloat16)
    mask_i8 = mask.astype(jnp.int8)

    kernel = functools.partial(gpt2_layer_kernel, num_heads, dim_head, tq)

    def full(shape):
        return pl.BlockSpec(shape, lambda b, qi: (0,) * len(shape))

    in_specs = [
        pl.BlockSpec((1, S, D), lambda b, qi: (b, 0, 0)),        # x (full seq per batch)
        pl.BlockSpec((1, tq, S), lambda b, qi: (b, qi, 0)),      # mask q-tile (int8)
        full((D, D)), full((D, D)), full((D, D)),                # wq, wk, wv
        full((D, D)), full((1, D)),                              # wo, bo
        full((1, D)), full((1, D)),                              # ln1 gamma, beta
        full((D, dim_ffn)), full((1, dim_ffn)),                  # ffn w1 (bf16), b1
        full((dim_ffn, D)), full((1, D)),                        # ffn w2 (bf16), b2
        full((1, D)), full((1, D)),                              # ln2 gamma, beta
    ]
    out_specs = [
        pl.BlockSpec((1, tq, D), lambda b, qi: (b, qi, 0)),
        pl.BlockSpec((1, num_heads, tq, S), lambda b, qi: (b, 0, qi, 0)),
    ]
    out_shape = [
        jax.ShapeDtypeStruct((B, S, D), jnp.float32),
        # TODO(synk): attn_p could be emitted as bf16 to halve the O(B*H*S^2) writeback
        # if downstream tolerates it; kept f32 to match the reference at 1e-5.
        jax.ShapeDtypeStruct((B, num_heads, S, S), jnp.float32),
    ]
    scratch_shapes = [
        pltpu.VMEM((S, D), jnp.float32),      # K, full sequence (reused across q-tiles)
        pltpu.VMEM((S, D), jnp.float32),      # V, full sequence
        pltpu.VMEM((tq, D), jnp.float32),     # per-tile context slab (replaces concat)
    ]
    return pl.pallas_call(
        kernel,
        out_shape=out_shape,
        grid_spec=pltpu.PrefetchScalarGridSpec(
            num_scalar_prefetch=0,
            grid=(B, nq),
            in_specs=in_specs,
            out_specs=out_specs,
            scratch_shapes=scratch_shapes,
        ),
        compiler_params=pltpu.CompilerParams(
            # batch axis parallel (megacore); q-tile axis must run sequentially because
            # the K/V scratch computed at qi==0 is reused by later q-tiles of the batch.
            dimension_semantics=("parallel", "arbitrary"),
            vmem_limit_bytes=48 * 1024 * 1024,
        ),
    )(x, mask_i8, wq, wk, wv, wo, bo, g1, be1, w1, bf1, w2, bf2, g2, be2)


def ref_forward(x, mask, params, num_heads, dim_head):
    """Pure-JAX f32 reference mirroring the PyTorch module semantics exactly."""
    (wq, wk, wv, wo, bo, g1, be1, w1, bf1, w2, bf2, g2, be2) = params
    B, S, D = x.shape

    def split(t):
        return t.reshape(B, S, num_heads, dim_head).transpose(0, 2, 1, 3)

    q = split(jnp.dot(x, wq, precision=_HP))
    k = split(jnp.dot(x, wk, precision=_HP))
    v = split(jnp.dot(x, wv, precision=_HP))
    scores = jnp.einsum('bhqd,bhkd->bhqk', q, k, precision=_HP) / math.sqrt(dim_head)
    scores = jnp.where(mask[:, None, :, :] != 0, jnp.float32(-1e9), scores)
    p = jax.nn.softmax(scores, axis=-1)
    av = jnp.einsum('bhqk,bhkd->bhqd', scores, v, precision=_HP)   # raw scores @ V (as in ref)
    av = av.transpose(0, 2, 1, 3).reshape(B, S, D)
    attn_out = jnp.dot(av, wo, precision=_HP) + bo

    def ln(t, g, b, eps=1e-5):
        mu = t.mean(-1, keepdims=True)
        var = ((t - mu) ** 2).mean(-1, keepdims=True)
        return (t - mu) / jnp.sqrt(var + eps) * g + b

    h1 = ln(x + attn_out, g1, be1)
    f = jnp.dot(h1, w1, precision=_HP) + bf1
    f = 0.5 * f * (1.0 + jax.lax.erf(f / jnp.sqrt(jnp.float32(2.0))))
    f = jnp.dot(f, w2, precision=_HP) + bf2
    out = ln(h1 + f, g2, be2)
    return out, p


if __name__ == "__main__":
    # small but layout-friendly shapes: D and S multiples of 128, dh = 64, two heads.
    B, S, H, dh, F = 2, 128, 2, 64, 256
    D = H * dh

    key = jax.random.PRNGKey(0)
    ks = jax.random.split(key, 12)
    x = jax.random.normal(ks[0], (B, S, D), jnp.float32)

    causal = (jnp.arange(S)[None, :] > jnp.arange(S)[:, None]).astype(jnp.int32)
    mask = jnp.tile(causal[None], (B, 1, 1))            # (B, S, S), same mask per batch

    sc = 0.02
    wq = sc * jax.random.normal(ks[1], (D, D), jnp.float32)
    wk = sc * jax.random.normal(ks[2], (D, D), jnp.float32)
    wv = sc * jax.random.normal(ks[3], (D, D), jnp.float32)
    wo = sc * jax.random.normal(ks[4], (D, D), jnp.float32)
    bo = sc * jax.random.normal(ks[5], (1, D), jnp.float32)
    g1 = 1.0 + 0.1 * jax.random.normal(ks[6], (1, D), jnp.float32)
    be1 = 0.1 * jax.random.normal(ks[7], (1, D), jnp.float32)
    w1 = sc * jax.random.normal(ks[8], (D, F), jnp.float32)
    bf1 = sc * jax.random.normal(ks[9], (1, F), jnp.float32)
    w2 = sc * jax.random.normal(ks[10], (F, D), jnp.float32)
    bf2 = sc * jax.random.normal(ks[11], (1, D), jnp.float32)
    g2 = jnp.ones((1, D), jnp.float32)
    be2 = jnp.zeros((1, D), jnp.float32)

    params = (wq, wk, wv, wo, bo, g1, be1, w1, bf1, w2, bf2, g2, be2)

    out, attn_p = gpt2_decoder_layer(x, mask, params, H, dh, F, q_tile=64)
    jax.block_until_ready((out, attn_p))

    ref_out, ref_p = ref_forward(x, mask, params, H, dh)
    assert out.shape == (B, S, D) and attn_p.shape == (B, H, S, S)
    # out tolerance is 5e-3: the FFN runs bf16-in/f32-acc while the reference is pure f32.
    assert jnp.allclose(out, ref_out, atol=5e-3, rtol=5e-3), "output mismatch"
    # attention probabilities computed fully in f32 (HIGHEST) -> tight tolerance holds.
    assert jnp.allclose(attn_p, ref_p, atol=1e-5, rtol=1e-5), "attn prob mismatch"

    print("KERNEL_OK")
</pallas_src>

<mosaic_0001>
module attributes {stable_mosaic.version = 11 : i64} {
  func.func @gpt2_layer_kernel(%arg0: i32, %arg1: i32, %arg2: memref<1x128x128xf32, #tpu.memory_space<vmem>>, %arg3: memref<1x64x128xi8, #tpu.memory_space<vmem>>, %arg4: memref<128x128xf32, #tpu.memory_space<vmem>>, %arg5: memref<128x128xf32, #tpu.memory_space<vmem>>, %arg6: memref<128x128xf32, #tpu.memory_space<vmem>>, %arg7: memref<128x128xf32, #tpu.memory_space<vmem>>, %arg8: memref<1x128xf32, #tpu.memory_space<vmem>>, %arg9: memref<1x128xf32, #tpu.memory_space<vmem>>, %arg10: memref<1x128xf32, #tpu.memory_space<vmem>>, %arg11: memref<128x256xbf16, #tpu.memory_space<vmem>>, %arg12: memref<1x256xf32, #tpu.memory_space<vmem>>, %arg13: memref<256x128xbf16, #tpu.memory_space<vmem>>, %arg14: memref<1x128xf32, #tpu.memory_space<vmem>>, %arg15: memref<1x128xf32, #tpu.memory_space<vmem>>, %arg16: memref<1x128xf32, #tpu.memory_space<vmem>>, %arg17: memref<1x64x128xf32, #tpu.memory_space<vmem>>, %arg18: memref<1x2x64x128xf32, #tpu.memory_space<vmem>>, %arg19: memref<128x128xf32, #tpu.memory_space<vmem>>, %arg20: memref<128x128xf32, #tpu.memory_space<vmem>>, %arg21: memref<64x128xf32, #tpu.memory_space<vmem>>) attributes {dimension_semantics = [#tpu.dimension_semantics<parallel>, #tpu.dimension_semantics<arbitrary>], iteration_bounds = array<i64: 2, 2>, scalar_prefetch = 0 : i64, scratch_operands = 3 : i64, tpu.core_type = #tpu.core_type<tc>, window_params = [{transform_indices = @transform_0, window_bounds = array<i64: 1, 128, 128>}, {transform_indices = @transform_1, window_bounds = array<i64: 1, 64, 128>}, {pipeline_mode = #tpu.pipeline_mode<synchronous>, transform_indices = @transform_2, window_bounds = array<i64: 128, 128>}, {pipeline_mode = #tpu.pipeline_mode<synchronous>, transform_indices = @transform_3, window_bounds = array<i64: 128, 128>}, {pipeline_mode = #tpu.pipeline_mode<synchronous>, transform_indices = @transform_4, window_bounds = array<i64: 128, 128>}, {pipeline_mode = #tpu.pipeline_mode<synchronous>, transform_indices = @transform_5, window_bounds = array<i64: 128, 128>}, {pipeline_mode = #tpu.pipeline_mode<synchronous>, transform_indices = @transform_6, window_bounds = array<i64: 1, 128>}, {pipeline_mode = #tpu.pipeline_mode<synchronous>, transform_indices = @transform_7, window_bounds = array<i64: 1, 128>}, {pipeline_mode = #tpu.pipeline_mode<synchronous>, transform_indices = @transform_8, window_bounds = array<i64: 1, 128>}, {pipeline_mode = #tpu.pipeline_mode<synchronous>, transform_indices = @transform_9, window_bounds = array<i64: 128, 256>}, {pipeline_mode = #tpu.pipeline_mode<synchronous>, transform_indices = @transform_10, window_bounds = array<i64: 1, 256>}, {pipeline_mode = #tpu.pipeline_mode<synchronous>, transform_indices = @transform_11, window_bounds = array<i64: 256, 128>}, {pipeline_mode = #tpu.pipeline_mode<synchronous>, transform_indices = @transform_12, window_bounds = array<i64: 1, 128>}, {pipeline_mode = #tpu.pipeline_mode<synchronous>, transform_indices = @transform_13, window_bounds = array<i64: 1, 128>}, {pipeline_mode = #tpu.pipeline_mode<synchronous>, transform_indices = @transform_14, window_bounds = array<i64: 1, 128>}, {transform_indices = @transform_15, window_bounds = array<i64: 1, 64, 128>}, {transform_indices = @transform_16, window_bounds = array<i64: 1, 2, 64, 128>}]} {
    %c0_i32 = arith.constant 0 : i32
    %0 = arith.cmpi eq, %arg1, %c0_i32 : i32
    %1 = arith.extui %0 : i1 to i32
    %c0_i32_0 = arith.constant 0 : i32
    %2 = arith.cmpi ne, %1, %c0_i32_0 : i32
    scf.if %2 {
      %c0_78 = arith.constant 0 : index
      %c0_79 = arith.constant 0 : index
      %c0_80 = arith.constant 0 : index
      %153 = vector.load %arg2[%c0_78, %c0_79, %c0_80] : memref<1x128x128xf32, #tpu.memory_space<vmem>>, vector<1x128x128xf32>
      %154 = vector.shape_cast %153 : vector<1x128x128xf32> to vector<128x128xf32>
      %c0_81 = arith.constant 0 : index
      %c0_82 = arith.constant 0 : index
      %155 = vector.load %arg5[%c0_81, %c0_82] : memref<128x128xf32, #tpu.memory_space<vmem>>, vector<128x128xf32>
      %cst_83 = arith.constant dense<0.000000e+00> : vector<128x128xf32>
      %156 = tpu.matmul %154, %155, %cst_83 {dimension_numbers = #tpu.dot_dimension_numbers<[1], [0], [0], [1], [0, 0, 1, 1], [], []>, precision = #tpu.contract_precision<fp32>} : vector<128x128xf32>, vector<128x128xf32>, vector<128x128xf32> -> vector<128x128xf32>
      %c0_84 = arith.constant 0 : index
      %c0_85 = arith.constant 0 : index
      %157 = vector.load %arg19[%c0_84, %c0_85] : memref<128x128xf32, #tpu.memory_space<vmem>>, vector<128x128xf32>
      tpu.vector_store %arg19[%c0_84, %c0_85], %156 {strides = array<i32>} : memref<128x128xf32, #tpu.memory_space<vmem>>, vector<128x128xf32>,
      %c0_86 = arith.constant 0 : index
      %c0_87 = arith.constant 0 : index
      %158 = vector.load %arg6[%c0_86, %c0_87] : memref<128x128xf32, #tpu.memory_space<vmem>>, vector<128x128xf32>
      %cst_88 = arith.constant dense<0.000000e+00> : vector<128x128xf32>
      %159 = tpu.matmul %154, %158, %cst_88 {dimension_numbers = #tpu.dot_dimension_numbers<[1], [0], [0], [1], [0, 0, 1, 1], [], []>, precision = #tpu.contract_precision<fp32>} : vector<128x128xf32>, vector<128x128xf32>, vector<128x128xf32> -> vector<128x128xf32>
      %c0_89 = arith.constant 0 : index
      %c0_90 = arith.constant 0 : index
      %160 = vector.load %arg20[%c0_89, %c0_90] : memref<128x128xf32, #tpu.memory_space<vmem>>, vector<128x128xf32>
      tpu.vector_store %arg20[%c0_89, %c0_90], %159 {strides = array<i32>} : memref<128x128xf32, #tpu.memory_space<vmem>>, vector<128x128xf32>,
    } else {
    }
    %c64_i32 = arith.constant 64 : i32
    %3 = arith.muli %arg1, %c64_i32 : i32
    %4 = tpu.assume_multiple %3, 64 : i32
    %c0 = arith.constant 0 : index
    %5 = arith.index_cast %4 : i32 to index
    %c0_1 = arith.constant 0 : index
    %6 = vector.load %arg2[%c0, %5, %c0_1] : memref<1x128x128xf32, #tpu.memory_space<vmem>>, vector<1x64x128xf32>
    %7 = vector.shape_cast %6 : vector<1x64x128xf32> to vector<64x128xf32>
    %c0_2 = arith.constant 0 : index
    %c0_3 = arith.constant 0 : index
    %8 = vector.load %arg4[%c0_2, %c0_3] : memref<128x128xf32, #tpu.memory_space<vmem>>, vector<128x128xf32>
    %cst = arith.constant dense<0.000000e+00> : vector<64x128xf32>
    %9 = tpu.matmul %7, %8, %cst {dimension_numbers = #tpu.dot_dimension_numbers<[1], [0], [0], [1], [0, 0, 1, 1], [], []>, precision = #tpu.contract_precision<fp32>} : vector<64x128xf32>, vector<128x128xf32>, vector<64x128xf32> -> vector<64x128xf32>
    %c0_4 = arith.constant 0 : index
    %c0_5 = arith.constant 0 : index
    %c0_6 = arith.constant 0 : index
    %10 = vector.load %arg3[%c0_4, %c0_5, %c0_6] : memref<1x64x128xi8, #tpu.memory_space<vmem>>, vector<1x64x128xi8>
    %11 = vector.shape_cast %10 : vector<1x64x128xi8> to vector<64x128xi8>
    %c0_i8 = arith.constant 0 : i8
    %12 = vector.broadcast %c0_i8 : i8 to vector<64x128xi8>
    %13 = arith.cmpi ne, %11, %12 : vector<64x128xi8>
    %14 = vector.extract_strided_slice %9 {offsets = [0, 0], sizes = [64, 64], strides = [1, 1]} : vector<64x128xf32> to vector<64x64xf32>
    %c0_7 = arith.constant 0 : index
    %c0_8 = arith.constant 0 : index
    %15 = vector.load %arg19[%c0_7, %c0_8] : memref<128x128xf32, #tpu.memory_space<vmem>>, vector<128x64xf32>
    %c0_9 = arith.constant 0 : index
    %c0_10 = arith.constant 0 : index
    %16 = vector.load %arg20[%c0_9, %c0_10] : memref<128x128xf32, #tpu.memory_space<vmem>>, vector<128x64xf32>
    %cst_11 = arith.constant dense<0.000000e+00> : vector<64x128xf32>
    %17 = tpu.matmul %14, %15, %cst_11 {dimension_numbers = #tpu.dot_dimension_numbers<[1], [1], [0], [0], [0, 0, 1, 0], [], []>, precision = #tpu.contract_precision<fp32>} : vector<64x64xf32>, vector<128x64xf32>, vector<64x128xf32> -> vector<64x128xf32>
    %cst_12 = arith.constant 1.250000e-01 : f32
    %18 = vector.broadcast %cst_12 : f32 to vector<64x128xf32>
    %19 = arith.mulf %17, %18 : vector<64x128xf32>
    %cst_13 = arith.constant -1.000000e+09 : f32
    %20 = vector.broadcast %cst_13 : f32 to vector<64x128xf32>
    %21 = arith.select %13, %20, %19 : vector<64x128xi1>, vector<64x128xf32>
    %cst_14 = arith.constant dense<0xFF800000> : vector<64xf32>
    %22 = vector.multi_reduction <maximumf>, %21, %cst_14 [1] : vector<64x128xf32> to vector<64xf32>
    %23 = vector.shape_cast %22 : vector<64xf32> to vector<64x1xf32>
    %24 = vector.broadcast %23 : vector<64x1xf32> to vector<64x128xf32>
    %25 = arith.subf %21, %24 : vector<64x128xf32>
    %26 = math.exp %25 : vector<64x128xf32>
    %cst_15 = arith.constant dense<0.000000e+00> : vector<64xf32>
    %27 = vector.multi_reduction <add>, %26, %cst_15 [1] : vector<64x128xf32> to vector<64xf32>
    %28 = vector.shape_cast %27 : vector<64xf32> to vector<64x1xf32>
    %29 = tpu.reciprocal %28 : vector<64x1xf32> -> vector<64x1xf32>
    %30 = vector.broadcast %29 : vector<64x1xf32> to vector<64x128xf32>
    %31 = arith.mulf %26, %30 : vector<64x128xf32>
    %c0_16 = arith.constant 0 : index
    %c0_17 = arith.constant 0 : index
    %c0_18 = arith.constant 0 : index
    %c0_19 = arith.constant 0 : index
    %32 = vector.load %arg18[%c0_16, %c0_17, %c0_18, %c0_19] : memref<1x2x64x128xf32, #tpu.memory_space<vmem>>, vector<1x1x64x128xf32>
    %33 = vector.shape_cast %32 : vector<1x1x64x128xf32> to vector<64x128xf32>
    %34 = vector.shape_cast %31 : vector<64x128xf32> to vector<1x1x64x128xf32>
    tpu.vector_store %arg18[%c0_16, %c0_17, %c0_18, %c0_19], %34 {strides = array<i32>} : memref<1x2x64x128xf32, #tpu.memory_space<vmem>>, vector<1x1x64x128xf32>,
    %cst_20 = arith.constant dense<0.000000e+00> : vector<64x64xf32>
    %35 = tpu.matmul %21, %16, %cst_20 {dimension_numbers = #tpu.dot_dimension_numbers<[1], [0], [0], [1], [0, 0, 1, 1], [], []>, precision = #tpu.contract_precision<fp32>} : vector<64x128xf32>, vector<128x64xf32>, vector<64x64xf32> -> vector<64x64xf32>
    %c0_21 = arith.constant 0 : index
    %c0_22 = arith.constant 0 : index
    %36 = vector.load %arg21[%c0_21, %c0_22] : memref<64x128xf32, #tpu.memory_space<vmem>>, vector<64x64xf32>
    tpu.vector_store %arg21[%c0_21, %c0_22], %35 {strides = array<i32>} : memref<64x128xf32, #tpu.memory_space<vmem>>, vector<64x64xf32>,
    %37 = vector.extract_strided_slice %9 {offsets = [0, 64], sizes = [64, 64], strides = [1, 1]} : vector<64x128xf32> to vector<64x64xf32>
    %c0_23 = arith.constant 0 : index
    %c64 = arith.constant 64 : index
    %38 = vector.load %arg19[%c0_23, %c64] : memref<128x128xf32, #tpu.memory_space<vmem>>, vector<128x64xf32>
    %c0_24 = arith.constant 0 : index
    %c64_25 = arith.constant 64 : index
    %39 = vector.load %arg20[%c0_24, %c64_25] : memref<128x128xf32, #tpu.memory_space<vmem>>, vector<128x64xf32>
    %cst_26 = arith.constant dense<0.000000e+00> : vector<64x128xf32>
    %40 = tpu.matmul %37, %38, %cst_26 {dimension_numbers = #tpu.dot_dimension_numbers<[1], [1], [0], [0], [0, 0, 1, 0], [], []>, precision = #tpu.contract_precision<fp32>} : vector<64x64xf32>, vector<128x64xf32>, vector<64x128xf32> -> vector<64x128xf32>
    %cst_27 = arith.constant 1.250000e-01 : f32
    %41 = vector.broadcast %cst_27 : f32 to vector<64x128xf32>
    %42 = arith.mulf %40, %41 : vector<64x128xf32>
    %cst_28 = arith.constant -1.000000e+09 : f32
    %43 = vector.broadcast %cst_28 : f32 to vector<64x128xf32>
    %44 = arith.select %13, %43, %42 : vector<64x128xi1>, vector<64x128xf32>
    %cst_29 = arith.constant dense<0xFF800000> : vector<64xf32>
    %45 = vector.multi_reduction <maximumf>, %44, %cst_29 [1] : vector<64x128xf32> to vector<64xf32>
    %46 = vector.shape_cast %45 : vector<64xf32> to vector<64x1xf32>
    %47 = vector.broadcast %46 : vector<64x1xf32> to vector<64x128xf32>
    %48 = arith.subf %44, %47 : vector<64x128xf32>
    %49 = math.exp %48 : vector<64x128xf32>
    %cst_30 = arith.constant dense<0.000000e+00> : vector<64xf32>
    %50 = vector.multi_reduction <add>, %49, %cst_30 [1] : vector<64x128xf32> to vector<64xf32>
    %51 = vector.shape_cast %50 : vector<64xf32> to vector<64x1xf32>
    %52 = tpu.reciprocal %51 : vector<64x1xf32> -> vector<64x1xf32>
    %53 = vector.broadcast %52 : vector<64x1xf32> to vector<64x128xf32>
    %54 = arith.mulf %49, %53 : vector<64x128xf32>
    %c0_31 = arith.constant 0 : index
    %c1 = arith.constant 1 : index
    %c0_32 = arith.constant 0 : index
    %c0_33 = arith.constant 0 : index
    %55 = vector.load %arg18[%c0_31, %c1, %c0_32, %c0_33] : memref<1x2x64x128xf32, #tpu.memory_space<vmem>>, vector<1x1x64x128xf32>
    %56 = vector.shape_cast %55 : vector<1x1x64x128xf32> to vector<64x128xf32>
    %57 = vector.shape_cast %54 : vector<64x128xf32> to vector<1x1x64x128xf32>
    tpu.vector_store %arg18[%c0_31, %c1, %c0_32, %c0_33], %57 {strides = array<i32>} : memref<1x2x64x128xf32, #tpu.memory_space<vmem>>, vector<1x1x64x128xf32>,
    %cst_34 = arith.constant dense<0.000000e+00> : vector<64x64xf32>
    %58 = tpu.matmul %44, %39, %cst_34 {dimension_numbers = #tpu.dot_dimension_numbers<[1], [0], [0], [1], [0, 0, 1, 1], [], []>, precision = #tpu.contract_precision<fp32>} : vector<64x128xf32>, vector<128x64xf32>, vector<64x64xf32> -> vector<64x64xf32>
    %c0_35 = arith.constant 0 : index
    %c64_36 = arith.constant 64 : index
    %59 = vector.load %arg21[%c0_35, %c64_36] : memref<64x128xf32, #tpu.memory_space<vmem>>, vector<64x64xf32>
    tpu.vector_store %arg21[%c0_35, %c64_36], %58 {strides = array<i32>} : memref<64x128xf32, #tpu.memory_space<vmem>>, vector<64x64xf32>,
    %c0_37 = arith.constant 0 : index
    %c0_38 = arith.constant 0 : index
    %60 = vector.load %arg21[%c0_37, %c0_38] : memref<64x128xf32, #tpu.memory_space<vmem>>, vector<64x128xf32>
    %c0_39 = arith.constant 0 : index
    %c0_40 = arith.constant 0 : index
    %61 = vector.load %arg7[%c0_39, %c0_40] : memref<128x128xf32, #tpu.memory_space<vmem>>, vector<128x128xf32>
    %cst_41 = arith.constant dense<0.000000e+00> : vector<64x128xf32>
    %62 = tpu.matmul %60, %61, %cst_41 {dimension_numbers = #tpu.dot_dimension_numbers<[1], [0], [0], [1], [0, 0, 1, 1], [], []>, precision = #tpu.contract_precision<fp32>} : vector<64x128xf32>, vector<128x128xf32>, vector<64x128xf32> -> vector<64x128xf32>
    %c0_42 = arith.constant 0 : index
    %c0_43 = arith.constant 0 : index
    %63 = vector.load %arg8[%c0_42, %c0_43] : memref<1x128xf32, #tpu.memory_space<vmem>>, vector<1x128xf32>
    %64 = vector.shape_cast %63 : vector<1x128xf32> to vector<128xf32>
    %65 = vector.shape_cast %64 : vector<128xf32> to vector<1x128xf32>
    %66 = vector.broadcast %65 : vector<1x128xf32> to vector<64x128xf32>
    %67 = arith.addf %62, %66 : vector<64x128xf32>
    %68 = arith.addf %7, %67 : vector<64x128xf32>
    %c0_44 = arith.constant 0 : index
    %c0_45 = arith.constant 0 : index
    %69 = vector.load %arg9[%c0_44, %c0_45] : memref<1x128xf32, #tpu.memory_space<vmem>>, vector<1x128xf32>
    %70 = vector.shape_cast %69 : vector<1x128xf32> to vector<128xf32>
    %c0_46 = arith.constant 0 : index
    %c0_47 = arith.constant 0 : index
    %71 = vector.load %arg10[%c0_46, %c0_47] : memref<1x128xf32, #tpu.memory_space<vmem>>, vector<1x128xf32>
    %72 = vector.shape_cast %71 : vector<1x128xf32> to vector<128xf32>
    %cst_48 = arith.constant dense<0.000000e+00> : vector<64xf32>
    %73 = vector.multi_reduction <add>, %68, %cst_48 [1] : vector<64x128xf32> to vector<64xf32>
    %74 = vector.shape_cast %73 : vector<64xf32> to vector<64x1xf32>
    %cst_49 = arith.constant 1.280000e+02 : f32
    %75 = vector.broadcast %cst_49 : f32 to vector<64x1xf32>
    %76 = arith.divf %74, %75 : vector<64x1xf32>
    %77 = vector.broadcast %76 : vector<64x1xf32> to vector<64x128xf32>
    %78 = arith.subf %68, %77 : vector<64x128xf32>
    %79 = arith.mulf %78, %78 : vector<64x128xf32>
    %cst_50 = arith.constant dense<0.000000e+00> : vector<64xf32>
    %80 = vector.multi_reduction <add>, %79, %cst_50 [1] : vector<64x128xf32> to vector<64xf32>
    %81 = vector.shape_cast %80 : vector<64xf32> to vector<64x1xf32>
    %cst_51 = arith.constant 1.280000e+02 : f32
    %82 = vector.broadcast %cst_51 : f32 to vector<64x1xf32>
    %83 = arith.divf %81, %82 : vector<64x1xf32>
    %84 = vector.broadcast %76 : vector<64x1xf32> to vector<64x128xf32>
    %85 = arith.subf %68, %84 : vector<64x128xf32>
    %cst_52 = arith.constant 9.99999974E-6 : f32
    %86 = vector.broadcast %cst_52 : f32 to vector<64x1xf32>
    %87 = arith.addf %83, %86 : vector<64x1xf32>
    %88 = math.rsqrt %87 : vector<64x1xf32>
    %89 = vector.broadcast %88 : vector<64x1xf32> to vector<64x128xf32>
    %90 = arith.mulf %85, %89 : vector<64x128xf32>
    %91 = vector.shape_cast %70 : vector<128xf32> to vector<1x128xf32>
    %92 = vector.broadcast %91 : vector<1x128xf32> to vector<64x128xf32>
    %93 = arith.mulf %90, %92 : vector<64x128xf32>
    %94 = vector.shape_cast %72 : vector<128xf32> to vector<1x128xf32>
    %95 = vector.broadcast %94 : vector<1x128xf32> to vector<64x128xf32>
    %96 = arith.addf %93, %95 : vector<64x128xf32>
    %97 = arith.truncf %96 : vector<64x128xf32> to vector<64x128xbf16>
    %c0_53 = arith.constant 0 : index
    %c0_54 = arith.constant 0 : index
    %98 = vector.load %arg11[%c0_53, %c0_54] : memref<128x256xbf16, #tpu.memory_space<vmem>>, vector<128x256xbf16>
    %cst_55 = arith.constant dense<0.000000e+00> : vector<64x256xf32>
    %99 = tpu.matmul %97, %98, %cst_55 {dimension_numbers = #tpu.dot_dimension_numbers<[1], [0], [0], [1], [0, 0, 1, 1], [], []>} : vector<64x128xbf16>, vector<128x256xbf16>, vector<64x256xf32> -> vector<64x256xf32>
    %c0_56 = arith.constant 0 : index
    %c0_57 = arith.constant 0 : index
    %100 = vector.load %arg12[%c0_56, %c0_57] : memref<1x256xf32, #tpu.memory_space<vmem>>, vector<1x256xf32>
    %101 = vector.shape_cast %100 : vector<1x256xf32> to vector<256xf32>
    %102 = vector.shape_cast %101 : vector<256xf32> to vector<1x256xf32>
    %103 = vector.broadcast %102 : vector<1x256xf32> to vector<64x256xf32>
    %104 = arith.addf %99, %103 : vector<64x256xf32>
    %cst_58 = arith.constant 5.000000e-01 : f32
    %105 = vector.broadcast %cst_58 : f32 to vector<64x256xf32>
    %106 = arith.mulf %105, %104 : vector<64x256xf32>
    %cst_59 = arith.constant 0.707106769 : f32
    %107 = vector.broadcast %cst_59 : f32 to vector<64x256xf32>
    %108 = arith.mulf %104, %107 : vector<64x256xf32>
    %109 = math.erf %108 : vector<64x256xf32>
    %cst_60 = arith.constant 1.000000e+00 : f32
    %110 = vector.broadcast %cst_60 : f32 to vector<64x256xf32>
    %111 = arith.addf %110, %109 : vector<64x256xf32>
    %112 = arith.mulf %106, %111 : vector<64x256xf32>
    %113 = arith.truncf %112 : vector<64x256xf32> to vector<64x256xbf16>
    %c0_61 = arith.constant 0 : index
    %c0_62 = arith.constant 0 : index
    %114 = vector.load %arg13[%c0_61, %c0_62] : memref<256x128xbf16, #tpu.memory_space<vmem>>, vector<256x128xbf16>
    %cst_63 = arith.constant dense<0.000000e+00> : vector<64x128xf32>
    %115 = tpu.matmul %113, %114, %cst_63 {dimension_numbers = #tpu.dot_dimension_numbers<[1], [0], [0], [1], [0, 0, 1, 1], [], []>} : vector<64x256xbf16>, vector<256x128xbf16>, vector<64x128xf32> -> vector<64x128xf32>
    %c0_64 = arith.constant 0 : index
    %c0_65 = arith.constant 0 : index
    %116 = vector.load %arg14[%c0_64, %c0_65] : memref<1x128xf32, #tpu.memory_space<vmem>>, vector<1x128xf32>
    %117 = vector.shape_cast %116 : vector<1x128xf32> to vector<128xf32>
    %118 = vector.shape_cast %117 : vector<128xf32> to vector<1x128xf32>
    %119 = vector.broadcast %118 : vector<1x128xf32> to vector<64x128xf32>
    %120 = arith.addf %115, %119 : vector<64x128xf32>
    %121 = arith.addf %96, %120 : vector<64x128xf32>
    %c0_66 = arith.constant 0 : index
    %c0_67 = arith.constant 0 : index
    %122 = vector.load %arg15[%c0_66, %c0_67] : memref<1x128xf32, #tpu.memory_space<vmem>>, vector<1x128xf32>
    %123 = vector.shape_cast %122 : vector<1x128xf32> to vector<128xf32>
    %c0_68 = arith.constant 0 : index
    %c0_69 = arith.constant 0 : index
    %124 = vector.load %arg16[%c0_68, %c0_69] : memref<1x128xf32, #tpu.memory_space<vmem>>, vector<1x128xf32>
    %125 = vector.shape_cast %124 : vector<1x128xf32> to vector<128xf32>
    %cst_70 = arith.constant dense<0.000000e+00> : vector<64xf32>
    %126 = vector.multi_reduction <add>, %121, %cst_70 [1] : vector<64x128xf32> to vector<64xf32>
    %127 = vector.shape_cast %126 : vector<64xf32> to vector<64x1xf32>
    %cst_71 = arith.constant 1.280000e+02 : f32
    %128 = vector.broadcast %cst_71 : f32 to vector<64x1xf32>
    %129 = arith.divf %127, %128 : vector<64x1xf32>
    %130 = vector.broadcast %129 : vector<64x1xf32> to vector<64x128xf32>
    %131 = arith.subf %121, %130 : vector<64x128xf32>
    %132 = arith.mulf %131, %131 : vector<64x128xf32>
    %cst_72 = arith.constant dense<0.000000e+00> : vector<64xf32>
    %133 = vector.multi_reduction <add>, %132, %cst_72 [1] : vector<64x128xf32> to vector<64xf32>
    %134 = vector.shape_cast %133 : vector<64xf32> to vector<64x1xf32>
    %cst_73 = arith.constant 1.280000e+02 : f32
    %135 = vector.broadcast %cst_73 : f32 to vector<64x1xf32>
    %136 = arith.divf %134, %135 : vector<64x1xf32>
    %137 = vector.broadcast %129 : vector<64x1xf32> to vector<64x128xf32>
    %138 = arith.subf %121, %137 : vector<64x128xf32>
    %cst_74 = arith.constant 9.99999974E-6 : f32
    %139 = vector.broadcast %cst_74 : f32 to vector<64x1xf32>
    %140 = arith.addf %136, %139 : vector<64x1xf32>
    %141 = math.rsqrt %140 : vector<64x1xf32>
    %142 = vector.broadcast %141 : vector<64x1xf32> to vector<64x128xf32>
    %143 = arith.mulf %138, %142 : vector<64x128xf32>
    %144 = vector.shape_cast %123 : vector<128xf32> to vector<1x128xf32>
    %145 = vector.broadcast %144 : vector<1x128xf32> to vector<64x128xf32>
    %146 = arith.mulf %143, %145 : vector<64x128xf32>
    %147 = vector.shape_cast %125 : vector<128xf32> to vector<1x128xf32>
    %148 = vector.broadcast %147 : vector<1x128xf32> to vector<64x128xf32>
    %149 = arith.addf %146, %148 : vector<64x128xf32>
    %c0_75 = arith.constant 0 : index
    %c0_76 = arith.constant 0 : index
    %c0_77 = arith.constant 0 : index
    %150 = vector.load %arg17[%c0_75, %c0_76, %c0_77] : memref<1x64x128xf32, #tpu.memory_space<vmem>>, vector<1x64x128xf32>
    %151 = vector.shape_cast %150 : vector<1x64x128xf32> to vector<64x128xf32>
    %152 = vector.shape_cast %149 : vector<64x128xf32> to vector<1x64x128xf32>
    tpu.vector_store %arg17[%c0_75, %c0_76, %c0_77], %152 {strides = array<i32>} : memref<1x64x128xf32, #tpu.memory_space<vmem>>, vector<1x64x128xf32>,
    return
  }
  func.func @transform_0(%arg0: i32, %arg1: i32) -> (i32, i32, i32) {
    %c0_i32 = arith.constant 0 : i32
    %c0_i32_0 = arith.constant 0 : i32
    %c0_i32_1 = arith.constant 0 : i32
    return %arg0, %c0_i32, %c0_i32_0 : i32, i32, i32
  }
  func.func @transform_1(%arg0: i32, %arg1: i32) -> (i32, i32, i32) {
    %c0_i32 = arith.constant 0 : i32
    %c0_i32_0 = arith.constant 0 : i32
    return %arg0, %arg1, %c0_i32 : i32, i32, i32
  }
  func.func @transform_2(%arg0: i32, %arg1: i32) -> (i32, i32) {
    %c0_i32 = arith.constant 0 : i32
    %c0_i32_0 = arith.constant 0 : i32
    %c0_i32_1 = arith.constant 0 : i32
    return %c0_i32, %c0_i32_0 : i32, i32
  }
  func.func @transform_3(%arg0: i32, %arg1: i32) -> (i32, i32) {
    %c0_i32 = arith.constant 0 : i32
    %c0_i32_0 = arith.constant 0 : i32
    %c0_i32_1 = arith.constant 0 : i32
    return %c0_i32, %c0_i32_0 : i32, i32
  }
  func.func @transform_4(%arg0: i32, %arg1: i32) -> (i32, i32) {
    %c0_i32 = arith.constant 0 : i32
    %c0_i32_0 = arith.constant 0 : i32
    %c0_i32_1 = arith.constant 0 : i32
    return %c0_i32, %c0_i32_0 : i32, i32
  }
  func.func @transform_5(%arg0: i32, %arg1: i32) -> (i32, i32) {
    %c0_i32 = arith.constant 0 : i32
    %c0_i32_0 = arith.constant 0 : i32
    %c0_i32_1 = arith.constant 0 : i32
    return %c0_i32, %c0_i32_0 : i32, i32
  }
  func.func @transform_6(%arg0: i32, %arg1: i32) -> (i32, i32) {
    %c0_i32 = arith.constant 0 : i32
    %c0_i32_0 = arith.constant 0 : i32
    %c0_i32_1 = arith.constant 0 : i32
    return %c0_i32, %c0_i32_0 : i32, i32
  }
  func.func @transform_7(%arg0: i32, %arg1: i32) -> (i32, i32) {
    %c0_i32 = arith.constant 0 : i32
    %c0_i32_0 = arith.constant 0 : i32
    %c0_i32_1 = arith.constant 0 : i32
    return %c0_i32, %c0_i32_0 : i32, i32
  }
  func.func @transform_8(%arg0: i32, %arg1: i32) -> (i32, i32) {
    %c0_i32 = arith.constant 0 : i32
    %c0_i32_0 = arith.constant 0 : i32
    %c0_i32_1 = arith.constant 0 : i32
    return %c0_i32, %c0_i32_0 : i32, i32
  }
  func.func @transform_9(%arg0: i32, %arg1: i32) -> (i32, i32) {
    %c0_i32 = arith.constant 0 : i32
    %c0_i32_0 = arith.constant 0 : i32
    %c0_i32_1 = arith.constant 0 : i32
    return %c0_i32, %c0_i32_0 : i32, i32
  }
  func.func @transform_10(%arg0: i32, %arg1: i32) -> (i32, i32) {
    %c0_i32 = arith.constant 0 : i32
    %c0_i32_0 = arith.constant 0 : i32
    %c0_i32_1 = arith.constant 0 : i32
    return %c0_i32, %c0_i32_0 : i32, i32
  }
  func.func @transform_11(%arg0: i32, %arg1: i32) -> (i32, i32) {
    %c0_i32 = arith.constant 0 : i32
    %c0_i32_0 = arith.constant 0 : i32
    %c0_i32_1 = arith.constant 0 : i32
    return %c0_i32, %c0_i32_0 : i32, i32
  }
  func.func @transform_12(%arg0: i32, %arg1: i32) -> (i32, i32) {
    %c0_i32 = arith.constant 0 : i32
    %c0_i32_0 = arith.constant 0 : i32
    %c0_i32_1 = arith.constant 0 : i32
    return %c0_i32, %c0_i32_0 : i32, i32
  }
  func.func @transform_13(%arg0: i32, %arg1: i32) -> (i32, i32) {
    %c0_i32 = arith.constant 0 : i32
    %c0_i32_0 = arith.constant 0 : i32
    %c0_i32_1 = arith.constant 0 : i32
    return %c0_i32, %c0_i32_0 : i32, i32
  }
  func.func @transform_14(%arg0: i32, %arg1: i32) -> (i32, i32) {
    %c0_i32 = arith.constant 0 : i32
    %c0_i32_0 = arith.constant 0 : i32
    %c0_i32_1 = arith.constant 0 : i32
    return %c0_i32, %c0_i32_0 : i32, i32
  }
  func.func @transform_15(%arg0: i32, %arg1: i32) -> (i32, i32, i32) {
    %c0_i32 = arith.constant 0 : i32
    %c0_i32_0 = arith.constant 0 : i32
    return %arg0, %arg1, %c0_i32 : i32, i32, i32
  }
  func.func @transform_16(%arg0: i32, %arg1: i32) -> (i32, i32, i32, i32) {
    %c0_i32 = arith.constant 0 : i32
    %c0_i32_0 = arith.constant 0 : i32
    %c0_i32_1 = arith.constant 0 : i32
    return %arg0, %c0_i32, %arg1, %c0_i32_0 : i32, i32, i32, i32
  }
}

</mosaic_0001>

<bundles_post_ra>
// kernel: tpu_custom_call.1
= control target key start
LH: loop header
LB: loop body
LE: loop exit
PB: predicated region body
PF: predicated region fallthrough
CT: control target
= control target key end

     0   :  { %s21867_s0 = inlined_call_operand.hbm [shape: f32[2,128,128], index: 0, kind: input, shape index: {}]   ;;  %s21868_s1 = inlined_call_operand.hbm [shape: s8[2,128,128], index: 1, kind: input, shape index: {}]   ;;  %s21869_s2 = inlined_call_operand.hbm [shape: f32[128,128], index: 2, kind: input, shape index: {}]   ;;  %s21870_s3 = inlined_call_operand.hbm [shape: f32[128,128], index: 3, kind: input, shape index: {}]   ;;  %s21871_s4 = inlined_call_operand.hbm [shape: f32[128,128], index: 4, kind: input, shape index: {}]   ;;  %s21872_s5 = inlined_call_operand.hbm [shape: f32[128,128], index: 5, kind: input, shape index: {}]   ;;  %s21873_s6 = inlined_call_operand.vmem [shape: f32[1,128], index: 6, kind: input, shape index: {}]   ;;  %s21874_s7 = inlined_call_operand.vmem [shape: f32[1,128], index: 7, kind: input, shape index: {}]   ;;  %s21875_s8 = inlined_call_operand.vmem [shape: f32[1,128], index: 8, kind: input, shape index: {}]   ;;  %s21876_s9 = inlined_call_operand.hbm [shape: bf16[128,256], index: 9, kind: input, shape index: {}]   ;;  %s21877_s10 = inlined_call_operand.vmem [shape: f32[1,256], index: 10, kind: input, shape index: {}]   ;;  %s21878_s11 = inlined_call_operand.hbm [shape: bf16[256,128], index: 11, kind: input, shape index: {}]   ;;  %s21879_s12 = inlined_call_operand.vmem [shape: f32[1,128], index: 12, kind: input, shape index: {}]   ;;  %s21880_s13 = inlined_call_operand.vmem [shape: f32[1,128], index: 13, kind: input, shape index: {}]   ;;  %s21881_s14 = inlined_call_operand.vmem [shape: f32[1,128], index: 14, kind: input, shape index: {}]   ;;  %s21882_s15 = inlined_call_operand.hbm [shape: f32[2,128,128], index: 15, kind: output, shape index: {0}]   ;;  %s21883_s16 = inlined_call_operand.hbm [shape: f32[2,2,128,128], index: 16, kind: output, shape index: {1}]  }
   0x1   :  { %22241 = sst [smem:[#allocation122_spill]] %s21867_s0 }
   0x2   :  { %22242 = sst [smem:[#allocation123_spill]] %s21868_s1 }
   0x3   :  { %22243 = sst [smem:[#allocation124_spill]] %s21869_s2 }
   0x4   :  { %22244 = sst [smem:[#allocation125_spill]] %s21870_s3 }
   0x5   :  { %22245 = sst [smem:[#allocation126_spill]] %s21871_s4 }
   0x6   :  { %22246 = sst [smem:[#allocation127_spill]] %s21872_s5 }
   0x7   :  { %22247 = sst [smem:[#allocation128_spill]] %s21873_s6 }
   0x8   :  { %22248 = sst [smem:[#allocation129_spill]] %s21874_s7 }
   0x9   :  { %22249 = sst [smem:[#allocation130_spill]] %s21875_s8 }
   0xa   :  { %22250 = sst [smem:[#allocation131_spill]] %s21876_s9 }
   0xb   :  { %22251 = sst [smem:[#allocation132_spill]] %s21877_s10 }
   0xc   :  { %22252 = sst [smem:[#allocation133_spill]] %s21878_s11 }
   0xd   :  { %22253 = sst [smem:[#allocation134_spill]] %s21879_s12 }
   0xe   :  { %22254 = sst [smem:[#allocation135_spill]] %s21880_s13 }
   0xf   :  { %22255 = sst [smem:[#allocation136_spill]] %s21881_s14 }
  0x10   :  { %22256 = sst [smem:[#allocation137_spill]] %s21882_s15 }
  0x11   :  { %22257 = sst [smem:[#allocation138_spill]] %s21883_s16 }
  0x12   :  { %22 = vsyncpa [#allocation6], 0 }
  0x13   :  { %24 = vsyncpa [#allocation6 + $0x1], 0 }
  0x14   :  { %25 = vsyncpa [#allocation9], 0 }
  0x15   :  { %27 = vsyncpa [#allocation9 + $0x1], 0 }
  0x16   :  { %28 = vsyncpa [#allocation12], 0 }
  0x17   :  { %29 = vsyncpa [#allocation15], 0 }
  0x18   :  { %30 = vsyncpa [#allocation18], 0 }
  0x19   :  { %31 = vsyncpa [#allocation7], 0 }
  0x1a   :  { %33 = vsyncpa [#allocation7 + $0x1], 0 }
  0x1b   :  { %34 = vsyncpa [#allocation21], 0 }
  0x1c   :  { %36 = vsyncpa [#allocation21 + $0x1], 0  ;;  %s17123_s21 = smov 0   ;;  %s17125_s22 = smov 0  }
  0x1d   :  { %s17127_s23 = smov 0   ;;  %s17129_s24 = smov 0  }
  0x1e   :  { %s17131_s25 = smov 0   ;;  %s17133_s26 = smov 0  }
  0x1f   :  { %s17135_s27 = smov 0   ;;  %s17137_s28 = smov 0  }
  0x20   :  { %s17139_s29 = smov 0   ;;  %s17141_s30 = smov 0  }
  0x21   :  { %s17143_s0 = smov 0  }
  0x22 LB: > { %22258 = sst [smem:[#allocation32_spill]] %s16973_s21  ;;  %s17179_s17 = sadd.s32 4294967295, %s17013_s0   ;;  %s17013_s0 = sphi %s17143_s0, %s42_s0   ;;  %s17009_s30 = sphi %s17141_s30, %s22733_s30   ;;  %s17005_s29 = sphi %s17139_s29, %s22732_s29   ;;  %s17001_s28 = sphi %s17137_s28, %s22731_s28   ;;  %s16997_s27 = sphi %s17135_s27, %s22730_s27   ;;  %s16993_s26 = sphi %s17133_s26, %s22729_s26   ;;  %s16989_s25 = sphi %s17131_s25, %s22728_s25   ;;  %s16985_s24 = sphi %s17129_s24, %s22727_s24   ;;  %s16981_s23 = sphi %s17127_s23, %s22726_s23   ;;  %s16977_s22 = sphi %s17125_s22, %s22725_s22   ;;  %s16973_s21 = sphi %s17123_s21, %s22722_s21  }
  0x23   : > { %22259 = sst [smem:[#allocation33_spill]] %s16977_s22  ;;  %p10697_p0 = scmp.ge.s32.totalorder %s17013_s0, 1 }
  0x24   : > { %22260 = sst [smem:[#allocation34_spill]] %s16997_s27  ;;  %p21891_p1 = scmp.eq.s32.totalorder %s17179_s17, 0 }
  0x25   : > { %22261 = sst [smem:[#allocation35_spill]] %s17001_s28  ;;  %p442_p2 = scmp.lt.s32.totalorder %s17013_s0, 5 }
  0x26   : > { %s17015_s19 = smov [#allocation10]   ;;  %s17016_s15 = smov [#allocation11]  }
  0x27   : > { %p17184_p3 = pnand %p10697_p0, %p442_p2  ;;  %s454_s20 = sshll.u32 %s17015_s19, 4  ;;  %s17188_s20 = int_to_ptr.vmem [resolvable:$true] %s454_s20 }
  0x28   : > { %s467_s28 = sshll.u32 %s17016_s15, 4  ;;  %s17017_s14 = smov [#allocation14]   ;;  %s17198_s28 = int_to_ptr.vmem [resolvable:$true] %s467_s28 }
  0x29   : > { %s22262_s18 = scalar_select %p17184_p3, 1, 0 }
  0x2a   : > { %p16308_p4 = pneg %p17184_p3  ;;  %s17200_s13 = sshll.u32 %s17017_s14, 4  ;;  %s494_s13 = int_to_ptr.vmem [resolvable:$true] %s17200_s13 }
  0x2b   : > { %22263 = sst [smem:[#allocation36_spill]] %s22262_s18  ;;  %s22265_s2 = sld [smem:[#allocation124_spill]] }
  0x2c   : > { %p17194_p5 = pnand %p16308_p4, %p21891_p1 }
  0x2e   : > { %p17210_p7 = pneg %p17194_p5 }
  0x31   : > { %s16639_s19 = scalar_lea.hbm %s22265_s2, 2048 }
  0x32   : > { %p16640_p6 = scmp.ne.s32.totalorder %s22265_s2, %s16639_s19  ;;  %p16646_p10 = scmp.lt.u32.totalorder %s16639_s19, %s22265_s2 }
  0x34   : > { %p16642_p8 = pnand %p17210_p7, %p16640_p6 }
  0x36   : > { %p16643_p9 = pneg %p16642_p8 }
  0x38   : > { %p16648_p11 = pnand %p16646_p10, %p16643_p9 }
  0x3a   : > { %16651 = shalt.err (!%p16648_p11)
}
  0x3b   : > { %s16652_s7 = scalar_lea.vmem %s17188_s20, 2048  ;;  %p16660_p2 = scmp.lt.s32.totalorder %s17188_s20, %s17188_s20 }
  0x3c   : > { %p16653_p12 = scmp.ne.s32.totalorder %s17188_s20, %s16652_s7  ;;  %p16661_p4 = scmp.lt.s32.totalorder %s16652_s7, %s16652_s7 }
  0x3e   : > { %p16655_p13 = pnand %p16653_p12, %p17210_p7  ;;  %p16662_p6 = por %p16661_p4, %p16660_p2 }
  0x40   : > { %p16656_p0 = pneg %p16655_p13 }
  0x42   : > { %p16663_p8 = pnand %p16662_p6, %p16656_p0 }
  0x44   : > { %16666 = shalt.err (!%p16663_p8)
}
  0x45   : > { %s21895_s8 = smov 128   ;;  %s21896_s10 = smov 8  }
  0x46   : > { %16311 = dma.hbm_to_vmem [thread:$0]  (!%p17194_p5), %s22265_s2, 2048, %s17188_s20, [#allocation9], %s21895_s8, %s21895_s8, %s21896_s10  }
  0x47   : > { %s22267_s3 = sld [smem:[#allocation125_spill]] }
  0x4d   : > { %s16667_s7 = scalar_lea.hbm %s22267_s3, 2048 }
  0x4e   : > { %p16668_p9 = scmp.ne.s32.totalorder %s22267_s3, %s16667_s7  ;;  %p16674_p12 = scmp.lt.u32.totalorder %s16667_s7, %s22267_s3 }
  0x50   : > { %p16670_p10 = pnand %p16668_p9, %p17210_p7 }
  0x52   : > { %p16671_p11 = pneg %p16670_p10 }
  0x54   : > { %p16676_p13 = pnand %p16674_p12, %p16671_p11 }
  0x56   : > { %16679 = shalt.err (!%p16676_p13)
}
  0x57   : > { %s16680_s20 = scalar_lea.vmem %s17198_s28, 2048  ;;  %p16688_p6 = scmp.lt.s32.totalorder %s17198_s28, %s17198_s28 }
  0x58   : > { %p16681_p0 = scmp.ne.s32.totalorder %s17198_s28, %s16680_s20  ;;  %p16689_p8 = scmp.lt.s32.totalorder %s16680_s20, %s16680_s20 }
  0x5a   : > { %p16683_p2 = pnand %p16681_p0, %p17210_p7  ;;  %p16690_p9 = por %p16689_p8, %p16688_p6 }
  0x5c   : > { %p16684_p4 = pneg %p16683_p2 }
  0x5e   : > { %p16691_p10 = pnand %p16690_p9, %p16684_p4 }
  0x60   : > { %16694 = shalt.err (!%p16691_p10)
}
  0x61   : > { %16314 = dma.hbm_to_vmem [thread:$0]  (!%p17194_p5), %s22267_s3, 2048, %s17198_s28, [#allocation12], %s21895_s8, %s21895_s8, %s21896_s10  }
  0x62   : > { %s22268_s5 = sld [smem:[#allocation127_spill]] }
  0x68   : > { %s16695_s12 = scalar_lea.hbm %s22268_s5, 2048 }
  0x69   : > { %p16696_p11 = scmp.ne.s32.totalorder %s22268_s5, %s16695_s12  ;;  %p16702_p0 = scmp.lt.u32.totalorder %s16695_s12, %s22268_s5 }
  0x6b   : > { %p16698_p12 = pnand %p16696_p11, %p17210_p7 }
  0x6d   : > { %p16699_p13 = pneg %p16698_p12 }
  0x6f   : > { %p16704_p2 = pnand %p16702_p0, %p16699_p13 }
  0x71   : > { %16707 = shalt.err (!%p16704_p2)
}
  0x72   : > { %s16708_s20 = scalar_lea.vmem %s494_s13, 2048  ;;  %p16716_p9 = scmp.lt.s32.totalorder %s494_s13, %s494_s13 }
  0x73   : > { %p16709_p4 = scmp.ne.s32.totalorder %s494_s13, %s16708_s20  ;;  %p16717_p10 = scmp.lt.s32.totalorder %s16708_s20, %s16708_s20 }
  0x75   : > { %p16711_p6 = pnand %p16709_p4, %p17210_p7  ;;  %p16718_p1 = por %p16717_p10, %p16716_p9 }
  0x77   : > { %p16712_p8 = pneg %p16711_p6 }
  0x79   : > { %p16719_p3 = pnand %p16718_p1, %p16712_p8 }
  0x7b   : > { %16722 = shalt.err (!%p16719_p3)
}
  0x7c   : > { %16320 = dma.hbm_to_vmem [thread:$0]  (!%p17194_p5), %s22268_s5, 2048, %s494_s13, [#allocation15], %s21895_s8, %s21895_s8, %s21896_s10  }
  0x7d   : > { %s17020_s22 = smov [#allocation13]   ;;  %s17021_s18 = smov [#allocation16]  }
  0x7e   : > { %s480_s27 = sshll.u32 %s17020_s22, 4  ;;  %s515_s12 = sshll.u32 %s17021_s18, 4  ;;  %s481_s27 = int_to_ptr.vmem [resolvable:$true] %s480_s27  ;;  %s516_s12 = int_to_ptr.vmem [resolvable:$true] %s515_s12 }
  0x7f   : > { %s22269_s4 = sld [smem:[#allocation126_spill]] }
  0x85   : > { %s16723_s14 = scalar_lea.hbm %s22269_s4, 2048 }
  0x86   : > { %p16724_p1 = scmp.ne.s32.totalorder %s22269_s4, %s16723_s14  ;;  %p16730_p12 = scmp.lt.u32.totalorder %s16723_s14, %s22269_s4 }
  0x88   : > { %p16726_p3 = pnand %p16724_p1, %p17210_p7 }
  0x8a   : > { %p16727_p11 = pneg %p16726_p3 }
  0x8c   : > { %p16732_p13 = pnand %p16730_p12, %p16727_p11 }
  0x8e   : > { %16735 = shalt.err (!%p16732_p13)
}
  0x8f   : > { %s16736_s13 = scalar_lea.vmem %s481_s27, 2048  ;;  %p16744_p6 = scmp.lt.s32.totalorder %s481_s27, %s481_s27 }
  0x90   : > { %p16737_p0 = scmp.ne.s32.totalorder %s481_s27, %s16736_s13  ;;  %p16745_p8 = scmp.lt.s32.totalorder %s16736_s13, %s16736_s13 }
  0x92   : > { %p16739_p2 = pnand %p16737_p0, %p17210_p7  ;;  %p16746_p9 = por %p16745_p8, %p16744_p6 }
  0x94   : > { %p16740_p4 = pneg %p16739_p2 }
  0x96   : > { %p16747_p10 = pnand %p16746_p9, %p16740_p4 }
  0x98   : > { %16750 = shalt.err (!%p16747_p10)
}
  0x99   : > { %16317 = dma.hbm_to_vmem [thread:$0]  (!%p17194_p5), %s22269_s4, 2048, %s481_s27, [#allocation12], %s21895_s8, %s21895_s8, %s21896_s10  }
  0x9a   : > { %s22270_s9 = sld [smem:[#allocation131_spill]] }
  0xa0   : > { %s16751_s19 = scalar_lea.hbm %s22270_s9, 2048 }
  0xa1   : > { %p16752_p1 = scmp.ne.s32.totalorder %s22270_s9, %s16751_s19  ;;  %p16758_p12 = scmp.lt.u32.totalorder %s16751_s19, %s22270_s9 }
  0xa3   : > { %p16754_p3 = pnand %p16752_p1, %p17210_p7 }
  0xa5   : > { %p16755_p11 = pneg %p16754_p3 }
  0xa7   : > { %p16760_p13 = pnand %p16758_p12, %p16755_p11 }
  0xa9   : > { %16763 = shalt.err (!%p16760_p13)
}
  0xaa   : > { %s16764_s28 = scalar_lea.vmem %s516_s12, 2048  ;;  %p16772_p6 = scmp.lt.s32.totalorder %s516_s12, %s516_s12 }
  0xab   : > { %p16765_p0 = scmp.ne.s32.totalorder %s516_s12, %s16764_s28  ;;  %p16773_p8 = scmp.lt.s32.totalorder %s16764_s28, %s16764_s28 }
  0xad   : > { %p16767_p2 = pnand %p16765_p0, %p17210_p7  ;;  %p16774_p9 = por %p16773_p8, %p16772_p6 }
  0xaf   : > { %p16768_p4 = pneg %p16767_p2 }
  0xb1   : > { %p16775_p10 = pnand %p16774_p9, %p16768_p4 }
  0xb3   : > { %16778 = shalt.err (!%p16775_p10)
}
  0xb4   : > { %16323 = dma.hbm_to_vmem [thread:$0]  (!%p17194_p5), %s22270_s9, 2048, %s516_s12, [#allocation15], %s21895_s8, %s21895_s8, %s21896_s10  }
  0xb5   : > { %s17022_s2 = smov [#allocation17]   ;;  %s22271_s11 = sld [smem:[#allocation133_spill]] }
  0xb6   : > { %s531_s1 = sshll.u32 %s17022_s2, 4  ;;  %s532_s1 = int_to_ptr.vmem [resolvable:$true] %s531_s1 }
  0xbb   : > { %s16779_s19 = scalar_lea.hbm %s22271_s11, 2048 }
  0xbc   : > { %p16780_p1 = scmp.ne.s32.totalorder %s22271_s11, %s16779_s19  ;;  %p16786_p12 = scmp.lt.u32.totalorder %s16779_s19, %s22271_s11 }
  0xbe   : > { %p16782_p3 = pnand %p16780_p1, %p17210_p7 }
  0xc0   : > { %p16783_p11 = pneg %p16782_p3 }
  0xc2   : > { %p16788_p13 = pnand %p16786_p12, %p16783_p11 }
  0xc4   : > { %16791 = shalt.err (!%p16788_p13)
}
  0xc5   : > { %s16792_s12 = scalar_lea.vmem %s532_s1, 2048  ;;  %p16800_p6 = scmp.lt.s32.totalorder %s532_s1, %s532_s1 }
  0xc6   : > { %p16793_p0 = scmp.ne.s32.totalorder %s532_s1, %s16792_s12  ;;  %p16801_p8 = scmp.lt.s32.totalorder %s16792_s12, %s16792_s12 }
  0xc8   : > { %p16795_p2 = pnand %p16793_p0, %p17210_p7  ;;  %p16802_p9 = por %p16801_p8, %p16800_p6 }
  0xca   : > { %p16796_p4 = pneg %p16795_p2 }
  0xcc   : > { %p16803_p10 = pnand %p16802_p9, %p16796_p4 }
  0xce   : > { %16806 = shalt.err (!%p16803_p10)
}
  0xcf   : > { %s17023_s28 = smov 64   ;;  %s17024_s6 = smov 4  }
  0xd0   : > { %16326 = dma.hbm_to_vmem [thread:$0]  (!%p17194_p5), %s22271_s11, 2048, %s532_s1, [#allocation18], %s17023_s28, %s17023_s28, %s17024_s6  }
  0xd1   : > { %s54_s2 = sadd.s32 1, %s17009_s30  ;;  %p68_p7 = scmp.ne.s32.totalorder %s16993_s26, %s16989_s25 }
  0xd2   : > { %p21894_p1 = scmp.eq.s32.totalorder %s17013_s0, 0  ;;  %p74_p3 = scmp.ne.s32.totalorder %s16989_s25, %s16985_s24 }
  0xd3   : > { %p21893_p11 = scmp.lt.s32.totalorder %s17013_s0, 4  ;;  %s554_s22 = sand.u32 1, %s16993_s26  }
  0xd4   : > { %p70_p12 = por %p21894_p1, %p68_p7  ;;  %p22272_p13 = scmp.eq.s32.totalorder %s17179_s17, 0 }
  0xd5   : > { %s10705_s19 = sshll.u32 %s554_s22, 7  ;;  %s10781_s15 = sshll.u32 %s17009_s30, 11 }
  0xd6   : > { %p17354_p0 = por %p22272_p13, %p74_p3  ;;  %s22274_s7 = sld [smem:[#allocation122_spill]] }
  0xd7   : > { %s558_s24 = scalar_lea.vmem [#allocation5], %s10705_s19  ;;  %p17366_p5 = pnand %p21893_p11, %p70_p12 }
  0xd8   : > { %s565_s1 = sshll.u32 %s558_s24, 4  ;;  %s17372_s28 = scalar_lea.sflag [#allocation6], %s554_s22  ;;  %s17370_s1 = int_to_ptr.vmem [resolvable:$true] %s565_s1 }
  0xd9   : > { %p16809_p4 = pneg %p17366_p5 }
  0xdc   : > { %s17362_s20 = scalar_lea.hbm %s22274_s7, %s10781_s15  ;;  %s16812_s19 = scalar_lea.hbm %s22274_s7, 4096 }
  0xdd   : > { %s16807_s6 = scalar_lea.hbm %s17362_s20, 2048  ;;  %p16813_p9 = scmp.lt.u32.totalorder %s17362_s20, %s22274_s7 }
  0xde   : > { %p16808_p2 = scmp.ne.s32.totalorder %s17362_s20, %s16807_s6  ;;  %p16814_p10 = scmp.lt.u32.totalorder %s16812_s19, %s16807_s6 }
  0xdf   : > { %p16816_p3 = scmp.lt.u32.totalorder %s16807_s6, %s17362_s20 }
  0xe0   : > { %p16810_p6 = pnand %p16809_p4, %p16808_p2  ;;  %p16815_p7 = por %p16814_p10, %p16813_p9 }
  0xe2   : > { %p16811_p8 = pneg %p16810_p6  ;;  %p16817_p12 = por %p16816_p3, %p16815_p7 }
  0xe4   : > { %p16818_p13 = pnand %p16817_p12, %p16811_p8 }
  0xe6   : > { %16821 = shalt.err (!%p16818_p13)
}
  0xe7   : > { %s16822_s22 = scalar_lea.vmem %s17370_s1, 2048  ;;  %s17025_s14 = smov [#allocation5]  }
  0xe8   : > { %p16823_p2 = scmp.ne.s32.totalorder %s17370_s1, %s16822_s22  ;;  %s16827_s24 = sshll.u32 %s17025_s14, 4  ;;  %s16828_s24 = int_to_ptr.vmem [resolvable:$false] %s16827_s24 }
  0xe9   : > { %s16829_s27 = scalar_lea.vmem %s16828_s24, 4096  ;;  %p16830_p1 = scmp.lt.s32.totalorder %s17370_s1, %s16828_s24 }
  0xea   : > { %p16825_p6 = pnand %p16823_p2, %p16809_p4  ;;  %p16831_p9 = scmp.lt.s32.totalorder %s16829_s27, %s16822_s22 }
  0xec   : > { %p16826_p11 = pneg %p16825_p6  ;;  %p16832_p10 = por %p16831_p9, %p16830_p1 }
  0xee   : > { %p16833_p7 = pnand %p16832_p10, %p16826_p11 }
  0xf0   : > { %16836 = shalt.err (!%p16833_p7)
}
  0xf1   : > { %s22276_s6 = sld [smem:[#allocation33_spill]]  ;;  %s61_s12 = sadd.s32 1, %s16993_s26 }
  0xf2   : > { %16330 = dma.hbm_to_vmem [thread:$0]  (!%p17366_p5), %s17362_s20, 2048, %s17370_s1, %s17372_s28, %s21895_s8, %s21895_s8, %s21896_s10  }
  0xf3   : > { %s51_s13 = sadd.s32 1, %s17005_s29  ;;  %s10696_s19 = sadd.s32 4294967294, %s17013_s0  }
  0xf4   : > { %p52_p1 = scmp.ge.s32.totalorder %s51_s13, 2  ;;  %s89_s15 = sadd.s32 1, %s16981_s23 }
  0xf5   : > { %p22278_p8 = scmp.eq.s32.totalorder %s17179_s17, 0  ;;  %p401_p12 = scmp.eq.s32.totalorder %s17179_s17, 3 }
  0xf6   : > { %s22735_s13 = smov (%p52_p1, %s51_s13), 0  ;;  %s22737_s2 = smov (!%p52_p1, %s54_s2), %s17009_s30 }
  0xf7   : > { %p102_p11 = scmp.ne.s32.totalorder %s22276_s6, %s16973_s21  ;;  %22277 = sst [smem:[#allocation37_spill]] %s22735_s13 }
  0xf8   : > { %s85_s16 = ssub.s32 %s17005_s29, %s22735_s13  ;;  %p96_p4 = scmp.ne.s32.totalorder %s16981_s23, %s22276_s6 }
  0xf9   : > { %p56_p5 = scmp.ge.s32.totalorder %s22737_s2, 2  ;;  %p17420_p3 = por %p102_p11, %p22278_p8 }
  0xfa   : > { %p407_p13 = scmp.eq.s32.totalorder %s10696_s19, 3  ;;  %p17427_p2 = por %p401_p12, %p96_p4 }
  0xfb   : > { %s22279_s20 = scalar_select %p17420_p3, 1, 0 }
  0xfc   : > { %s22739_s2 = smov (%p56_p5, %s22737_s2), 0  ;;  %p17431_p6 = por %p407_p13, %p102_p11 }
  0xfd   : > { %22280 = sst [smem:[#allocation38_spill]] %s22739_s2  ;;  %s58_s22 = ssub.s32 %s17009_s30, %s22739_s2 }
  0xfe   : > { %s22281_s1 = scalar_select %p17427_p2, 1, 0 }
  0xff   : > { %s22283_s28 = scalar_select %p17431_p6, 1, 0 }
 0x100   : > { %22282 = sst [smem:[#allocation39_spill]] %s22281_s1  ;;  %p22285_p9 = scmp.eq.s32.totalorder %s17013_s0, 0 }
 0x101   : > { %22284 = sst [smem:[#allocation40_spill]] %s22283_s28  ;;  %p59_p7 = scmp.eq.s32.totalorder %s58_s22, 0 }
 0x102   : > { %p17439_p10 = por %p96_p4, %p22285_p9  ;;  %s86_s24 = sor.u32 %s85_s16, %s58_s22 }
 0x103   : > { %p87_p1 = scmp.eq.s32.totalorder %s86_s24, 0  ;;  %s575_s27 = sand.u32 1, %s17013_s0  }
 0x104   : > { %s17445_s6 = scalar_select %p59_p7, %s16993_s26, %s61_s12  }
 0x105   : > { %s17448_s19 = scalar_select %p87_p1, %s16981_s23, %s89_s15  }
 0x106   : > { %s577_s8 = sand.u32 1, %s16981_s23   ;;  %s10709_s10 = sshll.u32 %s17005_s29, 1 }
 0x107   : > { %s10708_s3 = sshll.u32 %s577_s8, 4  ;;  %s10710_s4 = sshll.u32 %s17009_s30, 2 }
 0x108   : > { %s585_s5 = sadd.s32 %s10710_s4, %s10709_s10  ;;  %s579_s9 = scalar_lea.vmem [#allocation8], %s10708_s3 }
 0x109   : > { %s10711_s7 = sshll.u32 %s585_s5, 7  ;;  %s588_s11 = sshll.u32 %s579_s9, 4  ;;  %s17458_s11 = int_to_ptr.vmem [resolvable:$true] %s588_s11 }
 0x10a   : > { %s22287_s28 = sld [smem:[#allocation123_spill]]  ;;  %p22289_p11 = scmp.lt.s32.totalorder %s17013_s0, 4 }
 0x10b   : > { %s17468_s3 = scalar_lea.sflag [#allocation9], %s575_s27 }
 0x10c   : > { %p17464_p4 = pnand %p22289_p11, %p17439_p10 }
 0x10e   : > { %p16839_p8 = pneg %p17464_p4 }
 0x110   : > { %s22288_s1 = smov %s22287_s28  ;;  %s17456_s21 = scalar_lea.hbm %s22287_s28, %s10711_s7 }
 0x111   : > { %s16837_s4 = scalar_lea.hbm %s17456_s21, 256  ;;  %s16842_s10 = scalar_lea.hbm %s22288_s1, 1024 }
 0x112   : > { %p16838_p5 = scmp.ne.s32.totalorder %s17456_s21, %s16837_s4  ;;  %p16843_p9 = scmp.lt.u32.totalorder %s17456_s21, %s22288_s1 }
 0x113   : > { %p16844_p10 = scmp.lt.u32.totalorder %s16842_s10, %s16837_s4  ;;  %p16846_p1 = scmp.lt.u32.totalorder %s16837_s4, %s17456_s21 }
 0x114   : > { %p16840_p12 = pnand %p16839_p8, %p16838_p5 }
 0x115   : > { %p16845_p7 = por %p16844_p10, %p16843_p9 }
 0x116   : > { %p16841_p13 = pneg %p16840_p12 }
 0x117   : > { %p16847_p11 = por %p16846_p1, %p16845_p7 }
 0x119   : > { %p16848_p6 = pnand %p16847_p11, %p16841_p13 }
 0x11b   : > { %16851 = shalt.err (!%p16848_p6)
}
 0x11c   : > { %s16852_s12 = scalar_lea.vmem %s17458_s11, 256  ;;  %s17026_s13 = smov [#allocation8]  }
 0x11d   : > { %p16853_p5 = scmp.ne.s32.totalorder %s17458_s11, %s16852_s12  ;;  %s16857_s15 = sshll.u32 %s17026_s13, 4  ;;  %s16858_s15 = int_to_ptr.vmem [resolvable:$false] %s16857_s15 }
 0x11e   : > { %s16859_s16 = scalar_lea.vmem %s16858_s15, 512  ;;  %p16860_p3 = scmp.lt.s32.totalorder %s17458_s11, %s16858_s15 }
 0x11f   : > { %p16855_p12 = pnand %p16853_p5, %p16839_p8  ;;  %p16861_p9 = scmp.lt.s32.totalorder %s16859_s16, %s16852_s12 }
 0x121   : > { %p16856_p2 = pneg %p16855_p12  ;;  %p16862_p10 = por %p16861_p9, %p16860_p3 }
 0x123   : > { %p16863_p7 = pnand %p16862_p10, %p16856_p2 }
 0x125   : > { %16866 = shalt.err (!%p16863_p7)
}
 0x126   : > { %s22291_s28 = smov 8   ;;  %s22292_s22 = smov 128  }
 0x127   : > { %16333 = dma.hbm_to_vmem [thread:$0]  (!%p17464_p4), %s17456_s21, 256, %s17458_s11, %s17468_s3, %s22292_s22, %s22292_s22, %s22291_s28  }
 0x128   : > { %s22293_s14 = sld [smem:[#allocation36_spill]] }
 0x12e   : > { %p22294_p6 = scmp.ne.s32.totalorder %s22293_s14, 0 }
 0x130   : > { %600 = sbr.rel (%p22294_p6) target bundleno = 4576 (0x11e0), region = 80 }
 0x137   : > { %s602_s24 = sand.u32 1, %s16989_s25  }
 0x138   : > { %s10713_s27 = sshll.u32 %s602_s24, 7  ;;  %s603_s4 = scalar_lea.sflag [#allocation6], %s602_s24 }
 0x139   : > { %s17502_s5 = scalar_lea.vmem [#allocation5], %s10713_s27 }
 0x13a   : > { %16940 = dma.done.wait (%p17354_p0), %s603_s4, 2048  }
 0x13b   : > { %16942 = vsyncadd (%p17354_p0), %s603_s4, 4294965248  ;;  %s22295_s8 = sld [smem:[#allocation33_spill]]  ;;  %s611_s9 = sand.u32 1, %s17179_s17  }
 0x13c   : > { %s612_s3 = scalar_lea.sflag [#allocation9], %s611_s9  ;;  %p22296_p3 = scmp.ne.s32.totalorder %s22279_s20, 0 }
 0x141   : > { %s17510_s11 = sand.u32 1, %s22295_s8  }
 0x142   : > { %s10714_s21 = sshll.u32 %s17510_s11, 4 }
 0x143   : > { %s17513_s10 = scalar_lea.vmem [#allocation8], %s10714_s21 }
 0x144   : > { %16944 = dma.done.wait (%p22296_p3), %s612_s3, 256  }
 0x145   : > { %16946 = vsyncadd (%p22296_p3), %s612_s3, 4294967040  ;;  %p22297_p2 = scmp.eq.s32.totalorder %s17179_s17, 0 }
 0x147   : > { %16948 = dma.done.wait (%p22297_p2), [#allocation9], 2048   ;;  %p22298_p0 = pmov %p22297_p2 }
 0x149   : > { %16950 = vsyncadd (%p22298_p0), [#allocation9], 4294965248  ;;  %p22299_p4 = pmov %p22298_p0 }
 0x14a   : > { %p22300_p8 = pmov %p22298_p0 }
 0x14b   : > { %16952 = dma.done.wait (%p22299_p4), [#allocation12], 4096  }
 0x14c   : > { %16954 = vsyncadd (%p22300_p8), [#allocation12], 4294963200  ;;  %p22301_p13 = pmov %p22298_p0 }
 0x14d   : > { %p22302_p1 = pmov %p22298_p0 }
 0x14e   : > { %16956 = dma.done.wait (%p22301_p13), [#allocation15], 4096  }
 0x14f   : > { %16958 = vsyncadd (%p22302_p1), [#allocation15], 4294963200  ;;  %p22303_p11 = pmov %p22298_p0 }
 0x150   : > { %p22304_p5 = pmov %p22298_p0 }
 0x151   : > { %16960 = dma.done.wait (%p22303_p11), [#allocation18], 2048  }
 0x152   : > { %16962 = vsyncadd (%p22304_p5), [#allocation18], 4294965248  ;;  %s10721_s18 = sshll.u32 %s17510_s11, 6  ;;  %s10722_s20 = sshll.u32 %s17510_s11, 7 }
 0x153   : > { %s17537_s2 = scalar_lea.vmem [#allocation19], %s10721_s18  ;;  %s17539_s7 = scalar_lea.vmem [#allocation20], %s10722_s20 }
 0x154   : > { %s22305_s12 = sld [smem:[#allocation34_spill]] }
 0x15a   : > { %p10723_p12 = scmp.ne.s32.totalorder %s22305_s12, 0 }
 0x15c   : > { %707 = sbr.rel (%p10723_p12) target bundleno = 814 (0x32e), region = 116 }
 0x163   : > { %v17542_v0 = vld [vmem:[#allocation11] sm:$0xff]  ;;  %v17544_v1 = vld [vmem:[#allocation11 + $0x8] sm:$0xff]  ;;  %v17553_v7 = vld [vmem:[#allocation11 + $0x10] sm:$0xff] }
 0x164   : > { %v17546_v2 = vld [vmem:[#allocation13] sm:$0xff]  ;;  %v741_v3 = vand.u32 4294901760, %v17542_v0  ;;  %v744_v4 = vand.u32 4294901760, %v17544_v1  ;;  %v17550_v5 = vld [vmem:[#allocation13 + $0x8] sm:$0xff]  ;;  %v17555_v8 = vld [vmem:[#allocation11 + $0x18] sm:$0xff]  ;;  %v21927_v10 = vand.u32 4294901760, %v17553_v7 }
 0x165   : > { %v2059_v6 = vand.u32 4294901760, %v17546_v2  ;;  %v2062_v9 = vand.u32 4294901760, %v17550_v5  ;;  %v21924_v11 = vand.u32 4294901760, %v17555_v8  ;;  %v17560_v12 = vld [vmem:[#allocation13 + $0x10] sm:$0xff]  ;;  %v17562_v13 = vld [vmem:[#allocation13 + $0x18] sm:$0xff]  ;;  %v17564_v14 = vld [vmem:[#allocation11 + $0x20] sm:$0xff] }
 0x166   : > { %v17570_v15 = vpack.c.bf16 %v744_v4, %v741_v3  ;;  %v21923_v16 = vand.u32 4294901760, %v17560_v12  ;;  %v21922_v17 = vand.u32 4294901760, %v17562_v13  ;;  %v17574_v18 = vld [vmem:[#allocation11 + $0x28] sm:$0xff]  ;;  %v21919_v19 = vand.u32 4294901760, %v17564_v14  ;;  %v17577_v20 = vld [vmem:[#allocation13 + $0x20] sm:$0xff]  ;;  %v17595_v26 = vld [vmem:[#allocation11 + $0x30] sm:$0xff] }
 0x167   : > { %v17579_v21 = vld [vmem:[#allocation13 + $0x28] sm:$0xff]  ;;  %v17585_v22 = vpack.c.bf16 %v2062_v9, %v2059_v6  ;;  %v17591_v23 = vpack.c.bf16 %v21924_v11, %v21927_v10  ;;  %v21918_v24 = vand.u32 4294901760, %v17574_v18  ;;  %v21917_v25 = vand.u32 4294901760, %v17577_v20  ;;  %v17597_v27 = vld [vmem:[#allocation11 + $0x38] sm:$0xff]  ;;  %v17599_v28 = vld [vmem:[#allocation13 + $0x30] sm:$0xff] }
 0x168   : > { %22306 = vst [vmem:[#allocation41_spill] sm:$0xff] %v17570_v15  ;;  %14327 = vmatprep.subr.bf16.mxu0 %v17570_v15  ;;  %v17606_v29 = vpack.c.bf16 %v21922_v17, %v21923_v16  ;;  %v21912_v30 = vand.u32 4294901760, %v17579_v21  ;;  %v21911_v31 = vand.u32 4294901760, %v17595_v26  ;;  %v21910_v32 = vand.u32 4294901760, %v17597_v27  ;;  %v17611_v33 = vld [vmem:[#allocation13 + $0x38] sm:$0xff]  ;;  %v17613_v34 = vld [vmem:[#allocation11 + $0x40] sm:$0xff] }
 0x169   : > { %22307 = vst [vmem:[#allocation42_spill] sm:$0xff] %v17585_v22  ;;  %22308 = vst [vmem:[#allocation43_spill] sm:$0xff] %v17591_v23  ;;  %v17615_v35 = vld [vmem:[#allocation11 + $0x48] sm:$0xff]  ;;  %14519 = vmatprep.subr.bf16.mxu1 %v17585_v22  ;;  %14329 = vmatpush3.bf16.msra.mxu0 %v17570_v15  ;;  %v17623_v36 = vpack.c.bf16 %v21918_v24, %v21919_v19  ;;  %v21909_v37 = vand.u32 4294901760, %v17599_v28  ;;  %v21908_v38 = vand.u32 4294901760, %v17611_v33  ;;  %v21907_v39 = vand.u32 4294901760, %v17613_v34 }
 0x16a   : > { %22309 = vst [vmem:[#allocation44_spill] sm:$0xff] %v17606_v29  ;;  %v17628_v40 = vld [vmem:[#allocation13 + $0x40] sm:$0xff]  ;;  %v17630_v41 = vld [vmem:[#allocation13 + $0x48] sm:$0xff]  ;;  %v17632_v42 = vld [vmem:[#allocation11 + $0x50] sm:$0xff]  ;;  %14521 = vmatpush3.bf16.msra.mxu1 %v17585_v22  ;;  %14331 = vmatprep.subr.bf16.mxu0 %v17591_v23  ;;  %v17640_v43 = vpack.c.bf16 %v21912_v30, %v21917_v25  ;;  %v17646_v44 = vpack.c.bf16 %v21910_v32, %v21911_v31  ;;  %v21906_v45 = vand.u32 4294901760, %v17615_v35 }
 0x16b   : > { %22310 = vst [vmem:[#allocation45_spill] sm:$0xff] %v17623_v36  ;;  %v21916_v46 = vand.u32 4294901760, %v17628_v40  ;;  %v17650_v47 = vld [vmem:[#allocation11 + $0x58] sm:$0xff]  ;;  %v17652_v48 = vld [vmem:[#allocation13 + $0x50] sm:$0xff]  ;;  %14523 = vmatprep.subr.bf16.mxu1 %v17606_v29  ;;  %v17661_v50 = vpack.c.bf16 %v21908_v38, %v21909_v37  ;;  %v21915_v51 = vand.u32 4294901760, %v17630_v41  ;;  %v21914_v52 = vand.u32 4294901760, %v17632_v42 }
 0x16c   : > { %22311 = vst [vmem:[#allocation46_spill] sm:$0xff] %v17640_v43  ;;  %22312 = vst [vmem:[#allocation47_spill] sm:$0xff] %v17646_v44  ;;  %v17654_v49 = vld [vmem:[#allocation13 + $0x58] sm:$0xff]  ;;  %v21913_v53 = vand.u32 4294901760, %v17650_v47  ;;  %v17666_v54 = vld [vmem:[#allocation11 + $0x60] sm:$0xff]  ;;  %v17676_v57 = vpack.c.bf16 %v21906_v45, %v21907_v39  ;;  %v21921_v58 = vand.u32 4294901760, %v17652_v48 }
 0x16d   : > { %22313 = vst [vmem:[#allocation48_spill] sm:$0xff] %v17661_v50  ;;  %v17668_v55 = vld [vmem:[#allocation11 + $0x68] sm:$0xff]  ;;  %v17670_v56 = vld [vmem:[#allocation13 + $0x60] sm:$0xff]  ;;  %v21920_v59 = vand.u32 4294901760, %v17654_v49  ;;  %v21926_v60 = vand.u32 4294901760, %v17666_v54  ;;  %v17683_v62 = vld [vmem:[#allocation11 + $0x70] sm:$0xff]  ;;  %14333 = vmatpush3.bf16.msra.mxu0 %v17591_v23  ;;  %v17692_v45 = vpack.c.bf16 %v21915_v51, %v21916_v46 }
 0x16e   : > { %22314 = vst [vmem:[#allocation49_spill] sm:$0xff] %v17676_v57  ;;  %v17681_v61 = vld [vmem:[#allocation13 + $0x68] sm:$0xff]  ;;  %v17685_v63 = vld [vmem:[#allocation11 + $0x78] sm:$0xff]  ;;  %v17698_v39 = vpack.c.bf16 %v21913_v53, %v21914_v52  ;;  %v21925_v38 = vand.u32 4294901760, %v17668_v55  ;;  %v21929_v37 = vand.u32 4294901760, %v17670_v56  ;;  %v17702_v32 = vld [vmem:[#allocation13 + $0x70] sm:$0xff]  ;;  %14525 = vmatpush3.bf16.msra.mxu1 %v17606_v29  ;;  %14335 = vmatprep.subr.bf16.mxu0 %v17623_v36 }
 0x16f   : > { %22315 = vst [vmem:[#allocation50_spill] sm:$0xff] %v17692_v45  ;;  %v17704_v31 = vld [vmem:[#allocation13 + $0x78] sm:$0xff]  ;;  %v708_v30 = vld [vmem:[%s17502_s5] sm:$0xff]  ;;  %v17713_v53 = vpack.c.bf16 %v21920_v59, %v21921_v58  ;;  %v21928_v52 = vand.u32 4294901760, %v17681_v61  ;;  %v21933_v51 = vand.u32 4294901760, %v17683_v62  ;;  %v21930_v46 = vand.u32 4294901760, %v17685_v63  ;;  %14527 = vmatprep.subr.bf16.mxu1 %v17640_v43 }
 0x170   : > { %22316 = vst [vmem:[#allocation51_spill] sm:$0xff] %v17698_v39  ;;  %v709_v25 = vld [vmem:[%s17502_s5 + $0x8] sm:$0xff]  ;;  %v17724_v24 = vpack.c.bf16 %v21925_v38, %v21926_v60  ;;  %v21932_v19 = vand.u32 4294901760, %v17702_v32  ;;  %v21931_v59 = vand.u32 4294901760, %v17704_v31  ;;  %v17728_v58 = vand.u32 4294901760, %v708_v30  ;;  %v710_v17 = vld [vmem:[%s17502_s5 + $0x10] sm:$0xff] }
 0x171   : > { %22317 = vst [vmem:[#allocation52_spill] sm:$0xff] %v17713_v53  ;;  %v17735_v16 = vpack.c.bf16 %v21928_v52, %v21929_v37  ;;  %v17741_v11 = vpack.c.bf16 %v21930_v46, %v21933_v51  ;;  %v17743_v38 = vand.u32 4294901760, %v709_v25  ;;  %v17748_v60 = vsub.f32 %v17542_v0, %v741_v3  ;;  %v711_v10 = vld [vmem:[%s17502_s5 + $0x18] sm:$0xff]  ;;  %14337 = vmatpush3.bf16.msra.mxu0 %v17623_v36  ;;  %v712_v23 = vld [vmem:[%s17502_s5 + $0x20] sm:$0xff] }
 0x172   : > { %22318 = vst [vmem:[#allocation53_spill] sm:$0xff] %v17724_v24  ;;  %22319 = vst [vmem:[#allocation54_spill] sm:$0xff] %v17728_v58  ;;  %v17756_v52 = vpack.c.bf16 %v21931_v59, %v21932_v19  ;;  %v17759_v37 = vsub.f32 %v708_v30, %v17728_v58  ;;  %v17764_v46 = vsub.f32 %v17544_v1, %v744_v4  ;;  %14529 = vmatpush3.bf16.msra.mxu1 %v17640_v43 }
 0x173   : > { %22320 = vst [vmem:[#allocation55_spill] sm:$0xff] %v17735_v16  ;;  %22321 = vst [vmem:[#allocation56_spill] sm:$0xff] %v17741_v11  ;;  %v17769_v0 = vsub.f32 %v17546_v2, %v2059_v6  ;;  %14339 = vmatprep.subr.bf16.mxu0 %v17646_v44  ;;  %v17774_v3 = vsub.f32 %v709_v25, %v17743_v38  ;;  %v21940_v30 = vand.u32 4294901760, %v17748_v60  ;;  %v17782_v1 = vand.u32 4294901760, %v710_v17 }
 0x174   : > { %22322 = vst [vmem:[#allocation57_spill] sm:$0xff] %v17756_v52  ;;  %22323 = vst [vmem:[#allocation58_spill] sm:$0xff] %v17759_v37  ;;  %v17780_v59 = vsub.f32 %v17550_v5, %v2062_v9  ;;  %14531 = vmatprep.subr.bf16.mxu1 %v17661_v50  ;;  %v17786_v2 = vand.u32 4294901760, %v17759_v37  ;;  %v21945_v4 = vand.u32 4294901760, %v17764_v46  ;;  %v17790_v25 = vand.u32 4294901760, %v711_v10 }
 0x175   : > { %22324 = vst [vmem:[#allocation59_spill] sm:$0xff] %v17774_v3  ;;  %v17793_v19 = vand.u32 4294901760, %v17774_v3  ;;  %v985_v5 = vsub.f32 %v17748_v60, %v21940_v30  ;;  %v17800_v51 = vsub.f32 %v710_v17, %v17782_v1  ;;  %14341 = vmatpush3.bf16.msra.mxu0 %v17646_v44  ;;  %v22328_v36 = vand.u32 4294901760, %v17769_v0 }
 0x176   : > { %22325 = vst [vmem:[#allocation60_spill] sm:$0xff] %v17786_v2  ;;  %v824_v6 = vsub.f32 %v17759_v37, %v17786_v2  ;;  %v992_v43 = vsub.f32 %v17764_v46, %v21945_v4  ;;  %v17812_v30 = vsub.f32 %v711_v10, %v17790_v25  ;;  %14533 = vmatpush3.bf16.msra.mxu1 %v17661_v50  ;;  %v22330_v2 = vand.u32 4294901760, %v17780_v59  ;;  %v714_v37 = vld [vmem:[%s17502_s5 + $0x30] sm:$0xff] }
 0x177   : > { %22326 = vst [vmem:[#allocation61_spill] sm:$0xff] %v17793_v19  ;;  %22327 = vst [vmem:[#allocation62_spill] sm:$0xff] %v17800_v51  ;;  %v2303_v29 = vsub.f32 %v17769_v0, %v22328_v36  ;;  %14343 = vmatprep.subr.bf16.mxu0 %v17676_v57  ;;  %v834_v17 = vsub.f32 %v17774_v3, %v17793_v19  ;;  %v986_v9 = vand.u32 4294901760, %v985_v5  ;;  %v17822_v4 = vand.u32 4294901760, %v17800_v51 }
 0x178   : > { %22329 = vst [vmem:[#allocation63_spill] sm:$0xff] %v17812_v30  ;;  %v2310_v44 = vsub.f32 %v17780_v59, %v22330_v2  ;;  %14535 = vmatprep.subr.bf16.mxu1 %v17692_v45  ;;  %v825_v10 = vand.u32 4294901760, %v824_v6  ;;  %v993_v36 = vand.u32 4294901760, %v992_v43  ;;  %v17827_v22 = vand.u32 4294901760, %v17812_v30 }
 0x179   : > { %22331 = vst [vmem:[#allocation64_spill] sm:$0xff] %v17822_v4  ;;  %v2304_v50 = vand.u32 4294901760, %v2303_v29  ;;  %v17829_v15 = vand.u32 4294901760, %v834_v17  ;;  %v844_v19 = vsub.f32 %v17800_v51, %v17822_v4  ;;  %v22333_v2 = vand.u32 4294901760, %v17553_v7  ;;  %14345 = vmatpush3.bf16.msra.mxu0 %v17676_v57  ;;  %v713_v4 = vld [vmem:[%s17502_s5 + $0x28] sm:$0xff] }
 0x17a   : > { %22332 = vst [vmem:[#allocation65_spill] sm:$0xff] %v17827_v22  ;;  %v2311_v5 = vand.u32 4294901760, %v2310_v44  ;;  %12102 = vmatprep.mubr.f32.mxu0 %v825_v10  ;;  %v17839_v6 = vpack.c.bf16 %v993_v36, %v986_v9  ;;  %v854_v29 = vsub.f32 %v17812_v30, %v17827_v22  ;;  %v22334_v43 = vand.u32 4294901760, %v17555_v8  ;;  %14537 = vmatpush3.bf16.msra.mxu1 %v17692_v45 }
 0x17b   : > { %v17836_v3 = vsub.f32 %v17553_v7, %v22333_v2  ;;  %v17848_v17 = vand.u32 4294901760, %v712_v23  ;;  %14347 = vmatprep.subr.bf16.mxu0 %v17698_v39  ;;  %v17855_v2 = vand.u32 4294901760, %v844_v19  ;;  %v22335_v36 = vand.u32 4294901760, %v17560_v12  ;;  %14539 = vmatprep.subr.bf16.mxu1 %v17713_v53 }
 0x17c   : > { %v17846_v44 = vsub.f32 %v17555_v8, %v22334_v43  ;;  %v17853_v7 = vpack.c.bf16 %v2311_v5, %v2304_v50  ;;  %12438 = vmatprep.mubr.f32.mxu1 %v825_v10  ;;  %v17864_v8 = vand.u32 4294901760, %v854_v29  ;;  %v22336_v45 = vand.u32 4294901760, %v17562_v13 }
 0x17d   : > { %v21964_v9 = vand.u32 4294901760, %v17836_v3  ;;  %v17861_v22 = vsub.f32 %v17560_v12, %v22335_v36  ;;  %v17873_v19 = vsub.f32 %v712_v23, %v17848_v17  ;;  %v17879_v36 = vand.u32 4294901760, %v713_v4  ;;  %14349 = vmatpush3.bf16.msra.mxu0 %v17698_v39 }
 0x17e   : > { %v21965_v43 = vand.u32 4294901760, %v17846_v44  ;;  %v17870_v50 = vsub.f32 %v17562_v13, %v22336_v45  ;;  %v22339_v10 = vand.u32 4294901760, %v17564_v14  ;;  %14541 = vmatpush3.bf16.msra.mxu1 %v17713_v53  ;;  %14351 = vmatprep.subr.bf16.mxu0 %v17724_v24  ;;  %v22346_v51 = vand.u32 4294901760, %v17577_v20 }
 0x17f   : > { %22337 = vst [vmem:[#allocation66_spill] sm:$0xff] %v17873_v19  ;;  %v999_v12 = vsub.f32 %v17836_v3, %v21964_v9  ;;  %22338 = vst [vmem:[#allocation67_spill] sm:$0xff] %v17879_v36  ;;  %v17892_v45 = vand.u32 4294901760, %v17873_v19  ;;  %v22341_v9 = vand.u32 4294901760, %v17574_v18  ;;  %v17905_v23 = vsub.f32 %v713_v4, %v17879_v36  ;;  %14543 = vmatprep.subr.bf16.mxu1 %v17735_v16 }
 0x180   : > { %v17884_v29 = vsub.f32 %v17564_v14, %v22339_v10  ;;  %v1006_v13 = vsub.f32 %v17846_v44, %v21965_v43  ;;  %v22342_v10 = vand.u32 4294901760, %v17861_v22 }
 0x181   : > { %22340 = vst [vmem:[#allocation68_spill] sm:$0xff] %v17892_v45  ;;  %v17897_v5 = vsub.f32 %v17574_v18, %v22341_v9  ;;  %v1000_v14 = vand.u32 4294901760, %v999_v12  ;;  %22343 = vst [vmem:[#allocation69_spill] sm:$0xff] %v17905_v23  ;;  %v22344_v9 = vand.u32 4294901760, %v17870_v50  ;;  %v864_v57 = vsub.f32 %v17873_v19, %v17892_v45  ;;  %14353 = vmatpush3.bf16.msra.mxu0 %v17724_v24 }
 0x182   : > { %v2317_v43 = vsub.f32 %v17861_v22, %v22342_v10  ;;  %v21984_v39 = vand.u32 4294901760, %v17884_v29  ;;  %v1007_v18 = vand.u32 4294901760, %v1006_v13  ;;  %v17916_v10 = vand.u32 4294901760, %v17905_v23  ;;  %14545 = vmatpush3.bf16.msra.mxu1 %v17735_v16  ;;  %14355 = vmatprep.subr.bf16.mxu0 %v17741_v11 }
 0x183   : > { %v2324_v53 = vsub.f32 %v17870_v50, %v22344_v9  ;;  %v17924_v13 = vsub.f32 %v17577_v20, %v22346_v51  ;;  %v715_v9 = vld [vmem:[%s17502_s5 + $0x38] sm:$0xff]  ;;  %v22347_v19 = vand.u32 4294901760, %v17897_v5  ;;  %14547 = vmatprep.subr.bf16.mxu1 %v17756_v52 }
 0x184   : > { %v2318_v30 = vand.u32 4294901760, %v2317_v43  ;;  %22345 = vst [vmem:[#allocation70_spill] sm:$0xff] %v17916_v10  ;;  %v1013_v4 = vsub.f32 %v17884_v29, %v21984_v39  ;;  %v17929_v45 = vpack.c.bf16 %v1007_v18, %v1000_v14  ;;  %v17931_v43 = vand.u32 4294901760, %v864_v57 }
 0x185   : > { %v2325_v12 = vand.u32 4294901760, %v2324_v53  ;;  %v1020_v36 = vsub.f32 %v17897_v5, %v22347_v19  ;;  %v874_v20 = vsub.f32 %v17905_v23, %v17916_v10  ;;  %v21993_v39 = vand.u32 4294901760, %v17924_v13  ;;  %14357 = vmatpush3.bf16.msra.mxu0 %v17741_v11 }
 0x186   : > { %v1014_v51 = vand.u32 4294901760, %v1013_v4  ;;  %v22348_v14 = vand.u32 4294901760, %v17579_v21  ;;  %v17947_v18 = vand.u32 4294901760, %v714_v37  ;;  %v17949_v16 = vand.u32 4294901760, %v715_v9  ;;  %14549 = vmatpush3.bf16.msra.mxu1 %v17756_v52  ;;  %14359 = vmatprep.subr.bf16.mxu0 %v17839_v6 }
 0x187   : > { %v14554_v57 = vpack.c.bf16 %v2325_v12, %v2318_v30  ;;  %v1021_v19 = vand.u32 4294901760, %v1020_v36  ;;  %v17951_v24 = vand.u32 4294901760, %v874_v20  ;;  %v2331_v4 = vsub.f32 %v17924_v13, %v21993_v39  ;;  %v716_v39 = vld [vmem:[%s17502_s5 + $0x40] sm:$0xff]  ;;  %14551 = vmatprep.subr.bf16.mxu1 %v17853_v7 }
 0x188   : > { %v17944_v53 = vsub.f32 %v17579_v21, %v22348_v14  ;;  %22349 = vst [vmem:[#allocation71_spill] sm:$0xff] %v17949_v16  ;;  %v22350_v23 = vand.u32 4294901760, %v17595_v26  ;;  %v17966_v36 = vsub.f32 %v714_v37, %v17947_v18  ;;  %v17969_v12 = vsub.f32 %v715_v9, %v17949_v16  ;;  %12103 = vmatmul.mubr.f32.vlgmr.msra.gmra.mrb[0].mxu0 %v17829_v15  ;;  %v717_v16 = vld [vmem:[%s17502_s5 + $0x48] sm:$0xff] }
 0x189   : > { %v17963_v30 = vpack.c.bf16 %v1021_v19, %v1014_v51  ;;  %v22353_v20 = vand.u32 4294901760, %v17597_v27  ;;  %v22354_v9 = vand.u32 4294901760, %v17599_v28  ;;  %v18006_v11 = vand.u32 4294901760, %v716_v39  ;;  %12439 = vmatmul.mubr.f32.vlgmr.msra.gmra.mrb[0].mxu1 %v17829_v15  ;;  %14361 = vmatpush3.bf16.msra.mxu0 %v17839_v6 }
 0x18a   : > { %v21994_v10 = vand.u32 4294901760, %v17944_v53  ;;  %v17960_v21 = vsub.f32 %v17595_v26, %v22350_v23  ;;  %22351 = vst [vmem:[#allocation72_spill] sm:$0xff] %v17966_v36  ;;  %22352 = vst [vmem:[#allocation73_spill] sm:$0xff] %v17969_v12  ;;  %v2332_v26 = vand.u32 4294901760, %v2331_v4  ;;  %v17993_v19 = vand.u32 4294901760, %v17969_v12  ;;  %14553 = vmatpush3.bf16.msra.mxu1 %v17853_v7  ;;  %12105 = vmatprep.mubr.f32.mxu0 %v17855_v2 }
 0x18b   : > { %v17974_v14 = vsub.f32 %v17597_v27, %v22353_v20  ;;  %v17986_v51 = vsub.f32 %v17599_v28, %v22354_v9  ;;  %v17990_v27 = vand.u32 4294901760, %v17966_v36  ;;  %v22357_v20 = vand.u32 4294901760, %v17611_v33  ;;  %22358 = vst [vmem:[#allocation76_spill] sm:$0xff] %v18006_v11  ;;  %12441 = vmatprep.mubr.f32.mxu1 %v17855_v2  ;;  %14363 = vmatprep.subr.bf16.mxu0 %v17929_v45 }
 0x18c   : > { %v2338_v23 = vsub.f32 %v17944_v53, %v21994_v10  ;;  %v21999_v37 = vand.u32 4294901760, %v17960_v21  ;;  %22356 = vst [vmem:[#allocation75_spill] sm:$0xff] %v17993_v19  ;;  %12106 = vmatmul.mubr.f32.gmra.mrb[2].mxu0 %v17864_v8  ;;  %14555 = vmatprep.subr.bf16.mxu1 %v14554_v57  ;;  %v22363_v2 = vand.u32 4294901760, %v17613_v34 }
 0x18d   : > { %22355 = vst [vmem:[#allocation74_spill] sm:$0xff] %v17990_v27  ;;  %v17999_v10 = vsub.f32 %v17611_v33, %v22357_v20  ;;  %v22008_v52 = vand.u32 4294901760, %v17986_v51  ;;  %v884_v4 = vsub.f32 %v17966_v36, %v17990_v27  ;;  %v894_v33 = vsub.f32 %v17969_v12, %v17993_v19  ;;  %12442 = vmatmul.mubr.f32.gmra.mrb[2].mxu1 %v17864_v8 }
 0x18e   : > { %v2339_v28 = vand.u32 4294901760, %v2338_v23  ;;  %v1027_v9 = vsub.f32 %v17960_v21, %v21999_v37  ;;  %v22359_v23 = vand.u32 4294901760, %v17974_v14  ;;  %v18025_v19 = vsub.f32 %v716_v39, %v18006_v11  ;;  %14365 = vmatpush3.bf16.msra.mxu0 %v17929_v45  ;;  %14557 = vmatpush3.bf16.msra.mxu1 %v14554_v57 }
 0x18f   : > { %v2345_v27 = vsub.f32 %v17986_v51, %v22008_v52  ;;  %v895_v37 = vand.u32 4294901760, %v894_v33  ;;  %v22361_v7 = vand.u32 4294901760, %v17999_v10  ;;  %v18036_v39 = vand.u32 4294901760, %v717_v16  ;;  %v718_v33 = vld [vmem:[%s17502_s5 + $0x50] sm:$0xff]  ;;  %12108 = vmatprep.mubr.f32.mxu0 %v17931_v43  ;;  %12444 = vmatprep.mubr.f32.mxu1 %v17931_v43 }
 0x190   : > { %v1034_v20 = vsub.f32 %v17974_v14, %v22359_v23  ;;  %v14558_v15 = vpack.c.bf16 %v2339_v28, %v2332_v26  ;;  %v1028_v6 = vand.u32 4294901760, %v1027_v9  ;;  %22360 = vst [vmem:[#allocation77_spill] sm:$0xff] %v18025_v19  ;;  %v885_v23 = vand.u32 4294901760, %v884_v4  ;;  %14367 = vmatprep.subr.bf16.mxu0 %v17963_v30  ;;  %12109 = vmatmul.mubr.f32.gmra.mrb[4].mxu0 %v17951_v24 }
 0x191   : > { %v2352_v26 = vsub.f32 %v17999_v10, %v22361_v7  ;;  %v2346_v28 = vand.u32 4294901760, %v2345_v27  ;;  %v18034_v9 = vand.u32 4294901760, %v18025_v19  ;;  %v18041_v4 = vsub.f32 %v17613_v34, %v22363_v2  ;;  %12445 = vmatmul.mubr.f32.gmra.mrb[4].mxu1 %v17951_v24 }
 0x192   : > { %v1035_v12 = vand.u32 4294901760, %v1034_v20  ;;  %v22364_v27 = vand.u32 4294901760, %v17615_v35  ;;  %v22365_v36 = vand.u32 4294901760, %v17628_v40  ;;  %v18060_v8 = vsub.f32 %v717_v16, %v18036_v39  ;;  %14559 = vmatprep.subr.bf16.mxu1 %v14558_v15  ;;  %14369 = vmatpush3.bf16.msra.mxu0 %v17963_v30 }
 0x193   : > { %22362 = vst [vmem:[#allocation78_spill] sm:$0xff] %v18034_v9  ;;  %v2353_v7 = vand.u32 4294901760, %v2352_v26  ;;  %v904_v34 = vsub.f32 %v18025_v19, %v18034_v9  ;;  %v22015_v45 = vand.u32 4294901760, %v18041_v4  ;;  %v18073_v26 = vand.u32 4294901760, %v718_v33  ;;  %14561 = vmatpush3.bf16.msra.mxu1 %v14558_v15  ;;  %12111 = vmatprep.mubr.f32.mxu0 %v885_v23  ;;  %v721_v9 = vld [vmem:[%s17502_s5 + $0x68] sm:$0xff] }
 0x194   : > { %v14370_v20 = vpack.c.bf16 %v1035_v12, %v1028_v6  ;;  %v18049_v52 = vsub.f32 %v17615_v35, %v22364_v27  ;;  %v18054_v11 = vsub.f32 %v17628_v40, %v22365_v36  ;;  %22366 = vst [vmem:[#allocation79_spill] sm:$0xff] %v18060_v8  ;;  %v22367_v12 = vand.u32 4294901760, %v17630_v41  ;;  %v719_v6 = vld [vmem:[%s17502_s5 + $0x58] sm:$0xff]  ;;  %12447 = vmatprep.mubr.f32.mxu1 %v885_v23 }
 0x195   : > { %v14562_v40 = vpack.c.bf16 %v2353_v7, %v2346_v28  ;;  %v905_v16 = vand.u32 4294901760, %v904_v34  ;;  %v18077_v2 = vand.u32 4294901760, %v18060_v8  ;;  %v18092_v27 = vsub.f32 %v718_v33, %v18073_v26  ;;  %12112 = vmatmul.mubr.f32.gmra.mrb[6].mxu0 %v895_v37  ;;  %12448 = vmatmul.mubr.f32.gmra.mrb[6].mxu1 %v895_v37 }
 0x196   : > { %v18066_v35 = vsub.f32 %v17630_v41, %v22367_v12  ;;  %v22013_v57 = vand.u32 4294901760, %v18049_v52  ;;  %v22014_v36 = vand.u32 4294901760, %v18054_v11  ;;  %v1041_v41 = vsub.f32 %v18041_v4, %v22015_v45  ;;  %14371 = vmatprep.subr.bf16.mxu0 %v14370_v20 }
 0x197   : > { %22368 = vst [vmem:[#allocation80_spill] sm:$0xff] %v18077_v2  ;;  %22369 = vst [vmem:[#allocation81_spill] sm:$0xff] %v18092_v27  ;;  %v18094_v34 = vand.u32 4294901760, %v719_v6  ;;  %v914_v24 = vsub.f32 %v18060_v8, %v18077_v2  ;;  %v18107_v15 = vand.u32 4294901760, %v18092_v27  ;;  %14563 = vmatprep.subr.bf16.mxu1 %v14562_v40  ;;  %14373 = vmatpush3.bf16.msra.mxu0 %v14370_v20 }
 0x198   : > { %v22018_v43 = vand.u32 4294901760, %v18066_v35  ;;  %v1048_v28 = vsub.f32 %v18049_v52, %v22013_v57  ;;  %v2359_v7 = vsub.f32 %v18054_v11, %v22014_v36  ;;  %v1042_v30 = vand.u32 4294901760, %v1041_v41  ;;  %14565 = vmatpush3.bf16.msra.mxu1 %v14562_v40  ;;  %12114 = vmatprep.mubr.f32.mxu0 %v905_v16 }
 0x199   : > { %v22370_v57 = vand.u32 4294901760, %v17632_v42  ;;  %22371 = vst [vmem:[#allocation82_spill] sm:$0xff] %v18107_v15  ;;  %v18110_v2 = vsub.f32 %v719_v6, %v18094_v34  ;;  %v915_v41 = vand.u32 4294901760, %v914_v24  ;;  %v22375_v24 = vand.u32 4294901760, %v17652_v48  ;;  %12450 = vmatprep.mubr.f32.mxu1 %v905_v16 }
 0x19a   : > { %v2366_v12 = vsub.f32 %v18066_v35, %v22018_v43  ;;  %v1049_v33 = vand.u32 4294901760, %v1048_v28  ;;  %v2360_v45 = vand.u32 4294901760, %v2359_v7  ;;  %v924_v7 = vsub.f32 %v18092_v27, %v18107_v15 }
 0x19b   : > { %v18104_v36 = vsub.f32 %v17632_v42, %v22370_v57  ;;  %22372 = vst [vmem:[#allocation83_spill] sm:$0xff] %v18110_v2  ;;  %v22373_v42 = vand.u32 4294901760, %v17650_v47  ;;  %v720_v57 = vld [vmem:[%s17502_s5 + $0x60] sm:$0xff]  ;;  %v18122_v6 = vand.u32 4294901760, %v18110_v2  ;;  %12115 = vmatmul.mubr.f32.gmra.mrb[8].mxu0 %v915_v41  ;;  %12451 = vmatmul.mubr.f32.gmra.mrb[8].mxu1 %v915_v41 }
 0x19c   : > { %v2367_v43 = vand.u32 4294901760, %v2366_v12  ;;  %v14374_v28 = vpack.c.bf16 %v1049_v33, %v1042_v30  ;;  %v18127_v12 = vsub.f32 %v17652_v48, %v22375_v24  ;;  %v22377_v30 = vand.u32 4294901760, %v17654_v49 }
 0x19d   : > { %v18116_v23 = vsub.f32 %v17650_v47, %v22373_v42  ;;  %22374 = vst [vmem:[#allocation84_spill] sm:$0xff] %v18122_v6  ;;  %v22376_v42 = vand.u32 4294901760, %v18104_v36  ;;  %v925_v15 = vand.u32 4294901760, %v924_v7  ;;  %v934_v48 = vsub.f32 %v18110_v2, %v18122_v6 }
 0x19e   : > { %v14566_v47 = vpack.c.bf16 %v2367_v43, %v2360_v45  ;;  %v18137_v33 = vsub.f32 %v17654_v49, %v22377_v30  ;;  %14375 = vmatprep.subr.bf16.mxu0 %v14374_v28  ;;  %v22026_v40 = vand.u32 4294901760, %v18127_v12  ;;  %v18142_v45 = vand.u32 4294901760, %v720_v57 }
 0x19f   : > { %v1055_v37 = vsub.f32 %v18104_v36, %v22376_v42  ;;  %v22025_v20 = vand.u32 4294901760, %v18116_v23  ;;  %v18148_v42 = vand.u32 4294901760, %v721_v9  ;;  %14377 = vmatpush3.bf16.msra.mxu0 %v14374_v28  ;;  %v935_v16 = vand.u32 4294901760, %v934_v48  ;;  %12117 = vmatprep.mubr.f32.mxu0 %v925_v15 }
 0x1a0   : > { %14567 = vmatprep.subr.bf16.mxu1 %v14566_v47  ;;  %v22027_v49 = vand.u32 4294901760, %v18137_v33  ;;  %v2373_v7 = vsub.f32 %v18127_v12, %v22026_v40  ;;  %v18154_v30 = vsub.f32 %v720_v57, %v18142_v45  ;;  %v22381_v48 = vand.u32 4294901760, %v17668_v55  ;;  %12453 = vmatprep.mubr.f32.mxu1 %v925_v15 }
 0x1a1   : > { %v1056_v43 = vand.u32 4294901760, %v1055_v37  ;;  %v1062_v24 = vsub.f32 %v18116_v23, %v22025_v20  ;;  %v22379_v37 = vand.u32 4294901760, %v17666_v54  ;;  %14569 = vmatpush3.bf16.msra.mxu1 %v14566_v47  ;;  %v18165_v28 = vsub.f32 %v721_v9, %v18148_v42  ;;  %v722_v9 = vld [vmem:[%s17502_s5 + $0x70] sm:$0xff]  ;;  %12118 = vmatmul.mubr.f32.gmra.mrb[10].mxu0 %v935_v16 }
 0x1a2   : > { %22378 = vst [vmem:[#allocation85_spill] sm:$0xff] %v18154_v30  ;;  %v2380_v41 = vsub.f32 %v18137_v33, %v22027_v49  ;;  %v18170_v57 = vsub.f32 %v17668_v55, %v22381_v48  ;;  %v2374_v40 = vand.u32 4294901760, %v2373_v7  ;;  %12454 = vmatmul.mubr.f32.gmra.mrb[10].mxu1 %v935_v16 }
 0x1a3   : > { %v18159_v6 = vsub.f32 %v17666_v54, %v22379_v37  ;;  %v1063_v20 = vand.u32 4294901760, %v1062_v24  ;;  %22380 = vst [vmem:[#allocation86_spill] sm:$0xff] %v18165_v28  ;;  %v18173_v54 = vand.u32 4294901760, %v18154_v30  ;;  %v22383_v24 = vand.u32 4294901760, %v17670_v56 }
 0x1a4   : > { %v2381_v2 = vand.u32 4294901760, %v2380_v41  ;;  %v18183_v55 = vand.u32 4294901760, %v18165_v28  ;;  %v22041_v15 = vand.u32 4294901760, %v18170_v57 }
 0x1a5   : > { %22382 = vst [vmem:[#allocation87_spill] sm:$0xff] %v18173_v54  ;;  %v22034_v47 = vand.u32 4294901760, %v18159_v6  ;;  %v18179_v37 = vsub.f32 %v17670_v56, %v22383_v24  ;;  %v14378_v49 = vpack.c.bf16 %v1063_v20, %v1056_v43  ;;  %v944_v7 = vsub.f32 %v18154_v30, %v18173_v54  ;;  %v723_v43 = vld [vmem:[%s17502_s5 + $0x78] sm:$0xff] }
 0x1a6   : > { %22384 = vst [vmem:[#allocation88_spill] sm:$0xff] %v18183_v55  ;;  %v22385_v24 = vand.u32 4294901760, %v17681_v61  ;;  %v14570_v41 = vpack.c.bf16 %v2381_v2, %v2374_v40  ;;  %v954_v16 = vsub.f32 %v18165_v28, %v18183_v55  ;;  %v1076_v54 = vsub.f32 %v18170_v57, %v22041_v15 }
 0x1a7   : > { %v1069_v48 = vsub.f32 %v18159_v6, %v22034_v47  ;;  %14379 = vmatprep.subr.bf16.mxu0 %v14378_v49  ;;  %v18203_v30 = vand.u32 4294901760, %v722_v9  ;;  %v945_v47 = vand.u32 4294901760, %v944_v7  ;;  %v22386_v27 = vand.u32 4294901760, %v18179_v37 }
 0x1a8   : > { %v18195_v20 = vsub.f32 %v17681_v61, %v22385_v24  ;;  %14381 = vmatpush3.bf16.msra.mxu0 %v14378_v49  ;;  %14571 = vmatprep.subr.bf16.mxu1 %v14570_v41  ;;  %v955_v2 = vand.u32 4294901760, %v954_v16  ;;  %v1077_v40 = vand.u32 4294901760, %v1076_v54  ;;  %v18212_v28 = vand.u32 4294901760, %v723_v43 }
 0x1a9   : > { %v1070_v56 = vand.u32 4294901760, %v1069_v48  ;;  %v2387_v61 = vsub.f32 %v18179_v37, %v22386_v27  ;;  %v18210_v55 = vsub.f32 %v722_v9, %v18203_v30  ;;  %14573 = vmatpush3.bf16.msra.mxu1 %v14570_v41  ;;  %12120 = vmatprep.mubr.f32.mxu0 %v945_v47  ;;  %v22389_v7 = vand.u32 4294901760, %v17683_v62 }
 0x1aa   : > { %v22042_v24 = vand.u32 4294901760, %v18195_v20  ;;  %22388 = vst [vmem:[#allocation90_spill] sm:$0xff] %v18212_v28  ;;  %v22390_v48 = vand.u32 4294901760, %v17685_v63  ;;  %12456 = vmatprep.mubr.f32.mxu1 %v945_v47  ;;  %12121 = vmatmul.mubr.f32.gmra.mrb[12].mxu0 %v955_v2  ;;  %v18231_v16 = vsub.f32 %v723_v43, %v18212_v28  ;;  %v22393_v47 = vand.u32 4294901760, %v17704_v31 }
 0x1ab   : > { %22387 = vst [vmem:[#allocation89_spill] sm:$0xff] %v18210_v55  ;;  %v2388_v15 = vand.u32 4294901760, %v2387_v61  ;;  %v18220_v27 = vsub.f32 %v17683_v62, %v22389_v7  ;;  %v14382_v9 = vpack.c.bf16 %v1077_v40, %v1070_v56  ;;  %v18228_v41 = vand.u32 4294901760, %v18210_v55  ;;  %12457 = vmatmul.mubr.f32.gmra.mrb[12].mxu1 %v955_v2 }
 0x1ac   : > { %v2394_v49 = vsub.f32 %v18195_v20, %v22042_v24  ;;  %v18225_v54 = vsub.f32 %v17685_v63, %v22390_v48  ;;  %v22392_v61 = vand.u32 4294901760, %v17702_v32  ;;  %v18243_v56 = vsub.f32 %v17704_v31, %v22393_v47 }
 0x1ad   : > { %22391 = vst [vmem:[#allocation91_spill] sm:$0xff] %v18228_v41  ;;  %v1082_v7 = vand.u32 4294901760, %v18220_v27  ;;  %14383 = vmatprep.subr.bf16.mxu0 %v14382_v9  ;;  %v964_v43 = vsub.f32 %v18210_v55, %v18228_v41  ;;  %v18248_v40 = vand.u32 4294901760, %v18231_v16 }
 0x1ae   : > { %v18236_v24 = vsub.f32 %v17702_v32, %v22392_v61  ;;  %v2395_v62 = vand.u32 4294901760, %v2394_v49  ;;  %v1089_v63 = vand.u32 4294901760, %v18225_v54  ;;  %14385 = vmatpush3.bf16.msra.mxu0 %v14382_v9  ;;  %v2407_v61 = vand.u32 4294901760, %v18243_v56 }
 0x1af   : > { %22394 = vst [vmem:[#allocation92_spill] sm:$0xff] %v18248_v40  ;;  %v1083_v49 = vsub.f32 %v18220_v27, %v1082_v7  ;;  %v965_v8 = vand.u32 4294901760, %v964_v43  ;;  %v974_v31 = vsub.f32 %v18231_v16, %v18248_v40  ;;  %v14390_v43 = vpack.c.bf16 %v17764_v46, %v17748_v60 }
 0x1b0   : > { %v2400_v32 = vand.u32 4294901760, %v18236_v24  ;;  %v14574_v2 = vpack.c.bf16 %v2395_v62, %v2388_v15  ;;  %v1090_v48 = vsub.f32 %v18225_v54, %v1089_v63  ;;  %v2408_v19 = vsub.f32 %v18243_v56, %v2407_v61 }
 0x1b1   : > { %v1084_v41 = vand.u32 4294901760, %v1083_v49  ;;  %12123 = vmatprep.mubr.f32.mxu0 %v965_v8  ;;  %v975_v15 = vand.u32 4294901760, %v974_v31  ;;  %12459 = vmatprep.mubr.f32.mxu1 %v965_v8  ;;  %v14582_v49 = vpack.c.bf16 %v17780_v59, %v17769_v0  ;;  %v14394_v8 = vpack.c.bf16 %v17846_v44, %v17836_v3 }
 0x1b2   : > { %v2401_v47 = vsub.f32 %v18236_v24, %v2400_v32  ;;  %14575 = vmatprep.subr.bf16.mxu1 %v14574_v2  ;;  %v1091_v55 = vand.u32 4294901760, %v1090_v48  ;;  %v2409_v28 = vand.u32 4294901760, %v2408_v19  ;;  %v14586_v19 = vpack.c.bf16 %v17870_v50, %v17861_v22 }
 0x1b3   : > { %14577 = vmatpush3.bf16.msra.mxu1 %v14574_v2  ;;  %12124 = vmatmul.mubr.f32.gmra.mrb[14].mxu0 %v975_v15  ;;  %v22397_v48 = vand.u32 4294901760, %v17769_v0  ;;  %v22398_v31 = vand.u32 4294901760, %v17780_v59  ;;  %v22404_v0 = vand.u32 4294901760, %v17897_v5 }
 0x1b4   : > { %v2402_v9 = vand.u32 4294901760, %v2401_v47  ;;  %v14386_v62 = vpack.c.bf16 %v1091_v55, %v1084_v41  ;;  %12460 = vmatmul.mubr.f32.gmra.mrb[14].mxu1 %v975_v15  ;;  %12158 = vmatprep.mubr.f32.mxu0 %v17728_v58  ;;  %v14398_v55 = vpack.c.bf16 %v17897_v5, %v17884_v29  ;;  %v22396_v41 = vand.u32 4294901760, %v17764_v46 }
 0x1b5   : > { %12494 = vmatprep.mubr.f32.mxu1 %v17728_v58  ;;  %v18280_v47 = vpack.c.bf16 %v22398_v31, %v22397_v48  ;;  %v22399_v15 = vand.u32 4294901760, %v17836_v3  ;;  %v22401_v58 = vand.u32 4294901760, %v17861_v22  ;;  %v22406_v3 = vand.u32 4294901760, %v17944_v53 }
 0x1b6   : > { %14387 = vmatprep.subr.bf16.mxu0 %v14386_v62  ;;  %v14578_v40 = vpack.c.bf16 %v2409_v28, %v2402_v9  ;;  %v22395_v28 = vand.u32 4294901760, %v17748_v60  ;;  %v22400_v9 = vand.u32 4294901760, %v17846_v44  ;;  %v22402_v60 = vand.u32 4294901760, %v17870_v50 }
 0x1b7   : > { %14389 = vmatpush3.bf16.msra.mxu0 %v14386_v62  ;;  %v22407_v22 = vand.u32 4294901760, %v17960_v21  ;;  %v22409_v50 = vand.u32 4294901760, %v17986_v51  ;;  %v22410_v5 = vand.u32 4294901760, %v17999_v10  ;;  %v22411_v48 = vand.u32 4294901760, %v18041_v4 }
 0x1b8   : > { %14579 = vmatprep.subr.bf16.mxu1 %v14578_v40  ;;  %14391 = vmatprep.subr.bf16.mxu0 %v14390_v43  ;;  %v18274_v2 = vpack.c.bf16 %v22396_v41, %v22395_v28  ;;  %v18286_v62 = vpack.c.bf16 %v22400_v9, %v22399_v15  ;;  %v18292_v46 = vpack.c.bf16 %v22402_v60, %v22401_v58  ;;  %v22403_v28 = vand.u32 4294901760, %v17884_v29 }
 0x1b9   : > { %14581 = vmatpush3.bf16.msra.mxu1 %v14578_v40  ;;  %v22405_v40 = vand.u32 4294901760, %v17924_v13  ;;  %v22408_v58 = vand.u32 4294901760, %v17974_v14  ;;  %v18317_v29 = vpack.c.bf16 %v22410_v5, %v22409_v50  ;;  %v22412_v31 = vand.u32 4294901760, %v18049_v52 }
 0x1ba   : > { %v18298_v59 = vpack.c.bf16 %v22404_v0, %v22403_v28  ;;  %12159 = vmatmul.mubr.f32.vlgmr.msra.gmra.mrb[0].mxu0 %v17743_v38  ;;  %14583 = vmatprep.subr.bf16.mxu1 %v14582_v49  ;;  %v22413_v9 = vand.u32 4294901760, %v18054_v11  ;;  %v22414_v60 = vand.u32 4294901760, %v18066_v35  ;;  %v22415_v0 = vand.u32 4294901760, %v18104_v36 }
 0x1bb   : > { %v18304_v41 = vpack.c.bf16 %v22406_v3, %v22405_v40  ;;  %v18311_v44 = vpack.c.bf16 %v22408_v58, %v22407_v22  ;;  %v18323_v15 = vpack.c.bf16 %v22412_v31, %v22411_v48  ;;  %14393 = vmatpush3.bf16.msra.mxu0 %v14390_v43  ;;  %12161 = vmatprep.mubr.f32.mxu0 %v17782_v1  ;;  %v22416_v40 = vand.u32 4294901760, %v18116_v23 }
 0x1bc   : > { %v18330_v28 = vpack.c.bf16 %v22414_v60, %v22413_v9  ;;  %v22417_v22 = vand.u32 4294901760, %v18127_v12  ;;  %v22418_v58 = vand.u32 4294901760, %v18137_v33  ;;  %12495 = vmatmul.mubr.f32.vlgmr.msra.gmra.mrb[0].mxu1 %v17743_v38  ;;  %14395 = vmatprep.subr.bf16.mxu0 %v14394_v8  ;;  %v22419_v43 = vand.u32 4294901760, %v18159_v6 }
 0x1bd   : > { %v18336_v3 = vpack.c.bf16 %v22416_v40, %v22415_v0  ;;  %v22420_v5 = vand.u32 4294901760, %v18170_v57  ;;  %v22421_v31 = vand.u32 4294901760, %v18179_v37  ;;  %v22422_v9 = vand.u32 4294901760, %v18195_v20  ;;  %14585 = vmatpush3.bf16.msra.mxu1 %v14582_v49  ;;  %12497 = vmatprep.mubr.f32.mxu1 %v17782_v1  ;;  %v22439_v49 = vld [vmem:[#allocation72_spill] sm:$0xff] }
 0x1be   : > { %v18342_v50 = vpack.c.bf16 %v22418_v58, %v22417_v22  ;;  %v18357_v0 = vpack.c.bf16 %v1089_v63, %v1082_v7  ;;  %v18360_v40 = vpack.c.bf16 %v2407_v61, %v2400_v32  ;;  %12162 = vmatmul.mubr.f32.gmra.mrb[2].mxu0 %v17790_v25  ;;  %14587 = vmatprep.subr.bf16.mxu1 %v14586_v19  ;;  %v22423_v63 = vld [vmem:[#allocation67_spill] sm:$0xff]  ;;  %v22438_v61 = vld [vmem:[#allocation46_spill] sm:$0xff]  ;;  %v22443_v58 = vld [vmem:[#allocation77_spill] sm:$0xff] }
 0x1bf   : > { %v18349_v48 = vpack.c.bf16 %v22420_v5, %v22419_v43  ;;  %v18355_v60 = vpack.c.bf16 %v22422_v9, %v22421_v31  ;;  %v14590_v22 = vpack.c.bf16 %v17944_v53, %v17924_v13  ;;  %14397 = vmatpush3.bf16.msra.mxu0 %v14394_v8  ;;  %12164 = vmatprep.mubr.f32.mxu0 %v17848_v17  ;;  %v22424_v53 = vld [vmem:[#allocation71_spill] sm:$0xff]  ;;  %v22444_v43 = vld [vmem:[#allocation49_spill] sm:$0xff]  ;;  %v22446_v31 = vld [vmem:[#allocation50_spill] sm:$0xff] }
 0x1c0   : > { %12498 = vmatmul.mubr.f32.gmra.mrb[2].mxu1 %v17790_v25  ;;  %14399 = vmatprep.subr.bf16.mxu0 %v14398_v55  ;;  %v14402_v7 = vpack.c.bf16 %v17974_v14, %v17960_v21  ;;  %v14594_v32 = vpack.c.bf16 %v17999_v10, %v17986_v51  ;;  %v14406_v13 = vpack.c.bf16 %v18049_v52, %v18041_v4  ;;  %v22425_v10 = vld [vmem:[#allocation76_spill] sm:$0xff]  ;;  %v22440_v8 = vld [vmem:[#allocation47_spill] sm:$0xff]  ;;  %v22447_v9 = vld [vmem:[#allocation81_spill] sm:$0xff] }
 0x1c1   : > { %14589 = vmatpush3.bf16.msra.mxu1 %v14586_v19  ;;  %12500 = vmatprep.mubr.f32.mxu1 %v17848_v17  ;;  %v14598_v21 = vpack.c.bf16 %v18066_v35, %v18054_v11  ;;  %v14410_v14 = vpack.c.bf16 %v18116_v23, %v18104_v36  ;;  %v14602_v52 = vpack.c.bf16 %v18137_v33, %v18127_v12  ;;  %v22426_v36 = vld [vmem:[#allocation90_spill] sm:$0xff]  ;;  %v22429_v12 = vld [vmem:[#allocation59_spill] sm:$0xff]  ;;  %v22441_v19 = vld [vmem:[#allocation73_spill] sm:$0xff] }
 0x1c2   : > { %12165 = vmatmul.mubr.f32.gmra.mrb[4].mxu0 %v22423_v63  ;;  %14591 = vmatprep.subr.bf16.mxu1 %v14590_v22  ;;  %v14414_v11 = vpack.c.bf16 %v18170_v57, %v18159_v6  ;;  %v14606_v51 = vpack.c.bf16 %v18195_v20, %v18179_v37  ;;  %v14418_v4 = vpack.c.bf16 %v18225_v54, %v18220_v27  ;;  %v22427_v23 = vld [vmem:[#allocation58_spill] sm:$0xff]  ;;  %v22428_v6 = vld [vmem:[#allocation41_spill] sm:$0xff]  ;;  %v22432_v37 = vld [vmem:[#allocation43_spill] sm:$0xff] }
 0x1c3   : > { %14401 = vmatpush3.bf16.msra.mxu0 %v14398_v55  ;;  %12167 = vmatprep.mubr.f32.mxu0 %v17947_v18  ;;  %v14610_v35 = vpack.c.bf16 %v18243_v56, %v18236_v24  ;;  %v22430_v33 = vld [vmem:[#allocation42_spill] sm:$0xff]  ;;  %v22433_v20 = vld [vmem:[#allocation63_spill] sm:$0xff]  ;;  %v22434_v24 = vld [vmem:[#allocation44_spill] sm:$0xff] }
 0x1c4   : > { %12501 = vmatmul.mubr.f32.gmra.mrb[4].mxu1 %v22423_v63  ;;  %14403 = vmatprep.subr.bf16.mxu0 %v14402_v7  ;;  %v22431_v57 = vld [vmem:[#allocation62_spill] sm:$0xff]  ;;  %v22436_v54 = vld [vmem:[#allocation45_spill] sm:$0xff]  ;;  %v22442_v55 = vld [vmem:[#allocation48_spill] sm:$0xff] }
 0x1c5   : > { %14593 = vmatpush3.bf16.msra.mxu1 %v14590_v22  ;;  %12503 = vmatprep.mubr.f32.mxu1 %v17947_v18  ;;  %v22435_v27 = vld [vmem:[#allocation66_spill] sm:$0xff]  ;;  %v22437_v56 = vld [vmem:[#allocation69_spill] sm:$0xff]  ;;  %v22445_v5 = vld [vmem:[#allocation79_spill] sm:$0xff] }
 0x1c6   : > { %12168 = vmatmul.mubr.f32.gmra.mrb[6].mxu0 %v22424_v53  ;;  %14595 = vmatprep.subr.bf16.mxu1 %v14594_v32  ;;  %v22448_v22 = vld [vmem:[#allocation51_spill] sm:$0xff] }
 0x1c7   : > { %14405 = vmatpush3.bf16.msra.mxu0 %v14402_v7  ;;  %12170 = vmatprep.mubr.f32.mxu0 %v22425_v10  ;;  %v22449_v7 = vld [vmem:[#allocation83_spill] sm:$0xff] }
 0x1c8   : > { %12504 = vmatmul.mubr.f32.gmra.mrb[6].mxu1 %v22424_v53  ;;  %14407 = vmatprep.subr.bf16.mxu0 %v14406_v13 }
 0x1c9   : > { %14597 = vmatpush3.bf16.msra.mxu1 %v14594_v32  ;;  %12506 = vmatprep.mubr.f32.mxu1 %v22425_v10  ;;  %v22450_v32 = vld [vmem:[#allocation52_spill] sm:$0xff] }
 0x1ca   : > { %12171 = vmatmul.mubr.f32.gmra.mrb[8].mxu0 %v18036_v39  ;;  %14599 = vmatprep.subr.bf16.mxu1 %v14598_v21 }
 0x1cb   : > { %14409 = vmatpush3.bf16.msra.mxu0 %v14406_v13  ;;  %12173 = vmatprep.mubr.f32.mxu0 %v18073_v26  ;;  %v22451_v13 = vld [vmem:[#allocation85_spill] sm:$0xff] }
 0x1cc   : > { %12507 = vmatmul.mubr.f32.gmra.mrb[8].mxu1 %v18036_v39  ;;  %14411 = vmatprep.subr.bf16.mxu0 %v14410_v14 }
 0x1cd   : > { %14601 = vmatpush3.bf16.msra.mxu1 %v14598_v21  ;;  %12509 = vmatprep.mubr.f32.mxu1 %v18073_v26  ;;  %v22452_v21 = vld [vmem:[#allocation53_spill] sm:$0xff] }
 0x1ce   : > { %12174 = vmatmul.mubr.f32.gmra.mrb[10].mxu0 %v18094_v34  ;;  %14603 = vmatprep.subr.bf16.mxu1 %v14602_v52 }
 0x1cf   : > { %14413 = vmatpush3.bf16.msra.mxu0 %v14410_v14  ;;  %12176 = vmatprep.mubr.f32.mxu0 %v18142_v45  ;;  %v22453_v14 = vld [vmem:[#allocation86_spill] sm:$0xff] }
 0x1d0   : > { %12510 = vmatmul.mubr.f32.gmra.mrb[10].mxu1 %v18094_v34  ;;  %14415 = vmatprep.subr.bf16.mxu0 %v14414_v11 }
 0x1d1   : > { %14605 = vmatpush3.bf16.msra.mxu1 %v14602_v52  ;;  %12512 = vmatprep.mubr.f32.mxu1 %v18142_v45  ;;  %v22454_v52 = vld [vmem:[#allocation55_spill] sm:$0xff] }
 0x1d2   : > { %12177 = vmatmul.mubr.f32.gmra.mrb[12].mxu0 %v18148_v42  ;;  %14607 = vmatprep.subr.bf16.mxu1 %v14606_v51 }
 0x1d3   : > { %14417 = vmatpush3.bf16.msra.mxu0 %v14414_v11  ;;  %12179 = vmatprep.mubr.f32.mxu0 %v18203_v30  ;;  %v22455_v11 = vld [vmem:[#allocation89_spill] sm:$0xff] }
 0x1d4   : > { %12513 = vmatmul.mubr.f32.gmra.mrb[12].mxu1 %v18148_v42  ;;  %14419 = vmatprep.subr.bf16.mxu0 %v14418_v4 }
 0x1d5   : > { %14609 = vmatpush3.bf16.msra.mxu1 %v14606_v51  ;;  %12515 = vmatprep.mubr.f32.mxu1 %v18203_v30  ;;  %v22456_v51 = vld [vmem:[#allocation56_spill] sm:$0xff] }
 0x1d6   : > { %12180 = vmatmul.mubr.f32.gmra.mrb[14].mxu0 %v22426_v36  ;;  %14611 = vmatprep.subr.bf16.mxu1 %v14610_v35 }
 0x1d7   : > { %14421 = vmatpush3.bf16.msra.mxu0 %v14418_v4  ;;  %12214 = vmatprep.mubr.f32.mxu0 %v22427_v23  ;;  %v22457_v4 = vld [vmem:[#allocation57_spill] sm:$0xff] }
 0x1d8   : > { %12516 = vmatmul.mubr.f32.gmra.mrb[14].mxu1 %v22426_v36  ;;  %14423 = vmatprep.subr.bf16.mxu0 %v22428_v6 }
 0x1d9   : > { %14613 = vmatpush3.bf16.msra.mxu1 %v14610_v35  ;;  %12550 = vmatprep.mubr.f32.mxu1 %v22427_v23  ;;  %v22458_v35 = vld [vmem:[#allocation60_spill] sm:$0xff]  ;;  %v22459_v23 = vld [vmem:[#allocation61_spill] sm:$0xff] }
 0x1da   : > { %12215 = vmatmul.mubr.f32.vlgmr.msra.gmra.mrb[0].mxu0 %v22429_v12  ;;  %14615 = vmatprep.subr.bf16.mxu1 %v22430_v33 }
 0x1db   : > { %14425 = vmatpush3.bf16.msra.mxu0 %v22428_v6  ;;  %12217 = vmatprep.mubr.f32.mxu0 %v22431_v57 }
 0x1dc   : > { %12551 = vmatmul.mubr.f32.vlgmr.msra.gmra.mrb[0].mxu1 %v22429_v12  ;;  %14427 = vmatprep.subr.bf16.mxu0 %v22432_v37  ;;  %v22460_v12 = vld [vmem:[#allocation64_spill] sm:$0xff] }
 0x1dd   : > { %14617 = vmatpush3.bf16.msra.mxu1 %v22430_v33  ;;  %12553 = vmatprep.mubr.f32.mxu1 %v22431_v57  ;;  %v22462_v57 = vld [vmem:[#allocation68_spill] sm:$0xff] }
 0x1de   : > { %12218 = vmatmul.mubr.f32.gmra.mrb[2].mxu0 %v22433_v20  ;;  %14619 = vmatprep.subr.bf16.mxu1 %v22434_v24 }
 0x1df   : > { %14429 = vmatpush3.bf16.msra.mxu0 %v22432_v37  ;;  %12220 = vmatprep.mubr.f32.mxu0 %v22435_v27 }
 0x1e0   : > { %12554 = vmatmul.mubr.f32.gmra.mrb[2].mxu1 %v22433_v20  ;;  %14431 = vmatprep.subr.bf16.mxu0 %v22436_v54 }
 0x1e1   : > { %14621 = vmatpush3.bf16.msra.mxu1 %v22434_v24  ;;  %12556 = vmatprep.mubr.f32.mxu1 %v22435_v27 }
 0x1e2   : > { %12221 = vmatmul.mubr.f32.gmra.mrb[4].mxu0 %v22437_v56  ;;  %14623 = vmatprep.subr.bf16.mxu1 %v22438_v61 }
 0x1e3   : > { %14433 = vmatpush3.bf16.msra.mxu0 %v22436_v54  ;;  %12223 = vmatprep.mubr.f32.mxu0 %v22439_v49 }
 0x1e4   : > { %12557 = vmatmul.mubr.f32.gmra.mrb[4].mxu1 %v22437_v56  ;;  %14435 = vmatprep.subr.bf16.mxu0 %v22440_v8 }
 0x1e5   : > { %14625 = vmatpush3.bf16.msra.mxu1 %v22438_v61  ;;  %12559 = vmatprep.mubr.f32.mxu1 %v22439_v49 }
 0x1e6   : > { %12224 = vmatmul.mubr.f32.gmra.mrb[6].mxu0 %v22441_v19  ;;  %14627 = vmatprep.subr.bf16.mxu1 %v22442_v55 }
 0x1e7   : > { %14437 = vmatpush3.bf16.msra.mxu0 %v22440_v8  ;;  %12226 = vmatprep.mubr.f32.mxu0 %v22443_v58 }
 0x1e8   : > { %12560 = vmatmul.mubr.f32.gmra.mrb[6].mxu1 %v22441_v19  ;;  %14439 = vmatprep.subr.bf16.mxu0 %v22444_v43 }
 0x1e9   : > { %14629 = vmatpush3.bf16.msra.mxu1 %v22442_v55  ;;  %12562 = vmatprep.mubr.f32.mxu1 %v22443_v58 }
 0x1ea   : > { %12227 = vmatmul.mubr.f32.gmra.mrb[8].mxu0 %v22445_v5  ;;  %14631 = vmatprep.subr.bf16.mxu1 %v22446_v31 }
 0x1eb   : > { %14441 = vmatpush3.bf16.msra.mxu0 %v22444_v43  ;;  %12229 = vmatprep.mubr.f32.mxu0 %v22447_v9 }
 0x1ec   : > { %12563 = vmatmul.mubr.f32.gmra.mrb[8].mxu1 %v22445_v5  ;;  %14443 = vmatprep.subr.bf16.mxu0 %v22448_v22 }
 0x1ed   : > { %14633 = vmatpush3.bf16.msra.mxu1 %v22446_v31  ;;  %12565 = vmatprep.mubr.f32.mxu1 %v22447_v9 }
 0x1ee   : > { %12230 = vmatmul.mubr.f32.gmra.mrb[10].mxu0 %v22449_v7  ;;  %14635 = vmatprep.subr.bf16.mxu1 %v22450_v32 }
 0x1ef   : > { %14445 = vmatpush3.bf16.msra.mxu0 %v22448_v22  ;;  %12232 = vmatprep.mubr.f32.mxu0 %v22451_v13 }
 0x1f0   : > { %12566 = vmatmul.mubr.f32.gmra.mrb[10].mxu1 %v22449_v7  ;;  %14447 = vmatprep.subr.bf16.mxu0 %v22452_v21 }
 0x1f1   : > { %14637 = vmatpush3.bf16.msra.mxu1 %v22450_v32  ;;  %12568 = vmatprep.mubr.f32.mxu1 %v22451_v13 }
 0x1f2   : > { %12233 = vmatmul.mubr.f32.gmra.mrb[12].mxu0 %v22453_v14  ;;  %14639 = vmatprep.subr.bf16.mxu1 %v22454_v52 }
 0x1f3   : > { %14449 = vmatpush3.bf16.msra.mxu0 %v22452_v21  ;;  %12235 = vmatprep.mubr.f32.mxu0 %v22455_v11 }
 0x1f4   : > { %12569 = vmatmul.mubr.f32.gmra.mrb[12].mxu1 %v22453_v14  ;;  %14451 = vmatprep.subr.bf16.mxu0 %v22456_v51 }
 0x1f5   : > { %14641 = vmatpush3.bf16.msra.mxu1 %v22454_v52  ;;  %12571 = vmatprep.mubr.f32.mxu1 %v22455_v11 }
 0x1f6   : > { %12236 = vmatmul.mubr.f32.gmra.mrb[14].mxu0 %v18231_v16  ;;  %14643 = vmatprep.subr.bf16.mxu1 %v22457_v4 }
 0x1f7   : > { %14453 = vmatpush3.bf16.msra.mxu0 %v22456_v51  ;;  %12270 = vmatprep.mubr.f32.mxu0 %v22458_v35 }
 0x1f8   : > { %12572 = vmatmul.mubr.f32.gmra.mrb[14].mxu1 %v18231_v16  ;;  %14455 = vmatprep.subr.bf16.mxu0 %v18274_v2  ;;  %v22461_v16 = vld [vmem:[#allocation65_spill] sm:$0xff] }
 0x1f9   : > { %14645 = vmatpush3.bf16.msra.mxu1 %v22457_v4  ;;  %12606 = vmatprep.mubr.f32.mxu1 %v22458_v35 }
 0x1fa   : > { %12271 = vmatmul.mubr.f32.vlgmr.msra.gmra.mrb[0].mxu0 %v22459_v23  ;;  %14647 = vmatprep.subr.bf16.mxu1 %v18280_v47 }
 0x1fb   : > { %14457 = vmatpush3.bf16.msra.mxu0 %v18274_v2  ;;  %12273 = vmatprep.mubr.f32.mxu0 %v22460_v12  ;;  %v22463_v2 = vld [vmem:[#allocation70_spill] sm:$0xff] }
 0x1fc   : > { %12607 = vmatmul.mubr.f32.vlgmr.msra.gmra.mrb[0].mxu1 %v22459_v23  ;;  %14459 = vmatprep.subr.bf16.mxu0 %v18286_v62 }
 0x1fd   : > { %14649 = vmatpush3.bf16.msra.mxu1 %v18280_v47  ;;  %12609 = vmatprep.mubr.f32.mxu1 %v22460_v12  ;;  %v22464_v47 = vld [vmem:[#allocation74_spill] sm:$0xff] }
 0x1fe   : > { %12274 = vmatmul.mubr.f32.gmra.mrb[2].mxu0 %v22461_v16  ;;  %14651 = vmatprep.subr.bf16.mxu1 %v18292_v46 }
 0x1ff   : > { %14461 = vmatpush3.bf16.msra.mxu0 %v18286_v62  ;;  %12276 = vmatprep.mubr.f32.mxu0 %v22462_v57  ;;  %v22465_v62 = vld [vmem:[#allocation75_spill] sm:$0xff] }
 0x200   : > { %12610 = vmatmul.mubr.f32.gmra.mrb[2].mxu1 %v22461_v16  ;;  %14463 = vmatprep.subr.bf16.mxu0 %v18298_v59 }
 0x201   : > { %14653 = vmatpush3.bf16.msra.mxu1 %v18292_v46  ;;  %12612 = vmatprep.mubr.f32.mxu1 %v22462_v57  ;;  %v22466_v46 = vld [vmem:[#allocation78_spill] sm:$0xff] }
 0x202   : > { %12277 = vmatmul.mubr.f32.gmra.mrb[4].mxu0 %v22463_v2  ;;  %14655 = vmatprep.subr.bf16.mxu1 %v18304_v41 }
 0x203   : > { %14465 = vmatpush3.bf16.msra.mxu0 %v18298_v59  ;;  %12279 = vmatprep.mubr.f32.mxu0 %v22464_v47  ;;  %v22467_v59 = vld [vmem:[#allocation80_spill] sm:$0xff] }
 0x204   : > { %12613 = vmatmul.mubr.f32.gmra.mrb[4].mxu1 %v22463_v2  ;;  %14467 = vmatprep.subr.bf16.mxu0 %v18311_v44 }
 0x205   : > { %14657 = vmatpush3.bf16.msra.mxu1 %v18304_v41  ;;  %12615 = vmatprep.mubr.f32.mxu1 %v22464_v47  ;;  %v22468_v41 = vld [vmem:[#allocation82_spill] sm:$0xff] }
 0x206   : > { %12280 = vmatmul.mubr.f32.gmra.mrb[6].mxu0 %v22465_v62  ;;  %14659 = vmatprep.subr.bf16.mxu1 %v18317_v29 }
 0x207   : > { %14469 = vmatpush3.bf16.msra.mxu0 %v18311_v44  ;;  %12282 = vmatprep.mubr.f32.mxu0 %v22466_v46  ;;  %v22469_v44 = vld [vmem:[#allocation84_spill] sm:$0xff] }
 0x208   : > { %12616 = vmatmul.mubr.f32.gmra.mrb[6].mxu1 %v22465_v62  ;;  %14471 = vmatprep.subr.bf16.mxu0 %v18323_v15 }
 0x209   : > { %14661 = vmatpush3.bf16.msra.mxu1 %v18317_v29  ;;  %12618 = vmatprep.mubr.f32.mxu1 %v22466_v46  ;;  %v22470_v29 = vld [vmem:[#allocation87_spill] sm:$0xff] }
 0x20a   : > { %12283 = vmatmul.mubr.f32.gmra.mrb[8].mxu0 %v22467_v59  ;;  %14663 = vmatprep.subr.bf16.mxu1 %v18330_v28 }
 0x20b   : > { %14473 = vmatpush3.bf16.msra.mxu0 %v18323_v15  ;;  %12285 = vmatprep.mubr.f32.mxu0 %v22468_v41  ;;  %v22471_v15 = vld [vmem:[#allocation88_spill] sm:$0xff] }
 0x20c   : > { %12619 = vmatmul.mubr.f32.gmra.mrb[8].mxu1 %v22467_v59  ;;  %14475 = vmatprep.subr.bf16.mxu0 %v18336_v3 }
 0x20d   : > { %14665 = vmatpush3.bf16.msra.mxu1 %v18330_v28  ;;  %12621 = vmatprep.mubr.f32.mxu1 %v22468_v41  ;;  %v22472_v28 = vld [vmem:[#allocation91_spill] sm:$0xff] }
 0x20e   : > { %12286 = vmatmul.mubr.f32.gmra.mrb[10].mxu0 %v22469_v44  ;;  %14667 = vmatprep.subr.bf16.mxu1 %v18342_v50 }
 0x20f   : > { %14477 = vmatpush3.bf16.msra.mxu0 %v18336_v3  ;;  %12288 = vmatprep.mubr.f32.mxu0 %v22470_v29  ;;  %v22473_v3 = vld [vmem:[#allocation92_spill] sm:$0xff] }
 0x210   : > { %12622 = vmatmul.mubr.f32.gmra.mrb[10].mxu1 %v22469_v44  ;;  %14479 = vmatprep.subr.bf16.mxu0 %v18349_v48 }
 0x211   : > { %14669 = vmatpush3.bf16.msra.mxu1 %v18342_v50  ;;  %12624 = vmatprep.mubr.f32.mxu1 %v22470_v29  ;;  %v22474_v50 = vld [vmem:[#allocation54_spill] sm:$0xff] }
 0x212   : > { %12289 = vmatmul.mubr.f32.gmra.mrb[12].mxu0 %v22471_v15  ;;  %14671 = vmatprep.subr.bf16.mxu1 %v18355_v60 }
 0x213   : > { %14481 = vmatpush3.bf16.msra.mxu0 %v18349_v48  ;;  %12291 = vmatprep.mubr.f32.mxu0 %v22472_v28 }
 0x214   : > { %12625 = vmatmul.mubr.f32.gmra.mrb[12].mxu1 %v22471_v15  ;;  %14483 = vmatprep.subr.bf16.mxu0 %v18357_v0 }
 0x215   : > { %14673 = vmatpush3.bf16.msra.mxu1 %v18355_v60  ;;  %12627 = vmatprep.mubr.f32.mxu1 %v22472_v28 }
 0x216   : > { %12292 = vmatmul.mubr.f32.gmra.mrb[14].mxu0 %v22473_v3  ;;  %14675 = vmatprep.subr.bf16.mxu1 %v18360_v40 }
 0x217   : > { %14485 = vmatpush3.bf16.msra.mxu0 %v18357_v0  ;;  %12326 = vmatprep.mubr.f32.mxu0 %v22474_v50 }
 0x218   : > { %12628 = vmatmul.mubr.f32.gmra.mrb[14].mxu1 %v22473_v3  ;;  %14487 = vmatprep.subr.bf16.mxu0 %v22428_v6 }
 0x219   : > { %14677 = vmatpush3.bf16.msra.mxu1 %v18360_v40  ;;  %12662 = vmatprep.mubr.f32.mxu1 %v22474_v50 }
 0x21a   : > { %12327 = vmatmul.mubr.f32.vlgmr.msra.gmra.mrb[0].mxu0 %v17743_v38  ;;  %14679 = vmatprep.subr.bf16.mxu1 %v22430_v33 }
 0x21b   : > { %14489 = vmatpush3.bf16.msra.mxu0 %v22428_v6  ;;  %12329 = vmatprep.mubr.f32.mxu0 %v17782_v1 }
 0x21c   : > { %12663 = vmatmul.mubr.f32.vlgmr.msra.gmra.mrb[0].mxu1 %v17743_v38  ;;  %14491 = vmatprep.subr.bf16.mxu0 %v22432_v37 }
 0x21d   : > { %14681 = vmatpush3.bf16.msra.mxu1 %v22430_v33  ;;  %12665 = vmatprep.mubr.f32.mxu1 %v17782_v1 }
 0x21e   : > { %12330 = vmatmul.mubr.f32.gmra.mrb[2].mxu0 %v17790_v25  ;;  %14683 = vmatprep.subr.bf16.mxu1 %v22434_v24 }
 0x21f   : > { %14493 = vmatpush3.bf16.msra.mxu0 %v22432_v37  ;;  %12332 = vmatprep.mubr.f32.mxu0 %v17848_v17 }
 0x220   : > { %12666 = vmatmul.mubr.f32.gmra.mrb[2].mxu1 %v17790_v25  ;;  %14495 = vmatprep.subr.bf16.mxu0 %v22436_v54 }
 0x221   : > { %14685 = vmatpush3.bf16.msra.mxu1 %v22434_v24  ;;  %12668 = vmatprep.mubr.f32.mxu1 %v17848_v17 }
 0x222   : > { %12333 = vmatmul.mubr.f32.gmra.mrb[4].mxu0 %v22423_v63  ;;  %14687 = vmatprep.subr.bf16.mxu1 %v22438_v61 }
 0x223   : > { %14497 = vmatpush3.bf16.msra.mxu0 %v22436_v54  ;;  %12335 = vmatprep.mubr.f32.mxu0 %v17947_v18 }
 0x224   : > { %12669 = vmatmul.mubr.f32.gmra.mrb[4].mxu1 %v22423_v63  ;;  %14499 = vmatprep.subr.bf16.mxu0 %v22440_v8 }
 0x225   : > { %14689 = vmatpush3.bf16.msra.mxu1 %v22438_v61  ;;  %12671 = vmatprep.mubr.f32.mxu1 %v17947_v18 }
 0x226   : > { %12336 = vmatmul.mubr.f32.gmra.mrb[6].mxu0 %v22424_v53  ;;  %14691 = vmatprep.subr.bf16.mxu1 %v22442_v55 }
 0x227   : > { %14501 = vmatpush3.bf16.msra.mxu0 %v22440_v8  ;;  %12338 = vmatprep.mubr.f32.mxu0 %v22425_v10 }
 0x228   : > { %12672 = vmatmul.mubr.f32.gmra.mrb[6].mxu1 %v22424_v53  ;;  %14503 = vmatprep.subr.bf16.mxu0 %v22444_v43 }
 0x229   : > { %14693 = vmatpush3.bf16.msra.mxu1 %v22442_v55  ;;  %12674 = vmatprep.mubr.f32.mxu1 %v22425_v10 }
 0x22a   : > { %12339 = vmatmul.mubr.f32.gmra.mrb[8].mxu0 %v18036_v39  ;;  %14695 = vmatprep.subr.bf16.mxu1 %v22446_v31 }
 0x22b   : > { %14505 = vmatpush3.bf16.msra.mxu0 %v22444_v43  ;;  %12341 = vmatprep.mubr.f32.mxu0 %v18073_v26 }
 0x22c   : > { %12675 = vmatmul.mubr.f32.gmra.mrb[8].mxu1 %v18036_v39  ;;  %14507 = vmatprep.subr.bf16.mxu0 %v22448_v22 }
 0x22d   : > { %14697 = vmatpush3.bf16.msra.mxu1 %v22446_v31  ;;  %12677 = vmatprep.mubr.f32.mxu1 %v18073_v26 }
 0x22e   : > { %12342 = vmatmul.mubr.f32.gmra.mrb[10].mxu0 %v18094_v34  ;;  %14699 = vmatprep.subr.bf16.mxu1 %v22450_v32 }
 0x22f   : > { %14509 = vmatpush3.bf16.msra.mxu0 %v22448_v22  ;;  %12344 = vmatprep.mubr.f32.mxu0 %v18142_v45 }
 0x230   : > { %12678 = vmatmul.mubr.f32.gmra.mrb[10].mxu1 %v18094_v34  ;;  %14511 = vmatprep.subr.bf16.mxu0 %v22452_v21 }
 0x231   : > { %14701 = vmatpush3.bf16.msra.mxu1 %v22450_v32  ;;  %12680 = vmatprep.mubr.f32.mxu1 %v18142_v45 }
 0x232   : > { %12345 = vmatmul.mubr.f32.gmra.mrb[12].mxu0 %v18148_v42  ;;  %14703 = vmatprep.subr.bf16.mxu1 %v22454_v52 }
 0x233   : > { %14513 = vmatpush3.bf16.msra.mxu0 %v22452_v21  ;;  %12347 = vmatprep.mubr.f32.mxu0 %v18203_v30 }
 0x234   : > { %12681 = vmatmul.mubr.f32.gmra.mrb[12].mxu1 %v18148_v42  ;;  %14515 = vmatprep.subr.bf16.mxu0 %v22456_v51 }
 0x235   : > { %14705 = vmatpush3.bf16.msra.mxu1 %v22454_v52  ;;  %12683 = vmatprep.mubr.f32.mxu1 %v18203_v30 }
 0x236   : > { %12348 = vmatmul.mubr.f32.gmra.mrb[14].mxu0 %v22426_v36  ;;  %14707 = vmatprep.subr.bf16.mxu1 %v22457_v4 }
 0x237   : > { %14517 = vmatpush3.bf16.msra.mxu0 %v22456_v51  ;;  %12382 = vmatprep.mubr.f32.mxu0 %v22474_v50 }
 0x238   : > { %12684 = vmatmul.mubr.f32.gmra.mrb[14].mxu1 %v22426_v36 }
 0x239   : > { %14709 = vmatpush3.bf16.msra.mxu1 %v22457_v4  ;;  %12718 = vmatprep.mubr.f32.mxu1 %v22474_v50 }
 0x23a   : > { %12383 = vmatmul.mubr.f32.vlgmr.msra.gmra.mrb[0].mxu0 %v17743_v38 }
 0x23b   : > { %12385 = vmatprep.mubr.f32.mxu0 %v17782_v1 }
 0x23c   : > { %12719 = vmatmul.mubr.f32.vlgmr.msra.gmra.mrb[0].mxu1 %v17743_v38 }
 0x23d   : > { %12721 = vmatprep.mubr.f32.mxu1 %v17782_v1 }
 0x23e   : > { %12386 = vmatmul.mubr.f32.gmra.mrb[2].mxu0 %v17790_v25 }
 0x23f   : > { %12388 = vmatprep.mubr.f32.mxu0 %v17848_v17 }
 0x240   : > { %12722 = vmatmul.mubr.f32.gmra.mrb[2].mxu1 %v17790_v25 }
 0x241   : > { %12724 = vmatprep.mubr.f32.mxu1 %v17848_v17 }
 0x242   : > { %12389 = vmatmul.mubr.f32.gmra.mrb[4].mxu0 %v22423_v63 }
 0x243   : > { %12391 = vmatprep.mubr.f32.mxu0 %v17947_v18 }
 0x244   : > { %12725 = vmatmul.mubr.f32.gmra.mrb[4].mxu1 %v22423_v63 }
 0x245   : > { %12727 = vmatprep.mubr.f32.mxu1 %v17947_v18 }
 0x246   : > { %12392 = vmatmul.mubr.f32.gmra.mrb[6].mxu0 %v22424_v53 }
 0x247   : > { %12394 = vmatprep.mubr.f32.mxu0 %v22425_v10 }
 0x248   : > { %12728 = vmatmul.mubr.f32.gmra.mrb[6].mxu1 %v22424_v53 }
 0x249   : > { %12730 = vmatprep.mubr.f32.mxu1 %v22425_v10 }
 0x24a   : > { %12395 = vmatmul.mubr.f32.gmra.mrb[8].mxu0 %v18036_v39 }
 0x24b   : > { %12397 = vmatprep.mubr.f32.mxu0 %v18073_v26 }
 0x24c   : > { %12731 = vmatmul.mubr.f32.gmra.mrb[8].mxu1 %v18036_v39 }
 0x24d   : > { %12733 = vmatprep.mubr.f32.mxu1 %v18073_v26 }
 0x24e   : > { %12398 = vmatmul.mubr.f32.gmra.mrb[10].mxu0 %v18094_v34 }
 0x24f   : > { %12400 = vmatprep.mubr.f32.mxu0 %v18142_v45 }
 0x250   : > { %12734 = vmatmul.mubr.f32.gmra.mrb[10].mxu1 %v18094_v34 }
 0x251   : > { %12736 = vmatprep.mubr.f32.mxu1 %v18142_v45 }
 0x252   : > { %12401 = vmatmul.mubr.f32.gmra.mrb[12].mxu0 %v18148_v42 }
 0x253   : > { %12403 = vmatprep.mubr.f32.mxu0 %v18203_v30 }
 0x254   : > { %12737 = vmatmul.mubr.f32.gmra.mrb[12].mxu1 %v18148_v42 }
 0x255   : > { %12739 = vmatprep.mubr.f32.mxu1 %v18203_v30 }
 0x256   : > { %12404 = vmatmul.mubr.f32.gmra.mrb[14].mxu0 %v22426_v36 }
 0x258   : > { %12740 = vmatmul.mubr.f32.gmra.mrb[14].mxu1 %v22426_v36 }
 0x30d   : > { %v12384_v38 = vpop.f32.mrb[0].mxu0 }
 0x30e   : > { %2027 = vst [vmem:[#allocation2 + $0x8] sm:$0xff] %v12384_v38  ;;  %v1932_v1 = vpop.f32.mrb[1].mxu0 }
 0x30f   : > { %v12720_v25 = vpop.f32.mrb[0].mxu1  ;;  %2026 = vst [vmem:[#allocation2] sm:$0xff] %v1932_v1 }
 0x310   : > { %3345 = vst [vmem:[#allocation3 + $0x8] sm:$0xff] %v12720_v25  ;;  %v3250_v17 = vpop.f32.mrb[1].mxu1 }
 0x311   : > { %3344 = vst [vmem:[#allocation3] sm:$0xff] %v3250_v17  ;;  %v12387_v18 = vpop.f32.mrb[2].mxu0 }
 0x312   : > { %2029 = vst [vmem:[#allocation2 + $0x18] sm:$0xff] %v12387_v18  ;;  %v1944_v39 = vpop.f32.mrb[3].mxu0 }
 0x313   : > { %v12723_v26 = vpop.f32.mrb[2].mxu1  ;;  %2028 = vst [vmem:[#allocation2 + $0x10] sm:$0xff] %v1944_v39 }
 0x314   : > { %3347 = vst [vmem:[#allocation3 + $0x18] sm:$0xff] %v12723_v26  ;;  %v3262_v34 = vpop.f32.mrb[3].mxu1 }
 0x315   : > { %3346 = vst [vmem:[#allocation3 + $0x10] sm:$0xff] %v3262_v34  ;;  %v12390_v45 = vpop.f32.mrb[4].mxu0 }
 0x316   : > { %2031 = vst [vmem:[#allocation2 + $0x28] sm:$0xff] %v12390_v45  ;;  %v1956_v42 = vpop.f32.mrb[5].mxu0 }
 0x317   : > { %v12726_v30 = vpop.f32.mrb[4].mxu1  ;;  %2030 = vst [vmem:[#allocation2 + $0x20] sm:$0xff] %v1956_v42 }
 0x318   : > { %3349 = vst [vmem:[#allocation3 + $0x28] sm:$0xff] %v12726_v30  ;;  %v3274_v48 = vpop.f32.mrb[5].mxu1 }
 0x319   : > { %3348 = vst [vmem:[#allocation3 + $0x20] sm:$0xff] %v3274_v48  ;;  %v12393_v60 = vpop.f32.mrb[6].mxu0 }
 0x31a   : > { %2033 = vst [vmem:[#allocation2 + $0x38] sm:$0xff] %v12393_v60  ;;  %v1968_v0 = vpop.f32.mrb[7].mxu0 }
 0x31b   : > { %v12729_v40 = vpop.f32.mrb[6].mxu1  ;;  %2032 = vst [vmem:[#allocation2 + $0x30] sm:$0xff] %v1968_v0 }
 0x31c   : > { %3351 = vst [vmem:[#allocation3 + $0x38] sm:$0xff] %v12729_v40  ;;  %v3286_v63 = vpop.f32.mrb[7].mxu1 }
 0x31d   : > { %3350 = vst [vmem:[#allocation3 + $0x30] sm:$0xff] %v3286_v63  ;;  %v12396_v53 = vpop.f32.mrb[8].mxu0 }
 0x31e   : > { %2035 = vst [vmem:[#allocation2 + $0x48] sm:$0xff] %v12396_v53  ;;  %v1980_v10 = vpop.f32.mrb[9].mxu0 }
 0x31f   : > { %v12732_v36 = vpop.f32.mrb[8].mxu1  ;;  %2034 = vst [vmem:[#allocation2 + $0x40] sm:$0xff] %v1980_v10 }
 0x320   : > { %3353 = vst [vmem:[#allocation3 + $0x48] sm:$0xff] %v12732_v36  ;;  %v3298_v6 = vpop.f32.mrb[9].mxu1 }
 0x321   : > { %3352 = vst [vmem:[#allocation3 + $0x40] sm:$0xff] %v3298_v6  ;;  %v12399_v33 = vpop.f32.mrb[10].mxu0 }
 0x322   : > { %2037 = vst [vmem:[#allocation2 + $0x58] sm:$0xff] %v12399_v33  ;;  %v1992_v37 = vpop.f32.mrb[11].mxu0 }
 0x323   : > { %v12735_v20 = vpop.f32.mrb[10].mxu1  ;;  %2036 = vst [vmem:[#allocation2 + $0x50] sm:$0xff] %v1992_v37 }
 0x324   : > { %3355 = vst [vmem:[#allocation3 + $0x58] sm:$0xff] %v12735_v20  ;;  %v3310_v24 = vpop.f32.mrb[11].mxu1 }
 0x325   : > { %3354 = vst [vmem:[#allocation3 + $0x50] sm:$0xff] %v3310_v24  ;;  %v12402_v27 = vpop.f32.mrb[12].mxu0 }
 0x326   : > { %2039 = vst [vmem:[#allocation2 + $0x68] sm:$0xff] %v12402_v27  ;;  %v2004_v54 = vpop.f32.mrb[13].mxu0 }
 0x327   : > { %v12738_v56 = vpop.f32.mrb[12].mxu1  ;;  %2038 = vst [vmem:[#allocation2 + $0x60] sm:$0xff] %v2004_v54 }
 0x328   : > { %3357 = vst [vmem:[#allocation3 + $0x68] sm:$0xff] %v12738_v56  ;;  %v3322_v61 = vpop.f32.mrb[13].mxu1 }
 0x329   : > { %3356 = vst [vmem:[#allocation3 + $0x60] sm:$0xff] %v3322_v61  ;;  %v12405_v49 = vpop.f32.mrb[14].mxu0 }
 0x32a   : > { %2041 = vst [vmem:[#allocation2 + $0x78] sm:$0xff] %v12405_v49  ;;  %v2016_v8 = vpop.f32.mrb[15].mxu0 }
 0x32b   : > { %v12741_v19 = vpop.f32.mrb[14].mxu1  ;;  %2040 = vst [vmem:[#allocation2 + $0x70] sm:$0xff] %v2016_v8 }
 0x32c   : > { %3359 = vst [vmem:[#allocation3 + $0x78] sm:$0xff] %v12741_v19  ;;  %v3334_v55 = vpop.f32.mrb[15].mxu1 }
 0x32d   : > { %3358 = vst [vmem:[#allocation3 + $0x70] sm:$0xff] %v3334_v55 }
 0x32e PF: > { %v3370_v58 = vld [vmem:[#allocation10] sm:$0xff]  ;;  %s22475_s17 = sld [smem:[#allocation34_spill]]  ;;  %v3371_v43 = vld [vmem:[#allocation10 + $0x8] sm:$0xff]  ;;  %v3372_v5 = vld [vmem:[#allocation10 + $0x10] sm:$0xff]  ;;  %vm4364_vm0 = vcmask 523264   ;;  %s17027_s16 = smov 64  }
 0x32f   : > { %v3387_v31 = vand.u32 4294901760, %v3370_v58  ;;  %v3390_v9 = vand.u32 4294901760, %v3371_v43  ;;  %v3373_v22 = vld [vmem:[#allocation10 + $0x18] sm:$0xff]  ;;  %v3393_v7 = vand.u32 4294901760, %v3372_v5  ;;  %v3374_v32 = vld [vmem:[#allocation10 + $0x20] sm:$0xff]  ;;  %v3375_v13 = vld [vmem:[#allocation10 + $0x28] sm:$0xff] }
 0x330   : > { %v3396_v21 = vand.u32 4294901760, %v3373_v22  ;;  %v3399_v52 = vand.u32 4294901760, %v3374_v32  ;;  %v3402_v11 = vand.u32 4294901760, %v3375_v13  ;;  %v18642_v4 = vld [vmem:[#allocation10 + $0x30] sm:$0xff]  ;;  %v18644_v35 = vld [vmem:[#allocation10 + $0x38] sm:$0xff]  ;;  %v18649_v12 = vld [vmem:[#allocation10 + $0x40] sm:$0xff] }
 0x331   : > { %v18638_v14 = vpack.c.bf16 %v3390_v9, %v3387_v31  ;;  %v3405_v47 = vand.u32 4294901760, %v18642_v4  ;;  %v3408_v62 = vand.u32 4294901760, %v18644_v35  ;;  %v18659_v46 = vld [vmem:[#allocation10 + $0x48] sm:$0xff]  ;;  %v18661_v59 = vld [vmem:[#allocation10 + $0x50] sm:$0xff]  ;;  %v18663_v41 = vld [vmem:[#allocation10 + $0x58] sm:$0xff]  ;;  %v18670_v15 = vsub.f32 %v3370_v58, %v3387_v31  ;;  %s22690_s14 = sld [smem:[#allocation128_spill]] }
 0x332   : > { %v18640_v51 = vpack.c.bf16 %v3396_v21, %v3393_v7  ;;  %v18655_v2 = vpack.c.bf16 %v3402_v11, %v3399_v52  ;;  %v18665_v44 = vld [vmem:[#allocation10 + $0x60] sm:$0xff]  ;;  %v18672_v28 = vsub.f32 %v3371_v43, %v3390_v9  ;;  %v3411_v50 = vand.u32 4294901760, %v18649_v12  ;;  %v18705_v40 = vld [vmem:[#allocation10 + $0x68] sm:$0xff]  ;;  %v18707_v63 = vld [vmem:[#allocation10 + $0x70] sm:$0xff]  ;;  %s22707_s4 = sld [smem:[#allocation129_spill]]  ;;  %s22708_s9 = sld [smem:[#allocation130_spill]] }
 0x333   : > { %14711 = vmatprep.subr.bf16.mxu0 %v18638_v14  ;;  %v18679_v1 = vsub.f32 %v3372_v5, %v3393_v7  ;;  %v18684_v25 = vpack.c.bf16 %v3408_v62, %v3405_v47  ;;  %v3414_v17 = vand.u32 4294901760, %v18659_v46  ;;  %v3417_v18 = vand.u32 4294901760, %v18661_v59  ;;  %v18727_v56 = vld [vmem:[#allocation10 + $0x78] sm:$0xff]  ;;  %s22711_s12 = sld [smem:[#allocation134_spill]]  ;;  %s22714_s24 = sld [smem:[#allocation35_spill]] }
 0x334   : > { %s10724_s13 = sshll.u32 %s22475_s17, 6  ;;  %14713 = vmatpush3.bf16.msra.mxu0 %v18638_v14  ;;  %22476 = vst [vmem:[#allocation93_spill] sm:$0xff] %v18655_v2  ;;  %v18688_v39 = vsub.f32 %v3373_v22, %v3396_v21  ;;  %v3420_v26 = vand.u32 4294901760, %v18663_v41  ;;  %v18694_v45 = vsub.f32 %v3374_v32, %v3399_v52  ;;  %v18696_v42 = vsub.f32 %v3375_v13, %v3402_v11  ;;  %s10773_s27 = sshll.u32 %s22475_s17, 3 }
 0x335   : > { %s18636_s15 = scalar_lea.vmem %s17502_s5, %s10724_s13 [#allocation5]  ;;  %14715 = vmatprep.subr.bf16.mxu0 %v18640_v51  ;;  %22477 = vst [vmem:[#allocation94_spill] sm:$0xff] %v18684_v25  ;;  %v3423_v30 = vand.u32 4294901760, %v18665_v44  ;;  %v22066_v48 = vand.u32 4294901760, %v18670_v15  ;;  %v22063_v60 = vand.u32 4294901760, %v18672_v28  ;;  %v22062_v10 = vand.u32 4294901760, %v18679_v1  ;;  %s22715_s21 = sld [smem:[#allocation39_spill]] }
 0x336   : > { %v3362_v23 = vld [vmem:[%s18636_s15] sm:$0xff]  ;;  %v3363_v57 = vld [vmem:[%s18636_s15 + $0x8] sm:$0xff]  ;;  %v18715_v36 = vpack.c.bf16 %v3414_v17, %v3411_v50  ;;  %v22061_v6 = vand.u32 4294901760, %v18688_v39  ;;  %v3364_v33 = vld [vmem:[%s18636_s15 + $0x10] sm:$0xff]  ;;  %v22060_v37 = vand.u32 4294901760, %v18694_v45  ;;  %v22059_v20 = vand.u32 4294901760, %v18696_v42 }
 0x337   : > { %v18651_v16 = vand.u32 4294901760, %v3362_v23  ;;  %v18674_v3 = vand.u32 4294901760, %v3363_v57  ;;  %v3551_v24 = vsub.f32 %v18670_v15, %v22066_v48  ;;  %v3365_v54 = vld [vmem:[%s18636_s15 + $0x18] sm:$0xff]  ;;  %v3558_v61 = vsub.f32 %v18672_v28, %v22063_v60  ;;  %v3366_v22 = vld [vmem:[%s18636_s15 + $0x20] sm:$0xff]  ;;  %v3367_v52 = vld [vmem:[%s18636_s15 + $0x28] sm:$0xff]  ;;  %s22716_s18 = sld [smem:[#allocation137_spill]] }
 0x338   : > { %14717 = vmatpush3.bf16.msra.mxu0 %v18640_v51  ;;  %22478 = vst [vmem:[#allocation95_spill] sm:$0xff] %v18715_v36  ;;  %v3565_v49 = vsub.f32 %v18679_v1, %v22062_v10  ;;  %v18735_v8 = vand.u32 4294901760, %v3364_v33  ;;  %v18742_v19 = vpack.c.bf16 %v3420_v26, %v3417_v18  ;;  %v3426_v55 = vand.u32 4294901760, %v18705_v40 }
 0x339   : > { %v18668_v29 = vsub.f32 %v3362_v23, %v18651_v16  ;;  %14719 = vmatprep.subr.bf16.mxu0 %v18655_v2  ;;  %v18702_v0 = vsub.f32 %v3363_v57, %v18674_v3  ;;  %v3429_v58 = vand.u32 4294901760, %v18707_v63  ;;  %v3572_v43 = vsub.f32 %v18688_v39, %v22061_v6 }
 0x33a   : > { %22479 = vst [vmem:[#allocation96_spill] sm:$0xff] %v18742_v19  ;;  %v3579_v5 = vsub.f32 %v18694_v45, %v22060_v37  ;;  %v3586_v31 = vsub.f32 %v18696_v42, %v22059_v20  ;;  %v18755_v9 = vand.u32 4294901760, %v3365_v54  ;;  %v3432_v7 = vand.u32 4294901760, %v18727_v56 }
 0x33b   : > { %v22058_v38 = vand.u32 4294901760, %v18668_v29  ;;  %v22057_v27 = vand.u32 4294901760, %v18702_v0  ;;  %v3552_v32 = vand.u32 4294901760, %v3551_v24  ;;  %v18765_v21 = vsub.f32 %v18642_v4, %v3405_v47  ;;  %p22717_p10 = scmp.ne.s32.totalorder %s22715_s21, 0 }
 0x33c   : > { %14721 = vmatpush3.bf16.msra.mxu0 %v18655_v2  ;;  %v3559_v11 = vand.u32 4294901760, %v3558_v61  ;;  %v3566_v23 = vand.u32 4294901760, %v3565_v49  ;;  %v18770_v57 = vsub.f32 %v3364_v33, %v18735_v8  ;;  %v3573_v24 = vand.u32 4294901760, %v3572_v43 }
 0x33d   : > { %v3470_v34 = vsub.f32 %v18668_v29, %v22058_v38  ;;  %14723 = vmatprep.subr.bf16.mxu0 %v18684_v25  ;;  %v18762_v13 = vsub.f32 %v18702_v0, %v22057_v27  ;;  %v18779_v4 = vsub.f32 %v3365_v54, %v18755_v9  ;;  %v18781_v47 = vand.u32 4294901760, %v3366_v22  ;;  %v3369_v54 = vld [vmem:[%s18636_s15 + $0x38] sm:$0xff] }
 0x33e   : > { %v3580_v27 = vand.u32 4294901760, %v3579_v5  ;;  %v3587_v38 = vand.u32 4294901760, %v3586_v31  ;;  %v3592_v33 = vand.u32 4294901760, %v18765_v21  ;;  %v18788_v49 = vsub.f32 %v18644_v35, %v3408_v62 }
 0x33f   : > { %v3471_v53 = vand.u32 4294901760, %v3470_v34  ;;  %v3368_v34 = vld [vmem:[%s18636_s15 + $0x30] sm:$0xff]  ;;  %v3481_v61 = vand.u32 4294901760, %v18762_v13  ;;  %v18793_v43 = vsub.f32 %v18649_v12, %v3411_v50  ;;  %v22064_v5 = vand.u32 4294901760, %v18770_v57 }
 0x340   : > { %14725 = vmatpush3.bf16.msra.mxu0 %v18684_v25  ;;  %v18799_v31 = vsub.f32 %v3366_v22, %v18781_v47  ;;  %v18801_v13 = vand.u32 4294901760, %v3367_v52  ;;  %v18804_v20 = vpack.c.bf16 %v3432_v7, %v3429_v58  ;;  %v14742_v35 = vpack.c.bf16 %v3559_v11, %v3552_v32 }
 0x341   : > { %12774 = vmatprep.mubr.f32.mxu0 %v3471_v53  ;;  %14727 = vmatprep.subr.bf16.mxu0 %v18715_v36  ;;  %v18776_v53 = vpack.c.bf16 %v3426_v55, %v3423_v30  ;;  %v22065_v62 = vand.u32 4294901760, %v18779_v4  ;;  %v18807_v37 = vand.u32 4294901760, %v3368_v34  ;;  %v14746_v12 = vpack.c.bf16 %v3573_v24, %v3566_v23 }
 0x342   : > { %22481 = vst [vmem:[#allocation98_spill] sm:$0xff] %v18799_v31  ;;  %22482 = vst [vmem:[#allocation99_spill] sm:$0xff] %v18804_v20  ;;  %v18809_v50 = vpack.c.bf16 %v3587_v38, %v3580_v27  ;;  %v18814_v6 = vsub.f32 %v18659_v46, %v3414_v17  ;;  %v18817_v22 = vsub.f32 %v3367_v52, %v18801_v13  ;;  %v3599_v10 = vand.u32 4294901760, %v18788_v49 }
 0x343   : > { %22480 = vst [vmem:[#allocation97_spill] sm:$0xff] %v18776_v53  ;;  %v3606_v60 = vand.u32 4294901760, %v18793_v43  ;;  %v18824_v32 = vsub.f32 %v18661_v59, %v3417_v18  ;;  %v18827_v38 = vsub.f32 %v3368_v34, %v18807_v37  ;;  %v3593_v46 = vsub.f32 %v18765_v21, %v3592_v33 }
 0x344   : > { %14729 = vmatpush3.bf16.msra.mxu0 %v18715_v36  ;;  %22483 = vst [vmem:[#allocation100_spill] sm:$0xff] %v18817_v22  ;;  %v3490_v17 = vsub.f32 %v18770_v57, %v22064_v5  ;;  %v22069_v27 = vand.u32 4294901760, %v18799_v31  ;;  %v18835_v52 = vand.u32 4294901760, %v3369_v54  ;;  %v18841_v59 = vsub.f32 %v18663_v41, %v3420_v26 }
 0x345   : > { %14731 = vmatprep.subr.bf16.mxu0 %v18742_v19  ;;  %22484 = vst [vmem:[#allocation101_spill] sm:$0xff] %v18827_v38  ;;  %v3500_v18 = vsub.f32 %v18779_v4, %v22065_v62  ;;  %v18849_v11 = vsub.f32 %v18665_v44, %v3423_v30  ;;  %v18852_v23 = vsub.f32 %v18705_v40, %v3426_v55  ;;  %v22078_v34 = vand.u32 4294901760, %v18817_v22 }
 0x346   : > { %v18857_v5 = vsub.f32 %v18707_v63, %v3429_v58  ;;  %v18860_v41 = vsub.f32 %v18727_v56, %v3432_v7  ;;  %v3600_v26 = vsub.f32 %v18788_v49, %v3599_v10  ;;  %v3607_v62 = vsub.f32 %v18793_v43, %v3606_v60 }
 0x347   : > { %v3613_v44 = vand.u32 4294901760, %v18814_v6  ;;  %v18866_v30 = vsub.f32 %v3369_v54, %v18835_v52  ;;  %v3594_v40 = vand.u32 4294901760, %v3593_v46  ;;  %v3491_v55 = vand.u32 4294901760, %v3490_v17 }
 0x348   : > { %14733 = vmatpush3.bf16.msra.mxu0 %v18742_v19  ;;  %v3620_v48 = vand.u32 4294901760, %v18824_v32  ;;  %v3510_v63 = vsub.f32 %v18799_v31, %v22069_v27  ;;  %v3627_v56 = vand.u32 4294901760, %v18841_v59  ;;  %v3501_v58 = vand.u32 4294901760, %v3500_v18 }
 0x349   : > { %14735 = vmatprep.subr.bf16.mxu0 %v18776_v53  ;;  %v3634_v7 = vand.u32 4294901760, %v18849_v11  ;;  %v3641_v24 = vand.u32 4294901760, %v18852_v23  ;;  %v3520_v54 = vsub.f32 %v18817_v22, %v22078_v34  ;;  %v22485_v46 = vand.u32 4294901760, %v18827_v38 }
 0x34a   : > { %v3655_v27 = vand.u32 4294901760, %v18860_v41  ;;  %v22486_v18 = vand.u32 4294901760, %v18670_v15  ;;  %v22487_v19 = vand.u32 4294901760, %v18672_v28  ;;  %v22488_v25 = vand.u32 4294901760, %v18679_v1 }
 0x34b   : > { %v3530_v17 = vsub.f32 %v18827_v38, %v22485_v46  ;;  %v22489_v34 = vand.u32 4294901760, %v18688_v39  ;;  %v22491_v46 = vand.u32 4294901760, %v18694_v45  ;;  %v22492_v38 = vand.u32 4294901760, %v18696_v42 }
 0x34c   : > { %14737 = vmatpush3.bf16.msra.mxu0 %v18776_v53  ;;  %v18889_v36 = vpack.c.bf16 %v22487_v19, %v22486_v18  ;;  %v18903_v53 = vpack.c.bf16 %v3599_v10, %v3592_v33  ;;  %v18905_v31 = vpack.c.bf16 %v3613_v44, %v3606_v60  ;;  %v18907_v19 = vpack.c.bf16 %v3627_v56, %v3620_v48 }
 0x34d   : > { %14739 = vmatprep.subr.bf16.mxu0 %v18804_v20  ;;  %v18895_v22 = vpack.c.bf16 %v22489_v34, %v22488_v25  ;;  %v18901_v2 = vpack.c.bf16 %v22492_v38, %v22491_v46  ;;  %v3601_v18 = vand.u32 4294901760, %v3600_v26  ;;  %v3614_v25 = vsub.f32 %v18814_v6, %v3613_v44 }
 0x34e   : > { %v18910_v34 = vpack.c.bf16 %v3641_v24, %v3634_v7  ;;  %v3521_v38 = vand.u32 4294901760, %v3520_v54  ;;  %v3621_v60 = vsub.f32 %v18824_v32, %v3620_v48  ;;  %v3628_v10 = vsub.f32 %v18841_v59, %v3627_v56 }
 0x34f   : > { %22490 = vst [vmem:[#allocation102_spill] sm:$0xff] %v18895_v22  ;;  %v3531_v33 = vand.u32 4294901760, %v3530_v17  ;;  %v14754_v26 = vpack.c.bf16 %v3601_v18, %v3594_v40  ;;  %v3608_v44 = vand.u32 4294901760, %v3607_v62  ;;  %v3635_v48 = vsub.f32 %v18849_v11, %v3634_v7 }
 0x350   : > { %14741 = vmatpush3.bf16.msra.mxu0 %v18804_v20  ;;  %v3648_v20 = vand.u32 4294901760, %v18857_v5  ;;  %v3629_v54 = vand.u32 4294901760, %v3628_v10  ;;  %v3642_v56 = vsub.f32 %v18852_v23, %v3641_v24  ;;  %v14774_v7 = vpack.c.bf16 %v18672_v28, %v18670_v15  ;;  %v4337_v10 = vld [vmem:[#allocation2 + $0x28] sm:$0xff] }
 0x351   : > { %14743 = vmatprep.subr.bf16.mxu0 %v14742_v35  ;;  %v3636_v62 = vand.u32 4294901760, %v3635_v48  ;;  %v14786_v15 = vpack.c.bf16 %v18788_v49, %v18765_v21  ;;  %v14790_v28 = vpack.c.bf16 %v18814_v6, %v18793_v43  ;;  %v14802_v48 = vpack.c.bf16 %v18860_v41, %v18857_v5 }
 0x352   : > { %v18912_v22 = vpack.c.bf16 %v3655_v27, %v3648_v20  ;;  %v3643_v40 = vand.u32 4294901760, %v3642_v56 }
 0x353   : > { %12775 = vmatmul.mubr.f32.vlgmr.msra.gmra.mrb[0].mxu0 %v3481_v61  ;;  %v3511_v61 = vand.u32 4294901760, %v3510_v63  ;;  %v3615_v63 = vand.u32 4294901760, %v3614_v25 }
 0x354   : > { %14745 = vmatpush3.bf16.msra.mxu0 %v14742_v35  ;;  %12777 = vmatprep.mubr.f32.mxu0 %v3491_v55  ;;  %v22493_v35 = vand.u32 4294901760, %v18866_v30  ;;  %v14766_v18 = vpack.c.bf16 %v3643_v40, %v3636_v62  ;;  %v4340_v40 = vld [vmem:[#allocation2 + $0x40] sm:$0xff] }
 0x355   : > { %14747 = vmatprep.subr.bf16.mxu0 %v14746_v12 }
 0x356   : > { %v3540_v55 = vsub.f32 %v18866_v30, %v22493_v35  ;;  %v4335_v35 = vld [vmem:[#allocation2 + $0x18] sm:$0xff] }
 0x357   : > { %12778 = vmatmul.mubr.f32.gmra.mrb[2].mxu0 %v3501_v58  ;;  %v3622_v58 = vand.u32 4294901760, %v3621_v60  ;;  %v18958_v60 = vsel %vm4364_vm0, %v4335_v35, 0 }
 0x358   : > { %14749 = vmatpush3.bf16.msra.mxu0 %v14746_v12  ;;  %12780 = vmatprep.mubr.f32.mxu0 %v3511_v61  ;;  %v3541_v46 = vand.u32 4294901760, %v3540_v55  ;;  %v14758_v12 = vpack.c.bf16 %v3615_v63, %v3608_v44  ;;  %v3649_v61 = vsub.f32 %v18857_v5, %v3648_v20  ;;  %v14778_v20 = vpack.c.bf16 %v18688_v39, %v18679_v1  ;;  %v4332_v1 = vld [vmem:[#allocation2] sm:$0xff]  ;;  %v4333_v39 = vld [vmem:[#allocation2 + $0x8] sm:$0xff] }
 0x359   : > { %14751 = vmatprep.subr.bf16.mxu0 %v18809_v50  ;;  %v14762_v17 = vpack.c.bf16 %v3629_v54, %v3622_v58  ;;  %v18947_v21 = vsel %vm4364_vm0, %v4332_v1, 0  ;;  %v18950_v49 = vsel %vm4364_vm0, %v4333_v39, 0  ;;  %6547 = vrot.lane.b32.xlu0 %v4332_v1, %s17027_s16  ;;  %v14798_v58 = vpack.c.bf16 %v18852_v23, %v18849_v11  ;;  %v4338_v11 = vld [vmem:[#allocation2 + $0x30] sm:$0xff]  ;;  %v4339_v23 = vld [vmem:[#allocation2 + $0x38] sm:$0xff] }
 0x35a   : > { %v3650_v25 = vand.u32 4294901760, %v3649_v61  ;;  %v4438_v43 = vand.u32 4294901760, %v18947_v21  ;;  %v4441_v55 = vand.u32 4294901760, %v18950_v49  ;;  %v19005_v62 = vsel %vm4364_vm0, %v4339_v23, 0  ;;  %v4341_v61 = vld [vmem:[#allocation2 + $0x48] sm:$0xff]  ;;  %v22496_v1 = vld [vmem:[#allocation100_spill] sm:$0xff] }
 0x35b   : > { %12781 = vmatmul.mubr.f32.gmra.mrb[4].mxu0 %v3521_v38 }
 0x35c   : > { %14753 = vmatpush3.bf16.msra.mxu0 %v18809_v50  ;;  %12783 = vmatprep.mubr.f32.mxu0 %v3531_v33  ;;  %v3656_v50 = vsub.f32 %v18860_v41, %v3655_v27  ;;  %v14782_v27 = vpack.c.bf16 %v18696_v42, %v18694_v45  ;;  %v4334_v45 = vld [vmem:[#allocation2 + $0x10] sm:$0xff]  ;;  %v14794_v42 = vpack.c.bf16 %v18841_v59, %v18824_v32  ;;  %v4336_v59 = vld [vmem:[#allocation2 + $0x20] sm:$0xff]  ;;  %v4447_v33 = vand.u32 4294901760, %v18958_v60 }
 0x35d   : > { %14755 = vmatprep.subr.bf16.mxu0 %v14754_v26  ;;  %v18953_v6 = vsel %vm4364_vm0, %v4334_v45, 0  ;;  %6551 = vrot.lane.b32.xlu1 %v4334_v45, %s17027_s16  ;;  %v18977_v63 = vsel %vm4364_vm0, %v4336_v59, 0  ;;  %v22094_v41 = vand.u32 4294901760, %v19005_v62  ;;  %v19050_v45 = vld [vmem:[#allocation2 + $0x78] sm:$0xff] }
 0x35e   : > { %v3657_v38 = vand.u32 4294901760, %v3656_v50  ;;  %v4444_v32 = vand.u32 4294901760, %v18953_v6  ;;  %v4450_v54 = vand.u32 4294901760, %v18977_v63  ;;  %6549 = vrot.lane.b32.xlu0 %v4333_v39, %s17027_s16 }
 0x35f   : > { %12784 = vmatmul.mubr.f32.gmra.mrb[6].mxu0 %v3541_v46  ;;  %v18980_v46 = vsel %vm4364_vm0, %v4337_v10, 0 }
 0x360   : > { %14757 = vmatpush3.bf16.msra.mxu0 %v14754_v26  ;;  %12818 = vmatprep.mubr.f32.mxu0 %v18651_v16  ;;  %v14770_v24 = vpack.c.bf16 %v3657_v38, %v3650_v25  ;;  %v18968_v26 = vpack.c.bf16 %v4441_v55, %v4438_v43  ;;  %v18974_v44 = vpack.c.bf16 %v4447_v33, %v4444_v32  ;;  %v19029_v25 = vsel %vm4364_vm0, %v4341_v61, 0  ;;  %v6494_v38 = vld [vmem:[#allocation2 + $0x58] sm:$0xff] }
 0x361   : > { %14759 = vmatprep.subr.bf16.mxu0 %v14758_v12  ;;  %6553 = vrot.lane.b32.xlu1 %v4335_v35, %s17027_s16 }
 0x362   : > { %14903 = vmatprep.subr.bf16.mxu1 %v18968_v26  ;;  %6555 = vrot.lane.b32.xlu0 %v4336_v59, %s17027_s16  ;;  %v19058_v59 = vsel %vm4364_vm0, %v6494_v38, 0 }
 0x363   : > { %14905 = vmatpush3.bf16.xpose.msra.mxu1 %v18968_v26 }
 0x364   : > { %14761 = vmatpush3.bf16.msra.mxu0 %v14758_v12  ;;  %14907 = vmatprep.subr.bf16.mxu1 %v18974_v44  ;;  %v4453_v12 = vand.u32 4294901760, %v18980_v46 }
 0x365   : > { %14763 = vmatprep.subr.bf16.mxu0 %v14762_v17  ;;  %6557 = vrot.lane.b32.xlu1 %v4337_v10, %s17027_s16  ;;  %v6495_v10 = vld [vmem:[#allocation2 + $0x60] sm:$0xff] }
 0x366   : > { %v18998_v56 = vpack.c.bf16 %v4453_v12, %v4450_v54  ;;  %6559 = vrot.lane.b32.xlu0 %v4338_v11, %s17027_s16 }
 0x368   : > { %14765 = vmatpush3.bf16.msra.mxu0 %v14762_v17  ;;  %v19002_v17 = vsel %vm4364_vm0, %v4338_v11, 0 }
 0x369   : > { %14767 = vmatprep.subr.bf16.mxu0 %v14766_v18  ;;  %6561 = vrot.lane.b32.xlu1 %v4339_v23, %s17027_s16  ;;  %v22095_v5 = vand.u32 4294901760, %v19002_v17  ;;  %v22090_v23 = vand.u32 4294901760, %v19058_v59 }
 0x36a   : > { %6563 = vrot.lane.b32.xlu0 %v4340_v40, %s17027_s16 }
 0x36b   : > { %14909 = vmatpush3.bf16.xpose.msra.mxu1 %v18974_v44  ;;  %v19020_v50 = vpack.c.bf16 %v22094_v41, %v22095_v5  ;;  %v22507_v41 = vand.u32 4294901760, %v18779_v4 }
 0x36c   : > { %14769 = vmatpush3.bf16.msra.mxu0 %v14766_v18  ;;  %14911 = vmatprep.subr.bf16.mxu1 %v18998_v56  ;;  %v19026_v18 = vsel %vm4364_vm0, %v4340_v40, 0  ;;  %v22499_v40 = vand.u32 4294901760, %v18668_v29 }
 0x36d   : > { %14771 = vmatprep.subr.bf16.mxu0 %v14770_v24  ;;  %6565 = vrot.lane.b32.xlu1 %v4341_v61, %s17027_s16  ;;  %v22500_v61 = vld [vmem:[#allocation95_spill] sm:$0xff] }
 0x370   : > { %14773 = vmatpush3.bf16.msra.mxu0 %v14770_v24  ;;  %v22089_v24 = vand.u32 4294901760, %v19026_v18 }
 0x371   : > { %14775 = vmatprep.subr.bf16.mxu0 %v14774_v7  ;;  %6569 = vrot.lane.b32.xlu1 %v6494_v38, %s17027_s16 }
 0x373   : > { %12819 = vmatmul.mubr.f32.vlgmr.msra.gmra.mrb[0].mxu0 %v18674_v3  ;;  %14913 = vmatpush3.bf16.xpose.msra.mxu1 %v18998_v56 }
 0x374   : > { %14777 = vmatpush3.bf16.msra.mxu0 %v14774_v7  ;;  %12821 = vmatprep.mubr.f32.mxu0 %v18735_v8  ;;  %v22088_v7 = vand.u32 4294901760, %v19029_v25 }
 0x375   : > { %14779 = vmatprep.subr.bf16.mxu0 %v14778_v20  ;;  %14915 = vmatprep.subr.bf16.mxu1 %v19020_v50 }
 0x376   : > { %v19048_v39 = vpack.c.bf16 %v22088_v7, %v22089_v24 }
 0x377   : > { %12822 = vmatmul.mubr.f32.gmra.mrb[2].mxu0 %v18755_v9 }
 0x378   : > { %14781 = vmatpush3.bf16.msra.mxu0 %v14778_v20  ;;  %12824 = vmatprep.mubr.f32.mxu0 %v18781_v47  ;;  %v6496_v20 = vld [vmem:[#allocation2 + $0x68] sm:$0xff] }
 0x379   : > { %14783 = vmatprep.subr.bf16.mxu0 %v14782_v27  ;;  %6573 = vrot.lane.b32.xlu1 %v6496_v20, %s17027_s16  ;;  %v19088_v7 = vsel %vm4364_vm0, %v6496_v20, 0 }
 0x37a   : > { %v22092_v24 = vand.u32 4294901760, %v19088_v7 }
 0x37b   : > { %12825 = vmatmul.mubr.f32.gmra.mrb[4].mxu0 %v18801_v13  ;;  %14917 = vmatpush3.bf16.xpose.msra.mxu1 %v19020_v50 }
 0x37c   : > { %14785 = vmatpush3.bf16.msra.mxu0 %v14782_v27  ;;  %12827 = vmatprep.mubr.f32.mxu0 %v18807_v37  ;;  %v22494_v27 = vld [vmem:[#allocation98_spill] sm:$0xff] }
 0x37d   : > { %14787 = vmatprep.subr.bf16.mxu0 %v14786_v15  ;;  %6577 = vrot.lane.b32.xlu1 %v19050_v45, %s17027_s16  ;;  %v22508_v5 = vand.u32 4294901760, %v22494_v27 }
 0x37e   : > { %14919 = vmatprep.subr.bf16.mxu1 %v19048_v39 }
 0x37f   : > { %12828 = vmatmul.mubr.f32.gmra.mrb[6].mxu0 %v18835_v52 }
 0x380   : > { %14789 = vmatpush3.bf16.msra.mxu0 %v14786_v15  ;;  %12862 = vmatprep.mubr.f32.mxu0 %v18668_v29  ;;  %v4342_v15 = vld [vmem:[#allocation2 + $0x50] sm:$0xff]  ;;  %v22501_v29 = vld [vmem:[#allocation96_spill] sm:$0xff] }
 0x381   : > { %14791 = vmatprep.subr.bf16.mxu0 %v14790_v28  ;;  %6567 = vrot.lane.b32.xlu0 %v4342_v15, %s17027_s16  ;;  %v19055_v35 = vsel %vm4364_vm0, %v4342_v15, 0  ;;  %v19085_v15 = vsel %vm4364_vm0, %v6495_v10, 0 }
 0x382   : > { %v22091_v11 = vand.u32 4294901760, %v19055_v35 }
 0x383   : > { %14921 = vmatpush3.bf16.xpose.msra.mxu1 %v19048_v39 }
 0x384   : > { %14793 = vmatpush3.bf16.msra.mxu0 %v14790_v28  ;;  %v22495_v28 = vld [vmem:[#allocation93_spill] sm:$0xff]  ;;  %v19081_v38 = vpack.c.bf16 %v22090_v23, %v22091_v11  ;;  %v22504_v11 = vand.u32 4294901760, %v18702_v0 }
 0x385   : > { %14795 = vmatprep.subr.bf16.mxu0 %v14794_v42  ;;  %6571 = vrot.lane.b32.xlu0 %v6495_v10, %s17027_s16  ;;  %v22502_v23 = vld [vmem:[#allocation97_spill] sm:$0xff]  ;;  %v22503_v10 = vld [vmem:[#allocation99_spill] sm:$0xff] }
 0x386   : > { %14923 = vmatprep.subr.bf16.mxu1 %v19081_v38 }
 0x388   : > { %14797 = vmatpush3.bf16.msra.mxu0 %v14794_v42  ;;  %v22497_v42 = vld [vmem:[#allocation101_spill] sm:$0xff] }
 0x389   : > { %14799 = vmatprep.subr.bf16.mxu0 %v14798_v58 }
 0x38b   : > { %14925 = vmatpush3.bf16.xpose.msra.mxu1 %v19081_v38 }
 0x38c   : > { %14801 = vmatpush3.bf16.msra.mxu0 %v14798_v58  ;;  %v22498_v58 = vld [vmem:[#allocation94_spill] sm:$0xff] }
 0x38d   : > { %14803 = vmatprep.subr.bf16.mxu0 %v14802_v48 }
 0x390   : > { %14805 = vmatpush3.bf16.msra.mxu0 %v14802_v48  ;;  %v19065_v48 = vld [vmem:[#allocation2 + $0x70] sm:$0xff] }
 0x391   : > { %14807 = vmatprep.subr.bf16.mxu0 %v18638_v14  ;;  %6575 = vrot.lane.b32.xlu0 %v19065_v48, %s17027_s16 }
 0x393   : > { %12863 = vmatmul.mubr.f32.vlgmr.msra.gmra.mrb[0].mxu0 %v18702_v0  ;;  %v22509_v0 = vand.u32 4294901760, %v22496_v1 }
 0x394   : > { %14809 = vmatpush3.bf16.msra.mxu0 %v18638_v14  ;;  %12865 = vmatprep.mubr.f32.mxu0 %v18770_v57 }
 0x395   : > { %14811 = vmatprep.subr.bf16.mxu0 %v18640_v51 }
 0x397   : > { %12866 = vmatmul.mubr.f32.gmra.mrb[2].mxu0 %v18779_v4 }
 0x398   : > { %14813 = vmatpush3.bf16.msra.mxu0 %v18640_v51  ;;  %12868 = vmatprep.mubr.f32.mxu0 %v22494_v27 }
 0x399   : > { %14815 = vmatprep.subr.bf16.mxu0 %v22495_v28 }
 0x39b   : > { %12869 = vmatmul.mubr.f32.gmra.mrb[4].mxu0 %v22496_v1 }
 0x39c   : > { %14817 = vmatpush3.bf16.msra.mxu0 %v22495_v28  ;;  %12871 = vmatprep.mubr.f32.mxu0 %v22497_v42 }
 0x39d   : > { %14819 = vmatprep.subr.bf16.mxu0 %v22498_v58 }
 0x39f   : > { %12872 = vmatmul.mubr.f32.gmra.mrb[6].mxu0 %v18866_v30 }
 0x3a0   : > { %14821 = vmatpush3.bf16.msra.mxu0 %v22498_v58  ;;  %12906 = vmatprep.mubr.f32.mxu0 %v22499_v40  ;;  %v22093_v40 = vand.u32 4294901760, %v19085_v15 }
 0x3a1   : > { %14823 = vmatprep.subr.bf16.mxu0 %v22500_v61 }
 0x3a2   : > { %v19101_v20 = vpack.c.bf16 %v22092_v24, %v22093_v40  ;;  %v22505_v24 = vand.u32 4294901760, %v18770_v57  ;;  %v22506_v40 = vld [vmem:[#allocation102_spill] sm:$0xff]  ;;  %v22511_v57 = vand.u32 4294901760, %v18866_v30 }
 0x3a4   : > { %14825 = vmatpush3.bf16.msra.mxu0 %v22500_v61  ;;  %14927 = vmatprep.subr.bf16.mxu1 %v19101_v20 }
 0x3a5   : > { %14827 = vmatprep.subr.bf16.mxu0 %v22501_v29  ;;  %14929 = vmatpush3.bf16.xpose.msra.mxu1 %v19101_v20 }
 0x3a8   : > { %14829 = vmatpush3.bf16.msra.mxu0 %v22501_v29 }
 0x3a9   : > { %14831 = vmatprep.subr.bf16.mxu0 %v22502_v23 }
 0x3ac   : > { %14833 = vmatpush3.bf16.msra.mxu0 %v22502_v23 }
 0x3ad   : > { %14835 = vmatprep.subr.bf16.mxu0 %v22503_v10 }
 0x3b0   : > { %14837 = vmatpush3.bf16.msra.mxu0 %v22503_v10 }
 0x3b1   : > { %14839 = vmatprep.subr.bf16.mxu0 %v18889_v36 }
 0x3b3   : > { %12907 = vmatmul.mubr.f32.vlgmr.msra.gmra.mrb[0].mxu0 %v22504_v11 }
 0x3b4   : > { %14841 = vmatpush3.bf16.msra.mxu0 %v18889_v36  ;;  %12909 = vmatprep.mubr.f32.mxu0 %v22505_v24  ;;  %v22510_v36 = vand.u32 4294901760, %v22497_v42  ;;  %v19236_v24 = vsub.f32 %v18980_v46, %v4453_v12 }
 0x3b5   : > { %14843 = vmatprep.subr.bf16.mxu0 %v22506_v40 }
 0x3b7   : > { %12910 = vmatmul.mubr.f32.gmra.mrb[2].mxu0 %v22507_v41 }
 0x3b8   : > { %14845 = vmatpush3.bf16.msra.mxu0 %v22506_v40  ;;  %12912 = vmatprep.mubr.f32.mxu0 %v22508_v5 }
 0x3b9   : > { %14847 = vmatprep.subr.bf16.mxu0 %v18901_v2 }
 0x3bb   : > { %12913 = vmatmul.mubr.f32.gmra.mrb[4].mxu0 %v22509_v0 }
 0x3bc   : > { %14849 = vmatpush3.bf16.msra.mxu0 %v18901_v2  ;;  %12915 = vmatprep.mubr.f32.mxu0 %v22510_v36 }
 0x3bd   : > { %14851 = vmatprep.subr.bf16.mxu0 %v18903_v53 }
 0x3bf   : > { %12916 = vmatmul.mubr.f32.gmra.mrb[6].mxu0 %v22511_v57 }
 0x3c0   : > { %14853 = vmatpush3.bf16.msra.mxu0 %v18903_v53  ;;  %12950 = vmatprep.mubr.f32.mxu0 %v18651_v16 }
 0x3c1   : > { %14855 = vmatprep.subr.bf16.mxu0 %v18905_v31 }
 0x3c4   : > { %14857 = vmatpush3.bf16.msra.mxu0 %v18905_v31 }
 0x3c5   : > { %14859 = vmatprep.subr.bf16.mxu0 %v18907_v19 }
 0x3c8   : > { %14861 = vmatpush3.bf16.msra.mxu0 %v18907_v19  ;;  %v19207_v19 = vsub.f32 %v18953_v6, %v4444_v32 }
 0x3c9   : > { %14863 = vmatprep.subr.bf16.mxu0 %v18910_v34 }
 0x3cc   : > { %14865 = vmatpush3.bf16.msra.mxu0 %v18910_v34  ;;  %v19212_v34 = vsub.f32 %v18958_v60, %v4447_v33  ;;  %v19227_v60 = vsub.f32 %v18977_v63, %v4450_v54 }
 0x3cd   : > { %14867 = vmatprep.subr.bf16.mxu0 %v18912_v22 }
 0x3d0   : > { %14869 = vmatpush3.bf16.msra.mxu0 %v18912_v22 }
 0x3d1   : > { %14871 = vmatprep.subr.bf16.mxu0 %v18638_v14 }
 0x3d3   : > { %12951 = vmatmul.mubr.f32.vlgmr.msra.gmra.mrb[0].mxu0 %v18674_v3 }
 0x3d4   : > { %14873 = vmatpush3.bf16.msra.mxu0 %v18638_v14  ;;  %12953 = vmatprep.mubr.f32.mxu0 %v18735_v8  ;;  %v4432_v14 = vsel %vm4364_vm0, %v19065_v48, 0  ;;  %v22097_v48 = vand.u32 4294901760, %v19227_v60 }
 0x3d5   : > { %14875 = vmatprep.subr.bf16.mxu0 %v18640_v51 }
 0x3d7   : > { %12954 = vmatmul.mubr.f32.gmra.mrb[2].mxu0 %v18755_v9 }
 0x3d8   : > { %14877 = vmatpush3.bf16.msra.mxu0 %v18640_v51  ;;  %12956 = vmatprep.mubr.f32.mxu0 %v18781_v47  ;;  %v4435_v51 = vsel %vm4364_vm0, %v19050_v45, 0 }
 0x3d9   : > { %14879 = vmatprep.subr.bf16.mxu0 %v22495_v28  ;;  %v4483_v2 = vand.u32 4294901760, %v4435_v51 }
 0x3db   : > { %12957 = vmatmul.mubr.f32.gmra.mrb[4].mxu0 %v18801_v13  ;;  %v19202_v30 = vsub.f32 %v4435_v51, %v4483_v2 }
 0x3dc   : > { %14881 = vmatpush3.bf16.msra.mxu0 %v22495_v28  ;;  %12959 = vmatprep.mubr.f32.mxu0 %v18807_v37 }
 0x3dd   : > { %14883 = vmatprep.subr.bf16.mxu0 %v22498_v58 }
 0x3df   : > { %12960 = vmatmul.mubr.f32.gmra.mrb[6].mxu0 %v18835_v52 }
 0x3e0   : > { %14885 = vmatpush3.bf16.msra.mxu0 %v22498_v58  ;;  %12994 = vmatprep.mubr.f32.mxu0 %v18651_v16  ;;  %v4480_v16 = vand.u32 4294901760, %v4432_v14 }
 0x3e1   : > { %14887 = vmatprep.subr.bf16.mxu0 %v22500_v61 }
 0x3e4   : > { %14889 = vmatpush3.bf16.msra.mxu0 %v22500_v61 }
 0x3e5   : > { %14891 = vmatprep.subr.bf16.mxu0 %v22501_v29 }
 0x3e8   : > { %14893 = vmatpush3.bf16.msra.mxu0 %v22501_v29 }
 0x3e9   : > { %14895 = vmatprep.subr.bf16.mxu0 %v22502_v23 }
 0x3ec   : > { %14897 = vmatpush3.bf16.msra.mxu0 %v22502_v23  ;;  %v22096_v23 = vand.u32 4294901760, %v19236_v24 }
 0x3ed   : > { %14899 = vmatprep.subr.bf16.mxu0 %v22503_v10 }
 0x3f0   : > { %14901 = vmatpush3.bf16.msra.mxu0 %v22503_v10 }
 0x3f3   : > { %12995 = vmatmul.mubr.f32.vlgmr.msra.gmra.mrb[0].mxu0 %v18674_v3  ;;  %v19175_v3 = vpack.c.bf16 %v4483_v2, %v4480_v16  ;;  %v4630_v2 = vsub.f32 %v19227_v60, %v22097_v48 }
 0x3f4   : > { %12997 = vmatprep.mubr.f32.mxu0 %v18735_v8  ;;  %v19180_v8 = vsub.f32 %v18947_v21, %v4438_v43  ;;  %v4615_v21 = vand.u32 4294901760, %v19207_v19 }
 0x3f5   : > { %14931 = vmatprep.subr.bf16.mxu1 %v19175_v3 }
 0x3f6   : > { %14933 = vmatpush3.bf16.xpose.msra.mxu1 %v19175_v3 }
 0x3f7   : > { %12998 = vmatmul.mubr.f32.gmra.mrb[2].mxu0 %v18755_v9  ;;  %v4601_v9 = vand.u32 4294901760, %v19180_v8 }
 0x3f8   : > { %13000 = vmatprep.mubr.f32.mxu0 %v18781_v47 }
 0x3f9   : > { %v4602_v4 = vsub.f32 %v19180_v8, %v4601_v9 }
 0x3fb   : > { %13001 = vmatmul.mubr.f32.gmra.mrb[4].mxu0 %v18801_v13  ;;  %v4603_v31 = vand.u32 4294901760, %v4602_v4 }
 0x3fc   : > { %13003 = vmatprep.mubr.f32.mxu0 %v18807_v37  ;;  %v19185_v37 = vsub.f32 %v18950_v49, %v4441_v55  ;;  %v4622_v49 = vand.u32 4294901760, %v19212_v34  ;;  %v4616_v55 = vsub.f32 %v19207_v19, %v4615_v21 }
 0x3fe   : > { %v4608_v53 = vand.u32 4294901760, %v19185_v37  ;;  %v4623_v5 = vsub.f32 %v19212_v34, %v4622_v49  ;;  %v4617_v45 = vand.u32 4294901760, %v4616_v55 }
 0x3ff   : > { %13004 = vmatmul.mubr.f32.gmra.mrb[6].mxu0 %v18835_v52  ;;  %v19200_v52 = vsub.f32 %v4432_v14, %v4480_v16 }
 0x400   : > { %v4609_v47 = vsub.f32 %v19185_v37, %v4608_v53  ;;  %v4624_v63 = vand.u32 4294901760, %v4623_v5 }
 0x402   : > { %v4610_v13 = vand.u32 4294901760, %v4609_v47  ;;  %v14938_v36 = vpack.c.bf16 %v4624_v63, %v4617_v45 }
 0x404   : > { %v19197_v22 = vpack.c.bf16 %v4610_v13, %v4603_v31  ;;  %v4637_v13 = vsub.f32 %v19236_v24, %v22096_v23 }
 0x406   : > { %14935 = vmatprep.subr.bf16.mxu1 %v19197_v22 }
 0x4c6   : > { %v12996_v43 = vpop.f32.mrb[0].mxu0 }
 0x4c7   : > { %v4369_v6 = vsel %vm4364_vm0, %v12996_v43, 0  ;;  %6517 = vrot.lane.b32.xlu1 %v12996_v43, %s17027_s16  ;;  %v4282_v32 = vpop.f32.mrb[1].mxu0 }
 0x4c8   : > { %v19229_v33 = vand.u32 4294901760, %v4369_v6  ;;  %v4366_v41 = vsel %vm4364_vm0, %v4282_v32, 0  ;;  %6515 = vrot.lane.b32.xlu0 %v4282_v32, %s17027_s16 }
 0x4c9   : > { %v19238_v27 = vand.u32 4294901760, %v4366_v41 }
 0x4ca   : > { %v19241_v28 = vsub.f32 %v4369_v6, %v19229_v33  ;;  %v12999_v1 = vpop.f32.mrb[2].mxu0  ;;  %v22512_v6 = vand.u32 4294901760, %v19002_v17 }
 0x4cb   : > { %v19244_v54 = vsub.f32 %v4366_v41, %v19238_v27  ;;  %v4375_v42 = vsel %vm4364_vm0, %v12999_v1, 0  ;;  %6521 = vrot.lane.b32.xlu1 %v12999_v1, %s17027_s16  ;;  %v4294_v58 = vpop.f32.mrb[3].mxu0 }
 0x4cc   : > { %v19249_v46 = vand.u32 4294901760, %v4375_v42  ;;  %v4372_v12 = vsel %vm4364_vm0, %v4294_v58, 0  ;;  %6519 = vrot.lane.b32.xlu0 %v4294_v58, %s17027_s16  ;;  %v4530_v11 = vand.u32 4294901760, %v19241_v28  ;;  %v19289_v32 = vsub.f32 %v19002_v17, %v22512_v6 }
 0x4cd   : > { %v19255_v61 = vand.u32 4294901760, %v4372_v12  ;;  %v4520_v29 = vand.u32 4294901760, %v19244_v54 }
 0x4ce   : > { %v19259_v40 = vsub.f32 %v4375_v42, %v19249_v46  ;;  %v13002_v10 = vpop.f32.mrb[4].mxu0  ;;  %v4531_v0 = vsub.f32 %v19241_v28, %v4530_v11  ;;  %v22513_v42 = vand.u32 4294901760, %v19005_v62 }
 0x4cf   : > { %v19265_v57 = vsub.f32 %v4372_v12, %v19255_v61  ;;  %v4381_v14 = vsel %vm4364_vm0, %v13002_v10, 0  ;;  %6525 = vrot.lane.b32.xlu1 %v13002_v10, %s17027_s16  ;;  %v4306_v51 = vpop.f32.mrb[5].mxu0  ;;  %v4521_v16 = vsub.f32 %v19244_v54, %v4520_v29 }
 0x4d0   : > { %v19275_v4 = vand.u32 4294901760, %v4381_v14  ;;  %v4378_v47 = vsel %vm4364_vm0, %v4306_v51, 0  ;;  %6523 = vrot.lane.b32.xlu0 %v4306_v51, %s17027_s16  ;;  %v22098_v31 = vand.u32 4294901760, %v19259_v40  ;;  %v4532_v45 = vand.u32 4294901760, %v4531_v0 }
 0x4d1   : > { %v19283_v43 = vand.u32 4294901760, %v4378_v47  ;;  %v4522_v55 = vand.u32 4294901760, %v4521_v16  ;;  %v22100_v5 = vand.u32 4294901760, %v19265_v57  ;;  %v19300_v58 = vsub.f32 %v19005_v62, %v22513_v42 }
 0x4d2   : > { %v19292_v41 = vsub.f32 %v4381_v14, %v19275_v4  ;;  %v13005_v1 = vpop.f32.mrb[6].mxu0  ;;  %v4551_v63 = vsub.f32 %v19259_v40, %v22098_v31  ;;  %v4631_v14 = vand.u32 4294901760, %v4630_v2  ;;  %v22101_v42 = vand.u32 4294901760, %v19289_v32 }
 0x4d3   : > { %v19303_v12 = vsub.f32 %v4378_v47, %v19283_v43  ;;  %v4387_v17 = vsel %vm4364_vm0, %v13005_v1, 0  ;;  %13038 = vmatprep.mubr.f32.mxu1 %v4522_v55  ;;  %6529 = vrot.lane.b32.xlu1 %v13005_v1, %s17027_s16  ;;  %v4318_v10 = vpop.f32.mrb[7].mxu0  ;;  %v4541_v0 = vsub.f32 %v19265_v57, %v22100_v5  ;;  %v4638_v47 = vand.u32 4294901760, %v4637_v13 }
 0x4d4   : > { %v19310_v51 = vand.u32 4294901760, %v4387_v17  ;;  %v4384_v16 = vsel %vm4364_vm0, %v4318_v10, 0  ;;  %13039 = vmatmul.mubr.f32.vlgmr.msra.gmra.mrb[0].mxu1 %v4532_v45  ;;  %6527 = vrot.lane.b32.xlu0 %v4318_v10, %s17027_s16  ;;  %v22099_v62 = vand.u32 4294901760, %v19292_v41  ;;  %v4552_v23 = vand.u32 4294901760, %v4551_v63 }
 0x4d5   : > { %v19315_v6 = vand.u32 4294901760, %v4384_v16  ;;  %14937 = vmatpush3.bf16.xpose.msra.mxu1 %v19197_v22  ;;  %v4542_v55 = vand.u32 4294901760, %v4541_v0  ;;  %v4560_v1 = vand.u32 4294901760, %v19303_v12  ;;  %v22103_v13 = vand.u32 4294901760, %v19300_v58 }
 0x4d6   : > { %v19321_v2 = vsub.f32 %v4387_v17, %v19310_v51  ;;  %14939 = vmatprep.subr.bf16.mxu1 %v14938_v36  ;;  %v4571_v45 = vsub.f32 %v19292_v41, %v22099_v62  ;;  %v14942_v0 = vpack.c.bf16 %v4638_v47, %v4631_v14  ;;  %v22514_v31 = vand.u32 4294901760, %v19026_v18 }
 0x4d7   : > { %v19328_v10 = vsub.f32 %v4384_v16, %v19315_v6  ;;  %13041 = vmatprep.mubr.f32.mxu1 %v4542_v55  ;;  %v4561_v22 = vsub.f32 %v19303_v12, %v4560_v1  ;;  %v22515_v16 = vand.u32 4294901760, %v19029_v25  ;;  %v4644_v14 = vsub.f32 %v19289_v32, %v22101_v42 }
 0x4d8   : > { %13042 = vmatmul.mubr.f32.gmra.mrb[2].mxu1 %v4552_v23  ;;  %v4590_v17 = vand.u32 4294901760, %v19321_v2  ;;  %v19338_v62 = vsub.f32 %v19026_v18, %v22514_v31  ;;  %v4572_v5 = vand.u32 4294901760, %v4571_v45  ;;  %v4651_v47 = vsub.f32 %v19300_v58, %v22103_v13 }
 0x4d9   : > { %v4562_v63 = vand.u32 4294901760, %v4561_v22  ;;  %v4580_v48 = vand.u32 4294901760, %v19328_v10  ;;  %v19343_v55 = vsub.f32 %v19029_v25, %v22515_v16  ;;  %v4645_v16 = vand.u32 4294901760, %v4644_v14 }
 0x4da   : > { %v4591_v23 = vsub.f32 %v19321_v2, %v4590_v17  ;;  %v22102_v31 = vand.u32 4294901760, %v19338_v62  ;;  %v4652_v42 = vand.u32 4294901760, %v4651_v47  ;;  %v22517_v14 = vand.u32 4294901760, %v19058_v59 }
 0x4db   : > { %13044 = vmatprep.mubr.f32.mxu1 %v4562_v63  ;;  %v4581_v18 = vsub.f32 %v19328_v10, %v4580_v48  ;;  %v22104_v45 = vand.u32 4294901760, %v19343_v55 }
 0x4dc   : > { %13045 = vmatmul.mubr.f32.gmra.mrb[4].mxu1 %v4572_v5  ;;  %v4592_v22 = vand.u32 4294901760, %v4591_v23  ;;  %v4658_v63 = vsub.f32 %v19338_v62, %v22102_v31  ;;  %v14946_v5 = vpack.c.bf16 %v4652_v42, %v4645_v16  ;;  %v19374_v47 = vsub.f32 %v19058_v59, %v22517_v14 }
 0x4dd   : > { %14941 = vmatpush3.bf16.xpose.msra.mxu1 %v14938_v36  ;;  %v4582_v25 = vand.u32 4294901760, %v4581_v18  ;;  %v4665_v36 = vsub.f32 %v19343_v55, %v22104_v45  ;;  %v22516_v18 = vand.u32 4294901760, %v19055_v35  ;;  %v22518_v59 = vand.u32 4294901760, %v19085_v15 }
 0x4de   : > { %14943 = vmatprep.subr.bf16.mxu1 %v14942_v0  ;;  %v22105_v13 = vand.u32 4294901760, %v19374_v47  ;;  %v22519_v16 = vand.u32 4294901760, %v19088_v7 }
 0x4df   : > { %13047 = vmatprep.mubr.f32.mxu1 %v4582_v25  ;;  %v19369_v23 = vsub.f32 %v19055_v35, %v22516_v18  ;;  %v4659_v25 = vand.u32 4294901760, %v4658_v63 }
 0x4e0   : > { %13048 = vmatmul.mubr.f32.gmra.mrb[6].mxu1 %v4592_v22  ;;  %v4666_v22 = vand.u32 4294901760, %v4665_v36  ;;  %v4679_v35 = vsub.f32 %v19374_v47, %v22105_v13  ;;  %v19392_v63 = vsub.f32 %v19088_v7, %v22519_v16 }
 0x4e1   : > { %13082 = vmatprep.mubr.f32.mxu1 %v19238_v27  ;;  %v4671_v31 = vand.u32 4294901760, %v19369_v23 }
 0x4e2   : > { %v14950_v45 = vpack.c.bf16 %v4666_v22, %v4659_v25  ;;  %v4680_v18 = vand.u32 4294901760, %v4679_v35  ;;  %v22106_v25 = vand.u32 4294901760, %v19392_v63  ;;  %v4706_v35 = vand.u32 4294901760, %v19202_v30 }
 0x4e3   : > { %v4672_v42 = vsub.f32 %v19369_v23, %v4671_v31 }
 0x4e5   : > { %14945 = vmatpush3.bf16.xpose.msra.mxu1 %v14942_v0  ;;  %v19387_v0 = vsub.f32 %v19085_v15, %v22518_v59  ;;  %v4673_v36 = vand.u32 4294901760, %v4672_v42  ;;  %v4693_v15 = vsub.f32 %v19392_v63, %v22106_v25  ;;  %v4699_v42 = vand.u32 4294901760, %v19200_v52 }
 0x4e6   : > { %14947 = vmatprep.subr.bf16.mxu1 %v14946_v5 }
 0x4e7   : > { %v4685_v14 = vand.u32 4294901760, %v19387_v0  ;;  %v14954_v22 = vpack.c.bf16 %v4680_v18, %v4673_v36  ;;  %v4700_v16 = vsub.f32 %v19200_v52, %v4699_v42  ;;  %v4707_v36 = vsub.f32 %v19202_v30, %v4706_v35 }
 0x4e9   : > { %v4686_v13 = vsub.f32 %v19387_v0, %v4685_v14  ;;  %v4701_v18 = vand.u32 4294901760, %v4700_v16  ;;  %v14994_v16 = vpack.c.bf16 %v19202_v30, %v19200_v52 }
 0x4eb   : > { %v4687_v7 = vand.u32 4294901760, %v4686_v13  ;;  %v14966_v13 = vpack.c.bf16 %v19185_v37, %v19180_v8  ;;  %v22521_v8 = vand.u32 4294901760, %v19259_v40  ;;  %v22522_v37 = vand.u32 4294901760, %v19227_v60 }
 0x4ed   : > { %14949 = vmatpush3.bf16.xpose.msra.mxu1 %v14946_v5  ;;  %v4694_v5 = vand.u32 4294901760, %v4693_v15  ;;  %v14970_v15 = vpack.c.bf16 %v19212_v34, %v19207_v19  ;;  %v22524_v19 = vand.u32 4294901760, %v19292_v41  ;;  %v19485_v34 = vld [vmem:[#allocation3] sm:$0xff] }
 0x4ee   : > { %14951 = vmatprep.subr.bf16.mxu1 %v14950_v45 }
 0x4ef   : > { %v14958_v59 = vpack.c.bf16 %v4694_v5, %v4687_v7  ;;  %v14982_v7 = vpack.c.bf16 %v19343_v55, %v19338_v62  ;;  %v14986_v5 = vpack.c.bf16 %v19374_v47, %v19369_v23 }
 0x4f5   : > { %14953 = vmatpush3.bf16.xpose.msra.mxu1 %v14950_v45  ;;  %v4708_v45 = vand.u32 4294901760, %v4707_v36  ;;  %v22520_v36 = vand.u32 4294901760, %v19265_v57 }
 0x4f6   : > { %14955 = vmatprep.subr.bf16.mxu1 %v14954_v22 }
 0x4f7   : > { %v14962_v25 = vpack.c.bf16 %v4708_v45, %v4701_v18  ;;  %v19522_v18 = vld [vmem:[#allocation3 + $0x38] sm:$0xff] }
 0x4fd   : > { %14957 = vmatpush3.bf16.xpose.msra.mxu1 %v14954_v22  ;;  %v14974_v22 = vpack.c.bf16 %v19236_v24, %v19227_v60  ;;  %v5534_v60 = vand.u32 4294901760, %v19485_v34 }
 0x4fe   : > { %14959 = vmatprep.subr.bf16.mxu1 %v14958_v59 }
 0x505   : > { %14961 = vmatpush3.bf16.xpose.msra.mxu1 %v14958_v59  ;;  %v14990_v59 = vpack.c.bf16 %v19392_v63, %v19387_v0 }
 0x506   : > { %14963 = vmatprep.subr.bf16.mxu1 %v14962_v25 }
 0x50d   : > { %14965 = vmatpush3.bf16.xpose.msra.mxu1 %v14962_v25  ;;  %v14978_v25 = vpack.c.bf16 %v19300_v58, %v19289_v32 }
 0x50e   : > { %14967 = vmatprep.subr.bf16.mxu1 %v14966_v13 }
 0x514   : > { %13083 = vmatmul.mubr.f32.vlgmr.msra.gmra.mrb[0].mxu1 %v19229_v33 }
 0x515   : > { %13085 = vmatprep.mubr.f32.mxu1 %v19255_v61  ;;  %14969 = vmatpush3.bf16.xpose.msra.mxu1 %v14966_v13 }
 0x516   : > { %14971 = vmatprep.subr.bf16.mxu1 %v14970_v15 }
 0x518   : > { %13086 = vmatmul.mubr.f32.gmra.mrb[2].mxu1 %v19249_v46 }
 0x519   : > { %13088 = vmatprep.mubr.f32.mxu1 %v19283_v43 }
 0x51c   : > { %13089 = vmatmul.mubr.f32.gmra.mrb[4].mxu1 %v19275_v4 }
 0x51d   : > { %13091 = vmatprep.mubr.f32.mxu1 %v19315_v6  ;;  %14973 = vmatpush3.bf16.xpose.msra.mxu1 %v14970_v15  ;;  %v5555_v15 = vand.u32 4294901760, %v19522_v18 }
 0x51e   : > { %14975 = vmatprep.subr.bf16.mxu1 %v14974_v22 }
 0x520   : > { %13092 = vmatmul.mubr.f32.gmra.mrb[6].mxu1 %v19310_v51 }
 0x521   : > { %13126 = vmatprep.mubr.f32.mxu1 %v19244_v54  ;;  %v15030_v54 = vpack.c.bf16 %v4608_v53, %v4601_v9  ;;  %v22523_v9 = vand.u32 4294901760, %v19236_v24 }
 0x523   : > { %v15038_v53 = vpack.c.bf16 %v22523_v9, %v22522_v37 }
 0x525   : > { %14977 = vmatpush3.bf16.xpose.msra.mxu1 %v14974_v22  ;;  %v19535_v22 = vld [vmem:[#allocation3 + $0x40] sm:$0xff] }
 0x526   : > { %14979 = vmatprep.subr.bf16.mxu1 %v14978_v25 }
 0x52d   : > { %14981 = vmatpush3.bf16.xpose.msra.mxu1 %v14978_v25  ;;  %v19537_v25 = vld [vmem:[#allocation3 + $0x48] sm:$0xff] }
 0x52e   : > { %14983 = vmatprep.subr.bf16.mxu1 %v14982_v7 }
 0x535   : > { %14985 = vmatpush3.bf16.xpose.msra.mxu1 %v14982_v7  ;;  %v22527_v7 = vand.u32 4294901760, %v19338_v62 }
 0x536   : > { %14987 = vmatprep.subr.bf16.mxu1 %v14986_v5 }
 0x53d   : > { %14989 = vmatpush3.bf16.xpose.msra.mxu1 %v14986_v5  ;;  %v22528_v5 = vand.u32 4294901760, %v19343_v55  ;;  %v22529_v55 = vand.u32 4294901760, %v19374_v47 }
 0x53e   : > { %14991 = vmatprep.subr.bf16.mxu1 %v14990_v59 }
 0x545   : > { %14993 = vmatpush3.bf16.xpose.msra.mxu1 %v14990_v59  ;;  %v15046_v59 = vpack.c.bf16 %v22528_v5, %v22527_v7 }
 0x546   : > { %14995 = vmatprep.subr.bf16.mxu1 %v14994_v16 }
 0x54d   : > { %14997 = vmatpush3.bf16.xpose.msra.mxu1 %v14994_v16 }
 0x54e   : > { %14999 = vmatprep.subr.bf16.mxu1 %v18968_v26 }
 0x554   : > { %13127 = vmatmul.mubr.f32.vlgmr.msra.gmra.mrb[0].mxu1 %v19241_v28  ;;  %v19494_v28 = vld [vmem:[#allocation3 + $0x18] sm:$0xff] }
 0x555   : > { %13129 = vmatprep.mubr.f32.mxu1 %v19265_v57  ;;  %15001 = vmatpush3.bf16.xpose.msra.mxu1 %v18968_v26  ;;  %v22525_v57 = vand.u32 4294901760, %v19289_v32 }
 0x556   : > { %15003 = vmatprep.subr.bf16.mxu1 %v18974_v44 }
 0x558   : > { %13130 = vmatmul.mubr.f32.gmra.mrb[2].mxu1 %v19259_v40  ;;  %v19499_v40 = vld [vmem:[#allocation3 + $0x28] sm:$0xff] }
 0x559   : > { %13132 = vmatprep.mubr.f32.mxu1 %v19303_v12 }
 0x55c   : > { %13133 = vmatmul.mubr.f32.gmra.mrb[4].mxu1 %v19292_v41  ;;  %v22526_v41 = vand.u32 4294901760, %v19300_v58  ;;  %v19520_v58 = vld [vmem:[#allocation3 + $0x30] sm:$0xff] }
 0x55d   : > { %13135 = vmatprep.mubr.f32.mxu1 %v19328_v10  ;;  %15005 = vmatpush3.bf16.xpose.msra.mxu1 %v18974_v44  ;;  %v5552_v13 = vand.u32 4294901760, %v19520_v58 }
 0x55e   : > { %15007 = vmatprep.subr.bf16.mxu1 %v18998_v56  ;;  %v15042_v12 = vpack.c.bf16 %v22526_v41, %v22525_v57 }
 0x55f   : > { %v19549_v16 = vpack.c.bf16 %v5555_v15, %v5552_v13 }
 0x560   : > { %13136 = vmatmul.mubr.f32.gmra.mrb[6].mxu1 %v19321_v2 }
 0x561   : > { %13170 = vmatprep.mubr.f32.mxu1 %v4520_v29  ;;  %v15034_v29 = vpack.c.bf16 %v4622_v49, %v4615_v21  ;;  %v19487_v21 = vld [vmem:[#allocation3 + $0x8] sm:$0xff]  ;;  %v19489_v49 = vld [vmem:[#allocation3 + $0x10] sm:$0xff] }
 0x562   : > { %v5537_v24 = vand.u32 4294901760, %v19487_v21 }
 0x564   : > { %v19510_v2 = vpack.c.bf16 %v5537_v24, %v5534_v60 }
 0x565   : > { %15009 = vmatpush3.bf16.xpose.msra.mxu1 %v18998_v56 }
 0x566   : > { %15011 = vmatprep.subr.bf16.mxu1 %v19020_v50  ;;  %15095 = vmatprep.subr.bf16.mxu0 %v19510_v2 }
 0x567   : > { %15097 = vmatpush3.bf16.msra.mxu0 %v19510_v2 }
 0x56d   : > { %15013 = vmatpush3.bf16.xpose.msra.mxu1 %v19020_v50 }
 0x56e   : > { %15015 = vmatprep.subr.bf16.mxu1 %v19048_v39 }
 0x575   : > { %15017 = vmatpush3.bf16.xpose.msra.mxu1 %v19048_v39 }
 0x576   : > { %15019 = vmatprep.subr.bf16.mxu1 %v19081_v38 }
 0x57d   : > { %15021 = vmatpush3.bf16.xpose.msra.mxu1 %v19081_v38 }
 0x57e   : > { %15023 = vmatprep.subr.bf16.mxu1 %v19101_v20 }
 0x585   : > { %15025 = vmatpush3.bf16.xpose.msra.mxu1 %v19101_v20 }
 0x586   : > { %15027 = vmatprep.subr.bf16.mxu1 %v19175_v3 }
 0x58d   : > { %15029 = vmatpush3.bf16.xpose.msra.mxu1 %v19175_v3 }
 0x58e   : > { %15031 = vmatprep.subr.bf16.mxu1 %v15030_v54 }
 0x594   : > { %13171 = vmatmul.mubr.f32.vlgmr.msra.gmra.mrb[0].mxu1 %v4530_v11  ;;  %v19497_v11 = vld [vmem:[#allocation3 + $0x20] sm:$0xff] }
 0x595   : > { %13173 = vmatprep.mubr.f32.mxu1 %v22520_v36  ;;  %15033 = vmatpush3.bf16.xpose.msra.mxu1 %v15030_v54  ;;  %v5546_v10 = vand.u32 4294901760, %v19497_v11  ;;  %v5558_v54 = vand.u32 4294901760, %v19535_v22  ;;  %v15050_v36 = vpack.c.bf16 %v22529_v55, %v4671_v31  ;;  %v15058_v31 = vpack.c.bf16 %v4706_v35, %v4699_v42 }
 0x596   : > { %15035 = vmatprep.subr.bf16.mxu1 %v15034_v29 }
 0x598   : > { %13174 = vmatmul.mubr.f32.gmra.mrb[2].mxu1 %v22521_v8  ;;  %v22530_v8 = vand.u32 4294901760, %v19392_v63 }
 0x599   : > { %13176 = vmatprep.mubr.f32.mxu1 %v4560_v1  ;;  %v5543_v1 = vand.u32 4294901760, %v19494_v28 }
 0x59a   : > { %v15054_v37 = vpack.c.bf16 %v22530_v8, %v4685_v14 }
 0x59c   : > { %13177 = vmatmul.mubr.f32.gmra.mrb[4].mxu1 %v22524_v19 }
 0x59d   : > { %13179 = vmatprep.mubr.f32.mxu1 %v4580_v48  ;;  %15037 = vmatpush3.bf16.xpose.msra.mxu1 %v15034_v29  ;;  %v5540_v48 = vand.u32 4294901760, %v19489_v49  ;;  %v5561_v29 = vand.u32 4294901760, %v19537_v25 }
 0x59e   : > { %15039 = vmatprep.subr.bf16.mxu1 %v15038_v53 }
 0x59f   : > { %v19518_v32 = vpack.c.bf16 %v5543_v1, %v5540_v48  ;;  %v19559_v62 = vpack.c.bf16 %v5561_v29, %v5558_v54 }
 0x5a0   : > { %13180 = vmatmul.mubr.f32.gmra.mrb[6].mxu1 %v4590_v17  ;;  %v5549_v17 = vand.u32 4294901760, %v19499_v40 }
 0x5a1   : > { %13214 = vmatprep.mubr.f32.mxu1 %v19238_v27  ;;  %15099 = vmatprep.subr.bf16.mxu0 %v19518_v32 }
 0x5a2   : > { %v19531_v45 = vpack.c.bf16 %v5549_v17, %v5546_v10  ;;  %15101 = vmatpush3.bf16.msra.mxu0 %v19518_v32 }
 0x5a4   : > { %15103 = vmatprep.subr.bf16.mxu0 %v19531_v45 }
 0x5a5   : > { %15041 = vmatpush3.bf16.xpose.msra.mxu1 %v15038_v53 }
 0x5a6   : > { %15043 = vmatprep.subr.bf16.mxu1 %v15042_v12  ;;  %15105 = vmatpush3.bf16.msra.mxu0 %v19531_v45 }
 0x5a7   : > { %15107 = vmatprep.subr.bf16.mxu0 %v19549_v16 }
 0x5aa   : > { %15109 = vmatpush3.bf16.msra.mxu0 %v19549_v16 }
 0x5ab   : > { %15111 = vmatprep.subr.bf16.mxu0 %v19559_v62 }
 0x5ad   : > { %15045 = vmatpush3.bf16.xpose.msra.mxu1 %v15042_v12 }
 0x5ae   : > { %15047 = vmatprep.subr.bf16.mxu1 %v15046_v59  ;;  %15113 = vmatpush3.bf16.msra.mxu0 %v19559_v62 }
 0x5b5   : > { %15049 = vmatpush3.bf16.xpose.msra.mxu1 %v15046_v59 }
 0x5b6   : > { %15051 = vmatprep.subr.bf16.mxu1 %v15050_v36 }
 0x5bd   : > { %15053 = vmatpush3.bf16.xpose.msra.mxu1 %v15050_v36 }
 0x5be   : > { %15055 = vmatprep.subr.bf16.mxu1 %v15054_v37 }
 0x5c5   : > { %15057 = vmatpush3.bf16.xpose.msra.mxu1 %v15054_v37 }
 0x5c6   : > { %15059 = vmatprep.subr.bf16.mxu1 %v15058_v31 }
 0x5cd   : > { %15061 = vmatpush3.bf16.xpose.msra.mxu1 %v15058_v31 }
 0x5ce   : > { %15063 = vmatprep.subr.bf16.mxu1 %v18968_v26 }
 0x5d4   : > { %13215 = vmatmul.mubr.f32.vlgmr.msra.gmra.mrb[0].mxu1 %v19229_v33 }
 0x5d5   : > { %13217 = vmatprep.mubr.f32.mxu1 %v19255_v61  ;;  %15065 = vmatpush3.bf16.xpose.msra.mxu1 %v18968_v26  ;;  %v4358_v26 = vld [vmem:[#allocation3 + $0x50] sm:$0xff] }
 0x5d6   : > { %15067 = vmatprep.subr.bf16.mxu1 %v18974_v44 }
 0x5d8   : > { %13218 = vmatmul.mubr.f32.gmra.mrb[2].mxu1 %v19249_v46 }
 0x5d9   : > { %13220 = vmatprep.mubr.f32.mxu1 %v19283_v43 }
 0x5dc   : > { %13221 = vmatmul.mubr.f32.gmra.mrb[4].mxu1 %v19275_v4 }
 0x5dd   : > { %13223 = vmatprep.mubr.f32.mxu1 %v19315_v6  ;;  %15069 = vmatpush3.bf16.xpose.msra.mxu1 %v18974_v44  ;;  %v4359_v44 = vld [vmem:[#allocation3 + $0x58] sm:$0xff] }
 0x5de   : > { %15071 = vmatprep.subr.bf16.mxu1 %v18998_v56 }
 0x5e0   : > { %13224 = vmatmul.mubr.f32.gmra.mrb[6].mxu1 %v19310_v51 }
 0x5e1   : > { %13258 = vmatprep.mubr.f32.mxu1 %v19238_v27  ;;  %v4363_v27 = vld [vmem:[#allocation3 + $0x78] sm:$0xff] }
 0x5e5   : > { %15073 = vmatpush3.bf16.xpose.msra.mxu1 %v18998_v56  ;;  %v5564_v56 = vand.u32 4294901760, %v4358_v26 }
 0x5e6   : > { %15075 = vmatprep.subr.bf16.mxu1 %v19020_v50 }
 0x5e7   : > { %v19640_v35 = vsub.f32 %v4358_v26, %v5564_v56 }
 0x5e9   : > { %v22112_v53 = vand.u32 4294901760, %v19640_v35 }
 0x5ed   : > { %15077 = vmatpush3.bf16.xpose.msra.mxu1 %v19020_v50  ;;  %v5567_v50 = vand.u32 4294901760, %v4359_v44 }
 0x5ee   : > { %15079 = vmatprep.subr.bf16.mxu1 %v19048_v39 }
 0x5ef   : > { %v19642_v9 = vsub.f32 %v4359_v44, %v5567_v50 }
 0x5f1   : > { %v22111_v19 = vand.u32 4294901760, %v19642_v9 }
 0x5f5   : > { %15081 = vmatpush3.bf16.xpose.msra.mxu1 %v19048_v39  ;;  %v19607_v39 = vpack.c.bf16 %v5567_v50, %v5564_v56 }
 0x5f6   : > { %15083 = vmatprep.subr.bf16.mxu1 %v19081_v38 }
 0x5f7   : > { %15115 = vmatprep.subr.bf16.mxu0 %v19607_v39 }
 0x5f8   : > { %15117 = vmatpush3.bf16.msra.mxu0 %v19607_v39 }
 0x5fd   : > { %15085 = vmatpush3.bf16.xpose.msra.mxu1 %v19081_v38  ;;  %v4360_v38 = vld [vmem:[#allocation3 + $0x60] sm:$0xff] }
 0x5fe   : > { %15087 = vmatprep.subr.bf16.mxu1 %v19101_v20 }
 0x605   : > { %15089 = vmatpush3.bf16.xpose.msra.mxu1 %v19101_v20  ;;  %v4361_v20 = vld [vmem:[#allocation3 + $0x68] sm:$0xff] }
 0x606   : > { %15091 = vmatprep.subr.bf16.mxu1 %v19175_v3  ;;  %v5573_v52 = vand.u32 4294901760, %v4361_v20 }
 0x60d   : > { %15093 = vmatpush3.bf16.xpose.msra.mxu1 %v19175_v3  ;;  %v5570_v3 = vand.u32 4294901760, %v4360_v38 }
 0x60f   : > { %v19611_v30 = vpack.c.bf16 %v5573_v52, %v5570_v3 }
 0x611   : > { %15119 = vmatprep.subr.bf16.mxu0 %v19611_v30 }
 0x612   : > { %15121 = vmatpush3.bf16.msra.mxu0 %v19611_v30 }
 0x614   : > { %13259 = vmatmul.mubr.f32.vlgmr.msra.gmra.mrb[0].mxu1 %v19229_v33  ;;  %v4362_v33 = vld [vmem:[#allocation3 + $0x70] sm:$0xff] }
 0x615   : > { %13261 = vmatprep.mubr.f32.mxu1 %v19255_v61  ;;  %v5579_v61 = vand.u32 4294901760, %v4363_v27 }
 0x617   : > { %v19665_v36 = vsub.f32 %v4363_v27, %v5579_v61  ;;  %v19688_v27 = vpack.c.bf16 %v19642_v9, %v19640_v35 }
 0x618   : > { %13262 = vmatmul.mubr.f32.gmra.mrb[2].mxu1 %v19249_v46  ;;  %v5576_v46 = vand.u32 4294901760, %v4362_v33 }
 0x619   : > { %13264 = vmatprep.mubr.f32.mxu1 %v19283_v43  ;;  %22531 = vst [vmem:[#allocation98_spill] sm:$0xff] %v19665_v36  ;;  %v22107_v26 = vand.u32 4294901760, %v19665_v36 }
 0x61a   : > { %v19620_v43 = vpack.c.bf16 %v5579_v61, %v5576_v46  ;;  %v19663_v55 = vsub.f32 %v4362_v33, %v5576_v46 }
 0x61b   : > { %v5803_v50 = vsub.f32 %v19665_v36, %v22107_v26 }
 0x61c   : > { %13265 = vmatmul.mubr.f32.gmra.mrb[4].mxu1 %v19275_v4  ;;  %v19618_v4 = vsub.f32 %v19485_v34, %v5534_v60  ;;  %15123 = vmatprep.subr.bf16.mxu0 %v19620_v43  ;;  %v5768_v34 = vsub.f32 %v19640_v35, %v22112_v53  ;;  %v19652_v60 = vsub.f32 %v4360_v38, %v5570_v3  ;;  %v22108_v31 = vand.u32 4294901760, %v19663_v55 }
 0x61d   : > { %13267 = vmatprep.mubr.f32.mxu1 %v19315_v6  ;;  %v19626_v6 = vsub.f32 %v19487_v21, %v5537_v24  ;;  %15125 = vmatpush3.bf16.msra.mxu0 %v19620_v43  ;;  %v5775_v21 = vsub.f32 %v19642_v9, %v22111_v19  ;;  %v19654_v24 = vsub.f32 %v4361_v20, %v5573_v52  ;;  %v5804_v3 = vand.u32 4294901760, %v5803_v50 }
 0x61e   : > { %v5769_v57 = vand.u32 4294901760, %v5768_v34  ;;  %v22110_v12 = vand.u32 4294901760, %v19652_v60  ;;  %v5796_v56 = vsub.f32 %v19663_v55, %v22108_v31  ;;  %v19696_v61 = vpack.c.bf16 %v19665_v36, %v19663_v55 }
 0x61f   : > { %v22113_v47 = vand.u32 4294901760, %v19626_v6  ;;  %v5776_v41 = vand.u32 4294901760, %v5775_v21  ;;  %v22109_v7 = vand.u32 4294901760, %v19654_v24  ;;  %v19684_v33 = vpack.c.bf16 %v19626_v6, %v19618_v4 }
 0x620   : > { %13268 = vmatmul.mubr.f32.gmra.mrb[6].mxu1 %v19310_v51  ;;  %v22120_v51 = vand.u32 4294901760, %v19618_v4  ;;  %v5782_v59 = vsub.f32 %v19652_v60, %v22110_v12  ;;  %v5797_v20 = vand.u32 4294901760, %v5796_v56  ;;  %v19692_v46 = vpack.c.bf16 %v19654_v24, %v19652_v60 }
 0x621   : > { %v5705_v63 = vsub.f32 %v19626_v6, %v22113_v47  ;;  %v19658_v5 = vpack.c.bf16 %v5776_v41, %v5769_v57  ;;  %v5789_v8 = vsub.f32 %v19654_v24, %v22109_v7 }
 0x622   : > { %v5698_v23 = vsub.f32 %v19618_v4, %v22120_v51  ;;  %v5783_v37 = vand.u32 4294901760, %v5782_v59  ;;  %v19680_v52 = vpack.c.bf16 %v5804_v3, %v5797_v20 }
 0x623   : > { %v5706_v14 = vand.u32 4294901760, %v5705_v63  ;;  %v5790_v44 = vand.u32 4294901760, %v5789_v8  ;;  %v22114_v63 = vmov 0  }
 0x624   : > { %v5699_v0 = vand.u32 4294901760, %v5698_v23  ;;  %v4328_v23 = vld [vmem:[%s17513_s10] sm:$0xff] }
 0x625   : > { %v19678_v38 = vpack.c.bf16 %v5790_v44, %v5783_v37  ;;  %vm4330_vm1 = vnez %v4328_v23 }
 0x626   : > { %v19637_v42 = vpack.c.bf16 %v5706_v14, %v5699_v0  ;;  %v4329_v0 = vld [vmem:[%s17513_s10 + $0x8] sm:$0xff]  ;;  %v5387_v14 = vsel %vm4330_vm1, 16843009, %v22114_v63  ;;  %s22710_s10 = sld [smem:[#allocation132_spill]] }
 0x627   : > { %vm4331_vm2 = vnez %v4329_v0  ;;  %v5390_v34 = vunpack.c.1.s8 %v5387_v14  ;;  %v5389_v21 = vunpack.c.0.s8 %v5387_v14  ;;  %v5392_v57 = vunpack.c.3.s8 %v5387_v14 }
 0x628   : > { %15127 = vmatprep.subr.bf16.mxu0 %v19637_v42  ;;  %v5388_v41 = vsel %vm4331_vm2, 16843009, %v22114_v63  ;;  %v5391_v44 = vunpack.c.2.s8 %v5387_v14  ;;  %v19705_v14 = vsub.f32 %v19489_v49, %v5540_v48  ;;  %v19718_v49 = vsub.f32 %v19497_v11, %v5546_v10 }
 0x629   : > { %v5399_v59 = vpack.c.b16 %v5390_v34, %v5390_v34  ;;  %v5397_v8 = vpack.c.b16 %v5389_v21, %v5389_v21  ;;  %v5403_v37 = vpack.c.b16 %v5392_v57, %v5392_v57  ;;  %v5394_v56 = vunpack.c.1.s8 %v5388_v41 }
 0x62a   : > { %v5393_v50 = vunpack.c.0.s8 %v5388_v41  ;;  %v5396_v20 = vunpack.c.3.s8 %v5388_v41  ;;  %v5395_v3 = vunpack.c.2.s8 %v5388_v41  ;;  %v5401_v7 = vpack.c.b16 %v5391_v44, %v5391_v44 }
 0x62b   : > { %v5400_v26 = vpack.c.b8 %v5399_v59, %v5399_v59  ;;  %v5398_v23 = vpack.c.b8 %v5397_v8, %v5397_v8  ;;  %v5404_v31 = vpack.c.b8 %v5403_v37, %v5403_v37  ;;  %v5407_v12 = vpack.c.b16 %v5394_v56, %v5394_v56 }
 0x62c   : > { %v5405_v19 = vpack.c.b16 %v5393_v50, %v5393_v50  ;;  %v5411_v0 = vpack.c.b16 %v5396_v20, %v5396_v20  ;;  %v5409_v53 = vpack.c.b16 %v5395_v3, %v5395_v3  ;;  %v5402_v47 = vpack.c.b8 %v5401_v7, %v5401_v7 }
 0x62d   : > { %vm5414_vm3 = vnez %v5400_v26  ;;  %vm5413_vm4 = vnez %v5398_v23  ;;  %vm5416_vm5 = vnez %v5404_v31  ;;  %v5408_v34 = vpack.c.b8 %v5407_v12, %v5407_v12 }
 0x62e   : > { %v5406_v21 = vpack.c.b8 %v5405_v19, %v5405_v19  ;;  %v5412_v57 = vpack.c.b8 %v5411_v0, %v5411_v0  ;;  %v19710_v41 = vsub.f32 %v19494_v28, %v5543_v1  ;;  %v5410_v59 = vpack.c.b8 %v5409_v53, %v5409_v53 }
 0x62f   : > { %v5422_v8 = vsel %vm5414_vm3, 16843009, %v22114_v63  ;;  %v5421_v26 = vsel %vm5413_vm4, 16843009, %v22114_v63  ;;  %v5424_v7 = vsel %vm5416_vm5, 16843009, %v22114_v63  ;;  %vm5415_vm6 = vnez %v5402_v47 }
 0x630   : > { %vm5418_vm7 = vnez %v5408_v34  ;;  %vm5417_vm8 = vnez %v5406_v21  ;;  %vm5420_vm9 = vnez %v5412_v57  ;;  %v22119_v48 = vand.u32 4294901760, %v19705_v14 }
 0x631   : > { %v22118_v28 = vand.u32 4294901760, %v19710_v41  ;;  %v19725_v1 = vsub.f32 %v19499_v40, %v5549_v17  ;;  %v5430_v53 = vunpack.c.0.s8 %v5422_v8  ;;  %v5429_v19 = vunpack.c.0.s8 %v5421_v26 }
 0x632   : > { %vm5419_vm10 = vnez %v5410_v59  ;;  %v5432_v47 = vunpack.c.0.s8 %v5424_v7  ;;  %v5423_v12 = vsel %vm5415_vm6, 16843009, %v22114_v63  ;;  %v5426_v31 = vsel %vm5418_vm7, 16843009, %v22114_v63 }
 0x633   : > { %v5425_v11 = vsel %vm5417_vm8, 16843009, %v22114_v63  ;;  %v5428_v10 = vsel %vm5420_vm9, 16843009, %v22114_v63  ;;  %v22117_v37 = vand.u32 4294901760, %v19718_v49  ;;  %v5712_v40 = vsub.f32 %v19705_v14, %v22119_v48 }
 0x634   : > { %v5427_v44 = vsel %vm5419_vm10, 16843009, %v22114_v63  ;;  %v5719_v17 = vsub.f32 %v19710_v41, %v22118_v28  ;;  %v22116_v56 = vand.u32 4294901760, %v19725_v1  ;;  %vm19740_vm11 = vcmp.ne.s32.totalorder %v5430_v53, 0 }
 0x635   : > { %v22532_v50 = vmov 0  ;;  %v5431_v20 = vunpack.c.0.s8 %v5423_v12  ;;  %v5434_v3 = vunpack.c.0.s8 %v5426_v31  ;;  %v5433_v23 = vunpack.c.0.s8 %v5425_v11 }
 0x636   : > { %v22533_v50 = vsel %vm19740_vm11, 4294967295, %v22532_v50  ;;  %vm19744_vm12 = vcmp.ne.s32.totalorder %v5429_v19, 0  ;;  %v22535_v34 = vmov 0  ;;  %vm19748_vm13 = vcmp.ne.s32.totalorder %v5432_v47, 0 }
 0x637   : > { %22534 = vst [vmem:[#allocation93_spill] sm:$0xff] %v22533_v50  ;;  %v22536_v34 = vsel %vm19744_vm12, 4294967295, %v22535_v34  ;;  %v22538_v21 = vmov 0  ;;  %v5436_v57 = vunpack.c.0.s8 %v5428_v10  ;;  %v19755_v59 = vsub.f32 %v19520_v58, %v5552_v13 }
 0x638   : > { %22537 = vst [vmem:[#allocation100_spill] sm:$0xff] %v22536_v34  ;;  %v22539_v21 = vsel %vm19748_vm13, 4294967295, %v22538_v21  ;;  %v5435_v7 = vunpack.c.0.s8 %v5427_v44  ;;  %v5726_v53 = vsub.f32 %v19718_v49, %v22117_v37  ;;  %v19763_v19 = vsub.f32 %v19522_v18, %v5555_v15 }
 0x639   : > { %22540 = vst [vmem:[#allocation101_spill] sm:$0xff] %v22539_v21  ;;  %v5713_v12 = vand.u32 4294901760, %v5712_v40  ;;  %v5720_v31 = vand.u32 4294901760, %v5719_v17  ;;  %v5733_v58 = vsub.f32 %v19725_v1, %v22116_v56  ;;  %vm19772_vm14 = vcmp.ne.s32.totalorder %v5431_v20, 0 }
 0x63a   : > { %v22542_v11 = vmov 0  ;;  %vm19776_vm15 = vcmp.ne.s32.totalorder %v5434_v3, 0  ;;  %v22545_v10 = vmov 0  ;;  %vm19780_vm1 = vcmp.ne.s32.totalorder %v5433_v23, 0 }
 0x63b   : > { %v22543_v11 = vsel %vm19772_vm14, 4294967295, %v22542_v11  ;;  %v22546_v10 = vsel %vm19776_vm15, 4294967295, %v22545_v10  ;;  %v22548_v18 = vmov 0  ;;  %vm19791_vm2 = vcmp.ne.s32.totalorder %v5436_v57, 0 }
 0x63c   : > { %22544 = vst [vmem:[#allocation95_spill] sm:$0xff] %v22543_v11  ;;  %22547 = vst [vmem:[#allocation96_spill] sm:$0xff] %v22546_v10  ;;  %v22549_v18 = vsel %vm19780_vm1, 4294967295, %v22548_v18  ;;  %v22552_v17 = vmov 0  ;;  %v22121_v20 = vand.u32 4294901760, %v19755_v59  ;;  %vm19799_vm3 = vcmp.ne.s32.totalorder %v5435_v7, 0 }
 0x63d   : > { %22550 = vst [vmem:[#allocation97_spill] sm:$0xff] %v22549_v18  ;;  %v22553_v17 = vsel %vm19791_vm2, 4294967295, %v22552_v17  ;;  %v15130_v56 = vpack.c.bf16 %v5720_v31, %v5713_v12  ;;  %v5734_v37 = vand.u32 4294901760, %v5733_v58 }
 0x63e   : > { %22554 = vst [vmem:[#allocation102_spill] sm:$0xff] %v22553_v17 }
 0x6e7   : > { %v13260_v0 = vpop.f32.mrb[0].mxu1 }
 0x6e8   : > { %v5380_v8 = vmul.f32 0.125, %v13260_v0  ;;  %v5333_v26 = vpop.f32.mrb[1].mxu1 }
 0x6e9   : > { %v5379_v47 = vmul.f32 0.125, %v5333_v26  ;;  %v5727_v26 = vand.u32 4294901760, %v5726_v53  ;;  %v19819_v53 = vsub.f32 %v19535_v22, %v5558_v54  ;;  %v5740_v22 = vsub.f32 %v19755_v59, %v22121_v20 }
 0x6ea   : > { %v19770_v13 = vsel %vm19740_vm11, -1e+09, %v5380_v8  ;;  %v22555_v8 = vmov 0 }
 0x6eb   : > { %22541 = vst [vmem:[#allocation94_spill] sm:$0xff] %v19770_v13  ;;  %v19785_v15 = vand.u32 4294901760, %v19770_v13  ;;  %v19789_v44 = vsel %vm19744_vm12, -1e+09, %v5379_v47  ;;  %v13263_v40 = vpop.f32.mrb[2].mxu1  ;;  %v22556_v8 = vsel %vm19799_vm3, 4294967295, %v22555_v8 }
 0x6ec   : > { %22551 = vst [vmem:[#allocation99_spill] sm:$0xff] %v19789_v44  ;;  %v19797_v3 = vand.u32 4294901760, %v19789_v44  ;;  %v5382_v23 = vmul.f32 0.125, %v13263_v40  ;;  %v5345_v0 = vpop.f32.mrb[3].mxu1  ;;  %22557 = vst [vmem:[#allocation103_spill] sm:$0xff] %v22556_v8  ;;  %v22124_v47 = vand.u32 4294901760, %v19763_v19  ;;  %v19824_v40 = vsub.f32 %v19537_v25, %v5561_v29 }
 0x6ed   : > { %v19806_v57 = vsub.f32 %v19770_v13, %v19785_v15  ;;  %v5381_v63 = vmul.f32 0.125, %v5345_v0  ;;  %v15134_v13 = vpack.c.bf16 %v5734_v37, %v5727_v26 }
 0x6ee   : > { %v19810_v28 = vsub.f32 %v19789_v44, %v19797_v3  ;;  %v19814_v7 = vsel %vm19748_vm13, -1e+09, %v5382_v23  ;;  %v5747_v48 = vsub.f32 %v19763_v19, %v22124_v47  ;;  %v22566_v8 = vand.u32 4294901760, %v19824_v40 }
 0x6ef   : > { %22558 = vst [vmem:[#allocation104_spill] sm:$0xff] %v19814_v7  ;;  %v22127_v12 = vand.u32 4294901760, %v19806_v57  ;;  %v19828_v31 = vand.u32 4294901760, %v19814_v7  ;;  %v19832_v58 = vsel %vm19772_vm14, -1e+09, %v5381_v63  ;;  %v13266_v23 = vpop.f32.mrb[4].mxu1 }
 0x6f0   : > { %22559 = vst [vmem:[#allocation105_spill] sm:$0xff] %v19832_v58  ;;  %v19838_v54 = vand.u32 4294901760, %v19832_v58  ;;  %v5384_v0 = vmul.f32 0.125, %v13266_v23  ;;  %v5357_v25 = vpop.f32.mrb[5].mxu1  ;;  %v22561_v47 = vand.u32 4294901760, %v19810_v28 }
 0x6f1   : > { %v5627_v63 = vsub.f32 %v19806_v57, %v22127_v12  ;;  %v19849_v51 = vsub.f32 %v19814_v7, %v19828_v31  ;;  %v5383_v20 = vmul.f32 0.125, %v5357_v25 }
 0x6f2   : > { %v19853_v23 = vsub.f32 %v19832_v58, %v19838_v54  ;;  %v19857_v29 = vsel %vm19776_vm15, -1e+09, %v5384_v0  ;;  %v5617_v44 = vsub.f32 %v19810_v28, %v22561_v47 }
 0x6f3   : > { %22560 = vst [vmem:[#allocation106_spill] sm:$0xff] %v19857_v29  ;;  %v19864_v11 = vand.u32 4294901760, %v19857_v29  ;;  %v19868_v37 = vsel %vm19780_vm1, -1e+09, %v5383_v20  ;;  %v13269_v26 = vpop.f32.mrb[6].mxu1  ;;  %v22137_v25 = vand.u32 4294901760, %v19849_v51 }
 0x6f4   : > { %22562 = vst [vmem:[#allocation107_spill] sm:$0xff] %v19868_v37  ;;  %v19873_v0 = vand.u32 4294901760, %v19868_v37  ;;  %v5386_v58 = vmul.f32 0.125, %v13269_v26  ;;  %v5369_v10 = vpop.f32.mrb[7].mxu1  ;;  %v5618_v47 = vand.u32 4294901760, %v5617_v44  ;;  %v22142_v12 = vand.u32 4294901760, %v19853_v23 }
 0x6f5   : > { %v5628_v21 = vand.u32 4294901760, %v5627_v63  ;;  %v19878_v34 = vsub.f32 %v19857_v29, %v19864_v11  ;;  %v5385_v20 = vmul.f32 0.125, %v5369_v10  ;;  %v5647_v18 = vsub.f32 %v19849_v51, %v22137_v25 }
 0x6f6   : > { %v19885_v7 = vsub.f32 %v19868_v37, %v19873_v0  ;;  %v19889_v26 = vsel %vm19791_vm2, -1e+09, %v5386_v58  ;;  %13302 = vmatprep.mubr.f32.mxu0 %v5618_v47  ;;  %v5637_v44 = vsub.f32 %v19853_v23, %v22142_v12  ;;  %v5741_v63 = vand.u32 4294901760, %v5740_v22 }
 0x6f7   : > { %22563 = vst [vmem:[#allocation108_spill] sm:$0xff] %v19889_v26  ;;  %v19895_v10 = vand.u32 4294901760, %v19889_v26  ;;  %v19899_v25 = vsel %vm19799_vm3, -1e+09, %v5385_v20  ;;  %13303 = vmatmul.mubr.f32.vlgmr.msra.gmra.mrb[8].mxu0 %v5628_v21  ;;  %v22147_v29 = vand.u32 4294901760, %v19878_v34  ;;  %v5748_v37 = vand.u32 4294901760, %v5747_v48 }
 0x6f8   : > { %22564 = vst [vmem:[#allocation109_spill] sm:$0xff] %v19899_v25  ;;  %v19903_v58 = vand.u32 4294901760, %v19899_v25  ;;  %15129 = vmatpush3.bf16.msra.mxu0 %v19637_v42  ;;  %v5638_v47 = vand.u32 4294901760, %v5637_v44  ;;  %v22152_v12 = vand.u32 4294901760, %v19885_v7  ;;  %v22565_v22 = vand.u32 4294901760, %v19819_v53 }
 0x6f9   : > { %v19912_v20 = vsub.f32 %v19889_v26, %v19895_v10  ;;  %15131 = vmatprep.subr.bf16.mxu0 %v15130_v56  ;;  %v5648_v21 = vand.u32 4294901760, %v5647_v18  ;;  %v5667_v48 = vsub.f32 %v19878_v34, %v22147_v29  ;;  %v5761_v42 = vsub.f32 %v19824_v40, %v22566_v8 }
 0x6fa   : > { %v5754_v17 = vsub.f32 %v19819_v53, %v22565_v22  ;;  %v19922_v44 = vsub.f32 %v19899_v25, %v19903_v58  ;;  %13305 = vmatprep.mubr.f32.mxu0 %v5638_v47  ;;  %v5657_v22 = vsub.f32 %v19885_v7, %v22152_v12  ;;  %v15138_v50 = vpack.c.bf16 %v5748_v37, %v5741_v63  ;;  %v6548_v37 = vpop.permute.xlu0 %6547 }
 0x6fb   : > { %13306 = vmatmul.mubr.f32.gmra.mrb[10].mxu0 %v5648_v21  ;;  %v22161_v18 = vand.u32 4294901760, %v19912_v20  ;;  %v5668_v36 = vand.u32 4294901760, %v5667_v48  ;;  %v5762_v47 = vand.u32 4294901760, %v5761_v42 }
 0x6fc   : > { %15133 = vmatpush3.bf16.msra.mxu0 %v15130_v56  ;;  %v5658_v26 = vand.u32 4294901760, %v5657_v22  ;;  %v22162_v29 = vand.u32 4294901760, %v19922_v44  ;;  %v5755_v25 = vand.u32 4294901760, %v5754_v17 }
 0x6fd   : > { %15135 = vmatprep.subr.bf16.mxu0 %v15134_v13  ;;  %v5687_v8 = vsub.f32 %v19912_v20, %v22161_v18 }
 0x6fe   : > { %13308 = vmatprep.mubr.f32.mxu0 %v5658_v26  ;;  %v5677_v21 = vsub.f32 %v19922_v44, %v22162_v29  ;;  %v15142_v12 = vpack.c.bf16 %v5762_v47, %v5755_v25  ;;  %v6550_v17 = vpop.permute.xlu0 %6549  ;;  %v19938_v26 = vsel %vm4364_vm0, %v6548_v37, 0 }
 0x6ff   : > { %13309 = vmatmul.mubr.f32.gmra.mrb[12].mxu0 %v5668_v36  ;;  %v5688_v22 = vand.u32 4294901760, %v5687_v8  ;;  %v19941_v36 = vsel %vm4364_vm0, %v6550_v17, 0 }
 0x700   : > { %15137 = vmatpush3.bf16.msra.mxu0 %v15134_v13  ;;  %v5678_v56 = vand.u32 4294901760, %v5677_v21  ;;  %v6552_v13 = vpop.permute.xlu1 %6551  ;;  %v22157_v25 = vand.u32 4294901760, %v19941_v36 }
 0x701   : > { %15139 = vmatprep.subr.bf16.mxu0 %v15138_v50  ;;  %v19960_v48 = vsel %vm4364_vm0, %v6552_v13, 0 }
 0x702   : > { %13311 = vmatprep.mubr.f32.mxu0 %v5678_v56  ;;  %v22155_v8 = vand.u32 4294901760, %v19960_v48 }
 0x703   : > { %13312 = vmatmul.mubr.f32.gmra.mrb[14].mxu0 %v5688_v22  ;;  %v15166_v22 = vpack.c.bf16 %v19725_v1, %v19718_v49 }
 0x704   : > { %15141 = vmatpush3.bf16.msra.mxu0 %v15138_v50  ;;  %13346 = vmatprep.mubr.f32.mxu0 %v19797_v3  ;;  %v22160_v50 = vand.u32 4294901760, %v19938_v26  ;;  %v6554_v63 = vpop.permute.xlu1 %6553  ;;  %v19987_v37 = vsub.f32 %v19960_v48, %v22155_v8 }
 0x705   : > { %15143 = vmatprep.subr.bf16.mxu0 %v15142_v12  ;;  %v19963_v42 = vsel %vm4364_vm0, %v6554_v63, 0 }
 0x706   : > { %v22156_v21 = vand.u32 4294901760, %v19963_v42  ;;  %v22159_v13 = vand.u32 4294901760, %v19987_v37 }
 0x708   : > { %15145 = vmatpush3.bf16.msra.mxu0 %v15142_v12  ;;  %v19952_v12 = vsub.f32 %v19938_v26, %v22160_v50  ;;  %v19992_v17 = vsub.f32 %v19963_v42, %v22156_v21 }
 0x709   : > { %15147 = vmatprep.subr.bf16.mxu0 %v19658_v5 }
 0x70a   : > { %v22154_v47 = vand.u32 4294901760, %v19952_v12  ;;  %v22158_v63 = vand.u32 4294901760, %v19992_v17 }
 0x70c   : > { %15149 = vmatpush3.bf16.msra.mxu0 %v19658_v5  ;;  %v19957_v5 = vsub.f32 %v19941_v36, %v22157_v25  ;;  %v15174_v25 = vpack.c.bf16 %v19824_v40, %v19819_v53 }
 0x70d   : > { %15151 = vmatprep.subr.bf16.mxu0 %v19678_v38 }
 0x70e   : > { %v22153_v56 = vand.u32 4294901760, %v19957_v5 }
 0x710   : > { %15153 = vmatpush3.bf16.msra.mxu0 %v19678_v38  ;;  %v15162_v38 = vpack.c.bf16 %v19710_v41, %v19705_v14 }
 0x711   : > { %15155 = vmatprep.subr.bf16.mxu0 %v19680_v52 }
 0x714   : > { %15157 = vmatpush3.bf16.msra.mxu0 %v19680_v52  ;;  %v19980_v52 = vpack.c.bf16 %v22153_v56, %v22154_v47  ;;  %v6558_v56 = vpop.permute.xlu1 %6557  ;;  %v6556_v47 = vpop.permute.xlu0 %6555 }
 0x715   : > { %15159 = vmatprep.subr.bf16.mxu0 %v19684_v33  ;;  %v20001_v8 = vsel %vm4364_vm0, %v6558_v56, 0  ;;  %v20004_v21 = vsel %vm4364_vm0, %v6556_v47, 0 }
 0x716   : > { %22567 = vst [vmem:[#allocation110_spill] sm:$0xff] %v19980_v52  ;;  %v22163_v56 = vand.u32 4294901760, %v20001_v8  ;;  %v22165_v47 = vand.u32 4294901760, %v20004_v21 }
 0x717   : > { %13347 = vmatmul.mubr.f32.vlgmr.msra.gmra.mrb[8].mxu0 %v19785_v15 }
 0x718   : > { %13349 = vmatprep.mubr.f32.mxu0 %v19838_v54  ;;  %15161 = vmatpush3.bf16.msra.mxu0 %v19684_v33  ;;  %v15170_v33 = vpack.c.bf16 %v19763_v19, %v19755_v59  ;;  %v6560_v50 = vpop.permute.xlu0 %6559 }
 0x719   : > { %15163 = vmatprep.subr.bf16.mxu0 %v15162_v38 }
 0x71b   : > { %13350 = vmatmul.mubr.f32.gmra.mrb[10].mxu0 %v19828_v31 }
 0x71c   : > { %13352 = vmatprep.mubr.f32.mxu0 %v19873_v0  ;;  %15165 = vmatpush3.bf16.msra.mxu0 %v15162_v38  ;;  %v20012_v38 = vpack.c.bf16 %v22158_v63, %v22159_v13  ;;  %v20028_v63 = vsub.f32 %v20004_v21, %v22165_v47  ;;  %v6562_v13 = vpop.permute.xlu1 %6561 }
 0x71d   : > { %15167 = vmatprep.subr.bf16.mxu0 %v15166_v22  ;;  %v20031_v18 = vsel %vm4364_vm0, %v6562_v13, 0 }
 0x71e   : > { %22568 = vst [vmem:[#allocation111_spill] sm:$0xff] %v20012_v38  ;;  %22570 = vst [vmem:[#allocation113_spill] sm:$0xff] %v20028_v63  ;;  %v22171_v38 = vand.u32 4294901760, %v20031_v18 }
 0x71f   : > { %13353 = vmatmul.mubr.f32.gmra.mrb[12].mxu0 %v19864_v11 }
 0x720   : > { %13355 = vmatprep.mubr.f32.mxu0 %v19903_v58  ;;  %15169 = vmatpush3.bf16.msra.mxu0 %v15166_v22  ;;  %v20023_v22 = vsub.f32 %v20001_v8, %v22163_v56  ;;  %v22170_v56 = vand.u32 4294901760, %v20028_v63  ;;  %v6566_v52 = vpop.permute.xlu1 %6565 }
 0x721   : > { %15171 = vmatprep.subr.bf16.mxu0 %v15170_v33  ;;  %v20060_v63 = vsel %vm4364_vm0, %v6566_v52, 0 }
 0x722   : > { %22569 = vst [vmem:[#allocation112_spill] sm:$0xff] %v20023_v22  ;;  %v22169_v29 = vand.u32 4294901760, %v20023_v22 }
 0x723   : > { %13356 = vmatmul.mubr.f32.gmra.mrb[14].mxu0 %v19895_v10 }
 0x724   : > { %15173 = vmatpush3.bf16.msra.mxu0 %v15170_v33  ;;  %13390 = vmatprep.mubr.f32.mxu0 %v19810_v28  ;;  %v20034_v33 = vsel %vm4364_vm0, %v6560_v50, 0  ;;  %v20046_v13 = vpack.c.bf16 %v22169_v29, %v22170_v56  ;;  %v20052_v50 = vsub.f32 %v20031_v18, %v22171_v38  ;;  %v6570_v22 = vpop.permute.xlu1 %6569 }
 0x725   : > { %15175 = vmatprep.subr.bf16.mxu0 %v15174_v25  ;;  %v22173_v47 = vand.u32 4294901760, %v20034_v33 }
 0x726   : > { %22571 = vst [vmem:[#allocation114_spill] sm:$0xff] %v20046_v13  ;;  %22572 = vst [vmem:[#allocation115_spill] sm:$0xff] %v20052_v50  ;;  %v22178_v56 = vand.u32 4294901760, %v20052_v50  ;;  %v22180_v13 = vand.u32 4294901760, %v20060_v63 }
 0x728   : > { %15177 = vmatpush3.bf16.msra.mxu0 %v15174_v25  ;;  %v20057_v25 = vsub.f32 %v20034_v33, %v22173_v47 }
 0x729   : > { %15179 = vmatprep.subr.bf16.mxu0 %v19688_v27 }
 0x72a   : > { %22573 = vst [vmem:[#allocation116_spill] sm:$0xff] %v20057_v25  ;;  %v22179_v38 = vand.u32 4294901760, %v20057_v25  ;;  %v20090_v25 = vsel %vm4364_vm0, %v6570_v22, 0 }
 0x72c   : > { %15181 = vmatpush3.bf16.msra.mxu0 %v19688_v27  ;;  %v6564_v27 = vpop.permute.xlu0 %6563  ;;  %v20076_v52 = vpack.c.bf16 %v22178_v56, %v22179_v38 }
 0x72d   : > { %15183 = vmatprep.subr.bf16.mxu0 %v19692_v46  ;;  %v20063_v29 = vsel %vm4364_vm0, %v6564_v27, 0 }
 0x72e   : > { %v22181_v47 = vand.u32 4294901760, %v20063_v29  ;;  %22574 = vst [vmem:[#allocation117_spill] sm:$0xff] %v20076_v52 }
 0x730   : > { %15185 = vmatpush3.bf16.msra.mxu0 %v19692_v46  ;;  %v20082_v46 = vsub.f32 %v20060_v63, %v22180_v13  ;;  %v20087_v27 = vsub.f32 %v20063_v29, %v22181_v47  ;;  %v22187_v47 = vand.u32 4294901760, %v20090_v25 }
 0x731   : > { %15187 = vmatprep.subr.bf16.mxu0 %v19696_v61 }
 0x732   : > { %v22185_v38 = vand.u32 4294901760, %v20082_v46  ;;  %v22186_v13 = vand.u32 4294901760, %v20087_v27  ;;  %v20116_v52 = vsub.f32 %v20090_v25, %v22187_v47  ;;  %v22578_v47 = vand.u32 4294901760, %v19810_v28 }
 0x733   : > { %v22580_v28 = vand.u32 4294901760, %v19618_v4  ;;  %v22586_v4 = vand.u32 4294901760, %v19718_v49  ;;  %v22593_v49 = vand.u32 4294901760, %v19922_v44 }
 0x734   : > { %15189 = vmatpush3.bf16.msra.mxu0 %v19696_v61  ;;  %v6568_v61 = vpop.permute.xlu0 %6567  ;;  %22576 = vst [vmem:[#allocation119_spill] sm:$0xff] %v20116_v52 }
 0x735   : > { %15191 = vmatprep.subr.bf16.mxu0 %v19510_v2  ;;  %v20093_v56 = vsel %vm4364_vm0, %v6568_v61, 0  ;;  %v20110_v61 = vpack.c.bf16 %v22185_v38, %v22186_v13  ;;  %v22189_v38 = vand.u32 4294901760, %v20116_v52  ;;  %v22584_v52 = vand.u32 4294901760, %v19806_v57 }
 0x736   : > { %v22188_v22 = vand.u32 4294901760, %v20093_v56 }
 0x737   : > { %13391 = vmatmul.mubr.f32.vlgmr.msra.gmra.mrb[8].mxu0 %v19806_v57  ;;  %22575 = vst [vmem:[#allocation118_spill] sm:$0xff] %v20110_v61  ;;  %v22591_v57 = vand.u32 4294901760, %v19763_v19 }
 0x738   : > { %13393 = vmatprep.mubr.f32.mxu0 %v19853_v23  ;;  %15193 = vmatpush3.bf16.msra.mxu0 %v19510_v2  ;;  %v20121_v50 = vsub.f32 %v20093_v56, %v22188_v22 }
 0x739   : > { %15195 = vmatprep.subr.bf16.mxu0 %v19518_v32 }
 0x73a   : > { %22577 = vst [vmem:[#allocation120_spill] sm:$0xff] %v20121_v50  ;;  %v22190_v13 = vand.u32 4294901760, %v20121_v50  ;;  %v22585_v50 = vand.u32 4294901760, %v19853_v23 }
 0x73b   : > { %13394 = vmatmul.mubr.f32.gmra.mrb[10].mxu0 %v19849_v51 }
 0x73c   : > { %13396 = vmatprep.mubr.f32.mxu0 %v19885_v7  ;;  %15197 = vmatpush3.bf16.msra.mxu0 %v19518_v32  ;;  %v20137_v22 = vpack.c.bf16 %v22189_v38, %v22190_v13  ;;  %v22582_v13 = vand.u32 4294901760, %v19705_v14  ;;  %v22589_v14 = vand.u32 4294901760, %v19885_v7 }
 0x73d   : > { %15199 = vmatprep.subr.bf16.mxu0 %v19531_v45 }
 0x73e   : > { %22579 = vst [vmem:[#allocation121_spill] sm:$0xff] %v20137_v22  ;;  %v22583_v22 = vand.u32 4294901760, %v19710_v41  ;;  %v22590_v41 = vand.u32 4294901760, %v19755_v59  ;;  %v22598_v59 = vand.u32 4294901760, %v19642_v9  ;;  %v22605_v9 = vand.u32 4294901760, %v19941_v36 }
 0x73f   : > { %13397 = vmatmul.mubr.f32.gmra.mrb[12].mxu0 %v19878_v34 }
 0x740   : > { %13399 = vmatprep.mubr.f32.mxu0 %v19922_v44  ;;  %15201 = vmatpush3.bf16.msra.mxu0 %v19531_v45  ;;  %v15226_v61 = vpack.c.bf16 %v22583_v22, %v22582_v13  ;;  %v15234_v23 = vpack.c.bf16 %v22591_v57, %v22590_v41  ;;  %v22596_v13 = vand.u32 4294901760, %v19912_v20  ;;  %v22599_v44 = vand.u32 4294901760, %v19652_v60 }
 0x741   : > { %15203 = vmatprep.subr.bf16.mxu0 %v19549_v16 }
 0x743   : > { %13400 = vmatmul.mubr.f32.gmra.mrb[14].mxu0 %v19912_v20  ;;  %v22601_v20 = vand.u32 4294901760, %v19663_v55 }
 0x744   : > { %15205 = vmatpush3.bf16.msra.mxu0 %v19549_v16  ;;  %13434 = vmatprep.mubr.f32.mxu0 %v22578_v47  ;;  %v22581_v47 = vand.u32 4294901760, %v19626_v6  ;;  %v22587_v6 = vand.u32 4294901760, %v19725_v1  ;;  %v22595_v1 = vand.u32 4294901760, %v19824_v40 }
 0x745   : > { %15207 = vmatprep.subr.bf16.mxu0 %v19559_v62 }
 0x746   : > { %v15222_v38 = vpack.c.bf16 %v22581_v47, %v22580_v28  ;;  %v15230_v28 = vpack.c.bf16 %v22587_v6, %v22586_v4  ;;  %v22588_v47 = vand.u32 4294901760, %v19849_v51  ;;  %v22594_v51 = vand.u32 4294901760, %v19819_v53 }
 0x747   : > { %v22600_v53 = vand.u32 4294901760, %v19654_v24  ;;  %v22607_v24 = vand.u32 4294901760, %v19963_v42  ;;  %v6574_v42 = vpop.permute.xlu1 %6573 }
 0x748   : > { %15209 = vmatpush3.bf16.msra.mxu0 %v19559_v62  ;;  %v15238_v7 = vpack.c.bf16 %v22595_v1, %v22594_v51 }
 0x749   : > { %15211 = vmatprep.subr.bf16.mxu0 %v19607_v39  ;;  %v15246_v40 = vpack.c.bf16 %v22600_v53, %v22599_v44  ;;  %v22617_v53 = vand.u32 4294901760, %v19957_v5 }
 0x74c   : > { %15213 = vmatpush3.bf16.msra.mxu0 %v19607_v39 }
 0x74d   : > { %15215 = vmatprep.subr.bf16.mxu0 %v19611_v30 }
 0x750   : > { %15217 = vmatpush3.bf16.msra.mxu0 %v19611_v30 }
 0x751   : > { %15219 = vmatprep.subr.bf16.mxu0 %v19620_v43 }
 0x754   : > { %15221 = vmatpush3.bf16.msra.mxu0 %v19620_v43 }
 0x755   : > { %15223 = vmatprep.subr.bf16.mxu0 %v15222_v38 }
 0x757   : > { %13435 = vmatmul.mubr.f32.vlgmr.msra.gmra.mrb[8].mxu0 %v22584_v52 }
 0x758   : > { %13437 = vmatprep.mubr.f32.mxu0 %v22585_v50  ;;  %15225 = vmatpush3.bf16.msra.mxu0 %v15222_v38  ;;  %v22592_v38 = vand.u32 4294901760, %v19878_v34  ;;  %v22597_v34 = vand.u32 4294901760, %v19640_v35  ;;  %v22602_v50 = vld [vmem:[#allocation98_spill] sm:$0xff]  ;;  %v6572_v35 = vpop.permute.xlu0 %6571 }
 0x759   : > { %15227 = vmatprep.subr.bf16.mxu0 %v15226_v61  ;;  %v22603_v52 = vand.u32 4294901760, %v22602_v50 }
 0x75a   : > { %v15242_v19 = vpack.c.bf16 %v22598_v59, %v22597_v34 }
 0x75b   : > { %13438 = vmatmul.mubr.f32.gmra.mrb[10].mxu0 %v22588_v47  ;;  %v15250_v22 = vpack.c.bf16 %v22603_v52, %v22601_v20 }
 0x75c   : > { %13440 = vmatprep.mubr.f32.mxu0 %v22589_v14  ;;  %15229 = vmatpush3.bf16.msra.mxu0 %v15226_v61  ;;  %v20281_v61 = vsel %vm4364_vm0, %v6574_v42, 0  ;;  %v22619_v42 = vand.u32 4294901760, %v19992_v17 }
 0x75d   : > { %15231 = vmatprep.subr.bf16.mxu0 %v15230_v28  ;;  %v6667_v4 = vand.u32 4294901760, %v20281_v61 }
 0x75f   : > { %13441 = vmatmul.mubr.f32.gmra.mrb[12].mxu0 %v22592_v38 }
 0x760   : > { %13443 = vmatprep.mubr.f32.mxu0 %v22593_v49  ;;  %15233 = vmatpush3.bf16.msra.mxu0 %v15230_v28 }
 0x761   : > { %15235 = vmatprep.subr.bf16.mxu0 %v15234_v23 }
 0x763   : > { %13444 = vmatmul.mubr.f32.gmra.mrb[14].mxu0 %v22596_v13 }
 0x764   : > { %15237 = vmatpush3.bf16.msra.mxu0 %v15234_v23  ;;  %13478 = vmatprep.mubr.f32.mxu0 %v19797_v3 }
 0x765   : > { %15239 = vmatprep.subr.bf16.mxu0 %v15238_v7 }
 0x768   : > { %15241 = vmatpush3.bf16.msra.mxu0 %v15238_v7 }
 0x769   : > { %15243 = vmatprep.subr.bf16.mxu0 %v15242_v19 }
 0x76c   : > { %15245 = vmatpush3.bf16.msra.mxu0 %v15242_v19  ;;  %v22616_v19 = vand.u32 4294901760, %v19952_v12 }
 0x76d   : > { %15247 = vmatprep.subr.bf16.mxu0 %v15246_v40 }
 0x76e   : > { %v6792_v44 = vsub.f32 %v19952_v12, %v22616_v19 }
 0x770   : > { %15249 = vmatpush3.bf16.msra.mxu0 %v15246_v40  ;;  %v6799_v40 = vsub.f32 %v19957_v5, %v22617_v53 }
 0x771   : > { %15251 = vmatprep.subr.bf16.mxu0 %v15250_v22 }
 0x774   : > { %15253 = vmatpush3.bf16.msra.mxu0 %v15250_v22 }
 0x775   : > { %15255 = vmatprep.subr.bf16.mxu0 %v19510_v2 }
 0x777   : > { %13479 = vmatmul.mubr.f32.vlgmr.msra.gmra.mrb[8].mxu0 %v19785_v15 }
 0x778   : > { %13481 = vmatprep.mubr.f32.mxu0 %v19838_v54  ;;  %15257 = vmatpush3.bf16.msra.mxu0 %v19510_v2  ;;  %v6576_v2 = vpop.permute.xlu0 %6575 }
 0x779   : > { %15259 = vmatprep.subr.bf16.mxu0 %v19518_v32  ;;  %v20300_v14 = vsel %vm4364_vm0, %v6576_v2, 0 }
 0x77a   : > { %v6670_v38 = vand.u32 4294901760, %v20300_v14 }
 0x77b   : > { %13482 = vmatmul.mubr.f32.gmra.mrb[10].mxu0 %v19828_v31 }
 0x77c   : > { %13484 = vmatprep.mubr.f32.mxu0 %v19873_v0  ;;  %15261 = vmatpush3.bf16.msra.mxu0 %v19518_v32  ;;  %v6516_v32 = vpop.permute.xlu0 %6515 }
 0x77d   : > { %15263 = vmatprep.subr.bf16.mxu0 %v19531_v45 }
 0x77f   : > { %13485 = vmatmul.mubr.f32.gmra.mrb[12].mxu0 %v19864_v11 }
 0x780   : > { %13487 = vmatprep.mubr.f32.mxu0 %v19903_v58  ;;  %15265 = vmatpush3.bf16.msra.mxu0 %v19531_v45  ;;  %v6579_v45 = vsel %vm4364_vm0, %v6516_v32, 0 }
 0x781   : > { %15267 = vmatprep.subr.bf16.mxu0 %v19549_v16 }
 0x783   : > { %13488 = vmatmul.mubr.f32.gmra.mrb[14].mxu0 %v19895_v10 }
 0x784   : > { %15269 = vmatpush3.bf16.msra.mxu0 %v19549_v16  ;;  %13522 = vmatprep.mubr.f32.mxu0 %v19797_v3  ;;  %v22604_v16 = vand.u32 4294901760, %v19938_v26 }
 0x785   : > { %15271 = vmatprep.subr.bf16.mxu0 %v19559_v62 }
 0x786   : > { %v20221_v60 = vpack.c.bf16 %v22605_v9, %v22604_v16  ;;  %v6793_v16 = vand.u32 4294901760, %v6792_v44  ;;  %v6800_v9 = vand.u32 4294901760, %v6799_v40 }
 0x788   : > { %15273 = vmatpush3.bf16.msra.mxu0 %v19559_v62  ;;  %v20224_v62 = vand.u32 4294901760, %v6579_v45 }
 0x789   : > { %15275 = vmatprep.subr.bf16.mxu0 %v19607_v39 }
 0x78c   : > { %15277 = vmatpush3.bf16.msra.mxu0 %v19607_v39  ;;  %v20229_v39 = vsub.f32 %v6579_v45, %v20224_v62 }
 0x78d   : > { %15279 = vmatprep.subr.bf16.mxu0 %v19611_v30 }
 0x78e   : > { %v6710_v3 = vand.u32 4294901760, %v20229_v39 }
 0x790   : > { %15281 = vmatpush3.bf16.msra.mxu0 %v19611_v30  ;;  %v22606_v30 = vand.u32 4294901760, %v19960_v48  ;;  %v22613_v48 = vand.u32 4294901760, %v20060_v63 }
 0x791   : > { %15283 = vmatprep.subr.bf16.mxu0 %v19620_v43 }
 0x792   : > { %v20237_v55 = vpack.c.bf16 %v22607_v24, %v22606_v30 }
 0x794   : > { %15285 = vmatpush3.bf16.msra.mxu0 %v19620_v43  ;;  %v6711_v43 = vsub.f32 %v20229_v39, %v6710_v3 }
 0x795   : > { %15287 = vmatprep.subr.bf16.mxu0 %v20221_v60 }
 0x797   : > { %13523 = vmatmul.mubr.f32.vlgmr.msra.gmra.mrb[8].mxu0 %v19785_v15  ;;  %v22608_v15 = vand.u32 4294901760, %v20004_v21  ;;  %v22615_v21 = vand.u32 4294901760, %v20090_v25 }
 0x798   : > { %13525 = vmatprep.mubr.f32.mxu0 %v19838_v54  ;;  %v22609_v54 = vand.u32 4294901760, %v20001_v8  ;;  %v6578_v8 = vpop.permute.xlu1 %6577 }
 0x799   : > { %v20297_v47 = vsel %vm4364_vm0, %v6578_v8, 0  ;;  %v6813_v8 = vsub.f32 %v19992_v17, %v22619_v42 }
 0x79a   : > { %v20253_v26 = vpack.c.bf16 %v22609_v54, %v22608_v15  ;;  %v6673_v23 = vand.u32 4294901760, %v20297_v47 }
 0x79b   : > { %13526 = vmatmul.mubr.f32.gmra.mrb[10].mxu0 %v19828_v31  ;;  %v6712_v31 = vand.u32 4294901760, %v6711_v43 }
 0x79c   : > { %13528 = vmatprep.mubr.f32.mxu0 %v19873_v0  ;;  %v22610_v0 = vand.u32 4294901760, %v20034_v33  ;;  %v6518_v63 = vpop.permute.xlu1 %6517  ;;  %v20312_v51 = vpack.c.bf16 %v6673_v23, %v6670_v38 }
 0x79d   : > { %15289 = vmatpush3.bf16.xpose.msra.mxu0 %v20221_v60  ;;  %v6581_v41 = vsel %vm4364_vm0, %v6518_v63, 0 }
 0x79e   : > { %15291 = vmatprep.subr.bf16.mxu0 %v20237_v55  ;;  %v20314_v1 = vand.u32 4294901760, %v6581_v41 }
 0x79f   : > { %13529 = vmatmul.mubr.f32.gmra.mrb[12].mxu0 %v19864_v11  ;;  %v22611_v11 = vand.u32 4294901760, %v20031_v18  ;;  %v22614_v18 = vand.u32 4294901760, %v20093_v56  ;;  %v6520_v56 = vpop.permute.xlu0 %6519 }
 0x7a0   : > { %13531 = vmatprep.mubr.f32.mxu0 %v19903_v58  ;;  %v22612_v58 = vand.u32 4294901760, %v20063_v29  ;;  %v20284_v29 = vsel %vm4364_vm0, %v6572_v35, 0  ;;  %v6522_v28 = vpop.permute.xlu1 %6521  ;;  %v6583_v49 = vsel %vm4364_vm0, %v6520_v56, 0  ;;  %v20328_v50 = vsub.f32 %v6581_v41, %v20314_v1 }
 0x7a1   : > { %v20262_v36 = vpack.c.bf16 %v22611_v11, %v22610_v0  ;;  %v20278_v33 = vpack.c.bf16 %v22615_v21, %v22614_v18  ;;  %v6664_v6 = vand.u32 4294901760, %v20284_v29  ;;  %v6585_v13 = vsel %vm4364_vm0, %v6522_v28, 0 }
 0x7a2   : > { %v20317_v34 = vand.u32 4294901760, %v6583_v49  ;;  %v20330_v52 = vand.u32 4294901760, %v6585_v13  ;;  %v6720_v30 = vand.u32 4294901760, %v20328_v50  ;;  %v15318_v11 = vpack.c.bf16 %v6800_v9, %v6793_v16  ;;  %v22622_v9 = vld [vmem:[#allocation112_spill] sm:$0xff] }
 0x7a3   : > { %13532 = vmatmul.mubr.f32.gmra.mrb[14].mxu0 %v19895_v10  ;;  %v20270_v10 = vpack.c.bf16 %v22613_v48, %v22612_v58  ;;  %v20294_v25 = vpack.c.bf16 %v6667_v4, %v6664_v6  ;;  %v6524_v57 = vpop.permute.xlu0 %6523  ;;  %v22618_v58 = vand.u32 4294901760, %v19987_v37 }
 0x7a4   : > { %13566 = vmatprep.mubr.f32.mxu0 %v6712_v31  ;;  %v6526_v7 = vpop.permute.xlu1 %6525  ;;  %v6587_v59 = vsel %vm4364_vm0, %v6524_v57, 0  ;;  %v20334_v22 = vsub.f32 %v6583_v49, %v20317_v34  ;;  %v20342_v24 = vsub.f32 %v6585_v13, %v20330_v52  ;;  %v6721_v18 = vsub.f32 %v20328_v50, %v6720_v30 }
 0x7a5   : > { %15293 = vmatpush3.bf16.xpose.msra.mxu0 %v20237_v55  ;;  %v6589_v35 = vsel %vm4364_vm0, %v6526_v7, 0  ;;  %v20337_v2 = vand.u32 4294901760, %v6587_v59  ;;  %v6806_v48 = vsub.f32 %v19987_v37, %v22618_v58  ;;  %v6814_v7 = vand.u32 4294901760, %v6813_v8 }
 0x7a6   : > { %15295 = vmatprep.subr.bf16.mxu0 %v20253_v26  ;;  %v20344_v43 = vand.u32 4294901760, %v6589_v35  ;;  %v6730_v15 = vand.u32 4294901760, %v20334_v22  ;;  %v6740_v21 = vand.u32 4294901760, %v20342_v24  ;;  %v6722_v13 = vand.u32 4294901760, %v6721_v18 }
 0x7a7   : > { %v6528_v20 = vpop.permute.xlu0 %6527  ;;  %v20348_v54 = vsub.f32 %v6587_v59, %v20337_v2  ;;  %v6807_v49 = vand.u32 4294901760, %v6806_v48 }
 0x7a8   : > { %v6530_v32 = vpop.permute.xlu1 %6529  ;;  %v6591_v45 = vsel %vm4364_vm0, %v6528_v20, 0  ;;  %v20365_v63 = vsub.f32 %v6589_v35, %v20344_v43  ;;  %v6731_v57 = vsub.f32 %v20334_v22, %v6730_v15  ;;  %v6741_v44 = vsub.f32 %v20342_v24, %v6740_v21 }
 0x7a9   : > { %v6593_v31 = vsel %vm4364_vm0, %v6530_v32, 0  ;;  %v20351_v0 = vand.u32 4294901760, %v6591_v45  ;;  %v22198_v28 = vand.u32 4294901760, %v20348_v54  ;;  %v15322_v35 = vpack.c.bf16 %v6814_v7, %v6807_v49  ;;  %v22620_v32 = vld [vmem:[#allocation113_spill] sm:$0xff] }
 0x7aa   : > { %v20367_v56 = vand.u32 4294901760, %v6593_v31  ;;  %v22197_v59 = vand.u32 4294901760, %v20365_v63  ;;  %v6732_v40 = vand.u32 4294901760, %v6731_v57  ;;  %v6742_v42 = vand.u32 4294901760, %v6741_v44 }
 0x7ab   : > { %v20371_v41 = vsub.f32 %v6591_v45, %v20351_v0  ;;  %v6751_v20 = vsub.f32 %v20348_v54, %v22198_v28  ;;  %v22621_v45 = vand.u32 4294901760, %v22620_v32 }
 0x7ac   : > { %v20378_v19 = vsub.f32 %v6593_v31, %v20367_v56  ;;  %v22623_v31 = vand.u32 4294901760, %v22622_v9  ;;  %v6761_v8 = vsub.f32 %v20365_v63, %v22197_v59  ;;  %v22626_v59 = vld [vmem:[#allocation115_spill] sm:$0xff] }
 0x7ad   : > { %15297 = vmatpush3.bf16.xpose.msra.mxu0 %v20253_v26  ;;  %v22199_v53 = vand.u32 4294901760, %v20371_v41  ;;  %v6820_v16 = vsub.f32 %v22620_v32, %v22621_v45  ;;  %v6752_v18 = vand.u32 4294901760, %v6751_v20  ;;  %v22624_v45 = vld [vmem:[#allocation116_spill] sm:$0xff]  ;;  %v22627_v28 = vand.u32 4294901760, %v22626_v59 }
 0x7ae   : > { %15299 = vmatprep.subr.bf16.mxu0 %v20262_v36  ;;  %v6827_v58 = vsub.f32 %v22622_v9, %v22623_v31  ;;  %v6780_v48 = vand.u32 4294901760, %v20378_v19  ;;  %v22625_v31 = vand.u32 4294901760, %v22624_v45 }
 0x7af   : > { %v6771_v57 = vsub.f32 %v20371_v41, %v22199_v53  ;;  %v6821_v49 = vand.u32 4294901760, %v6820_v16  ;;  %v6841_v53 = vsub.f32 %v22626_v59, %v22627_v28 }
 0x7b0   : > { %v6828_v7 = vand.u32 4294901760, %v6827_v58  ;;  %v6834_v20 = vsub.f32 %v22624_v45, %v22625_v31 }
 0x7b2   : > { %v15326_v44 = vpack.c.bf16 %v6828_v7, %v6821_v49  ;;  %v6835_v58 = vand.u32 4294901760, %v6834_v20  ;;  %v22629_v49 = vand.u32 4294901760, %v20082_v46 }
 0x7b4   : > { %v6855_v7 = vsub.f32 %v20082_v46, %v22629_v49 }
 0x7b5   : > { %15301 = vmatpush3.bf16.xpose.msra.mxu0 %v20262_v36 }
 0x7b6   : > { %15303 = vmatprep.subr.bf16.mxu0 %v20270_v10 }
 0x7bd   : > { %15305 = vmatpush3.bf16.xpose.msra.mxu0 %v20270_v10 }
 0x7be   : > { %15307 = vmatprep.subr.bf16.mxu0 %v20278_v33 }
 0x7c5   : > { %15309 = vmatpush3.bf16.xpose.msra.mxu0 %v20278_v33 }
 0x7c6   : > { %15311 = vmatprep.subr.bf16.mxu0 %v20294_v25 }
 0x7cd   : > { %15313 = vmatpush3.bf16.xpose.msra.mxu0 %v20294_v25 }
 0x7ce   : > { %15315 = vmatprep.subr.bf16.mxu0 %v20312_v51 }
 0x7d5   : > { %15317 = vmatpush3.bf16.xpose.msra.mxu0 %v20312_v51 }
 0x7d6   : > { %15319 = vmatprep.subr.bf16.mxu0 %v15318_v11 }
 0x7dc   : > { %13567 = vmatmul.mubr.f32.vlgmr.msra.gmra.mrb[16].mxu0 %v6722_v13  ;;  %v6762_v13 = vand.u32 4294901760, %v6761_v8 }
 0x7dd   : > { %13569 = vmatprep.mubr.f32.mxu0 %v6732_v40  ;;  %15321 = vmatpush3.bf16.xpose.msra.mxu0 %v15318_v11  ;;  %v6781_v11 = vsub.f32 %v20378_v19, %v6780_v48  ;;  %v6772_v40 = vand.u32 4294901760, %v6771_v57 }
 0x7de   : > { %15323 = vmatprep.subr.bf16.mxu0 %v15322_v35 }
 0x7df   : > { %v6782_v16 = vand.u32 4294901760, %v6781_v11 }
 0x7e0   : > { %13570 = vmatmul.mubr.f32.gmra.mrb[18].mxu0 %v6742_v42  ;;  %v6842_v42 = vand.u32 4294901760, %v6841_v53  ;;  %v20424_v53 = vsub.f32 %v20284_v29, %v6664_v6  ;;  %v20440_v6 = vsub.f32 %v20297_v47, %v6673_v23 }
 0x7e1   : > { %13572 = vmatprep.mubr.f32.mxu0 %v6752_v18  ;;  %v22628_v18 = vand.u32 4294901760, %v20087_v27 }
 0x7e2   : > { %v15330_v8 = vpack.c.bf16 %v6842_v42, %v6835_v58 }
 0x7e3   : > { %v6848_v57 = vsub.f32 %v20087_v27, %v22628_v18 }
 0x7e4   : > { %13573 = vmatmul.mubr.f32.gmra.mrb[20].mxu0 %v6762_v13  ;;  %v20419_v13 = vsub.f32 %v20281_v61, %v6667_v4  ;;  %v6875_v61 = vand.u32 4294901760, %v20424_v53 }
 0x7e5   : > { %13575 = vmatprep.mubr.f32.mxu0 %v6772_v40  ;;  %15325 = vmatpush3.bf16.xpose.msra.mxu0 %v15322_v35  ;;  %v6849_v28 = vand.u32 4294901760, %v6848_v57  ;;  %v6856_v35 = vand.u32 4294901760, %v6855_v7  ;;  %v22630_v40 = vld [vmem:[#allocation120_spill] sm:$0xff]  ;;  %v6896_v7 = vand.u32 4294901760, %v20440_v6 }
 0x7e6   : > { %15327 = vmatprep.subr.bf16.mxu0 %v15326_v44  ;;  %v22631_v31 = vand.u32 4294901760, %v22630_v40  ;;  %v6882_v42 = vand.u32 4294901760, %v20419_v13  ;;  %v6876_v49 = vsub.f32 %v20424_v53, %v6875_v61 }
 0x7e7   : > { %v15334_v11 = vpack.c.bf16 %v6856_v35, %v6849_v28  ;;  %v6897_v47 = vsub.f32 %v20440_v6, %v6896_v7 }
 0x7e8   : > { %13576 = vmatmul.mubr.f32.gmra.mrb[22].mxu0 %v6782_v16  ;;  %v6862_v20 = vsub.f32 %v22630_v40, %v22631_v31  ;;  %v22632_v16 = vld [vmem:[#allocation119_spill] sm:$0xff]  ;;  %v6883_v29 = vsub.f32 %v20419_v13, %v6882_v42  ;;  %v6877_v35 = vand.u32 4294901760, %v6876_v49  ;;  %v22638_v49 = vand.u32 4294901760, %v20371_v41 }
 0x7e9   : > { %13610 = vmatprep.mubr.f32.mxu0 %v20224_v62 }
 0x7ea   : > { %v6863_v4 = vand.u32 4294901760, %v6862_v20  ;;  %v6884_v31 = vand.u32 4294901760, %v6883_v29  ;;  %v22636_v29 = vand.u32 4294901760, %v20348_v54 }
 0x7ec   : > { %v15342_v23 = vpack.c.bf16 %v6884_v31, %v6877_v35  ;;  %v6508_v35 = vld [vmem:[#allocation3 + $0x48] sm:$0xff]  ;;  %v6507_v31 = vld [vmem:[#allocation3 + $0x40] sm:$0xff] }
 0x7ed   : > { %15329 = vmatpush3.bf16.xpose.msra.mxu0 %v15326_v44  ;;  %v22633_v44 = vand.u32 4294901760, %v22632_v16 }
 0x7ee   : > { %15331 = vmatprep.subr.bf16.mxu0 %v15330_v8 }
 0x7ef   : > { %v6869_v58 = vsub.f32 %v22632_v16, %v22633_v44  ;;  %v15350_v44 = vpack.c.bf16 %v19957_v5, %v19952_v12  ;;  %v15358_v12 = vpack.c.bf16 %v22622_v9, %v22620_v32  ;;  %v15362_v5 = vpack.c.bf16 %v22626_v59, %v22624_v45 }
 0x7f0   : > { %v15374_v32 = vpack.c.bf16 %v20419_v13, %v20424_v53 }
 0x7f1   : > { %v6870_v18 = vand.u32 4294901760, %v6869_v58  ;;  %v15354_v58 = vpack.c.bf16 %v19992_v17, %v19987_v37  ;;  %v15366_v37 = vpack.c.bf16 %v20082_v46, %v20087_v27  ;;  %v15370_v17 = vpack.c.bf16 %v22632_v16, %v22630_v40 }
 0x7f3   : > { %v15338_v57 = vpack.c.bf16 %v6870_v18, %v6863_v4  ;;  %v22634_v4 = vld [vmem:[#allocation110_spill] sm:$0xff]  ;;  %v22635_v18 = vld [vmem:[#allocation111_spill] sm:$0xff] }
 0x7f5   : > { %15333 = vmatpush3.bf16.xpose.msra.mxu0 %v15330_v8  ;;  %v20445_v8 = vsub.f32 %v20300_v14, %v6670_v38 }
 0x7f6   : > { %15335 = vmatprep.subr.bf16.mxu0 %v15334_v11 }
 0x7f7   : > { %v6889_v28 = vand.u32 4294901760, %v20445_v8  ;;  %v15378_v59 = vpack.c.bf16 %v20440_v6, %v20445_v8 }
 0x7f9   : > { %v6890_v14 = vsub.f32 %v20445_v8, %v6889_v28 }
 0x7fb   : > { %v6891_v38 = vand.u32 4294901760, %v6890_v14  ;;  %v22642_v14 = vld [vmem:[#allocation121_spill] sm:$0xff] }
 0x7fd   : > { %15337 = vmatpush3.bf16.xpose.msra.mxu0 %v15334_v11  ;;  %v6898_v11 = vand.u32 4294901760, %v6897_v47  ;;  %v6510_v47 = vld [vmem:[#allocation3 + $0x58] sm:$0xff] }
 0x7fe   : > { %15339 = vmatprep.subr.bf16.mxu0 %v15338_v57 }
 0x7ff   : > { %v15346_v20 = vpack.c.bf16 %v6898_v11, %v6891_v38  ;;  %v6512_v38 = vld [vmem:[#allocation3 + $0x68] sm:$0xff]  ;;  %v6511_v11 = vld [vmem:[#allocation3 + $0x60] sm:$0xff] }
 0x805   : > { %15341 = vmatpush3.bf16.xpose.msra.mxu0 %v15338_v57  ;;  %v22637_v57 = vand.u32 4294901760, %v20365_v63 }
 0x806   : > { %15343 = vmatprep.subr.bf16.mxu0 %v15342_v23 }
 0x80d   : > { %15345 = vmatpush3.bf16.xpose.msra.mxu0 %v15342_v23  ;;  %v6509_v23 = vld [vmem:[#allocation3 + $0x50] sm:$0xff] }
 0x80e   : > { %15347 = vmatprep.subr.bf16.mxu0 %v15346_v20 }
 0x815   : > { %15349 = vmatpush3.bf16.xpose.msra.mxu0 %v15346_v20  ;;  %v6514_v20 = vld [vmem:[#allocation3 + $0x78] sm:$0xff] }
 0x816   : > { %15351 = vmatprep.subr.bf16.mxu0 %v15350_v44 }
 0x81c   : > { %13611 = vmatmul.mubr.f32.vlgmr.msra.gmra.mrb[16].mxu0 %v20314_v1 }
 0x81d   : > { %13613 = vmatprep.mubr.f32.mxu0 %v20317_v34  ;;  %15353 = vmatpush3.bf16.xpose.msra.mxu0 %v15350_v44  ;;  %v6513_v44 = vld [vmem:[#allocation3 + $0x70] sm:$0xff] }
 0x81e   : > { %15355 = vmatprep.subr.bf16.mxu0 %v15354_v58 }
 0x820   : > { %13614 = vmatmul.mubr.f32.gmra.mrb[18].mxu0 %v20330_v52 }
 0x821   : > { %13616 = vmatprep.mubr.f32.mxu0 %v20337_v2 }
 0x824   : > { %13617 = vmatmul.mubr.f32.gmra.mrb[20].mxu0 %v20344_v43 }
 0x825   : > { %13619 = vmatprep.mubr.f32.mxu0 %v20351_v0  ;;  %15357 = vmatpush3.bf16.xpose.msra.mxu0 %v15354_v58  ;;  %v15438_v58 = vpack.c.bf16 %v6882_v42, %v6875_v61 }
 0x826   : > { %15359 = vmatprep.subr.bf16.mxu0 %v15358_v12 }
 0x828   : > { %13620 = vmatmul.mubr.f32.gmra.mrb[22].mxu0 %v20367_v56 }
 0x829   : > { %13654 = vmatprep.mubr.f32.mxu0 %v20229_v39 }
 0x82d   : > { %15361 = vmatpush3.bf16.xpose.msra.mxu0 %v15358_v12  ;;  %v15442_v12 = vpack.c.bf16 %v6896_v7, %v6889_v28 }
 0x82e   : > { %15363 = vmatprep.subr.bf16.mxu0 %v15362_v5 }
 0x835   : > { %15365 = vmatpush3.bf16.xpose.msra.mxu0 %v15362_v5 }
 0x836   : > { %15367 = vmatprep.subr.bf16.mxu0 %v15366_v37 }
 0x83d   : > { %15369 = vmatpush3.bf16.xpose.msra.mxu0 %v15366_v37 }
 0x83e   : > { %15371 = vmatprep.subr.bf16.mxu0 %v15370_v17 }
 0x845   : > { %15373 = vmatpush3.bf16.xpose.msra.mxu0 %v15370_v17 }
 0x846   : > { %15375 = vmatprep.subr.bf16.mxu0 %v15374_v32 }
 0x84d   : > { %15377 = vmatpush3.bf16.xpose.msra.mxu0 %v15374_v32 }
 0x84e   : > { %15379 = vmatprep.subr.bf16.mxu0 %v15378_v59 }
 0x855   : > { %15381 = vmatpush3.bf16.xpose.msra.mxu0 %v15378_v59 }
 0x856   : > { %15383 = vmatprep.subr.bf16.mxu0 %v20221_v60 }
 0x85c   : > { %13655 = vmatmul.mubr.f32.vlgmr.msra.gmra.mrb[16].mxu0 %v20328_v50  ;;  %v22639_v50 = vld [vmem:[#allocation114_spill] sm:$0xff] }
 0x85d   : > { %13657 = vmatprep.mubr.f32.mxu0 %v20334_v22  ;;  %15385 = vmatpush3.bf16.xpose.msra.mxu0 %v20221_v60  ;;  %v6500_v22 = vld [vmem:[#allocation3 + $0x8] sm:$0xff] }
 0x85e   : > { %15387 = vmatprep.subr.bf16.mxu0 %v20237_v55  ;;  %7684 = vrot.lane.b32.xlu1 %v6500_v22, %s17027_s16 }
 0x860   : > { %13658 = vmatmul.mubr.f32.gmra.mrb[18].mxu0 %v20342_v24  ;;  %v6502_v24 = vld [vmem:[#allocation3 + $0x18] sm:$0xff] }
 0x861   : > { %13660 = vmatprep.mubr.f32.mxu0 %v20348_v54  ;;  %v22640_v54 = vld [vmem:[#allocation117_spill] sm:$0xff] }
 0x862   : > { %7688 = vrot.lane.b32.xlu1 %v6502_v24, %s17027_s16 }
 0x864   : > { %13661 = vmatmul.mubr.f32.gmra.mrb[20].mxu0 %v20365_v63  ;;  %v6503_v63 = vld [vmem:[#allocation3 + $0x20] sm:$0xff] }
 0x865   : > { %13663 = vmatprep.mubr.f32.mxu0 %v20371_v41  ;;  %15389 = vmatpush3.bf16.xpose.msra.mxu0 %v20237_v55  ;;  %v6506_v41 = vld [vmem:[#allocation3 + $0x38] sm:$0xff] }
 0x866   : > { %15391 = vmatprep.subr.bf16.mxu0 %v20253_v26 }
 0x868   : > { %13664 = vmatmul.mubr.f32.gmra.mrb[22].mxu0 %v20378_v19  ;;  %v6505_v19 = vld [vmem:[#allocation3 + $0x30] sm:$0xff] }
 0x869   : > { %13698 = vmatprep.mubr.f32.mxu0 %v6710_v3 }
 0x86a   : > { %v13524_v46 = vpop.f32.mrb[8].mxu0 }
 0x86b   : > { %6476 = vst.msk [vmem:[#allocation4 + $0x8] sm:$0xff] %vm4364_vm0, %v13524_v46  ;;  %v6429_v27 = vpop.f32.mrb[9].mxu0 }
 0x86c   : > { %6475 = vst.msk [vmem:[#allocation4] sm:$0xff] %vm4364_vm0, %v6429_v27 }
 0x86d   : > { %15393 = vmatpush3.bf16.xpose.msra.mxu0 %v20253_v26 }
 0x86e   : > { %v13527_v9 = vpop.f32.mrb[10].mxu0  ;;  %15395 = vmatprep.subr.bf16.mxu0 %v20262_v36 }
 0x86f   : > { %6478 = vst.msk [vmem:[#allocation4 + $0x18] sm:$0xff] %vm4364_vm0, %v13527_v9  ;;  %v6441_v45 = vpop.f32.mrb[11].mxu0 }
 0x870   : > { %6477 = vst.msk [vmem:[#allocation4 + $0x10] sm:$0xff] %vm4364_vm0, %v6441_v45 }
 0x872   : > { %v13530_v40 = vpop.f32.mrb[12].mxu0 }
 0x873   : > { %6480 = vst.msk [vmem:[#allocation4 + $0x28] sm:$0xff] %vm4364_vm0, %v13530_v40  ;;  %v6453_v39 = vpop.f32.mrb[13].mxu0 }
 0x874   : > { %6479 = vst.msk [vmem:[#allocation4 + $0x20] sm:$0xff] %vm4364_vm0, %v6453_v39 }
 0x875   : > { %15397 = vmatpush3.bf16.xpose.msra.mxu0 %v20262_v36 }
 0x876   : > { %v13533_v3 = vpop.f32.mrb[14].mxu0  ;;  %15399 = vmatprep.subr.bf16.mxu0 %v20270_v10 }
 0x877   : > { %6482 = vst.msk [vmem:[#allocation4 + $0x38] sm:$0xff] %vm4364_vm0, %v13533_v3  ;;  %v6465_v16 = vpop.f32.mrb[15].mxu0 }
 0x878   : > { %6481 = vst.msk [vmem:[#allocation4 + $0x30] sm:$0xff] %vm4364_vm0, %v6465_v16  ;;  %vm8704_vm0 = vcmask 1048064  }
 0x87d   : > { %15401 = vmatpush3.bf16.xpose.msra.mxu0 %v20270_v10 }
 0x87e   : > { %15403 = vmatprep.subr.bf16.mxu0 %v20278_v33 }
 0x885   : > { %15405 = vmatpush3.bf16.xpose.msra.mxu0 %v20278_v33 }
 0x886   : > { %15407 = vmatprep.subr.bf16.mxu0 %v20294_v25 }
 0x88d   : > { %15409 = vmatpush3.bf16.xpose.msra.mxu0 %v20294_v25 }
 0x88e   : > { %15411 = vmatprep.subr.bf16.mxu0 %v20312_v51 }
 0x895   : > { %15413 = vmatpush3.bf16.xpose.msra.mxu0 %v20312_v51 }
 0x896   : > { %15415 = vmatprep.subr.bf16.mxu0 %v22634_v4 }
 0x89c   : > { %13699 = vmatmul.mubr.f32.vlgmr.msra.gmra.mrb[16].mxu0 %v6720_v30  ;;  %v6499_v30 = vld [vmem:[#allocation3] sm:$0xff] }
 0x89d   : > { %13701 = vmatprep.mubr.f32.mxu0 %v6730_v15  ;;  %15417 = vmatpush3.bf16.xpose.msra.mxu0 %v22634_v4  ;;  %v6501_v15 = vld [vmem:[#allocation3 + $0x10] sm:$0xff] }
 0x89e   : > { %15419 = vmatprep.subr.bf16.mxu0 %v22635_v18  ;;  %7682 = vrot.lane.b32.xlu0 %v6499_v30, %s17027_s16 }
 0x8a0   : > { %13702 = vmatmul.mubr.f32.gmra.mrb[18].mxu0 %v6740_v21  ;;  %v6504_v21 = vld [vmem:[#allocation3 + $0x28] sm:$0xff] }
 0x8a1   : > { %13704 = vmatprep.mubr.f32.mxu0 %v22636_v29  ;;  %7692 = vrot.lane.b32.xlu1 %v6504_v21, %s17027_s16 }
 0x8a2   : > { %7686 = vrot.lane.b32.xlu0 %v6501_v15, %s17027_s16 }
 0x8a4   : > { %13705 = vmatmul.mubr.f32.gmra.mrb[20].mxu0 %v22637_v57 }
 0x8a5   : > { %13707 = vmatprep.mubr.f32.mxu0 %v22638_v49  ;;  %15421 = vmatpush3.bf16.xpose.msra.mxu0 %v22635_v18 }
 0x8a6   : > { %15423 = vmatprep.subr.bf16.mxu0 %v22639_v50  ;;  %7690 = vrot.lane.b32.xlu0 %v6503_v63, %s17027_s16 }
 0x8a7   : > { %7696 = vrot.lane.b32.xlu1 %v6506_v41, %s17027_s16 }
 0x8a8   : > { %13708 = vmatmul.mubr.f32.gmra.mrb[22].mxu0 %v6780_v48  ;;  %v22641_v48 = vld [vmem:[#allocation118_spill] sm:$0xff] }
 0x8a9   : > { %13742 = vmatprep.mubr.f32.mxu0 %v20224_v62 }
 0x8aa   : > { %7694 = vrot.lane.b32.xlu0 %v6505_v19, %s17027_s16 }
 0x8ab   : > { %7700 = vrot.lane.b32.xlu1 %v6508_v35, %s17027_s16 }
 0x8ad   : > { %15425 = vmatpush3.bf16.xpose.msra.mxu0 %v22639_v50 }
 0x8ae   : > { %15427 = vmatprep.subr.bf16.mxu0 %v22640_v54  ;;  %7698 = vrot.lane.b32.xlu0 %v6507_v31, %s17027_s16 }
 0x8af   : > { %7704 = vrot.lane.b32.xlu1 %v6510_v47, %s17027_s16 }
 0x8b2   : > { %7702 = vrot.lane.b32.xlu0 %v6509_v23, %s17027_s16 }
 0x8b3   : > { %7708 = vrot.lane.b32.xlu1 %v6512_v38, %s17027_s16 }
 0x8b5   : > { %15429 = vmatpush3.bf16.xpose.msra.mxu0 %v22640_v54 }
 0x8b6   : > { %15431 = vmatprep.subr.bf16.mxu0 %v22641_v48  ;;  %7706 = vrot.lane.b32.xlu0 %v6511_v11, %s17027_s16 }
 0x8b7   : > { %7712 = vrot.lane.b32.xlu1 %v6514_v20, %s17027_s16 }
 0x8ba   : > { %7710 = vrot.lane.b32.xlu0 %v6513_v44, %s17027_s16 }
 0x8bd   : > { %15433 = vmatpush3.bf16.xpose.msra.mxu0 %v22641_v48 }
 0x8be   : > { %15435 = vmatprep.subr.bf16.mxu0 %v22642_v14 }
 0x8c5   : > { %15437 = vmatpush3.bf16.xpose.msra.mxu0 %v22642_v14 }
 0x8c6   : > { %15439 = vmatprep.subr.bf16.mxu0 %v15438_v58 }
 0x8cd   : > { %15441 = vmatpush3.bf16.xpose.msra.mxu0 %v15438_v58 }
 0x8ce   : > { %15443 = vmatprep.subr.bf16.mxu0 %v15442_v12 }
 0x8d5   : > { %15445 = vmatpush3.bf16.xpose.msra.mxu0 %v15442_v12 }
 0x8d6   : > { %15447 = vmatprep.subr.bf16.mxu0 %v20221_v60 }
 0x8dc   : > { %13743 = vmatmul.mubr.f32.vlgmr.msra.gmra.mrb[16].mxu0 %v20314_v1 }
 0x8dd   : > { %13745 = vmatprep.mubr.f32.mxu0 %v20317_v34  ;;  %15449 = vmatpush3.bf16.xpose.msra.mxu0 %v20221_v60  ;;  %v7685_v60 = vpop.permute.xlu1 %7684 }
 0x8de   : > { %15451 = vmatprep.subr.bf16.mxu0 %v20237_v55 }
 0x8e0   : > { %13746 = vmatmul.mubr.f32.gmra.mrb[18].mxu0 %v20330_v52 }
 0x8e1   : > { %13748 = vmatprep.mubr.f32.mxu0 %v20337_v2 }
 0x8e4   : > { %13749 = vmatmul.mubr.f32.gmra.mrb[20].mxu0 %v20344_v43 }
 0x8e5   : > { %13751 = vmatprep.mubr.f32.mxu0 %v20351_v0  ;;  %15453 = vmatpush3.bf16.xpose.msra.mxu0 %v20237_v55 }
 0x8e6   : > { %15455 = vmatprep.subr.bf16.mxu0 %v20253_v26 }
 0x8e8   : > { %13752 = vmatmul.mubr.f32.gmra.mrb[22].mxu0 %v20367_v56 }
 0x8e9   : > { %13786 = vmatprep.mubr.f32.mxu0 %v20224_v62  ;;  %v7734_v62 = vand.u32 4294901760, %v7685_v60 }
 0x8eb   : > { %v7900_v17 = vsub.f32 %v7685_v60, %v7734_v62 }
 0x8ed   : > { %15457 = vmatpush3.bf16.xpose.msra.mxu0 %v20253_v26  ;;  %v7901_v39 = vand.u32 4294901760, %v7900_v17 }
 0x8ee   : > { %15459 = vmatprep.subr.bf16.mxu0 %v20262_v36 }
 0x8ef   : > { %v7902_v22 = vsub.f32 %v7900_v17, %v7901_v39 }
 0x8f1   : > { %v7903_v23 = vand.u32 4294901760, %v7902_v22 }
 0x8f5   : > { %15461 = vmatpush3.bf16.xpose.msra.mxu0 %v20262_v36 }
 0x8f6   : > { %15463 = vmatprep.subr.bf16.mxu0 %v20270_v10 }
 0x8fd   : > { %15465 = vmatpush3.bf16.xpose.msra.mxu0 %v20270_v10  ;;  %v7689_v10 = vpop.permute.xlu1 %7688 }
 0x8fe   : > { %15467 = vmatprep.subr.bf16.mxu0 %v20278_v33 }
 0x905   : > { %15469 = vmatpush3.bf16.xpose.msra.mxu0 %v20278_v33  ;;  %v7740_v33 = vand.u32 4294901760, %v7689_v10 }
 0x906   : > { %15471 = vmatprep.subr.bf16.mxu0 %v20294_v25 }
 0x90d   : > { %15473 = vmatpush3.bf16.xpose.msra.mxu0 %v20294_v25 }
 0x90e   : > { %15475 = vmatprep.subr.bf16.mxu0 %v20312_v51 }
 0x910   : > { %v7683_v55 = vpop.permute.xlu0 %7682 }
 0x911   : > { %v7731_v26 = vand.u32 4294901760, %v7683_v55 }
 0x913   : > { %v20592_v36 = vpack.c.bf16 %v7734_v62, %v7731_v26  ;;  %v7693_v53 = vpop.permute.xlu1 %7692  ;;  %v7893_v32 = vsub.f32 %v7683_v55, %v7731_v26 }
 0x914   : > { %v7687_v13 = vpop.permute.xlu0 %7686  ;;  %v7746_v42 = vand.u32 4294901760, %v7693_v53 }
 0x915   : > { %15477 = vmatpush3.bf16.xpose.msra.mxu0 %v20312_v51  ;;  %v7737_v25 = vand.u32 4294901760, %v7687_v13  ;;  %15479 = vmatprep.subr.bf16.mxu1 %v20592_v36  ;;  %v20597_v51 = vsub.f32 %v7689_v10, %v7740_v33  ;;  %v7894_v3 = vand.u32 4294901760, %v7893_v32  ;;  %v20659_v60 = vpack.c.bf16 %v7900_v17, %v7893_v32 }
 0x916   : > { %15481 = vmatpush3.bf16.msra.mxu1 %v20592_v36 }
 0x917   : > { %v7895_v30 = vsub.f32 %v7893_v32, %v7894_v3  ;;  %v7915_v58 = vand.u32 4294901760, %v20597_v51 }
 0x919   : > { %v7697_v7 = vpop.permute.xlu1 %7696  ;;  %v7896_v47 = vand.u32 4294901760, %v7895_v30  ;;  %v7916_v55 = vsub.f32 %v20597_v51, %v7915_v58 }
 0x91a   : > { %v7752_v28 = vand.u32 4294901760, %v7697_v7 }
 0x91b   : > { %v20652_v44 = vpack.c.bf16 %v7903_v23, %v7896_v47 }
 0x91c   : > { %13787 = vmatmul.mubr.f32.vlgmr.msra.gmra.mrb[16].mxu0 %v20314_v1  ;;  %v20600_v1 = vpack.c.bf16 %v7740_v33, %v7737_v25  ;;  %v20617_v37 = vsub.f32 %v7697_v7, %v7752_v28  ;;  %v20665_v33 = vpack.c.bf16 %v7901_v39, %v7894_v3  ;;  %v7917_v7 = vand.u32 4294901760, %v7916_v55 }
 0x91d   : > { %13789 = vmatprep.mubr.f32.mxu0 %v20317_v34  ;;  %v20602_v34 = vsub.f32 %v7687_v13, %v7737_v25  ;;  %v7701_v27 = vpop.permute.xlu1 %7700 }
 0x91e   : > { %15483 = vmatprep.subr.bf16.mxu1 %v20600_v1  ;;  %v7758_v9 = vand.u32 4294901760, %v7701_v27 }
 0x91f   : > { %15485 = vmatpush3.bf16.msra.mxu1 %v20600_v1  ;;  %v7908_v12 = vand.u32 4294901760, %v20602_v34  ;;  %v20669_v13 = vpack.c.bf16 %v20597_v51, %v20602_v34 }
 0x920   : > { %13790 = vmatmul.mubr.f32.gmra.mrb[18].mxu0 %v20330_v52  ;;  %v7691_v52 = vpop.permute.xlu0 %7690  ;;  %v20625_v40 = vsub.f32 %v7701_v27, %v7758_v9 }
 0x921   : > { %13792 = vmatprep.mubr.f32.mxu0 %v20337_v2  ;;  %v7743_v61 = vand.u32 4294901760, %v7691_v52  ;;  %v20607_v2 = vsub.f32 %v7693_v53, %v7746_v42  ;;  %v7705_v18 = vpop.permute.xlu1 %7704  ;;  %v7909_v26 = vsub.f32 %v20602_v34, %v7908_v12  ;;  %v7943_v53 = vand.u32 4294901760, %v20617_v37 }
 0x922   : > { %v7764_v29 = vand.u32 4294901760, %v7705_v18  ;;  %v7957_v17 = vand.u32 4294901760, %v20625_v40 }
 0x923   : > { %v20610_v6 = vpack.c.bf16 %v7746_v42, %v7743_v61  ;;  %v20612_v8 = vsub.f32 %v7691_v52, %v7743_v61  ;;  %v7929_v62 = vand.u32 4294901760, %v20607_v2  ;;  %v7910_v61 = vand.u32 4294901760, %v7909_v26 }
 0x924   : > { %13793 = vmatmul.mubr.f32.gmra.mrb[20].mxu0 %v20344_v43  ;;  %v7695_v43 = vpop.permute.xlu0 %7694  ;;  %v20633_v50 = vsub.f32 %v7705_v18, %v7764_v29  ;;  %v7944_v51 = vsub.f32 %v20617_v37, %v7943_v53 }
 0x925   : > { %13795 = vmatprep.mubr.f32.mxu0 %v20351_v0  ;;  %v7749_v5 = vand.u32 4294901760, %v7695_v43  ;;  %15487 = vmatprep.subr.bf16.mxu1 %v20610_v6  ;;  %v22643_v0 = vmov 0   ;;  %v7709_v54 = vpop.permute.xlu1 %7708  ;;  %v7922_v10 = vand.u32 4294901760, %v20612_v8  ;;  %v7930_v25 = vsub.f32 %v20607_v2, %v7929_v62 }
 0x926   : > { %15489 = vmatpush3.bf16.msra.mxu1 %v20610_v6  ;;  %v7770_v21 = vand.u32 4294901760, %v7709_v54 }
 0x927   : > { %v20620_v59 = vpack.c.bf16 %v7752_v28, %v7749_v5  ;;  %v20622_v46 = vsub.f32 %v7695_v43, %v7749_v5  ;;  %v7923_v52 = vsub.f32 %v20612_v8, %v7922_v10  ;;  %v20675_v28 = vpack.c.bf16 %v7915_v58, %v7908_v12 }
 0x928   : > { %13796 = vmatmul.mubr.f32.gmra.mrb[22].mxu0 %v20367_v56  ;;  %v7699_v56 = vpop.permute.xlu0 %7698  ;;  %v20641_v19 = vsub.f32 %v7709_v54, %v7770_v21  ;;  %v20677_v43 = vpack.c.bf16 %v7917_v7, %v7910_v61  ;;  %v20681_v5 = vpack.c.bf16 %v20607_v2, %v20612_v8  ;;  %v7958_v8 = vsub.f32 %v20625_v40, %v7957_v17 }
 0x929   : > { %9957 = vmatprep.mubr.bf16.mxu0 %v22643_v0  ;;  %v7755_v45 = vand.u32 4294901760, %v7699_v56  ;;  %15491 = vmatprep.subr.bf16.mxu1 %v20620_v59  ;;  %v7713_v31 = vpop.permute.xlu1 %7712  ;;  %v7936_v42 = vand.u32 4294901760, %v20622_v46  ;;  %v7924_v27 = vand.u32 4294901760, %v7923_v52  ;;  %v20694_v2 = vpack.c.bf16 %v20617_v37, %v20622_v46 }
 0x92a   : > { %15493 = vmatpush3.bf16.msra.mxu1 %v20620_v59  ;;  %v7776_v14 = vand.u32 4294901760, %v7713_v31  ;;  %v7959_v23 = vand.u32 4294901760, %v7958_v8 }
 0x92b   : > { %v20628_v16 = vpack.c.bf16 %v7758_v9, %v7755_v45  ;;  %v20630_v4 = vsub.f32 %v7699_v56, %v7755_v45  ;;  %v7937_v34 = vsub.f32 %v20622_v46, %v7936_v42  ;;  %v7931_v9 = vand.u32 4294901760, %v7930_v25 }
 0x92c   : > { %v7703_v57 = vpop.permute.xlu0 %7702  ;;  %v20687_v56 = vpack.c.bf16 %v7929_v62, %v7922_v10  ;;  %v7971_v45 = vand.u32 4294901760, %v20633_v50  ;;  %v7985_v46 = vand.u32 4294901760, %v20641_v19 }
 0x92d   : > { %v7761_v49 = vand.u32 4294901760, %v7703_v57  ;;  %15495 = vmatprep.subr.bf16.mxu1 %v20628_v16  ;;  %v7950_v32 = vand.u32 4294901760, %v20630_v4  ;;  %v20690_v39 = vpack.c.bf16 %v7931_v9, %v7924_v27  ;;  %v20706_v54 = vpack.c.bf16 %v20625_v40, %v20630_v4 }
 0x92e   : > { %15497 = vmatpush3.bf16.msra.mxu1 %v20628_v16  ;;  %v7972_v22 = vsub.f32 %v20633_v50, %v7971_v45  ;;  %v7986_v40 = vsub.f32 %v20641_v19, %v7985_v46 }
 0x92f   : > { %v20636_v24 = vpack.c.bf16 %v7764_v29, %v7761_v49  ;;  %v20638_v15 = vsub.f32 %v7703_v57, %v7761_v49  ;;  %v7951_v18 = vsub.f32 %v20630_v4, %v7950_v32  ;;  %v7938_v29 = vand.u32 4294901760, %v7937_v34 }
 0x930   : > { %v7707_v63 = vpop.permute.xlu0 %7706  ;;  %v7945_v57 = vand.u32 4294901760, %v7944_v51  ;;  %v20699_v49 = vpack.c.bf16 %v7943_v53, %v7936_v42  ;;  %v20711_v58 = vpack.c.bf16 %v7957_v17, %v7950_v32  ;;  %v7973_v25 = vand.u32 4294901760, %v7972_v22 }
 0x931   : > { %v7767_v41 = vand.u32 4294901760, %v7707_v63  ;;  %15499 = vmatprep.subr.bf16.mxu1 %v20636_v24  ;;  %v7964_v3 = vand.u32 4294901760, %v20638_v15  ;;  %v7952_v47 = vand.u32 4294901760, %v7951_v18  ;;  %v20717_v62 = vpack.c.bf16 %v20633_v50, %v20638_v15 }
 0x932   : > { %15501 = vmatpush3.bf16.msra.mxu1 %v20636_v24  ;;  %v20702_v30 = vpack.c.bf16 %v7945_v57, %v7938_v29 }
 0x933   : > { %v20644_v48 = vpack.c.bf16 %v7770_v21, %v7767_v41  ;;  %v20646_v35 = vsub.f32 %v7707_v63, %v7767_v41  ;;  %v7965_v37 = vsub.f32 %v20638_v15, %v7964_v3  ;;  %v7998_v63 = vsub.f32 %v7713_v31, %v7776_v14 }
 0x934   : > { %v7711_v38 = vpop.permute.xlu0 %7710  ;;  %v20713_v12 = vpack.c.bf16 %v7959_v23, %v7952_v47  ;;  %v20721_v31 = vpack.c.bf16 %v7971_v45, %v7964_v3  ;;  %v7987_v15 = vand.u32 4294901760, %v7986_v40 }
 0x935   : > { %v7773_v11 = vand.u32 4294901760, %v7711_v38  ;;  %15503 = vmatprep.subr.bf16.mxu1 %v20644_v48  ;;  %v7978_v21 = vand.u32 4294901760, %v20646_v35  ;;  %v7999_v55 = vand.u32 4294901760, %v7998_v63  ;;  %v7966_v10 = vand.u32 4294901760, %v7965_v37 }
 0x936   : > { %15505 = vmatpush3.bf16.msra.mxu1 %v20644_v48 }
 0x937   : > { %v20650_v20 = vpack.c.bf16 %v7776_v14, %v7773_v11  ;;  %v7991_v41 = vsub.f32 %v7711_v38, %v7773_v11  ;;  %v7979_v4 = vsub.f32 %v20646_v35, %v7978_v21  ;;  %v20723_v14 = vpack.c.bf16 %v7973_v25, %v7966_v10 }
 0x938   : > { %v20727_v38 = vpack.c.bf16 %v20641_v19, %v20646_v35  ;;  %v8000_v11 = vsub.f32 %v7998_v63, %v7999_v55  ;;  %v20729_v42 = vpack.c.bf16 %v7985_v46, %v7978_v21 }
 0x939   : > { %15507 = vmatprep.subr.bf16.mxu1 %v20650_v20  ;;  %v7992_v26 = vand.u32 4294901760, %v7991_v41  ;;  %v7980_v50 = vand.u32 4294901760, %v7979_v4  ;;  %v20733_v61 = vpack.c.bf16 %v7998_v63, %v7991_v41 }
 0x93a   : > { %15509 = vmatpush3.bf16.msra.mxu1 %v20650_v20  ;;  %v8001_v51 = vand.u32 4294901760, %v8000_v11 }
 0x93b   : > { %15511 = vmatprep.subr.bf16.mxu1 %v20652_v44  ;;  %v7993_v53 = vsub.f32 %v7991_v41, %v7992_v26  ;;  %v20731_v52 = vpack.c.bf16 %v7987_v15, %v7980_v50  ;;  %v20735_v34 = vpack.c.bf16 %v7999_v55, %v7992_v26 }
 0x93d   : > { %v7994_v7 = vand.u32 4294901760, %v7993_v53 }
 0x93f   : > { %v20737_v17 = vpack.c.bf16 %v8001_v51, %v7994_v7 }
 0x9ef   : > { %v13788_v32 = vpop.f32.mrb[16].mxu0 }
 0x9f0   : > { %v7570_v27 = vmul.f32 0.125, %v13788_v32  ;;  %v7523_v19 = vpop.f32.mrb[17].mxu0 }
 0x9f1   : > { %v7569_v35 = vmul.f32 0.125, %v7523_v19 }
 0x9f2   : > { %v20741_v45 = vsel %vm19740_vm11, -1e+09, %v7570_v27 }
 0x9f3   : > { %22645 = vst [vmem:[#allocation98_spill] sm:$0xff] %v20741_v45  ;;  %v20744_v8 = vand.u32 4294901760, %v20741_v45  ;;  %v20748_v18 = vsel %vm19744_vm12, -1e+09, %v7569_v35  ;;  %v13791_v29 = vpop.f32.mrb[18].mxu0 }
 0x9f4   : > { %22647 = vst [vmem:[#allocation113_spill] sm:$0xff] %v20748_v18  ;;  %v20751_v57 = vand.u32 4294901760, %v20748_v18  ;;  %v7572_v22 = vmul.f32 0.125, %v13791_v29  ;;  %v7535_v37 = vpop.f32.mrb[19].mxu0 }
 0x9f5   : > { %v20755_v46 = vsub.f32 %v20741_v45, %v20744_v8  ;;  %v7571_v21 = vmul.f32 0.125, %v7535_v37 }
 0x9f6   : > { %v20759_v63 = vsub.f32 %v20748_v18, %v20751_v57  ;;  %v20763_v47 = vsel %vm19748_vm13, -1e+09, %v7572_v22 }
 0x9f7   : > { %22649 = vst [vmem:[#allocation112_spill] sm:$0xff] %v20763_v47  ;;  %v22200_v23 = vand.u32 4294901760, %v20755_v46  ;;  %v20767_v40 = vand.u32 4294901760, %v20763_v47  ;;  %v20771_v55 = vsel %vm19772_vm14, -1e+09, %v7571_v21  ;;  %v13794_v26 = vpop.f32.mrb[20].mxu0 }
 0x9f8   : > { %22651 = vst [vmem:[#allocation116_spill] sm:$0xff] %v20771_v55  ;;  %v20774_v10 = vand.u32 4294901760, %v20771_v55  ;;  %v7574_v25 = vmul.f32 0.125, %v13794_v26  ;;  %v7547_v11 = vpop.f32.mrb[21].mxu0  ;;  %v22201_v53 = vand.u32 4294901760, %v20759_v63 }
 0x9f9   : > { %v7824_v50 = vsub.f32 %v20755_v46, %v22200_v23  ;;  %v20782_v15 = vsub.f32 %v20763_v47, %v20767_v40  ;;  %v7573_v7 = vmul.f32 0.125, %v7547_v11 }
 0x9fa   : > { %v20786_v51 = vsub.f32 %v20771_v55, %v20774_v10  ;;  %v20790_v27 = vsel %vm19776_vm15, -1e+09, %v7574_v25  ;;  %v7814_v19 = vsub.f32 %v20759_v63, %v22201_v53 }
 0x9fb   : > { %22653 = vst [vmem:[#allocation115_spill] sm:$0xff] %v20790_v27  ;;  %v20796_v35 = vand.u32 4294901760, %v20790_v27  ;;  %v20800_v3 = vsel %vm19780_vm1, -1e+09, %v7573_v7  ;;  %v13797_v29 = vpop.f32.mrb[22].mxu0  ;;  %v22202_v22 = vand.u32 4294901760, %v20782_v15 }
 0x9fc   : > { %22655 = vst [vmem:[#allocation120_spill] sm:$0xff] %v20800_v3  ;;  %v20804_v37 = vand.u32 4294901760, %v20800_v3  ;;  %v7576_v21 = vmul.f32 0.125, %v13797_v29  ;;  %v7559_v41 = vpop.f32.mrb[23].mxu0  ;;  %v7815_v4 = vand.u32 4294901760, %v7814_v19  ;;  %v22203_v26 = vand.u32 4294901760, %v20786_v51 }
 0x9fd   : > { %v7825_v25 = vand.u32 4294901760, %v7824_v50  ;;  %v20809_v11 = vsub.f32 %v20790_v27, %v20796_v35  ;;  %v7575_v32 = vmul.f32 0.125, %v7559_v41  ;;  %v7844_v7 = vsub.f32 %v20782_v15, %v22202_v22 }
 0x9fe   : > { %v20816_v9 = vsub.f32 %v20800_v3, %v20804_v37  ;;  %v20820_v29 = vsel %vm19791_vm2, -1e+09, %v7576_v21  ;;  %13830 = vmatprep.mubr.f32.mxu1 %v7815_v4  ;;  %v7834_v50 = vsub.f32 %v20786_v51, %v22203_v26 }
 0x9ff   : > { %22657 = vst [vmem:[#allocation119_spill] sm:$0xff] %v20820_v29  ;;  %v20826_v19 = vand.u32 4294901760, %v20820_v29  ;;  %v20830_v53 = vsel %vm19799_vm3, -1e+09, %v7575_v32  ;;  %13831 = vmatmul.mubr.f32.vlgmr.msra.gmra.mrb[8].mxu1 %v7825_v25  ;;  %v22204_v22 = vand.u32 4294901760, %v20809_v11  ;;  %v7845_v41 = vand.u32 4294901760, %v7844_v7 }
 0xa00   : > { %22659 = vst [vmem:[#allocation110_spill] sm:$0xff] %v20830_v53  ;;  %v20834_v0 = vand.u32 4294901760, %v20830_v53  ;;  %15513 = vmatpush3.bf16.msra.mxu1 %v20652_v44  ;;  %v7835_v23 = vand.u32 4294901760, %v7834_v50  ;;  %v7853_v21 = vand.u32 4294901760, %v20816_v9 }
 0xa01   : > { %v20840_v4 = vsub.f32 %v20820_v29, %v20826_v19  ;;  %15515 = vmatprep.subr.bf16.mxu1 %v20677_v43  ;;  %v7864_v25 = vsub.f32 %v20809_v11, %v22204_v22 }
 0xa02   : > { %v20848_v32 = vsub.f32 %v20830_v53, %v20834_v0  ;;  %13833 = vmatprep.mubr.f32.mxu1 %v7835_v23  ;;  %v7854_v44 = vsub.f32 %v20816_v9, %v7853_v21 }
 0xa03   : > { %13834 = vmatmul.mubr.f32.gmra.mrb[10].mxu1 %v7845_v41  ;;  %v7883_v50 = vand.u32 4294901760, %v20840_v4  ;;  %v7865_v22 = vand.u32 4294901760, %v7864_v25 }
 0xa04   : > { %15517 = vmatpush3.bf16.msra.mxu1 %v20677_v43  ;;  %v7855_v26 = vand.u32 4294901760, %v7854_v44  ;;  %v7873_v7 = vand.u32 4294901760, %v20848_v32 }
 0xa05   : > { %15519 = vmatprep.subr.bf16.mxu1 %v20690_v39  ;;  %v7884_v29 = vsub.f32 %v20840_v4, %v7883_v50 }
 0xa06   : > { %13836 = vmatprep.mubr.f32.mxu1 %v7855_v26  ;;  %v7874_v23 = vsub.f32 %v20848_v32, %v7873_v7  ;;  %v8735_v26 = vld [vmem:[#allocation14 + $0x70] sm:$0xff] }
 0xa07   : > { %13837 = vmatmul.mubr.f32.gmra.mrb[12].mxu1 %v7865_v22  ;;  %v7885_v43 = vand.u32 4294901760, %v7884_v29 }
 0xa08   : > { %15521 = vmatpush3.bf16.msra.mxu1 %v20690_v39  ;;  %v7875_v41 = vand.u32 4294901760, %v7874_v23  ;;  %v22663_v39 = vand.u32 4294901760, %v20782_v15 }
 0xa09   : > { %15523 = vmatprep.subr.bf16.mxu1 %v20702_v30 }
 0xa0a   : > { %13839 = vmatprep.mubr.f32.mxu1 %v7875_v41 }
 0xa0b   : > { %13840 = vmatmul.mubr.f32.gmra.mrb[14].mxu1 %v7885_v43 }
 0xa0c   : > { %15525 = vmatpush3.bf16.msra.mxu1 %v20702_v30  ;;  %13874 = vmatprep.mubr.f32.mxu1 %v20751_v57 }
 0xa0d   : > { %15527 = vmatprep.subr.bf16.mxu1 %v20713_v12 }
 0xa10   : > { %15529 = vmatpush3.bf16.msra.mxu1 %v20713_v12 }
 0xa11   : > { %15531 = vmatprep.subr.bf16.mxu1 %v20723_v14 }
 0xa14   : > { %15533 = vmatpush3.bf16.msra.mxu1 %v20723_v14 }
 0xa15   : > { %15535 = vmatprep.subr.bf16.mxu1 %v20731_v52 }
 0xa18   : > { %15537 = vmatpush3.bf16.msra.mxu1 %v20731_v52 }
 0xa19   : > { %15539 = vmatprep.subr.bf16.mxu1 %v20737_v17 }
 0xa1c   : > { %15541 = vmatpush3.bf16.msra.mxu1 %v20737_v17  ;;  %v8731_v17 = vld [vmem:[#allocation14 + $0x50] sm:$0xff] }
 0xa1d   : > { %15543 = vmatprep.subr.bf16.mxu1 %v20659_v60 }
 0xa1f   : > { %13875 = vmatmul.mubr.f32.vlgmr.msra.gmra.mrb[8].mxu1 %v20744_v8 }
 0xa20   : > { %13877 = vmatprep.mubr.f32.mxu1 %v20774_v10  ;;  %15545 = vmatpush3.bf16.msra.mxu1 %v20659_v60  ;;  %v22660_v60 = vand.u32 4294901760, %v20759_v63 }
 0xa21   : > { %15547 = vmatprep.subr.bf16.mxu1 %v20669_v13 }
 0xa23   : > { %13878 = vmatmul.mubr.f32.gmra.mrb[10].mxu1 %v20767_v40 }
 0xa24   : > { %13880 = vmatprep.mubr.f32.mxu1 %v20804_v37  ;;  %15549 = vmatpush3.bf16.msra.mxu1 %v20669_v13  ;;  %v22661_v13 = vand.u32 4294901760, %v20755_v46 }
 0xa25   : > { %15551 = vmatprep.subr.bf16.mxu1 %v20681_v5 }
 0xa27   : > { %13881 = vmatmul.mubr.f32.gmra.mrb[12].mxu1 %v20796_v35 }
 0xa28   : > { %13883 = vmatprep.mubr.f32.mxu1 %v20834_v0  ;;  %15553 = vmatpush3.bf16.msra.mxu1 %v20681_v5  ;;  %v22662_v5 = vand.u32 4294901760, %v20786_v51 }
 0xa29   : > { %15555 = vmatprep.subr.bf16.mxu1 %v20694_v2 }
 0xa2b   : > { %13884 = vmatmul.mubr.f32.gmra.mrb[14].mxu1 %v20826_v19 }
 0xa2c   : > { %15557 = vmatpush3.bf16.msra.mxu1 %v20694_v2  ;;  %13918 = vmatprep.mubr.f32.mxu1 %v20759_v63  ;;  %v22664_v2 = vand.u32 4294901760, %v20809_v11 }
 0xa2d   : > { %15559 = vmatprep.subr.bf16.mxu1 %v20706_v54 }
 0xa30   : > { %15561 = vmatpush3.bf16.msra.mxu1 %v20706_v54  ;;  %v21006_v54 = vld [vmem:[#allocation14 + $0x30] sm:$0xff] }
 0xa31   : > { %15563 = vmatprep.subr.bf16.mxu1 %v20717_v62 }
 0xa34   : > { %15565 = vmatpush3.bf16.msra.mxu1 %v20717_v62  ;;  %v8763_v62 = vand.u32 4294901760, %v21006_v54 }
 0xa35   : > { %15567 = vmatprep.subr.bf16.mxu1 %v20727_v38 }
 0xa38   : > { %15569 = vmatpush3.bf16.msra.mxu1 %v20727_v38  ;;  %v8729_v38 = vld [vmem:[#allocation14 + $0x40] sm:$0xff] }
 0xa39   : > { %15571 = vmatprep.subr.bf16.mxu1 %v20733_v61  ;;  %v8769_v52 = vand.u32 4294901760, %v8729_v38 }
 0xa3c   : > { %15573 = vmatpush3.bf16.msra.mxu1 %v20733_v61 }
 0xa3d   : > { %15575 = vmatprep.subr.bf16.mxu1 %v20592_v36 }
 0xa3f   : > { %13919 = vmatmul.mubr.f32.vlgmr.msra.gmra.mrb[8].mxu1 %v20755_v46 }
 0xa40   : > { %13921 = vmatprep.mubr.f32.mxu1 %v20786_v51  ;;  %15577 = vmatpush3.bf16.msra.mxu1 %v20592_v36 }
 0xa41   : > { %15579 = vmatprep.subr.bf16.mxu1 %v20600_v1 }
 0xa43   : > { %13922 = vmatmul.mubr.f32.gmra.mrb[10].mxu1 %v20782_v15 }
 0xa44   : > { %13924 = vmatprep.mubr.f32.mxu1 %v20816_v9  ;;  %15581 = vmatpush3.bf16.msra.mxu1 %v20600_v1  ;;  %v8787_v9 = vand.u32 4294901760, %v8735_v26 }
 0xa45   : > { %15583 = vmatprep.subr.bf16.mxu1 %v20610_v6 }
 0xa47   : > { %13925 = vmatmul.mubr.f32.gmra.mrb[12].mxu1 %v20809_v11  ;;  %v8736_v11 = vld [vmem:[#allocation14 + $0x78] sm:$0xff] }
 0xa48   : > { %13927 = vmatprep.mubr.f32.mxu1 %v20848_v32  ;;  %15585 = vmatpush3.bf16.msra.mxu1 %v20610_v6  ;;  %v8790_v29 = vand.u32 4294901760, %v8736_v11 }
 0xa49   : > { %15587 = vmatprep.subr.bf16.mxu1 %v20620_v59 }
 0xa4a   : > { %v21051_v32 = vpack.c.bf16 %v8790_v29, %v8787_v9 }
 0xa4b   : > { %13928 = vmatmul.mubr.f32.gmra.mrb[14].mxu1 %v20840_v4 }
 0xa4c   : > { %15589 = vmatpush3.bf16.msra.mxu1 %v20620_v59  ;;  %13962 = vmatprep.mubr.f32.mxu1 %v22660_v60 }
 0xa4d   : > { %15591 = vmatprep.subr.bf16.mxu1 %v20628_v16 }
 0xa50   : > { %15593 = vmatpush3.bf16.msra.mxu1 %v20628_v16 }
 0xa51   : > { %15595 = vmatprep.subr.bf16.mxu1 %v20636_v24 }
 0xa54   : > { %15597 = vmatpush3.bf16.msra.mxu1 %v20636_v24 }
 0xa55   : > { %15599 = vmatprep.subr.bf16.mxu1 %v20644_v48 }
 0xa58   : > { %15601 = vmatpush3.bf16.msra.mxu1 %v20644_v48 }
 0xa59   : > { %15603 = vmatprep.subr.bf16.mxu1 %v20650_v20 }
 0xa5c   : > { %15605 = vmatpush3.bf16.msra.mxu1 %v20650_v20 }
 0xa5d   : > { %15607 = vmatprep.subr.bf16.mxu1 %v20665_v33 }
 0xa5f   : > { %13963 = vmatmul.mubr.f32.vlgmr.msra.gmra.mrb[8].mxu1 %v22661_v13 }
 0xa60   : > { %13965 = vmatprep.mubr.f32.mxu1 %v22662_v5  ;;  %15609 = vmatpush3.bf16.msra.mxu1 %v20665_v33  ;;  %v20993_v33 = vld [vmem:[#allocation14 + $0x28] sm:$0xff] }
 0xa61   : > { %15611 = vmatprep.subr.bf16.mxu1 %v20675_v28 }
 0xa63   : > { %13966 = vmatmul.mubr.f32.gmra.mrb[10].mxu1 %v22663_v39 }
 0xa64   : > { %13968 = vmatprep.mubr.f32.mxu1 %v7853_v21  ;;  %15613 = vmatpush3.bf16.msra.mxu1 %v20675_v28 }
 0xa65   : > { %15615 = vmatprep.subr.bf16.mxu1 %v20687_v56 }
 0xa67   : > { %13969 = vmatmul.mubr.f32.gmra.mrb[12].mxu1 %v22664_v2 }
 0xa68   : > { %13971 = vmatprep.mubr.f32.mxu1 %v7873_v7  ;;  %15617 = vmatpush3.bf16.msra.mxu1 %v20687_v56 }
 0xa69   : > { %15619 = vmatprep.subr.bf16.mxu1 %v20699_v49 }
 0xa6b   : > { %13972 = vmatmul.mubr.f32.gmra.mrb[14].mxu1 %v7883_v50 }
 0xa6c   : > { %15621 = vmatpush3.bf16.msra.mxu1 %v20699_v49  ;;  %14006 = vmatprep.mubr.f32.mxu1 %v20751_v57  ;;  %v8760_v49 = vand.u32 4294901760, %v20993_v33 }
 0xa6d   : > { %15623 = vmatprep.subr.bf16.mxu1 %v20711_v58 }
 0xa70   : > { %15625 = vmatpush3.bf16.msra.mxu1 %v20711_v58  ;;  %v21008_v58 = vld [vmem:[#allocation14 + $0x38] sm:$0xff] }
 0xa71   : > { %15627 = vmatprep.subr.bf16.mxu1 %v20721_v31 }
 0xa74   : > { %15629 = vmatpush3.bf16.msra.mxu1 %v20721_v31  ;;  %v8766_v31 = vand.u32 4294901760, %v21008_v58 }
 0xa75   : > { %15631 = vmatprep.subr.bf16.mxu1 %v20729_v42 }
 0xa76   : > { %v21027_v14 = vpack.c.bf16 %v8766_v31, %v8763_v62 }
 0xa78   : > { %15633 = vmatpush3.bf16.msra.mxu1 %v20729_v42  ;;  %v8730_v42 = vld [vmem:[#allocation14 + $0x48] sm:$0xff] }
 0xa79   : > { %15635 = vmatprep.subr.bf16.mxu1 %v20735_v34  ;;  %v8772_v61 = vand.u32 4294901760, %v8730_v42 }
 0xa7c   : > { %15637 = vmatpush3.bf16.msra.mxu1 %v20735_v34  ;;  %v21032_v34 = vpack.c.bf16 %v8772_v61, %v8769_v52 }
 0xa7d   : > { %15639 = vmatprep.subr.bf16.mxu1 %v20592_v36 }
 0xa7f   : > { %14007 = vmatmul.mubr.f32.vlgmr.msra.gmra.mrb[8].mxu1 %v20744_v8 }
 0xa80   : > { %14009 = vmatprep.mubr.f32.mxu1 %v20774_v10  ;;  %15641 = vmatpush3.bf16.msra.mxu1 %v20592_v36  ;;  %v8721_v36 = vld [vmem:[#allocation14] sm:$0xff] }
 0xa81   : > { %15643 = vmatprep.subr.bf16.mxu1 %v20600_v1 }
 0xa83   : > { %14010 = vmatmul.mubr.f32.gmra.mrb[10].mxu1 %v20767_v40 }
 0xa84   : > { %14012 = vmatprep.mubr.f32.mxu1 %v20804_v37  ;;  %15645 = vmatpush3.bf16.msra.mxu1 %v20600_v1  ;;  %v8722_v1 = vld [vmem:[#allocation14 + $0x8] sm:$0xff] }
 0xa85   : > { %15647 = vmatprep.subr.bf16.mxu1 %v20610_v6 }
 0xa87   : > { %14013 = vmatmul.mubr.f32.gmra.mrb[12].mxu1 %v20796_v35 }
 0xa88   : > { %14015 = vmatprep.mubr.f32.mxu1 %v20834_v0  ;;  %15649 = vmatpush3.bf16.msra.mxu1 %v20610_v6  ;;  %v20986_v6 = vld [vmem:[#allocation14 + $0x10] sm:$0xff] }
 0xa89   : > { %15651 = vmatprep.subr.bf16.mxu1 %v20620_v59 }
 0xa8b   : > { %14016 = vmatmul.mubr.f32.gmra.mrb[14].mxu1 %v20826_v19 }
 0xa8c   : > { %15653 = vmatpush3.bf16.msra.mxu1 %v20620_v59  ;;  %14050 = vmatprep.mubr.f32.mxu1 %v20751_v57  ;;  %v8745_v59 = vand.u32 4294901760, %v8721_v36  ;;  %v8775_v57 = vand.u32 4294901760, %v8731_v17 }
 0xa8d   : > { %15655 = vmatprep.subr.bf16.mxu1 %v20628_v16 }
 0xa8e   : > { %v21042_v22 = vsub.f32 %v8721_v36, %v8745_v59  ;;  %v21071_v36 = vsub.f32 %v8729_v38, %v8769_v52 }
 0xa90   : > { %15657 = vmatpush3.bf16.msra.mxu1 %v20628_v16  ;;  %v8748_v16 = vand.u32 4294901760, %v8722_v1 }
 0xa91   : > { %15659 = vmatprep.subr.bf16.mxu1 %v20636_v24 }
 0xa92   : > { %v20996_v56 = vpack.c.bf16 %v8748_v16, %v8745_v59  ;;  %v22214_v59 = vand.u32 4294901760, %v21071_v36 }
 0xa94   : > { %15661 = vmatpush3.bf16.msra.mxu1 %v20636_v24  ;;  %v20988_v24 = vld [vmem:[#allocation14 + $0x18] sm:$0xff] }
 0xa95   : > { %15663 = vmatprep.subr.bf16.mxu1 %v20644_v48  ;;  %v8754_v28 = vand.u32 4294901760, %v20988_v24 }
 0xa98   : > { %15665 = vmatpush3.bf16.msra.mxu1 %v20644_v48  ;;  %v8751_v48 = vand.u32 4294901760, %v20986_v6 }
 0xa99   : > { %15667 = vmatprep.subr.bf16.mxu1 %v20650_v20 }
 0xa9a   : > { %v21004_v30 = vpack.c.bf16 %v8754_v28, %v8751_v48 }
 0xa9c   : > { %15669 = vmatpush3.bf16.msra.mxu1 %v20650_v20  ;;  %v20991_v20 = vld [vmem:[#allocation14 + $0x20] sm:$0xff] }
 0xa9d   : > { %15671 = vmatprep.subr.bf16.mxu1 %v20996_v56 }
 0xa9f   : > { %14051 = vmatmul.mubr.f32.vlgmr.msra.gmra.mrb[8].mxu1 %v20744_v8  ;;  %v8732_v8 = vld [vmem:[#allocation14 + $0x58] sm:$0xff] }
 0xaa0   : > { %14053 = vmatprep.mubr.f32.mxu1 %v20774_v10  ;;  %15673 = vmatpush3.bf16.msra.mxu1 %v20996_v56  ;;  %v8778_v46 = vand.u32 4294901760, %v8732_v8  ;;  %v8734_v10 = vld [vmem:[#allocation14 + $0x68] sm:$0xff] }
 0xaa1   : > { %15675 = vmatprep.subr.bf16.mxu1 %v21004_v30  ;;  %v8784_v51 = vand.u32 4294901760, %v8734_v10 }
 0xaa2   : > { %v21036_v63 = vpack.c.bf16 %v8778_v46, %v8775_v57 }
 0xaa3   : > { %14054 = vmatmul.mubr.f32.gmra.mrb[10].mxu1 %v20767_v40  ;;  %v8733_v40 = vld [vmem:[#allocation14 + $0x60] sm:$0xff] }
 0xaa4   : > { %14056 = vmatprep.mubr.f32.mxu1 %v20804_v37  ;;  %15677 = vmatpush3.bf16.msra.mxu1 %v21004_v30  ;;  %v8781_v15 = vand.u32 4294901760, %v8733_v40  ;;  %v21044_v37 = vsub.f32 %v8722_v1, %v8748_v16  ;;  %v21073_v1 = vsub.f32 %v8730_v42, %v8772_v61 }
 0xaa6   : > { %v22219_v21 = vand.u32 4294901760, %v21044_v37  ;;  %v22213_v16 = vand.u32 4294901760, %v21073_v1 }
 0xaa7   : > { %14057 = vmatmul.mubr.f32.gmra.mrb[12].mxu1 %v20796_v35  ;;  %v21040_v35 = vpack.c.bf16 %v8784_v51, %v8781_v15 }
 0xaa8   : > { %14059 = vmatprep.mubr.f32.mxu1 %v20834_v0  ;;  %v8757_v0 = vand.u32 4294901760, %v20991_v20  ;;  %v8916_v50 = vsub.f32 %v21044_v37, %v22219_v21 }
 0xaaa   : > { %v21017_v12 = vpack.c.bf16 %v8760_v49, %v8757_v0  ;;  %v8917_v23 = vand.u32 4294901760, %v8916_v50  ;;  %v21085_v50 = vsub.f32 %v8732_v8, %v8778_v46  ;;  %v21099_v8 = vsub.f32 %v8734_v10, %v8784_v51 }
 0xaab   : > { %14060 = vmatmul.mubr.f32.gmra.mrb[14].mxu1 %v20826_v19  ;;  %v22220_v19 = vand.u32 4294901760, %v21042_v22 }
 0xaac   : > { %15679 = vmatprep.subr.bf16.mxu1 %v21017_v12  ;;  %v22211_v61 = vand.u32 4294901760, %v21085_v50 }
 0xaad   : > { %15681 = vmatpush3.bf16.msra.mxu1 %v21017_v12  ;;  %v8909_v44 = vsub.f32 %v21042_v22, %v22220_v19 }
 0xaae   : > { %15683 = vmatprep.subr.bf16.mxu1 %v21027_v14 }
 0xaaf   : > { %v8910_v7 = vand.u32 4294901760, %v8909_v44  ;;  %v21083_v44 = vsub.f32 %v8731_v17, %v8775_v57  ;;  %v21097_v17 = vsub.f32 %v8733_v40, %v8781_v15 }
 0xab1   : > { %15685 = vmatpush3.bf16.msra.mxu1 %v21027_v14  ;;  %v21063_v60 = vpack.c.bf16 %v8917_v23, %v8910_v7  ;;  %v22212_v42 = vand.u32 4294901760, %v21083_v44 }
 0xab2   : > { %15687 = vmatprep.subr.bf16.mxu1 %v21032_v34 }
 0xab3   : > { %v8979_v23 = vsub.f32 %v21083_v44, %v22212_v42 }
 0xab5   : > { %15689 = vmatpush3.bf16.msra.mxu1 %v21032_v34  ;;  %v8980_v57 = vand.u32 4294901760, %v8979_v23  ;;  %v21129_v23 = vpack.c.bf16 %v21044_v37, %v21042_v22 }
 0xab6   : > { %15691 = vmatprep.subr.bf16.mxu1 %v21036_v63 }
 0xab9   : > { %15693 = vmatpush3.bf16.msra.mxu1 %v21036_v63 }
 0xaba   : > { %15695 = vmatprep.subr.bf16.mxu1 %v21040_v35 }
 0xabd   : > { %15697 = vmatpush3.bf16.msra.mxu1 %v21040_v35 }
 0xabe   : > { %15699 = vmatprep.subr.bf16.mxu1 %v21051_v32 }
 0xac1   : > { %15701 = vmatpush3.bf16.msra.mxu1 %v21051_v32 }
 0xac2   : > { %15703 = vmatprep.subr.bf16.mxu1 %v21063_v60 }
 0xb72   : > { %v14052_v4 = vpop.f32.mrb[8].mxu1 }
 0xb73   : > { %8682 = vrot.lane.b32.xlu1 %v14052_v4, %s17027_s16  ;;  %v8626_v25 = vpop.f32.mrb[9].mxu1  ;;  %v8965_v4 = vsub.f32 %v21071_v36, %v22214_v59 }
 0xb74   : > { %8680 = vrot.lane.b32.xlu0 %v8626_v25, %s17027_s16  ;;  %v8972_v25 = vsub.f32 %v21073_v1, %v22213_v16 }
 0xb75   : > { %v8966_v38 = vand.u32 4294901760, %v8965_v4  ;;  %v21110_v4 = vsub.f32 %v8736_v11, %v8790_v29 }
 0xb76   : > { %v14055_v41 = vpop.f32.mrb[10].mxu1  ;;  %v8973_v52 = vand.u32 4294901760, %v8972_v25 }
 0xb77   : > { %8686 = vrot.lane.b32.xlu1 %v14055_v41, %s17027_s16  ;;  %v8638_v43 = vpop.f32.mrb[11].mxu1  ;;  %v8986_v41 = vsub.f32 %v21085_v50, %v22211_v61  ;;  %22665 = vst [vmem:[#allocation111_spill] sm:$0xff] %v21110_v4  ;;  %v22207_v51 = vand.u32 4294901760, %v21110_v4 }
 0xb78   : > { %8684 = vrot.lane.b32.xlu0 %v8638_v43, %s17027_s16  ;;  %v21089_v7 = vpack.c.bf16 %v8973_v52, %v8966_v38  ;;  %v22210_v43 = vand.u32 4294901760, %v21097_v17 }
 0xb79   : > { %v8987_v46 = vand.u32 4294901760, %v8986_v41  ;;  %v21133_v41 = vpack.c.bf16 %v21073_v1, %v21071_v36 }
 0xb7a   : > { %v14058_v13 = vpop.f32.mrb[12].mxu1 }
 0xb7b   : > { %8690 = vrot.lane.b32.xlu1 %v14058_v13, %s17027_s16  ;;  %v8650_v5 = vpop.f32.mrb[13].mxu1  ;;  %v22209_v13 = vand.u32 4294901760, %v21099_v8 }
 0xb7c   : > { %8688 = vrot.lane.b32.xlu0 %v8650_v5, %s17027_s16  ;;  %v21103_v5 = vpack.c.bf16 %v8987_v46, %v8980_v57  ;;  %v21137_v57 = vpack.c.bf16 %v21085_v50, %v21083_v44  ;;  %v21141_v46 = vpack.c.bf16 %v21099_v8, %v21097_v17 }
 0xb7d   : > { %v9000_v40 = vsub.f32 %v21099_v8, %v22209_v13 }
 0xb7e   : > { %v14061_v39 = vpop.f32.mrb[14].mxu1 }
 0xb7f   : > { %8694 = vrot.lane.b32.xlu1 %v14061_v39, %s17027_s16  ;;  %v8662_v2 = vpop.f32.mrb[15].mxu1  ;;  %v8993_v39 = vsub.f32 %v21097_v17, %v22210_v43  ;;  %v9001_v25 = vand.u32 4294901760, %v9000_v40 }
 0xb80   : > { %8692 = vrot.lane.b32.xlu0 %v8662_v2, %s17027_s16  ;;  %v21108_v2 = vsub.f32 %v8735_v26, %v8787_v9  ;;  %v9014_v26 = vsub.f32 %v21110_v4, %v22207_v51  ;;  %s22712_s16 = sld [smem:[#allocation135_spill]] }
 0xb81   : > { %v8994_v10 = vand.u32 4294901760, %v8993_v39 }
 0xb82   : > { %v22208_v15 = vand.u32 4294901760, %v21108_v2  ;;  %v9015_v29 = vand.u32 4294901760, %v9014_v26  ;;  %v21145_v39 = vpack.c.bf16 %v21110_v4, %v21108_v2 }
 0xb83   : > { %v21123_v11 = vpack.c.bf16 %v9001_v25, %v8994_v10  ;;  %v21150_v10 = vsub.f32 %v20986_v6, %v8751_v48  ;;  %v21155_v25 = vsub.f32 %v20988_v24, %v8754_v28  ;;  %v21165_v6 = vsub.f32 %v20991_v20, %v8757_v0 }
 0xb84   : > { %v9007_v38 = vsub.f32 %v21108_v2, %v22208_v15  ;;  %v21170_v24 = vsub.f32 %v20993_v33, %v8760_v49  ;;  %v21190_v15 = vsub.f32 %v21006_v54, %v8763_v62 }
 0xb85   : > { %v22216_v33 = vand.u32 4294901760, %v21165_v6 }
 0xb86   : > { %v9008_v9 = vand.u32 4294901760, %v9007_v38  ;;  %v22217_v49 = vand.u32 4294901760, %v21170_v24  ;;  %v22666_v3 = vand.u32 4294901760, %v21190_v15 }
 0xb88   : > { %v21125_v52 = vpack.c.bf16 %v9015_v29, %v9008_v9  ;;  %v22218_v9 = vand.u32 4294901760, %v21150_v10  ;;  %v22215_v29 = vand.u32 4294901760, %v21155_v25 }
 0xbe5   : > { %v8683_v40 = vpop.permute.xlu1 %8682 }
 0xbe6   : > { %8706 = vst.msk [vmem:[#allocation4 + $0x8] sm:$0xff] %vm8704_vm0, %v8683_v40  ;;  %v8681_v38 = vpop.permute.xlu0 %8680  ;;  %v8923_v40 = vsub.f32 %v21150_v10, %v22218_v9 }
 0xbe7   : > { %8705 = vst.msk [vmem:[#allocation4] sm:$0xff] %vm8704_vm0, %v8681_v38  ;;  %v8930_v38 = vsub.f32 %v21155_v25, %v22215_v29 }
 0xbe9   : > { %v8687_v26 = vpop.permute.xlu1 %8686  ;;  %v8931_v42 = vand.u32 4294901760, %v8930_v38 }
 0xbea   : > { %8708 = vst.msk [vmem:[#allocation4 + $0x18] sm:$0xff] %vm8704_vm0, %v8687_v26  ;;  %v8685_v51 = vpop.permute.xlu0 %8684 }
 0xbeb   : > { %8707 = vst.msk [vmem:[#allocation4 + $0x10] sm:$0xff] %vm8704_vm0, %v8685_v51 }
 0xbed   : > { %v8691_v48 = vpop.permute.xlu1 %8690  ;;  %v8714_v28 = vld [vmem:[#allocation4 + $0x8] sm:$0xff] }
 0xbee   : > { %8710 = vst.msk [vmem:[#allocation4 + $0x28] sm:$0xff] %vm8704_vm0, %v8691_v48  ;;  %v8689_v20 = vpop.permute.xlu0 %8688  ;;  %v8713_v0 = vld [vmem:[#allocation4] sm:$0xff]  ;;  %v21180_v26 = vand.u32 4294901760, %v8714_v28  ;;  %v21198_v48 = vsub.f32 %v21008_v58, %v8766_v31  ;;  %v8937_v58 = vsub.f32 %v21165_v6, %v22216_v33  ;;  %v8944_v31 = vsub.f32 %v21170_v24, %v22217_v49 }
 0xbef   : > { %8709 = vst.msk [vmem:[#allocation4 + $0x20] sm:$0xff] %vm8704_vm0, %v8689_v20  ;;  %v21185_v51 = vand.u32 4294901760, %v8713_v0  ;;  %v8924_v20 = vand.u32 4294901760, %v8923_v40 }
 0xbf0   : > { %v21193_v13 = vsub.f32 %v8714_v28, %v21180_v26  ;;  %v8938_v27 = vand.u32 4294901760, %v8937_v58  ;;  %v8945_v53 = vand.u32 4294901760, %v8944_v31  ;;  %v22667_v58 = vand.u32 4294901760, %v21198_v48 }
 0xbf1   : > { %v8695_v43 = vpop.permute.xlu1 %8694  ;;  %v21201_v61 = vsub.f32 %v8713_v0, %v21185_v51  ;;  %v8716_v16 = vld [vmem:[#allocation4 + $0x18] sm:$0xff]  ;;  %v15706_v9 = vpack.c.bf16 %v8931_v42, %v8924_v20 }
 0xbf2   : > { %8712 = vst.msk [vmem:[#allocation4 + $0x38] sm:$0xff] %vm8704_vm0, %v8695_v43  ;;  %v8693_v59 = vpop.permute.xlu0 %8692  ;;  %v22225_v54 = vand.u32 4294901760, %v21193_v13  ;;  %v8715_v62 = vld [vmem:[#allocation4 + $0x10] sm:$0xff]  ;;  %v21205_v28 = vand.u32 4294901760, %v8716_v16 }
 0xbf3   : > { %8711 = vst.msk [vmem:[#allocation4 + $0x30] sm:$0xff] %vm8704_vm0, %v8693_v59  ;;  %v22230_v40 = vand.u32 4294901760, %v21201_v61  ;;  %v21215_v38 = vand.u32 4294901760, %v8715_v62 }
 0xbf4   : > { %v8838_v0 = vsub.f32 %v21193_v13, %v22225_v54  ;;  %v21222_v29 = vsub.f32 %v8716_v16, %v21205_v28 }
 0xbf5   : > { %v8828_v49 = vsub.f32 %v21201_v61, %v22230_v40  ;;  %v21229_v59 = vsub.f32 %v8715_v62, %v21215_v38  ;;  %v8718_v21 = vld [vmem:[#allocation4 + $0x28] sm:$0xff]  ;;  %v8951_v40 = vsub.f32 %v21190_v15, %v22666_v3 }
 0xbf6   : > { %v22233_v19 = vand.u32 4294901760, %v21222_v29  ;;  %v8717_v43 = vld [vmem:[#allocation4 + $0x20] sm:$0xff]  ;;  %v21232_v54 = vand.u32 4294901760, %v8718_v21  ;;  %v8839_v62 = vand.u32 4294901760, %v8838_v0  ;;  %v15710_v0 = vpack.c.bf16 %v8945_v53, %v8938_v27 }
 0xbf7   : > { %v8829_v16 = vand.u32 4294901760, %v8828_v49  ;;  %v22239_v47 = vand.u32 4294901760, %v21229_v59  ;;  %v21235_v33 = vand.u32 4294901760, %v8717_v43  ;;  %v8958_v49 = vsub.f32 %v21198_v48, %v22667_v58 }
 0xbf8   : > { %v8858_v42 = vsub.f32 %v21222_v29, %v22233_v19  ;;  %v21244_v20 = vsub.f32 %v8718_v21, %v21232_v54  ;;  %v8952_v4 = vand.u32 4294901760, %v8951_v40 }
 0xbf9   : > { %14094 = vmatprep.mubr.f32.mxu1 %v8829_v16  ;;  %v8848_v31 = vsub.f32 %v21229_v59, %v22239_v47  ;;  %v21253_v45 = vsub.f32 %v8717_v43, %v21235_v33  ;;  %v8720_v3 = vld [vmem:[#allocation4 + $0x38] sm:$0xff]  ;;  %v8959_v53 = vand.u32 4294901760, %v8958_v49 }
 0xbfa   : > { %14095 = vmatmul.mubr.f32.vlgmr.msra.gmra.mrb[16].mxu1 %v8839_v62  ;;  %v22240_v19 = vand.u32 4294901760, %v21244_v20  ;;  %v8719_v55 = vld [vmem:[#allocation4 + $0x30] sm:$0xff]  ;;  %v21256_v21 = vand.u32 4294901760, %v8720_v3  ;;  %v8859_v47 = vand.u32 4294901760, %v8858_v42 }
 0xbfb   : > { %15705 = vmatpush3.bf16.msra.mxu1 %v21063_v60  ;;  %v8849_v18 = vand.u32 4294901760, %v8848_v31  ;;  %v8867_v16 = vand.u32 4294901760, %v21253_v45  ;;  %v21260_v58 = vand.u32 4294901760, %v8719_v55 }
 0xbfc   : > { %15707 = vmatprep.subr.bf16.mxu1 %v15706_v9  ;;  %v8878_v43 = vsub.f32 %v21244_v20, %v22240_v19  ;;  %v21266_v27 = vsub.f32 %v8720_v3, %v21256_v21  ;;  %v15714_v19 = vpack.c.bf16 %v8959_v53, %v8952_v4  ;;  %v22668_v4 = vand.u32 4294901760, %v21201_v61 }
 0xbfd   : > { %14097 = vmatprep.mubr.f32.mxu1 %v8849_v18  ;;  %v8868_v60 = vsub.f32 %v21253_v45, %v8867_v16  ;;  %v21272_v62 = vsub.f32 %v8719_v55, %v21260_v58 }
 0xbfe   : > { %14098 = vmatmul.mubr.f32.gmra.mrb[18].mxu1 %v8859_v47  ;;  %v8897_v40 = vand.u32 4294901760, %v21266_v27  ;;  %v8879_v49 = vand.u32 4294901760, %v8878_v43  ;;  %v22688_v43 = vld [vmem:[#allocation111_spill] sm:$0xff] }
 0xbff   : > { %15709 = vmatpush3.bf16.msra.mxu1 %v15706_v9  ;;  %v8869_v42 = vand.u32 4294901760, %v8868_v60  ;;  %v8887_v31 = vand.u32 4294901760, %v21272_v62  ;;  %v22689_v53 = vand.u32 4294901760, %v22688_v43 }
 0xc00   : > { %15711 = vmatprep.subr.bf16.mxu1 %v15710_v0  ;;  %v8898_v18 = vsub.f32 %v21266_v27, %v8897_v40 }
 0xc01   : > { %14100 = vmatprep.mubr.f32.mxu1 %v8869_v42  ;;  %v8888_v55 = vsub.f32 %v21272_v62, %v8887_v31 }
 0xc02   : > { %14101 = vmatmul.mubr.f32.gmra.mrb[20].mxu1 %v8879_v49  ;;  %v8899_v9 = vand.u32 4294901760, %v8898_v18  ;;  %v16636_v18 = vld [vmem:[%s18636_s15 + $0x30] sm:$0xff] }
 0xc03   : > { %15713 = vmatpush3.bf16.msra.mxu1 %v15710_v0  ;;  %v8889_v47 = vand.u32 4294901760, %v8888_v55  ;;  %v22677_v0 = vand.u32 4294901760, %v21222_v29 }
 0xc04   : > { %15715 = vmatprep.subr.bf16.mxu1 %v15714_v19 }
 0xc05   : > { %14103 = vmatprep.mubr.f32.mxu1 %v8889_v47  ;;  %v16637_v47 = vld [vmem:[%s18636_s15 + $0x28] sm:$0xff] }
 0xc06   : > { %14104 = vmatmul.mubr.f32.gmra.mrb[22].mxu1 %v8899_v9 }
 0xc07   : > { %15717 = vmatpush3.bf16.msra.mxu1 %v15714_v19  ;;  %14138 = vmatprep.mubr.f32.mxu1 %v21185_v51  ;;  %v15738_v19 = vpack.c.bf16 %v21155_v25, %v21150_v10 }
 0xc08   : > { %15719 = vmatprep.subr.bf16.mxu1 %v21089_v7 }
 0xc0b   : > { %15721 = vmatpush3.bf16.msra.mxu1 %v21089_v7  ;;  %v15742_v7 = vpack.c.bf16 %v21170_v24, %v21165_v6 }
 0xc0c   : > { %15723 = vmatprep.subr.bf16.mxu1 %v21103_v5 }
 0xc0f   : > { %15725 = vmatpush3.bf16.msra.mxu1 %v21103_v5  ;;  %v15746_v5 = vpack.c.bf16 %v21198_v48, %v21190_v15 }
 0xc10   : > { %15727 = vmatprep.subr.bf16.mxu1 %v21123_v11 }
 0xc13   : > { %15729 = vmatpush3.bf16.msra.mxu1 %v21123_v11  ;;  %v22669_v11 = vand.u32 4294901760, %v21042_v22  ;;  %v22675_v22 = vand.u32 4294901760, %v21165_v6 }
 0xc14   : > { %15731 = vmatprep.subr.bf16.mxu1 %v21125_v52 }
 0xc17   : > { %15733 = vmatpush3.bf16.msra.mxu1 %v21125_v52  ;;  %v22670_v52 = vand.u32 4294901760, %v21044_v37  ;;  %v22676_v37 = vand.u32 4294901760, %v21170_v24  ;;  %v22684_v24 = vand.u32 4294901760, %v21085_v50 }
 0xc18   : > { %15735 = vmatprep.subr.bf16.mxu1 %v21129_v23 }
 0xc19   : > { %v15806_v3 = vpack.c.bf16 %v22676_v37, %v22675_v22 }
 0xc1a   : > { %14139 = vmatmul.mubr.f32.vlgmr.msra.gmra.mrb[16].mxu1 %v21180_v26 }
 0xc1b   : > { %14141 = vmatprep.mubr.f32.mxu1 %v21215_v38  ;;  %15737 = vmatpush3.bf16.msra.mxu1 %v21129_v23  ;;  %v22671_v23 = vand.u32 4294901760, %v21150_v10  ;;  %v22679_v10 = vand.u32 4294901760, %v21198_v48 }
 0xc1c   : > { %15739 = vmatprep.subr.bf16.mxu1 %v15738_v19 }
 0xc1e   : > { %14142 = vmatmul.mubr.f32.gmra.mrb[18].mxu1 %v21205_v28 }
 0xc1f   : > { %14144 = vmatprep.mubr.f32.mxu1 %v21235_v33  ;;  %15741 = vmatpush3.bf16.msra.mxu1 %v15738_v19  ;;  %v16638_v19 = vld [vmem:[%s18636_s15 + $0x38] sm:$0xff] }
 0xc20   : > { %15743 = vmatprep.subr.bf16.mxu1 %v15742_v7 }
 0xc22   : > { %14145 = vmatmul.mubr.f32.gmra.mrb[20].mxu1 %v21232_v54 }
 0xc23   : > { %14147 = vmatprep.mubr.f32.mxu1 %v21260_v58  ;;  %15745 = vmatpush3.bf16.msra.mxu1 %v15742_v7 }
 0xc24   : > { %15747 = vmatprep.subr.bf16.mxu1 %v15746_v5 }
 0xc26   : > { %14148 = vmatmul.mubr.f32.gmra.mrb[22].mxu1 %v21256_v21 }
 0xc27   : > { %15749 = vmatpush3.bf16.msra.mxu1 %v15746_v5  ;;  %14182 = vmatprep.mubr.f32.mxu1 %v21201_v61  ;;  %v15798_v61 = vpack.c.bf16 %v22670_v52, %v22669_v11  ;;  %v16463_v5 = vld [vmem:[#allocation16] ss:$8 sps:$4 sm:$0xff]   ;;  %v16468_v11 = vld [vmem:[#allocation16 + $0x14] ss:$8 sps:$4 sm:$0xff]   ;;  %v16466_v52 = vld [vmem:[#allocation16 + $0x10] ss:$8 sps:$4 sm:$0xff]  }
 0xc28   : > { %15751 = vmatprep.subr.bf16.mxu1 %v21133_v41 }
 0xc2b   : > { %15753 = vmatpush3.bf16.msra.mxu1 %v21133_v41  ;;  %v22672_v41 = vand.u32 4294901760, %v21155_v25 }
 0xc2c   : > { %15755 = vmatprep.subr.bf16.mxu1 %v21137_v57 }
 0xc2f   : > { %15757 = vmatpush3.bf16.msra.mxu1 %v21137_v57  ;;  %v15802_v57 = vpack.c.bf16 %v22672_v41, %v22671_v23 }
 0xc30   : > { %15759 = vmatprep.subr.bf16.mxu1 %v21141_v46 }
 0xc33   : > { %15761 = vmatpush3.bf16.msra.mxu1 %v21141_v46  ;;  %v22673_v46 = vand.u32 4294901760, %v21193_v13 }
 0xc34   : > { %15763 = vmatprep.subr.bf16.mxu1 %v21145_v39 }
 0xc37   : > { %15765 = vmatpush3.bf16.msra.mxu1 %v21145_v39  ;;  %v22674_v39 = vand.u32 4294901760, %v21229_v59 }
 0xc38   : > { %15767 = vmatprep.subr.bf16.mxu1 %v20996_v56 }
 0xc3a   : > { %14183 = vmatmul.mubr.f32.vlgmr.msra.gmra.mrb[16].mxu1 %v21193_v13  ;;  %v22678_v13 = vand.u32 4294901760, %v21190_v15  ;;  %v22683_v15 = vand.u32 4294901760, %v21083_v44  ;;  %v16632_v44 = vld [vmem:[%s18636_s15] sm:$0xff] }
 0xc3b   : > { %14185 = vmatprep.mubr.f32.mxu1 %v21229_v59  ;;  %15769 = vmatpush3.bf16.msra.mxu1 %v20996_v56  ;;  %v22680_v59 = vand.u32 4294901760, %v21244_v20 }
 0xc3c   : > { %15771 = vmatprep.subr.bf16.mxu1 %v21004_v30  ;;  %v15810_v25 = vpack.c.bf16 %v22679_v10, %v22678_v13  ;;  %v15818_v48 = vpack.c.bf16 %v22684_v24, %v22683_v15 }
 0xc3e   : > { %14186 = vmatmul.mubr.f32.gmra.mrb[18].mxu1 %v21222_v29  ;;  %v22681_v29 = vand.u32 4294901760, %v21071_v36  ;;  %v22686_v36 = vand.u32 4294901760, %v21099_v8 }
 0xc3f   : > { %14188 = vmatprep.mubr.f32.mxu1 %v21253_v45  ;;  %15773 = vmatpush3.bf16.msra.mxu1 %v21004_v30  ;;  %v22682_v45 = vand.u32 4294901760, %v21073_v1 }
 0xc40   : > { %15775 = vmatprep.subr.bf16.mxu1 %v21017_v12 }
 0xc41   : > { %v15814_v6 = vpack.c.bf16 %v22682_v45, %v22681_v29 }
 0xc42   : > { %14189 = vmatmul.mubr.f32.gmra.mrb[20].mxu1 %v21244_v20  ;;  %v22685_v20 = vand.u32 4294901760, %v21097_v17 }
 0xc43   : > { %14191 = vmatprep.mubr.f32.mxu1 %v21272_v62  ;;  %15777 = vmatpush3.bf16.msra.mxu1 %v21017_v12  ;;  %v16635_v62 = vld [vmem:[%s18636_s15 + $0x18] sm:$0xff] }
 0xc44   : > { %15779 = vmatprep.subr.bf16.mxu1 %v21027_v14  ;;  %v15822_v1 = vpack.c.bf16 %v22686_v36, %v22685_v20 }
 0xc46   : > { %14192 = vmatmul.mubr.f32.gmra.mrb[22].mxu1 %v21266_v27 }
 0xc47   : > { %15781 = vmatpush3.bf16.msra.mxu1 %v21027_v14  ;;  %14226 = vmatprep.mubr.f32.mxu1 %v22668_v4  ;;  %v16465_v4 = vld [vmem:[#allocation16 + $0x4] ss:$8 sps:$4 sm:$0xff]  }
 0xc48   : > { %15783 = vmatprep.subr.bf16.mxu1 %v21032_v34  ;;  %9925 = vmatprep.subr.bf16.mxu0 %v16465_v4  ;;  %v16488_v4 = vld [vmem:[#allocation17] sm:$0xff]  }
 0xc49   : > { %9926 = vmatpush1.bf16.msra.mxu0 %v16463_v5  ;;  %v16487_v5 = vld [vmem:[#allocation17 + $0x40] sm:$0xff]  }
 0xc4a   : > { %9927 = vmatprep.subr.bf16.mxu0 %v16468_v11  ;;  %v16489_v11 = vld [vmem:[#allocation17 + $0x48] sm:$0xff]  }
 0xc4b   : > { %15785 = vmatpush3.bf16.msra.mxu1 %v21032_v34 }
 0xc4c   : > { %15787 = vmatprep.subr.bf16.mxu1 %v21036_v63 }
 0xc4d   : > { %9928 = vmatpush1.bf16.msra.mxu0 %v16466_v52  ;;  %v16490_v52 = vld [vmem:[#allocation17 + $0x8] sm:$0xff]  }
 0xc4f   : > { %15789 = vmatpush3.bf16.msra.mxu1 %v21036_v63 }
 0xc50   : > { %15791 = vmatprep.subr.bf16.mxu1 %v21040_v35 }
 0xc53   : > { %15793 = vmatpush3.bf16.msra.mxu1 %v21040_v35 }
 0xc54   : > { %15795 = vmatprep.subr.bf16.mxu1 %v21051_v32 }
 0xc57   : > { %15797 = vmatpush3.bf16.msra.mxu1 %v21051_v32 }
 0xc58   : > { %15799 = vmatprep.subr.bf16.mxu1 %v15798_v61 }
 0xc5a   : > { %14227 = vmatmul.mubr.f32.vlgmr.msra.gmra.mrb[16].mxu1 %v22673_v46 }
 0xc5b   : > { %14229 = vmatprep.mubr.f32.mxu1 %v22674_v39  ;;  %15801 = vmatpush3.bf16.msra.mxu1 %v15798_v61 }
 0xc5c   : > { %15803 = vmatprep.subr.bf16.mxu1 %v15802_v57 }
 0xc5e   : > { %14230 = vmatmul.mubr.f32.gmra.mrb[18].mxu1 %v22677_v0 }
 0xc5f   : > { %14232 = vmatprep.mubr.f32.mxu1 %v8867_v16  ;;  %15805 = vmatpush3.bf16.msra.mxu1 %v15802_v57  ;;  %v22687_v16 = vand.u32 4294901760, %v21108_v2 }
 0xc60   : > { %15807 = vmatprep.subr.bf16.mxu1 %v15806_v3 }
 0xc61   : > { %v15826_v27 = vpack.c.bf16 %v22689_v53, %v22687_v16 }
 0xc62   : > { %14233 = vmatmul.mubr.f32.gmra.mrb[20].mxu1 %v22680_v59 }
 0xc63   : > { %14235 = vmatprep.mubr.f32.mxu1 %v8887_v31  ;;  %15809 = vmatpush3.bf16.msra.mxu1 %v15806_v3 }
 0xc64   : > { %15811 = vmatprep.subr.bf16.mxu1 %v15810_v25 }
 0xc66   : > { %14236 = vmatmul.mubr.f32.gmra.mrb[22].mxu1 %v8897_v40 }
 0xc67   : > { %15813 = vmatpush3.bf16.msra.mxu1 %v15810_v25  ;;  %14270 = vmatprep.mubr.f32.mxu1 %v21185_v51 }
 0xc68   : > { %15815 = vmatprep.subr.bf16.mxu1 %v15814_v6 }
 0xc6b   : > { %15817 = vmatpush3.bf16.msra.mxu1 %v15814_v6 }
 0xc6c   : > { %15819 = vmatprep.subr.bf16.mxu1 %v15818_v48 }
 0xc6f   : > { %15821 = vmatpush3.bf16.msra.mxu1 %v15818_v48 }
 0xc70   : > { %15823 = vmatprep.subr.bf16.mxu1 %v15822_v1 }
 0xc73   : > { %15825 = vmatpush3.bf16.msra.mxu1 %v15822_v1 }
 0xc74   : > { %15827 = vmatprep.subr.bf16.mxu1 %v15826_v27 }
 0xc77   : > { %15829 = vmatpush3.bf16.msra.mxu1 %v15826_v27 }
 0xc78   : > { %15831 = vmatprep.subr.bf16.mxu1 %v20996_v56 }
 0xc7a   : > { %14271 = vmatmul.mubr.f32.vlgmr.msra.gmra.mrb[16].mxu1 %v21180_v26 }
 0xc7b   : > { %14273 = vmatprep.mubr.f32.mxu1 %v21215_v38  ;;  %15833 = vmatpush3.bf16.msra.mxu1 %v20996_v56  ;;  %v10733_v56 = vld [vmem:[%s22690_s14] ss:$0 sm:$0xff]  ;;  %s22713_s14 = sld [smem:[#allocation136_spill]] }
 0xc7c   : > { %15835 = vmatprep.subr.bf16.mxu1 %v21004_v30 }
 0xc7e   : > { %14274 = vmatmul.mubr.f32.gmra.mrb[18].mxu1 %v21205_v28 }
 0xc7f   : > { %14276 = vmatprep.mubr.f32.mxu1 %v21235_v33  ;;  %15837 = vmatpush3.bf16.msra.mxu1 %v21004_v30 }
 0xc80   : > { %15839 = vmatprep.subr.bf16.mxu1 %v21017_v12 }
 0xc82   : > { %14277 = vmatmul.mubr.f32.gmra.mrb[20].mxu1 %v21232_v54 }
 0xc83   : > { %14279 = vmatprep.mubr.f32.mxu1 %v21260_v58  ;;  %15841 = vmatpush3.bf16.msra.mxu1 %v21017_v12 }
 0xc84   : > { %15843 = vmatprep.subr.bf16.mxu1 %v21027_v14 }
 0xc86   : > { %14280 = vmatmul.mubr.f32.gmra.mrb[22].mxu1 %v21256_v21 }
 0xc87   : > { %15845 = vmatpush3.bf16.msra.mxu1 %v21027_v14  ;;  %14314 = vmatprep.mubr.f32.mxu1 %v21185_v51 }
 0xc88   : > { %15847 = vmatprep.subr.bf16.mxu1 %v21032_v34 }
 0xc8b   : > { %15849 = vmatpush3.bf16.msra.mxu1 %v21032_v34 }
 0xc8c   : > { %15851 = vmatprep.subr.bf16.mxu1 %v21036_v63 }
 0xc8f   : > { %15853 = vmatpush3.bf16.msra.mxu1 %v21036_v63  ;;  %v16631_v63 = vld [vmem:[%s18636_s15 + $0x8] sm:$0xff] }
 0xc90   : > { %15855 = vmatprep.subr.bf16.mxu1 %v21040_v35 }
 0xc93   : > { %15857 = vmatpush3.bf16.msra.mxu1 %v21040_v35 }
 0xc94   : > { %15859 = vmatprep.subr.bf16.mxu1 %v21051_v32 }
 0xc97   : > { %15861 = vmatpush3.bf16.msra.mxu1 %v21051_v32 }
 0xc98   : > { %12030 = vmatprep.subr.bf16.mxu1 %v16487_v5  ;;  %v22709_v5 = vmov 0  }
 0xc9a   : > { %14315 = vmatmul.mubr.f32.vlgmr.msra.gmra.mrb[16].mxu1 %v21180_v26 }
 0xc9b   : > { %14317 = vmatprep.mubr.f32.mxu1 %v21215_v38  ;;  %12031 = vmatpush3.bf16.msra.mxu1 %v16488_v4 }
 0xc9c   : > { %12032 = vmatprep.subr.bf16.mxu1 %v16489_v11 }
 0xc9e   : > { %14318 = vmatmul.mubr.f32.gmra.mrb[18].mxu1 %v21205_v28 }
 0xc9f   : > { %14320 = vmatprep.mubr.f32.mxu1 %v21235_v33  ;;  %v16633_v33 = vld [vmem:[%s18636_s15 + $0x10] sm:$0xff]  ;;  %12033 = vmatpush3.bf16.msra.mxu1 %v16490_v52 }
 0xca2   : > { %14321 = vmatmul.mubr.f32.gmra.mrb[20].mxu1 %v21232_v54 }
 0xca3   : > { %14323 = vmatprep.mubr.f32.mxu1 %v21260_v58  ;;  %v16634_v58 = vld [vmem:[%s18636_s15 + $0x20] sm:$0xff]  ;;  %s17029_s15 = smov [#allocation19]  }
 0xca6   : > { %14324 = vmatmul.mubr.f32.gmra.mrb[22].mxu1 %v21256_v21 }
 0xd6d   : > { %v14316_v30 = vpop.f32.mrb[16].mxu1 }
 0xd6e   : > { %v16022_v12 = vadd.f32 %v14316_v30, %v10733_v56  ;;  %v9640_v14 = vpop.f32.mrb[17].mxu1 }
 0xd6f   : > { %v16023_v34 = vadd.f32 %v10733_v56, %v9640_v14  ;;  %v16471_v14 = vld [vmem:[#allocation16 + $0x24] ss:$8 sps:$4 sm:$0xff]  }
 0xd70   : > { %v9687_v35 = vadd.f32 %v16631_v63, %v16022_v12  ;;  %v16469_v63 = vld [vmem:[#allocation16 + $0x20] ss:$8 sps:$4 sm:$0xff]   ;;  %9929 = vmatprep.subr.bf16.mxu0 %v16471_v14 }
 0xd71   : > { %v14319_v32 = vpop.f32.mrb[18].mxu1  ;;  %v9686_v50 = vadd.f32 %v16632_v44, %v16023_v34  ;;  %9930 = vmatpush1.bf16.msra.mxu0 %v16469_v63  ;;  %v22691_v44 = vld [vmem:[#allocation99_spill] sm:$0xff] }
 0xd72   : > { %9698 = vadd.xlane.f32.xlu1 %v9687_v35  ;;  %v9652_v17 = vpop.f32.mrb[19].mxu1  ;;  %v16024_v2 = vadd.f32 %v14319_v32, %v10733_v56  ;;  %v16474_v32 = vld [vmem:[#allocation16 + $0x34] ss:$8 sps:$4 sm:$0xff]  }
 0xd73   : > { %v16025_v8 = vadd.f32 %v10733_v56, %v9652_v17  ;;  %9696 = vadd.xlane.f32.xlu0 %v9686_v50  ;;  %9931 = vmatprep.subr.bf16.mxu0 %v16474_v32  ;;  %v16477_v17 = vld [vmem:[#allocation16 + $0x44] ss:$8 sps:$4 sm:$0xff]   ;;  %v10735_v32 = vld [vmem:[%s22708_s9] ss:$0 sm:$0xff]  ;;  %s10441_s9 = sshll.u32 %s17537_s2, 4  ;;  %s21772_s9 = int_to_ptr.vmem [resolvable:$true] %s10441_s9 }
 0xd74   : > { %v9689_v40 = vadd.f32 %v16635_v62, %v16024_v2  ;;  %v22693_v2 = vld [vmem:[#allocation94_spill] sm:$0xff]  ;;  %v22698_v62 = vld [vmem:[#allocation113_spill] sm:$0xff]  ;;  %s16867_s13 = scalar_lea.vmem %s21772_s9, 1024 }
 0xd75   : > { %v14322_v26 = vpop.f32.mrb[20].mxu1  ;;  %v9688_v51 = vadd.f32 %v16633_v33, %v16025_v8  ;;  %v22692_v8 = vld [vmem:[#allocation105_spill] sm:$0xff]  ;;  %v22694_v33 = vld [vmem:[#allocation107_spill] sm:$0xff]  ;;  %p16868_p9 = scmp.ne.s32.totalorder %s21772_s9, %s16867_s13 }
 0xd76   : > { %v9664_v54 = vpop.f32.mrb[21].mxu1  ;;  %v16026_v38 = vadd.f32 %v14322_v26, %v10733_v56  ;;  %v16475_v26 = vld [vmem:[#allocation16 + $0x40] ss:$8 sps:$4 sm:$0xff]  }
 0xd77   : > { %v16027_v28 = vadd.f32 %v10733_v56, %v9664_v54  ;;  %9700 = vadd.xlane.f32.xlu0 %v9688_v51  ;;  %v16480_v54 = vld [vmem:[#allocation16 + $0x54] ss:$8 sps:$4 sm:$0xff]   ;;  %p16869_p7 = pnand %p16868_p9, %p22717_p10 }
 0xd78   : > { %v9691_v9 = vadd.f32 %v16637_v47, %v16026_v38  ;;  %v22696_v38 = vld [vmem:[#allocation109_spill] sm:$0xff]  ;;  %v22703_v47 = vld [vmem:[#allocation112_spill] sm:$0xff] }
 0xd79   : > { %v14325_v21 = vpop.f32.mrb[22].mxu1  ;;  %v9690_v60 = vadd.f32 %v16634_v58, %v16027_v28  ;;  %v16478_v28 = vld [vmem:[#allocation16 + $0x50] ss:$8 sps:$4 sm:$0xff]   ;;  %v16483_v58 = vld [vmem:[#allocation16 + $0x64] ss:$8 sps:$4 sm:$0xff]   ;;  %p16870_p6 = pneg %p16869_p7 }
 0xd7a   : > { %v9676_v42 = vpop.f32.mrb[23].mxu1  ;;  %v16028_v49 = vadd.f32 %v14325_v21, %v10733_v56  ;;  %v22697_v21 = vld [vmem:[#allocation106_spill] sm:$0xff] }
 0xd7b   : > { %v16029_v31 = vadd.f32 %v10733_v56, %v9676_v42  ;;  %9704 = vadd.xlane.f32.xlu1 %v9690_v60  ;;  %9702 = vadd.xlane.f32.xlu0 %v9689_v40  ;;  %v16486_v42 = vld [vmem:[#allocation16 + $0x74] ss:$8 sps:$4 sm:$0xff]  }
 0xd7c   : > { %v9693_v7 = vadd.f32 %v16638_v19, %v16028_v49  ;;  %v22700_v49 = vld [vmem:[#allocation116_spill] sm:$0xff]  ;;  %v22705_v19 = vld [vmem:[#allocation115_spill] sm:$0xff] }
 0xd7d   : > { %v9692_v55 = vadd.f32 %v16636_v18, %v16029_v31  ;;  %v16484_v31 = vld [vmem:[#allocation16 + $0x70] ss:$8 sps:$4 sm:$0xff]   ;;  %v22701_v18 = vld [vmem:[#allocation98_spill] sm:$0xff] }
 0xd7f   : > { %9708 = vadd.xlane.f32.xlu1 %v9692_v55  ;;  %9706 = vadd.xlane.f32.xlu0 %v9691_v9 }
 0xd83   : > { %9710 = vadd.xlane.f32.xlu0 %v9693_v7 }
 0xdff   : > { %v9699_v61 = vpop.xlane.xlu1 %9698 }
 0xe00   : > { %v9714_v23 = vmul.f32 0.0078125, %v9699_v61  ;;  %v9697_v41 = vpop.xlane.xlu0 %9696 }
 0xe01   : > { %v9713_v57 = vmul.f32 0.0078125, %v9697_v41 }
 0xe02   : > { %v21429_v46 = vsub.f32 %v9687_v35, %v9714_v23 }
 0xe03   : > { %v21431_v39 = vsub.f32 %v9686_v50, %v9713_v57  ;;  %v16472_v50 = vld [vmem:[#allocation16 + $0x30] ss:$8 sps:$4 sm:$0xff]  }
 0xe04   : > { %v9701_v22 = vpop.xlane.xlu0 %9700  ;;  %v9730_v37 = vmul.f32 %v21429_v46, %v21429_v46  ;;  %9932 = vmatpush1.bf16.msra.mxu0 %v16472_v50 }
 0xe05   : > { %v9715_v3 = vmul.f32 0.0078125, %v9701_v22  ;;  %v9729_v0 = vmul.f32 %v21431_v39, %v21431_v39  ;;  %9933 = vmatprep.subr.bf16.mxu0 %v16477_v17 }
 0xe06   : > { %9739 = vadd.xlane.f32.xlu0 %v9730_v37 }
 0xe07   : > { %v21437_v13 = vsub.f32 %v9688_v51, %v9715_v3  ;;  %9737 = vadd.xlane.f32.xlu1 %v9729_v0  ;;  %v22695_v51 = vld [vmem:[#allocation104_spill] sm:$0xff] }
 0xe08   : > { %v9705_v10 = vpop.xlane.xlu1 %9704  ;;  %v9703_v25 = vpop.xlane.xlu0 %9702  ;;  %9934 = vmatpush1.bf16.msra.mxu0 %v16475_v26 }
 0xe09   : > { %v9717_v59 = vmul.f32 0.0078125, %v9705_v10  ;;  %v9716_v29 = vmul.f32 0.0078125, %v9703_v25  ;;  %v9731_v45 = vmul.f32 %v21437_v13, %v21437_v13  ;;  %9935 = vmatprep.subr.bf16.mxu0 %v16480_v54 }
 0xe0b   : > { %v21441_v6 = vsub.f32 %v9690_v60, %v9717_v59  ;;  %v21443_v15 = vsub.f32 %v9689_v40, %v9716_v29  ;;  %9741 = vadd.xlane.f32.xlu1 %v9731_v45  ;;  %v16481_v60 = vld [vmem:[#allocation16 + $0x60] ss:$8 sps:$4 sm:$0xff]   ;;  %v22699_v40 = vld [vmem:[#allocation108_spill] sm:$0xff] }
 0xe0c   : > { %v9709_v24 = vpop.xlane.xlu1 %9708  ;;  %v9707_v48 = vpop.xlane.xlu0 %9706  ;;  %9936 = vmatpush1.bf16.msra.mxu0 %v16478_v28 }
 0xe0d   : > { %v9719_v20 = vmul.f32 0.0078125, %v9709_v24  ;;  %v9718_v36 = vmul.f32 0.0078125, %v9707_v48  ;;  %v9733_v1 = vmul.f32 %v21441_v6, %v21441_v6  ;;  %v9732_v16 = vmul.f32 %v21443_v15, %v21443_v15  ;;  %9937 = vmatprep.subr.bf16.mxu0 %v16483_v58 }
 0xe0f   : > { %v21449_v43 = vsub.f32 %v9692_v55, %v9719_v20  ;;  %v21451_v53 = vsub.f32 %v9691_v9, %v9718_v36  ;;  %9745 = vadd.xlane.f32.xlu1 %v9733_v1  ;;  %9743 = vadd.xlane.f32.xlu0 %v9732_v16  ;;  %v22702_v55 = vld [vmem:[#allocation120_spill] sm:$0xff]  ;;  %v22704_v9 = vld [vmem:[#allocation110_spill] sm:$0xff] }
 0xe10   : > { %v9711_v27 = vpop.xlane.xlu0 %9710  ;;  %9938 = vmatpush1.bf16.msra.mxu0 %v16481_v60 }
 0xe11   : > { %v9720_v56 = vmul.f32 0.0078125, %v9711_v27  ;;  %v9735_v30 = vmul.f32 %v21449_v43, %v21449_v43  ;;  %v9734_v12 = vmul.f32 %v21451_v53, %v21451_v53  ;;  %9939 = vmatprep.subr.bf16.mxu0 %v16486_v42  ;;  %v10734_v27 = vld [vmem:[%s22707_s4] ss:$0 sm:$0xff]  ;;  %s10774_s4 = sshll.u32 %s22714_s24, 4 }
 0xe12   : > { %s10438_s5 = sadd.s32 %s10774_s4, %s10773_s27 }
 0xe13   : > { %v21457_v34 = vsub.f32 %v9693_v7, %v9720_v56  ;;  %9749 = vadd.xlane.f32.xlu1 %v9735_v30  ;;  %9747 = vadd.xlane.f32.xlu0 %v9734_v12  ;;  %v22706_v7 = vld [vmem:[#allocation119_spill] sm:$0xff]  ;;  %s10775_s8 = sshll.u32 %s10438_s5, 7 }
 0xe14   : > { %9940 = vmatpush1.bf16.msra.mxu0 %v16484_v31  ;;  %s21770_s20 = scalar_lea.hbm %s22716_s18, %s10775_s8 }
 0xe15   : > { %v9736_v35 = vmul.f32 %v21457_v34, %v21457_v34 }
 0xe17   : > { %5453 = vmax.xlane.f32.xlu1 %v22691_v44  ;;  %9751 = vadd.xlane.f32.xlu0 %v9736_v35 }
 0xe1b   : > { %5457 = vmax.xlane.f32.xlu1 %v22692_v8  ;;  %5455 = vmax.xlane.f32.xlu0 %v22693_v2 }
 0xe1f   : > { %5461 = vmax.xlane.f32.xlu1 %v22694_v33  ;;  %5459 = vmax.xlane.f32.xlu0 %v22695_v51 }
 0xe23   : > { %5465 = vmax.xlane.f32.xlu1 %v22696_v38  ;;  %5463 = vmax.xlane.f32.xlu0 %v22697_v21 }
 0xe27   : > { %7585 = vmax.xlane.f32.xlu1 %v22698_v62  ;;  %5467 = vmax.xlane.f32.xlu0 %v22699_v40 }
 0xe2b   : > { %7589 = vmax.xlane.f32.xlu1 %v22700_v49  ;;  %7587 = vmax.xlane.f32.xlu0 %v22701_v18 }
 0xe2f   : > { %7593 = vmax.xlane.f32.xlu1 %v22702_v55  ;;  %7591 = vmax.xlane.f32.xlu0 %v22703_v47 }
 0xe33   : > { %7597 = vmax.xlane.f32.xlu1 %v22704_v9  ;;  %7595 = vmax.xlane.f32.xlu0 %v22705_v19 }
 0xe37   : > { %7599 = vmax.xlane.f32.xlu0 %v22706_v7 }
 0xe93   : > { %v9740_v61 = vpop.xlane.xlu0 %9739 }
 0xe94   : > { %v9754_v23 = vmul.f32 0.0078125, %v9740_v61  ;;  %v9738_v41 = vpop.xlane.xlu1 %9737 }
 0xe95   : > { %v9753_v57 = vmul.f32 0.0078125, %v9738_v41 }
 0xe96   : > { %v9762_v22 = vadd.f32 1e-05, %v9754_v23 }
 0xe97   : > { %v9761_v37 = vadd.f32 1e-05, %v9753_v57 }
 0xe98   : > { %16503 = vrsqrt.f32 %v9762_v22  ;;  %v9742_v3 = vpop.xlane.xlu1 %9741 }
 0xe99   : > { %16505 = vrsqrt.f32 %v9761_v37  ;;  %v9755_v0 = vmul.f32 0.0078125, %v9742_v3 }
 0xe9b   : > { %v9763_v10 = vadd.f32 1e-05, %v9755_v0 }
 0xe9c   : > { %v9746_v25 = vpop.xlane.xlu1 %9745  ;;  %v9744_v59 = vpop.xlane.xlu0 %9743 }
 0xe9d   : > { %16507 = vrsqrt.f32 %v9763_v10  ;;  %v9757_v29 = vmul.f32 0.0078125, %v9746_v25  ;;  %v9756_v45 = vmul.f32 0.0078125, %v9744_v59 }
 0xe9f   : > { %v9764_v24 = vadd.f32 1e-05, %v9756_v45  ;;  %v9765_v48 = vadd.f32 1e-05, %v9757_v29 }
 0xea0   : > { %v9748_v20 = vpop.xlane.xlu0 %9747  ;;  %v9750_v36 = vpop.xlane.xlu1 %9749 }
 0xea1   : > { %v9758_v1 = vmul.f32 0.0078125, %v9748_v20  ;;  %16509 = vrsqrt.f32 %v9764_v24  ;;  %v9759_v63 = vmul.f32 0.0078125, %v9750_v36 }
 0xea2   : > { %v16504_v16 = vpop.eup %16503  ;;  %16511 = vrsqrt.f32 %v9765_v48 }
 0xea3   : > { %v16506_v56 = vpop.eup %16505  ;;  %v9778_v30 = vmul.f32 %v16504_v16, %v21429_v46  ;;  %v9766_v12 = vadd.f32 1e-05, %v9758_v1  ;;  %v9767_v60 = vadd.f32 1e-05, %v9759_v63  ;;  %v16492_v1 = vld [vmem:[#allocation17 + $0x10] sm:$0xff]   ;;  %v16494_v16 = vld [vmem:[#allocation17 + $0x18] sm:$0xff]  }
 0xea4   : > { %v9777_v14 = vmul.f32 %v16506_v56, %v21431_v39  ;;  %v9752_v35 = vpop.xlane.xlu0 %9751  ;;  %v16495_v56 = vld [vmem:[#allocation17 + $0x60] sm:$0xff]   ;;  %v16500_v63 = vld [vmem:[#allocation17 + $0x30] sm:$0xff]  }
 0xea5   : > { %v9792_v50 = vmul.f32 %v10734_v27, %v9778_v30  ;;  %v9760_v17 = vmul.f32 0.0078125, %v9752_v35  ;;  %16513 = vrsqrt.f32 %v9766_v12  ;;  %v16497_v30 = vld [vmem:[#allocation17 + $0x68] sm:$0xff]   ;;  %v16501_v35 = vld [vmem:[#allocation17 + $0x78] sm:$0xff]  }
 0xea6   : > { %v9791_v26 = vmul.f32 %v10734_v27, %v9777_v14  ;;  %v16498_v12 = vld [vmem:[#allocation17 + $0x28] sm:$0xff]   ;;  %v16499_v14 = vld [vmem:[#allocation17 + $0x70] sm:$0xff]  }
 0xea7   : > { %v16508_v54 = vpop.eup %16507  ;;  %v9768_v28 = vadd.f32 1e-05, %v9760_v17  ;;  %v21485_v58 = vadd.f32 %v10735_v32, %v9792_v50  ;;  %v9835_v50 = vlaneseq }
 0xea8   : > { %v21487_v46 = vadd.f32 %v10735_v32, %v9791_v26  ;;  %v9779_v39 = vmul.f32 %v16508_v54, %v21437_v13  ;;  %v9833_v54 = vld [vmem:[%s22710_s10] sm:$0x3] }
 0xea9   : > { %16515 = vrsqrt.f32 %v9768_v28  ;;  %v9836_v17 = vshrl.u32 %v9835_v50, 7 }
 0xeaa   : > { %v9813_v42 = vpack.c.bf16 %v21485_v58, %v21487_v46  ;;  %16517 = vrsqrt.f32 %v9767_v60  ;;  %v9793_v11 = vmul.f32 %v10734_v27, %v9779_v39 }
 0xeab   : > { %v16510_v31 = vpop.eup %16509  ;;  %v9837_v26 = vsub.s32 0, %v9836_v17  ;;  %v9841_v28 = vsub.s32 1, %v9836_v17 }
 0xeac   : > { %9958 = vmatmul.mubr.bf16.vlgmr.msra.gmra.mrb[24].mxu0 %v9813_v42  ;;  %v9780_v4 = vmul.f32 %v16510_v31, %v21443_v15  ;;  %v16512_v52 = vpop.eup %16511  ;;  %v21494_v41 = vadd.f32 %v10735_v32, %v9793_v11 }
 0xead   : > { %9967 = vmatprep.mubr.bf16.mxu0 %v22709_v5  ;;  %v9781_v13 = vmul.f32 %v16512_v52, %v21441_v6  ;;  %v21521_v60 = vrot.slane %v9833_v54, %v9837_v26  ;;  %v21523_v39 = vrot.slane %v9833_v54, %v9841_v28 }
 0xeae   : > { %v9794_v61 = vmul.f32 %v10734_v27, %v9780_v4 }
 0xeaf   : > { %v16514_v23 = vpop.eup %16513  ;;  %v9795_v10 = vmul.f32 %v10734_v27, %v9781_v13 }
 0xeb0   : > { %v21496_v57 = vadd.f32 %v10735_v32, %v9794_v61  ;;  %v9782_v22 = vmul.f32 %v16514_v23, %v21451_v53 }
 0xeb1   : > { %v21506_v29 = vadd.f32 %v10735_v32, %v9795_v10 }
 0xeb2   : > { %v9814_v37 = vpack.c.bf16 %v21496_v57, %v21494_v41  ;;  %v9796_v0 = vmul.f32 %v10734_v27, %v9782_v22 }
 0xeb3   : > { %v16516_v3 = vpop.eup %16515 }
 0xeb4   : > { %9968 = vmatmul.mubr.bf16.gmra.mrb[28].mxu0 %v9814_v37  ;;  %v16518_v15 = vpop.eup %16517  ;;  %v21503_v25 = vadd.f32 %v10735_v32, %v9796_v0  ;;  %v9784_v59 = vmul.f32 %v16516_v3, %v21457_v34  ;;  %v16491_v34 = vld [vmem:[#allocation17 + $0x50] sm:$0xff]  }
 0xeb5   : > { %9977 = vmatprep.mubr.bf16.mxu0 %v22709_v5  ;;  %v9783_v6 = vmul.f32 %v16518_v15, %v21449_v43  ;;  %12034 = vmatprep.subr.bf16.mxu1 %v16491_v34  ;;  %v16493_v43 = vld [vmem:[#allocation17 + $0x58] sm:$0xff]  }
 0xeb6   : > { %v9815_v53 = vpack.c.bf16 %v21503_v25, %v21506_v29  ;;  %v9798_v45 = vmul.f32 %v10734_v27, %v9784_v59  ;;  %12035 = vmatpush3.bf16.msra.mxu1 %v16492_v1 }
 0xeb7   : > { %v9797_v24 = vmul.f32 %v10734_v27, %v9783_v6  ;;  %12036 = vmatprep.subr.bf16.mxu1 %v16493_v43  ;;  %v16496_v27 = vld [vmem:[#allocation17 + $0x20] sm:$0xff]  }
 0xeb8   : > { %v21512_v48 = vadd.f32 %v10735_v32, %v9798_v45 }
 0xeb9   : > { %v21514_v20 = vadd.f32 %v10735_v32, %v9797_v24  ;;  %v16502_v32 = vld [vmem:[#allocation17 + $0x38] sm:$0xff]  }
 0xeba   : > { %12037 = vmatpush3.bf16.msra.mxu1 %v16494_v16 }
 0xebb   : > { %v9816_v36 = vpack.c.bf16 %v21512_v48, %v21514_v20  ;;  %12038 = vmatprep.subr.bf16.mxu1 %v16495_v56 }
 0xebc   : > { %9978 = vmatmul.mubr.bf16.gmra.mrb[32].mxu0 %v9815_v53 }
 0xebd   : > { %9987 = vmatprep.mubr.bf16.mxu0 %v22709_v5 }
 0xebe   : > { %12039 = vmatpush3.bf16.msra.mxu1 %v16496_v27 }
 0xebf   : > { %12040 = vmatprep.subr.bf16.mxu1 %v16497_v30 }
 0xec2   : > { %12041 = vmatpush3.bf16.msra.mxu1 %v16498_v12 }
 0xec3   : > { %12042 = vmatprep.subr.bf16.mxu1 %v16499_v14 }
 0xec4   : > { %9988 = vmatmul.mubr.bf16.gmra.mrb[36].mxu0 %v9816_v36 }
 0xec6   : > { %12043 = vmatpush3.bf16.msra.mxu1 %v16500_v63 }
 0xec7   : > { %12044 = vmatprep.subr.bf16.mxu1 %v16501_v35 }
 0xeca   : > { %12045 = vmatpush3.bf16.msra.mxu1 %v16502_v32 }
 0xf7f   : > { %v9959_v42 = vpop.f32.mrb[24].mxu0 }
 0xf80   : > { %v9960_v31 = vadd.f32 %v9959_v42, %v21521_v60  ;;  %v9961_v5 = vpop.f32.mrb[25].mxu0 }
 0xf81   : > { %v9962_v4 = vadd.f32 %v9961_v5, %v21523_v39  ;;  %v9963_v11 = vpop.f32.mrb[26].mxu0 }
 0xf82   : > { %v10014_v52 = vmul.f32 0.70710677, %v9960_v31  ;;  %v9964_v61 = vadd.f32 %v9963_v11, %v21521_v60  ;;  %v9965_v23 = vpop.f32.mrb[27].mxu0  ;;  %v9998_v35 = vmul.f32 0.5, %v9960_v31 }
 0xf83   : > { %v10015_v13 = vmul.f32 0.70710677, %v9962_v4  ;;  %v9966_v22 = vadd.f32 %v9965_v23, %v21523_v39  ;;  %v9999_v54 = vmul.f32 0.5, %v9962_v4 }
 0xf84   : > { %16519 = verf.f32 %v10014_v52  ;;  %v10016_v37 = vmul.f32 0.70710677, %v9964_v61  ;;  %v10000_v32 = vmul.f32 0.5, %v9964_v61 }
 0xf85   : > { %16521 = verf.f32 %v10015_v13  ;;  %v10017_v3 = vmul.f32 0.70710677, %v9966_v22  ;;  %v10001_v28 = vmul.f32 0.5, %v9966_v22 }
 0xf86   : > { %16523 = verf.f32 %v10016_v37 }
 0xf87   : > { %16525 = verf.f32 %v10017_v3  ;;  %v9969_v0 = vpop.f32.mrb[28].mxu0 }
 0xf88   : > { %v9970_v10 = vadd.f32 %v9969_v0, %v21521_v60  ;;  %v9971_v15 = vpop.f32.mrb[29].mxu0 }
 0xf89   : > { %v9972_v59 = vadd.f32 %v9971_v15, %v21523_v39  ;;  %v9973_v6 = vpop.f32.mrb[30].mxu0 }
 0xf8a   : > { %v10018_v53 = vmul.f32 0.70710677, %v9970_v10  ;;  %v9974_v45 = vadd.f32 %v9973_v6, %v21521_v60  ;;  %v9975_v24 = vpop.f32.mrb[31].mxu0 }
 0xf8b   : > { %v10019_v36 = vmul.f32 0.70710677, %v9972_v59  ;;  %v9976_v34 = vadd.f32 %v9975_v24, %v21523_v39 }
 0xf8c   : > { %16527 = verf.f32 %v10018_v53  ;;  %v10020_v1 = vmul.f32 0.70710677, %v9974_v45 }
 0xf8d   : > { %16529 = verf.f32 %v10019_v36  ;;  %v10021_v16 = vmul.f32 0.70710677, %v9976_v34 }
 0xf8e   : > { %v16520_v43 = vpop.eup %16519  ;;  %16531 = verf.f32 %v10020_v1 }
 0xf8f   : > { %v16522_v56 = vpop.eup %16521  ;;  %v10046_v27 = vadd.f32 1.0, %v16520_v43  ;;  %16533 = verf.f32 %v10021_v16  ;;  %v9979_v14 = vpop.f32.mrb[32].mxu0 }
 0xf90   : > { %v16524_v30 = vpop.eup %16523  ;;  %v10047_v12 = vadd.f32 1.0, %v16522_v56  ;;  %v21534_v17 = vadd.f32 %v9979_v14, %v21521_v60  ;;  %v9981_v26 = vpop.f32.mrb[33].mxu0  ;;  %v10002_v14 = vmul.f32 0.5, %v9970_v10 }
 0xf91   : > { %v16526_v63 = vpop.eup %16525  ;;  %v10048_v50 = vadd.f32 1.0, %v16524_v30  ;;  %v21537_v5 = vadd.f32 %v9981_v26, %v21523_v39  ;;  %v9983_v11 = vpop.f32.mrb[34].mxu0  ;;  %v10062_v52 = vmul.f32 %v10046_v27, %v9998_v35  ;;  %v10003_v26 = vmul.f32 0.5, %v9972_v59 }
 0xf92   : > { %v10049_v42 = vadd.f32 1.0, %v16526_v63  ;;  %v10022_v13 = vmul.f32 0.70710677, %v21534_v17  ;;  %v9984_v37 = vadd.f32 %v9983_v11, %v21521_v60  ;;  %v9985_v31 = vpop.f32.mrb[35].mxu0  ;;  %v10063_v61 = vmul.f32 %v10047_v12, %v9999_v54 }
 0xf93   : > { %v10064_v23 = vmul.f32 %v10048_v50, %v10000_v32  ;;  %v10023_v0 = vmul.f32 0.70710677, %v21537_v5  ;;  %v9986_v15 = vadd.f32 %v9985_v31, %v21523_v39  ;;  %v10004_v63 = vmul.f32 0.5, %v9974_v45 }
 0xf94   : > { %v10065_v3 = vmul.f32 %v10049_v42, %v10001_v28  ;;  %16535 = verf.f32 %v10022_v13  ;;  %v10024_v22 = vmul.f32 0.70710677, %v9984_v37  ;;  %v10005_v54 = vmul.f32 0.5, %v9976_v34 }
 0xf95   : > { %v10078_v4 = vpack.c.bf16 %v10064_v23, %v10062_v52  ;;  %16537 = verf.f32 %v10023_v0  ;;  %v10025_v6 = vmul.f32 0.70710677, %v9986_v15 }
 0xf96   : > { %v10079_v53 = vpack.c.bf16 %v10065_v3, %v10063_v61  ;;  %v16528_v24 = vpop.eup %16527  ;;  %16539 = verf.f32 %v10024_v22 }
 0xf97   : > { %v16530_v36 = vpop.eup %16529  ;;  %v10050_v1 = vadd.f32 1.0, %v16528_v24  ;;  %16541 = verf.f32 %v10025_v6  ;;  %v9989_v43 = vpop.f32.mrb[36].mxu0 }
 0xf98   : > { %10253 = vmatprep.mubr.bf16.mxu1 %v10079_v53  ;;  %v16532_v16 = vpop.eup %16531  ;;  %v10051_v56 = vadd.f32 1.0, %v16530_v36  ;;  %v9990_v27 = vadd.f32 %v9989_v43, %v21521_v60  ;;  %v9991_v30 = vpop.f32.mrb[37].mxu0 }
 0xf99   : > { %10254 = vmatmul.mubr.bf16.vlgmr.msra.gmra.mrb[24].mxu1 %v10078_v4  ;;  %v16534_v12 = vpop.eup %16533  ;;  %v10052_v35 = vadd.f32 1.0, %v16532_v16  ;;  %v9992_v32 = vadd.f32 %v9991_v30, %v21523_v39  ;;  %v9993_v50 = vpop.f32.mrb[38].mxu0  ;;  %v10066_v52 = vmul.f32 %v10050_v1, %v10002_v14  ;;  %v10008_v1 = vmul.f32 0.5, %v9984_v37 }
 0xf9a   : > { %v10053_v28 = vadd.f32 1.0, %v16534_v12  ;;  %v10026_v42 = vmul.f32 0.70710677, %v9990_v27  ;;  %v9995_v11 = vpop.f32.mrb[39].mxu0  ;;  %v9994_v31 = vadd.f32 %v9993_v50, %v21521_v60  ;;  %v10067_v61 = vmul.f32 %v10051_v56, %v10003_v26 }
 0xf9b   : > { %v10068_v23 = vmul.f32 %v10052_v35, %v10004_v63  ;;  %v10027_v13 = vmul.f32 0.70710677, %v9992_v32  ;;  %v9996_v10 = vadd.f32 %v9995_v11, %v21523_v39  ;;  %v10006_v60 = vmul.f32 0.5, %v21534_v17 }
 0xf9c   : > { %v10069_v3 = vmul.f32 %v10053_v28, %v10005_v54  ;;  %16543 = verf.f32 %v10026_v42  ;;  %v10028_v45 = vmul.f32 0.70710677, %v9994_v31  ;;  %v10007_v39 = vmul.f32 0.5, %v21537_v5 }
 0xf9d   : > { %16545 = verf.f32 %v10027_v13  ;;  %v10080_v0 = vpack.c.bf16 %v10068_v23, %v10066_v52  ;;  %v10029_v22 = vmul.f32 0.70710677, %v9996_v10  ;;  %v10009_v16 = vmul.f32 0.5, %v9986_v15 }
 0xf9e   : > { %v16536_v4 = vpop.eup %16535  ;;  %v10081_v59 = vpack.c.bf16 %v10069_v3, %v10067_v61  ;;  %16547 = verf.f32 %v10028_v45  ;;  %v10010_v37 = vmul.f32 0.5, %v9990_v27  ;;  %v10012_v52 = vmul.f32 0.5, %v9994_v31 }
 0xf9f   : > { %v16538_v34 = vpop.eup %16537  ;;  %v10054_v6 = vadd.f32 1.0, %v16536_v4  ;;  %16549 = verf.f32 %v10029_v22  ;;  %v10011_v5 = vmul.f32 0.5, %v9992_v32  ;;  %v10013_v15 = vmul.f32 0.5, %v9996_v10 }
 0xfa0   : > { %v16540_v53 = vpop.eup %16539  ;;  %v10055_v24 = vadd.f32 1.0, %v16538_v34  ;;  %10261 = vmatprep.mubr.bf16.mxu1 %v10081_v59  ;;  %v21552_v34 = vld [vmem:[%s22711_s12] ss:$0 sm:$0xff]  ;;  %s10421_s12 = scalar_lea.sflag [#allocation7], %s17510_s11 }
 0xfa1   : > { %v16542_v36 = vpop.eup %16541  ;;  %v10056_v43 = vadd.f32 1.0, %v16540_v53  ;;  %10262 = vmatmul.mubr.bf16.gmra.mrb[28].mxu1 %v10080_v0  ;;  %v10070_v30 = vmul.f32 %v10054_v6, %v10006_v60  ;;  %v5454_v60 = vpop.xlane.xlu1 %5453 }
 0xfa2   : > { %v10057_v56 = vadd.f32 1.0, %v16542_v36  ;;  %v10071_v14 = vmul.f32 %v10055_v24, %v10007_v39  ;;  %v5456_v39 = vpop.xlane.xlu0 %5455 }
 0xfa3   : > { %v10072_v12 = vmul.f32 %v10056_v43, %v10008_v1 }
 0xfa4   : > { %v10073_v63 = vmul.f32 %v10057_v56, %v10009_v16 }
 0xfa5   : > { %v10082_v35 = vpack.c.bf16 %v10072_v12, %v10070_v30 }
 0xfa6   : > { %v16544_v50 = vpop.eup %16543  ;;  %v10083_v26 = vpack.c.bf16 %v10073_v63, %v10071_v14 }
 0xfa7   : > { %v16546_v54 = vpop.eup %16545  ;;  %v10058_v28 = vadd.f32 1.0, %v16544_v50 }
 0xfa8   : > { %10269 = vmatprep.mubr.bf16.mxu1 %v10083_v26  ;;  %v16548_v42 = vpop.eup %16547  ;;  %v10059_v11 = vadd.f32 1.0, %v16546_v54  ;;  %v5460_v26 = vpop.xlane.xlu0 %5459 }
 0xfa9   : > { %10270 = vmatmul.mubr.bf16.gmra.mrb[32].mxu1 %v10082_v35  ;;  %v16550_v17 = vpop.eup %16549  ;;  %v10060_v23 = vadd.f32 1.0, %v16548_v42  ;;  %v10074_v61 = vmul.f32 %v10058_v28, %v10010_v37  ;;  %v5458_v35 = vpop.xlane.xlu1 %5457  ;;  %v5469_v42 = vsub.f32 %v22691_v44, %v5454_v60 }
 0xfaa   : > { %v10061_v13 = vadd.f32 1.0, %v16550_v17  ;;  %v10075_v45 = vmul.f32 %v10059_v11, %v10011_v5 }
 0xfab   : > { %v10076_v3 = vmul.f32 %v10060_v23, %v10012_v52  ;;  %v5470_v23 = vsub.f32 %v22693_v2, %v5456_v39 }
 0xfac   : > { %v10077_v0 = vmul.f32 %v10061_v13, %v10013_v15  ;;  %v5464_v15 = vpop.xlane.xlu0 %5463  ;;  %v5477_v13 = vmul.f32 1.442695, %v5469_v42 }
 0xfad   : > { %v10084_v4 = vpack.c.bf16 %v10076_v3, %v10074_v61  ;;  %v5462_v37 = vpop.xlane.xlu1 %5461  ;;  %v5471_v61 = vsub.f32 %v22692_v8, %v5458_v35  ;;  %v5479_v44 = vmul.f32 1.442695, %v5470_v23 }
 0xfae   : > { %v10085_v22 = vpack.c.bf16 %v10077_v0, %v10075_v45  ;;  %v5472_v45 = vsub.f32 %v22695_v51, %v5460_v26  ;;  %16551 = vpow2.f32 %v5477_v13  ;;  %v5474_v51 = vsub.f32 %v22697_v21, %v5464_v15 }
 0xfaf   : > { %16553 = vpow2.f32 %v5479_v44 }
 0xfb0   : > { %10277 = vmatprep.mubr.bf16.mxu1 %v10085_v22  ;;  %v5481_v22 = vmul.f32 1.442695, %v5471_v61  ;;  %v5487_v39 = vmul.f32 1.442695, %v5474_v51 }
 0xfb1   : > { %10278 = vmatmul.mubr.bf16.gmra.mrb[36].mxu1 %v10084_v4  ;;  %v5466_v2 = vpop.xlane.xlu1 %5465 }
 0xfb2   : > { %16555 = vpow2.f32 %v5481_v22 }
 0xfb5   : > { %v7586_v60 = vpop.xlane.xlu1 %7585 }
 0xfb9   : > { %v7590_v42 = vpop.xlane.xlu1 %7589 }
0x106c   : > { %v12046_v59 = vpop.f32.mrb[24].mxu1 }
0x106d   : > { %v12047_v27 = vpop.f32.mrb[25].mxu1 }
0x106e   : > { %v12048_v31 = vadd.f32 %v12047_v27, %v12046_v59  ;;  %v12049_v6 = vpop.f32.mrb[26].mxu1  ;;  %v5473_v59 = vsub.f32 %v22694_v33, %v5462_v37  ;;  %v5468_v27 = vpop.xlane.xlu0 %5467 }
0x106f   : > { %v12050_v32 = vpop.f32.mrb[27].mxu1 }
0x1070   : > { %v10256_v10 = vadd.f32 %v12048_v31, %v21552_v34  ;;  %v12051_v53 = vadd.f32 %v12050_v32, %v12049_v6  ;;  %v5483_v6 = vmul.f32 1.442695, %v5472_v45 }
0x1072   : > { %v10259_v24 = vadd.f32 %v12051_v53, %v21552_v34  ;;  %v21557_v36 = vadd.f32 %v10256_v10, %v21487_v46  ;;  %v5485_v53 = vmul.f32 1.442695, %v5473_v59  ;;  %16557 = vpow2.f32 %v5483_v6 }
0x1074   : > { %10296 = vadd.xlane.f32.xlu1 %v21557_v36  ;;  %v21561_v1 = vadd.f32 %v10259_v24, %v21485_v58  ;;  %v12052_v43 = vpop.f32.mrb[28].mxu1  ;;  %v5475_v24 = vsub.f32 %v22696_v38, %v5466_v2  ;;  %16559 = vpow2.f32 %v5485_v53  ;;  %v7601_v38 = vsub.f32 %v22698_v62, %v7586_v60 }
0x1075   : > { %v12053_v16 = vpop.f32.mrb[29].mxu1  ;;  %16561 = vpow2.f32 %v5487_v39 }
0x1076   : > { %10298 = vadd.xlane.f32.xlu0 %v21561_v1  ;;  %v12054_v56 = vadd.f32 %v12053_v16, %v12052_v43  ;;  %v12055_v30 = vpop.f32.mrb[30].mxu1  ;;  %v5476_v16 = vsub.f32 %v22699_v40, %v5468_v27 }
0x1077   : > { %v12056_v12 = vpop.f32.mrb[31].mxu1 }
0x1078   : > { %v10264_v14 = vadd.f32 %v12054_v56, %v21552_v34  ;;  %v12057_v63 = vadd.f32 %v12056_v12, %v12055_v30  ;;  %v7588_v56 = vpop.xlane.xlu0 %7587  ;;  %v5489_v30 = vmul.f32 1.442695, %v5475_v24 }
0x1079   : > { %v7602_v12 = vsub.f32 %v22701_v18, %v7588_v56 }
0x107a   : > { %v10267_v46 = vadd.f32 %v12057_v63, %v21552_v34  ;;  %v21567_v50 = vadd.f32 %v10264_v14, %v21494_v41  ;;  %16563 = vpow2.f32 %v5489_v30  ;;  %v7609_v14 = vmul.f32 1.442695, %v7601_v38 }
0x107b   : > { %v7611_v62 = vmul.f32 1.442695, %v7602_v12 }
0x107c   : > { %10300 = vadd.xlane.f32.xlu1 %v21567_v50  ;;  %v12058_v58 = vpop.f32.mrb[32].mxu1  ;;  %v21571_v54 = vadd.f32 %v10267_v46, %v21496_v57 }
0x107d   : > { %v12059_v28 = vpop.f32.mrb[33].mxu1 }
0x107e   : > { %v12060_v11 = vadd.f32 %v12059_v28, %v12058_v58  ;;  %10302 = vadd.xlane.f32.xlu0 %v21571_v54  ;;  %v12061_v17 = vpop.f32.mrb[34].mxu1 }
0x107f   : > { %v12062_v52 = vpop.f32.mrb[35].mxu1 }
0x1080   : > { %v10272_v41 = vadd.f32 %v12060_v11, %v21552_v34  ;;  %v12063_v5 = vadd.f32 %v12062_v52, %v12061_v17  ;;  %v7592_v11 = vpop.xlane.xlu0 %7591  ;;  %v7594_v17 = vpop.xlane.xlu1 %7593 }
0x1082   : > { %v10275_v57 = vadd.f32 %v12063_v5, %v21552_v34  ;;  %v21580_v3 = vadd.f32 %v10272_v41, %v21506_v29 }
0x1084   : > { %10304 = vadd.xlane.f32.xlu1 %v21580_v3  ;;  %v21585_v0 = vadd.f32 %v10275_v57, %v21503_v25  ;;  %v12064_v4 = vpop.f32.mrb[36].mxu1  ;;  %v7596_v37 = vpop.xlane.xlu0 %7595 }
0x1085   : > { %v12065_v8 = vpop.f32.mrb[37].mxu1  ;;  %v7598_v52 = vpop.xlane.xlu1 %7597 }
0x1086   : > { %10306 = vadd.xlane.f32.xlu0 %v21585_v0  ;;  %v12066_v29 = vadd.f32 %v12065_v8, %v12064_v4  ;;  %v12067_v31 = vpop.f32.mrb[38].mxu1 }
0x1087   : > { %v12068_v32 = vpop.f32.mrb[39].mxu1 }
0x1088   : > { %v10280_v25 = vadd.f32 %v12066_v29, %v21552_v34  ;;  %v12069_v10 = vadd.f32 %v12068_v32, %v12067_v31  ;;  %v7600_v23 = vpop.xlane.xlu0 %7599  ;;  %v7603_v31 = vsub.f32 %v22700_v49, %v7590_v42  ;;  %v7606_v49 = vsub.f32 %v22705_v19, %v7596_v37 }
0x108a   : > { %v10283_v33 = vadd.f32 %v12069_v10, %v21552_v34  ;;  %v21594_v43 = vadd.f32 %v10280_v25, %v21514_v20  ;;  %v21603_v34 = vpop.eup %16551  ;;  %v5491_v20 = vmul.f32 1.442695, %v5476_v16  ;;  %v7613_v25 = vmul.f32 1.442695, %v7603_v31 }
0x108b   : > { %v21607_v40 = vpop.eup %16553  ;;  %v7605_v10 = vsub.f32 %v22702_v55, %v7594_v17  ;;  %v7608_v16 = vsub.f32 %v22706_v7, %v7600_v23 }
0x108c   : > { %10308 = vadd.xlane.f32.xlu1 %v21594_v43  ;;  %v21599_v21 = vadd.f32 %v10283_v33, %v21512_v48  ;;  %v21610_v48 = vpop.eup %16555  ;;  %16565 = vpow2.f32 %v5491_v20  ;;  %v7607_v33 = vsub.f32 %v22704_v9, %v7598_v52 }
0x108d   : > { %v21613_v63 = vpop.eup %16557  ;;  %16567 = vpow2.f32 %v7609_v14  ;;  %v7623_v14 = vmul.f32 1.442695, %v7608_v16 }
0x108e   : > { %10310 = vadd.xlane.f32.xlu0 %v21599_v21  ;;  %v21616_v18 = vpop.eup %16559  ;;  %16569 = vpow2.f32 %v7611_v62  ;;  %v7621_v38 = vmul.f32 1.442695, %v7607_v33 }
0x108f   : > { %v21619_v35 = vpop.eup %16561  ;;  %16571 = vpow2.f32 %v7613_v25 }
0x1090   : > { %5493 = vadd.xlane.f32.xlu1 %v21603_v34  ;;  %v21622_v46 = vpop.eup %16563 }
0x1092   : > { %5495 = vadd.xlane.f32.xlu0 %v21607_v40 }
0x1094   : > { %5497 = vadd.xlane.f32.xlu1 %v21610_v48 }
0x1096   : > { %5499 = vadd.xlane.f32.xlu0 %v21613_v63  ;;  %v21625_v26 = vpop.eup %16565 }
0x1097   : > { %v21628_v58 = vpop.eup %16567 }
0x1098   : > { %5501 = vadd.xlane.f32.xlu1 %v21616_v18  ;;  %v21631_v28 = vpop.eup %16569 }
0x1099   : > { %v21680_v42 = vpop.eup %16571 }
0x109a   : > { %5503 = vadd.xlane.f32.xlu0 %v21619_v35 }
0x109c   : > { %5505 = vadd.xlane.f32.xlu1 %v21622_v46 }
0x109e   : > { %5507 = vadd.xlane.f32.xlu0 %v21625_v26 }
0x10a0   : > { %7625 = vadd.xlane.f32.xlu1 %v21628_v58 }
0x10a2   : > { %7627 = vadd.xlane.f32.xlu0 %v21631_v28 }
0x1101   : > { %v10297_v41 = vpop.xlane.xlu1 %10296 }
0x1102   : > { %v10312_v5 = vmul.f32 0.0078125, %v10297_v41 }
0x1103   : > { %v10299_v15 = vpop.xlane.xlu0 %10298 }
0x1104   : > { %v21635_v13 = vsub.f32 %v21557_v36, %v10312_v5  ;;  %v10313_v61 = vmul.f32 0.0078125, %v10299_v15 }
0x1106   : > { %v21638_v57 = vsub.f32 %v21561_v1, %v10313_v61  ;;  %v10328_v44 = vmul.f32 %v21635_v13, %v21635_v13 }
0x1108   : > { %10336 = vadd.xlane.f32.xlu1 %v10328_v44  ;;  %v10329_v45 = vmul.f32 %v21638_v57, %v21638_v57 }
0x1109   : > { %v10301_v2 = vpop.xlane.xlu1 %10300 }
0x110a   : > { %10338 = vadd.xlane.f32.xlu0 %v10329_v45  ;;  %v10314_v4 = vmul.f32 0.0078125, %v10301_v2 }
0x110b   : > { %v10303_v22 = vpop.xlane.xlu0 %10302 }
0x110c   : > { %v21645_v59 = vsub.f32 %v21567_v50, %v10314_v4  ;;  %v10315_v36 = vmul.f32 0.0078125, %v10303_v22  ;;  %v7604_v50 = vsub.f32 %v22703_v47, %v7592_v11 }
0x110e   : > { %v21648_v8 = vsub.f32 %v21571_v54, %v10315_v36  ;;  %v10330_v1 = vmul.f32 %v21645_v59, %v21645_v59  ;;  %v7615_v60 = vmul.f32 1.442695, %v7604_v50 }
0x1110   : > { %10340 = vadd.xlane.f32.xlu1 %v10330_v1  ;;  %v10331_v27 = vmul.f32 %v21648_v8, %v21648_v8  ;;  %16573 = vpow2.f32 %v7615_v60 }
0x1111   : > { %v10305_v29 = vpop.xlane.xlu1 %10304 }
0x1112   : > { %v10316_v6 = vmul.f32 0.0078125, %v10305_v29  ;;  %10342 = vadd.xlane.f32.xlu0 %v10331_v27 }
0x1113   : > { %v10307_v51 = vpop.xlane.xlu0 %10306 }
0x1114   : > { %v21657_v32 = vsub.f32 %v21580_v3, %v10316_v6  ;;  %v10317_v54 = vmul.f32 0.0078125, %v10307_v51  ;;  %v7617_v3 = vmul.f32 1.442695, %v7605_v10 }
0x1116   : > { %v21661_v53 = vsub.f32 %v21585_v0, %v10317_v54  ;;  %v10332_v24 = vmul.f32 %v21657_v32, %v21657_v32  ;;  %v7619_v0 = vmul.f32 1.442695, %v7606_v49  ;;  %16575 = vpow2.f32 %v7617_v3 }
0x1118   : > { %10344 = vadd.xlane.f32.xlu1 %v10332_v24  ;;  %v10333_v47 = vmul.f32 %v21661_v53, %v21661_v53 }
0x1119   : > { %v10309_v39 = vpop.xlane.xlu1 %10308 }
0x111a   : > { %10346 = vadd.xlane.f32.xlu0 %v10333_v47  ;;  %v10318_v55 = vmul.f32 0.0078125, %v10309_v39  ;;  %v21683_v11 = vpop.eup %16573 }
0x111b   : > { %v10311_v56 = vpop.xlane.xlu0 %10310 }
0x111c   : > { %v21671_v30 = vsub.f32 %v21594_v43, %v10318_v55  ;;  %v10319_v19 = vmul.f32 0.0078125, %v10311_v56 }
0x111d   : > { %v5494_v20 = vpop.xlane.xlu1 %5493 }
0x111e   : > { %v21674_v12 = vsub.f32 %v21599_v21, %v10319_v19  ;;  %16577 = vrcp.f32 %v5494_v20  ;;  %v10334_v9 = vmul.f32 %v21671_v30, %v21671_v30 }
0x111f   : > { %16579 = vpow2.f32 %v7619_v0  ;;  %v5496_v62 = vpop.xlane.xlu0 %5495 }
0x1120   : > { %16581 = vrcp.f32 %v5496_v62  ;;  %10348 = vadd.xlane.f32.xlu1 %v10334_v9  ;;  %v10335_v7 = vmul.f32 %v21674_v12, %v21674_v12  ;;  %v21686_v37 = vpop.eup %16575 }
0x1121   : > { %16583 = vpow2.f32 %v7621_v38  ;;  %v5498_v43 = vpop.xlane.xlu1 %5497  ;;  %v21727_v38 = vld [vmem:[%s22713_s14] ss:$0 sm:$0xff] }
0x1122   : > { %16585 = vrcp.f32 %v5498_v43  ;;  %10350 = vadd.xlane.f32.xlu0 %v10335_v7 }
0x1123   : > { %16587 = vpow2.f32 %v7623_v14  ;;  %v5500_v21 = vpop.xlane.xlu0 %5499 }
0x1124   : > { %16589 = vrcp.f32 %v5500_v21  ;;  %7629 = vadd.xlane.f32.xlu1 %v21680_v42 }
0x1125   : > { %v5502_v17 = vpop.xlane.xlu1 %5501 }
0x1126   : > { %16591 = vrcp.f32 %v5502_v17  ;;  %7631 = vadd.xlane.f32.xlu0 %v21683_v11 }
0x1127   : > { %v5504_v52 = vpop.xlane.xlu0 %5503 }
0x1128   : > { %v16578_v23 = vpop.eup %16577  ;;  %16593 = vrcp.f32 %v5504_v52  ;;  %7633 = vadd.xlane.f32.xlu1 %v21686_v37 }
0x1129   : > { %v21689_v41 = vpop.eup %16579  ;;  %v5517_v5 = vmul.f32 %v16578_v23, %v21603_v34  ;;  %v5506_v15 = vpop.xlane.xlu1 %5505 }
0x112a   : > { %v16582_v61 = vpop.eup %16581  ;;  %16595 = vrcp.f32 %v5506_v15  ;;  %7635 = vadd.xlane.f32.xlu0 %v21689_v41 }
0x112b   : > { %v21693_v44 = vpop.eup %16583  ;;  %5525 = vst [vmem:[%s17539_s7] sm:$0xff] %v5517_v5  ;;  %v5518_v45 = vmul.f32 %v16582_v61, %v21607_v40  ;;  %v5508_v2 = vpop.xlane.xlu0 %5507 }
0x112c   : > { %v16586_v4 = vpop.eup %16585  ;;  %16597 = vrcp.f32 %v5508_v2  ;;  %7637 = vadd.xlane.f32.xlu1 %v21693_v44 }
0x112d   : > { %v21698_v22 = vpop.eup %16587  ;;  %5526 = vst [vmem:[%s17539_s7 + $0x8] sm:$0xff] %v5518_v45  ;;  %v5519_v34 = vmul.f32 %v16586_v4, %v21610_v48  ;;  %v7626_v36 = vpop.xlane.xlu1 %7625 }
0x112e   : > { %v16590_v1 = vpop.eup %16589  ;;  %16599 = vrcp.f32 %v7626_v36  ;;  %7639 = vadd.xlane.f32.xlu0 %v21698_v22 }
0x112f   : > { %5527 = vst [vmem:[%s17539_s7 + $0x10] sm:$0xff] %v5519_v34  ;;  %v5520_v40 = vmul.f32 %v16590_v1, %v21613_v63  ;;  %v7628_v27 = vpop.xlane.xlu0 %7627 }
0x1130   : > { %v16592_v29 = vpop.eup %16591  ;;  %16601 = vrcp.f32 %v7628_v27 }
0x1131   : > { %5528 = vst [vmem:[%s17539_s7 + $0x18] sm:$0xff] %v5520_v40  ;;  %v5521_v31 = vmul.f32 %v16592_v29, %v21616_v18 }
0x1132   : > { %v16594_v48 = vpop.eup %16593 }
0x1133   : > { %5529 = vst [vmem:[%s17539_s7 + $0x20] sm:$0xff] %v5521_v31  ;;  %v5522_v6 = vmul.f32 %v16594_v48, %v21619_v35 }
0x1134   : > { %v16596_v51 = vpop.eup %16595 }
0x1135   : > { %5530 = vst [vmem:[%s17539_s7 + $0x28] sm:$0xff] %v5522_v6  ;;  %v5523_v50 = vmul.f32 %v16596_v51, %v21622_v46 }
0x1136   : > { %v16598_v54 = vpop.eup %16597 }
0x1137   : > { %5531 = vst [vmem:[%s17539_s7 + $0x30] sm:$0xff] %v5523_v50  ;;  %v5524_v63 = vmul.f32 %v16598_v54, %v21625_v26 }
0x1138   : > { %v16600_v25 = vpop.eup %16599 }
0x1139   : > { %5532 = vst [vmem:[%s17539_s7 + $0x38] sm:$0xff] %v5524_v63  ;;  %v7649_v10 = vmul.f32 %v16600_v25, %v21628_v58 }
0x113a   : > { %v16602_v24 = vpop.eup %16601 }
0x113b   : > { %10725 = vst [vmem:[%s17539_s7 + $0x40] sm:$0xff] %v7649_v10  ;;  %v7650_v18 = vmul.f32 %v16602_v24, %v21631_v28  ;;  %v21721_v28 = vld [vmem:[%s22712_s16] ss:$0 sm:$0xff]  ;;  %s16871_s16 = sshll.u32 %s17029_s15, 4  ;;  %s16872_s16 = int_to_ptr.vmem [resolvable:$false] %s16871_s16 }
0x113c   : > { %s16873_s28 = scalar_lea.vmem %s16872_s16, 2048  ;;  %p16874_p3 = scmp.lt.s32.totalorder %s21772_s9, %s16872_s16 }
0x113d   : > { %10726 = vst [vmem:[%s17539_s7 + $0x48] sm:$0xff] %v7650_v18  ;;  %p16875_p2 = scmp.lt.s32.totalorder %s16873_s28, %s16867_s13 }
0x113f   : > { %p16876_p0 = por %p16875_p2, %p16874_p3 }
0x1141   : > { %p16877_p4 = pnand %p16876_p0, %p16870_p6 }
0x1195   : > { %v10337_v60 = vpop.xlane.xlu1 %10336 }
0x1196   : > { %v10352_v49 = vmul.f32 0.0078125, %v10337_v60 }
0x1197   : > { %v10339_v35 = vpop.xlane.xlu0 %10338 }
0x1198   : > { %v10360_v47 = vadd.f32 1e-05, %v10352_v49  ;;  %v10353_v3 = vmul.f32 0.0078125, %v10339_v35 }
0x119a   : > { %16603 = vrsqrt.f32 %v10360_v47  ;;  %v10361_v46 = vadd.f32 1e-05, %v10353_v3 }
0x119c   : > { %16605 = vrsqrt.f32 %v10361_v46 }
0x119d   : > { %v10341_v33 = vpop.xlane.xlu1 %10340 }
0x119e   : > { %v10354_v39 = vmul.f32 0.0078125, %v10341_v33 }
0x119f   : > { %v10343_v26 = vpop.xlane.xlu0 %10342 }
0x11a0   : > { %v10362_v55 = vadd.f32 1e-05, %v10354_v39  ;;  %v10355_v0 = vmul.f32 0.0078125, %v10343_v26 }
0x11a2   : > { %16607 = vrsqrt.f32 %v10362_v55  ;;  %v10363_v58 = vadd.f32 1e-05, %v10355_v0 }
0x11a4   : > { %v16604_v16 = vpop.eup %16603  ;;  %16609 = vrsqrt.f32 %v10363_v58 }
0x11a5   : > { %v10376_v56 = vmul.f32 %v16604_v16, %v21635_v13  ;;  %v10345_v20 = vpop.xlane.xlu1 %10344 }
0x11a6   : > { %v16606_v19 = vpop.eup %16605  ;;  %v10356_v62 = vmul.f32 0.0078125, %v10345_v20 }
0x11a7   : > { %v10390_v9 = vmul.f32 %v21721_v28, %v10376_v56  ;;  %v10377_v14 = vmul.f32 %v16606_v19, %v21638_v57  ;;  %v10347_v7 = vpop.xlane.xlu0 %10346 }
0x11a8   : > { %v10364_v13 = vadd.f32 1e-05, %v10356_v62  ;;  %v10357_v17 = vmul.f32 0.0078125, %v10347_v7 }
0x11a9   : > { %v10404_v43 = vadd.f32 %v21727_v38, %v10390_v9  ;;  %v10391_v21 = vmul.f32 %v21721_v28, %v10377_v14 }
0x11aa   : > { %16611 = vrsqrt.f32 %v10364_v13  ;;  %v10365_v23 = vadd.f32 1e-05, %v10357_v17 }
0x11ab   : > { %10412 = vst [vmem:[%s17537_s2] sm:$0xff] %v10404_v43  ;;  %v10405_v52 = vadd.f32 %v21727_v38, %v10391_v21 }
0x11ac   : > { %v16608_v5 = vpop.eup %16607  ;;  %16613 = vrsqrt.f32 %v10365_v23 }
0x11ad   : > { %10413 = vst [vmem:[%s17537_s2 + $0x8] sm:$0xff] %v10405_v52  ;;  %v10378_v15 = vmul.f32 %v16608_v5, %v21645_v59  ;;  %v10349_v61 = vpop.xlane.xlu1 %10348 }
0x11ae   : > { %v16610_v57 = vpop.eup %16609  ;;  %v10358_v4 = vmul.f32 0.0078125, %v10349_v61 }
0x11af   : > { %v10392_v45 = vmul.f32 %v21721_v28, %v10378_v15  ;;  %v10379_v2 = vmul.f32 %v16610_v57, %v21648_v8  ;;  %v10351_v34 = vpop.xlane.xlu0 %10350 }
0x11b0   : > { %v10366_v40 = vadd.f32 1e-05, %v10358_v4  ;;  %v10359_v27 = vmul.f32 0.0078125, %v10351_v34 }
0x11b1   : > { %v10406_v36 = vadd.f32 %v21727_v38, %v10392_v45  ;;  %v10393_v1 = vmul.f32 %v21721_v28, %v10379_v2  ;;  %v7630_v29 = vpop.xlane.xlu1 %7629 }
0x11b2   : > { %16615 = vrsqrt.f32 %v10366_v40  ;;  %v10367_v59 = vadd.f32 1e-05, %v10359_v27 }
0x11b3   : > { %10414 = vst [vmem:[%s17537_s2 + $0x10] sm:$0xff] %v10406_v36  ;;  %v10407_v31 = vadd.f32 %v21727_v38, %v10393_v1  ;;  %16617 = vrcp.f32 %v7630_v29  ;;  %v7632_v6 = vpop.xlane.xlu0 %7631 }
0x11b4   : > { %v16612_v48 = vpop.eup %16611  ;;  %16619 = vrsqrt.f32 %v10367_v59 }
0x11b5   : > { %10415 = vst [vmem:[%s17537_s2 + $0x18] sm:$0xff] %v10407_v31  ;;  %v10380_v8 = vmul.f32 %v16612_v48, %v21657_v32  ;;  %16621 = vrcp.f32 %v7632_v6  ;;  %v7634_v50 = vpop.xlane.xlu1 %7633 }
0x11b6   : > { %v16614_v51 = vpop.eup %16613  ;;  %16623 = vrcp.f32 %v7634_v50 }
0x11b7   : > { %v10394_v54 = vmul.f32 %v21721_v28, %v10380_v8  ;;  %v10381_v63 = vmul.f32 %v16614_v51, %v21661_v53  ;;  %v7636_v25 = vpop.xlane.xlu0 %7635 }
0x11b8   : > { %16625 = vrcp.f32 %v7636_v25 }
0x11b9   : > { %v10408_v10 = vadd.f32 %v21727_v38, %v10394_v54  ;;  %v10395_v24 = vmul.f32 %v21721_v28, %v10381_v63  ;;  %v7638_v18 = vpop.xlane.xlu1 %7637 }
0x11ba   : > { %16627 = vrcp.f32 %v7638_v18 }
0x11bb   : > { %10416 = vst [vmem:[%s17537_s2 + $0x20] sm:$0xff] %v10408_v10  ;;  %v10409_v32 = vadd.f32 %v21727_v38, %v10395_v24  ;;  %v7640_v60 = vpop.xlane.xlu0 %7639 }
0x11bc   : > { %v16616_v49 = vpop.eup %16615  ;;  %16629 = vrcp.f32 %v7640_v60 }
0x11bd   : > { %10417 = vst [vmem:[%s17537_s2 + $0x28] sm:$0xff] %v10409_v32  ;;  %v16618_v53 = vpop.eup %16617  ;;  %v10382_v35 = vmul.f32 %v16616_v49, %v21671_v30 }
0x11be   : > { %v16620_v47 = vpop.eup %16619  ;;  %v7651_v3 = vmul.f32 %v16618_v53, %v21680_v42 }
0x11bf   : > { %v16622_v46 = vpop.eup %16621  ;;  %v10396_v33 = vmul.f32 %v21721_v28, %v10382_v35  ;;  %v10383_v39 = vmul.f32 %v16620_v47, %v21674_v12 }
0x11c0   : > { %v16624_v26 = vpop.eup %16623  ;;  %10727 = vst [vmem:[%s17539_s7 + $0x50] sm:$0xff] %v7651_v3  ;;  %v7652_v55 = vmul.f32 %v16622_v46, %v21683_v11 }
0x11c1   : > { %v10410_v30 = vadd.f32 %v21727_v38, %v10396_v33  ;;  %v10397_v42 = vmul.f32 %v21721_v28, %v10383_v39  ;;  %v7653_v0 = vmul.f32 %v16624_v26, %v21686_v37 }
0x11c2   : > { %v16626_v58 = vpop.eup %16625  ;;  %10728 = vst [vmem:[%s17539_s7 + $0x58] sm:$0xff] %v7652_v55 }
0x11c3   : > { %10418 = vst [vmem:[%s17537_s2 + $0x30] sm:$0xff] %v10410_v30  ;;  %v10411_v12 = vadd.f32 %v21727_v38, %v10397_v42  ;;  %10729 = vst [vmem:[%s17539_s7 + $0x60] sm:$0xff] %v7653_v0  ;;  %v7654_v11 = vmul.f32 %v16626_v58, %v21689_v41 }
0x11c4   : > { %v16628_v37 = vpop.eup %16627 }
0x11c5   : > { %10419 = vst [vmem:[%s17537_s2 + $0x38] sm:$0xff] %v10411_v12  ;;  %10730 = vst [vmem:[%s17539_s7 + $0x68] sm:$0xff] %v7654_v11  ;;  %v7655_v16 = vmul.f32 %v16628_v37, %v21693_v44 }
0x11c6   : > { %v16630_v28 = vpop.eup %16629 }
0x11c7   : > { %16880 = shalt.err (!%p16877_p4)
}
0x11c8   : > { %s16881_s2 = scalar_lea.hbm %s21770_s20, 1024  ;;  %s16885_s4 = scalar_lea.hbm %s22716_s18, 4096 }
0x11c9   : > { %p16882_p8 = scmp.ne.s32.totalorder %s21770_s20, %s16881_s2  ;;  %p16886_p11 = scmp.lt.u32.totalorder %s21770_s20, %s22716_s18 }
0x11ca   : > { %p16887_p5 = scmp.lt.u32.totalorder %s16885_s4, %s16881_s2  ;;  %p16889_p9 = scmp.lt.u32.totalorder %s16881_s2, %s21770_s20 }
0x11cb   : > { %p16883_p13 = pnand %p16882_p8, %p22717_p10 }
0x11cc   : > { %p16888_p12 = por %p16887_p5, %p16886_p11 }
0x11cd   : > { %p16884_p1 = pneg %p16883_p13 }
0x11ce   : > { %p16890_p7 = por %p16889_p9, %p16888_p12 }
0x11d0   : > { %p16891_p6 = pnand %p16890_p7, %p16884_p1 }
0x11d2   : > { %16894 = shalt.err (!%p16891_p6)
}
0x11d3   : > { %s17030_s3 = smov 128   ;;  %s17031_s10 = smov 8   ;;  %10731 = vst [vmem:[%s17539_s7 + $0x70] sm:$0xff] %v7655_v16  ;;  %v7656_v41 = vmul.f32 %v16630_v28, %v21698_v22 }
0x11d4   : > { %16298 = dma.vmem_to_hbm [thread:$0]  (%p22717_p10), %s21772_s9, 1024, %s21770_s20, %s10421_s12, %s17030_s3, %s17030_s3, %s17031_s10  }
0x11d5   : > { %10732 = vst [vmem:[%s17539_s7 + $0x78] sm:$0xff] %v7656_v41  ;;  %s10426_s13 = scalar_lea.sflag [#allocation21], %s17510_s11 }
0x11d6   : > { %s10777_s15 = sshll.u32 %s22714_s24, 5  ;;  %s10475_s16 = sshll.u32 %s17539_s7, 4  ;;  %s10476_s16 = int_to_ptr.vmem [resolvable:$true] %s10475_s16 }
0x11d7   : > { %s10456_s28 = sadd.s32 %s10777_s15, %s10773_s27  ;;  %s22718_s2 = sld [smem:[#allocation138_spill]] }
0x11d8   : > { %s10778_s9 = sshll.u32 %s10456_s28, 7  ;;  %s17032_s22 = smov 1024  }
0x11d9   : > { %16299 = sst [smem:[#allocation23]] (%p22717_p10), %s17032_s22  ;;  %s17033_s14 = smov 2048  }
0x11da   : > { %16300 = sst [smem:[#allocation23 + $0x1]] (%p22717_p10), %s17033_s14  ;;  %s17034_s4 = smov 8  }
0x11db   : > { %16301 = sst [smem:[#allocation23 + $0x2]] (%p22717_p10), %s17034_s4  ;;  %s17035_s24 = smov 128  }
0x11dc   : > { %16302 = sst [smem:[#allocation23 + $0x3]] (%p22717_p10), %s17035_s24  ;;  %s17036_s7 = smov [#allocation22]  }
0x11dd   : > { %s10458_s11 = scalar_lea.hbm %s22718_s2, %s10778_s9  ;;  %16303 = sst [smem:[#allocation23 + $0x4]] (%p22717_p10), %s17035_s24 }
0x11de   : > { %16304 = sst [smem:[#allocation23 + $0x5]] (%p22717_p10), %s17034_s4  ;;  %s17037_s17 = smov 0  }
0x11df   : > { %16305 = dma.general (%p22717_p10), %s10476_s16, 2048, %s10458_s11, %s10426_s13, %s17036_s7, [#allocation23], %s17037_s17, 0  }
0x11e0 PF: > { %s22719_s27 = sld [smem:[#allocation32_spill]]  ;;  %s22720_s5 = sld [smem:[#allocation40_spill]] }
0x11e1   : > { %p16354_p3 = scmp.ge.s32.totalorder %s17013_s0, 2 }
0x11e6   : > { %s10503_s8 = sand.u32 1, %s22719_s27   ;;  %p22721_p2 = scmp.ne.s32.totalorder %s22720_s5, 0 }
0x11e7   : > { %s10504_s3 = scalar_lea.sflag [#allocation7], %s10503_s8 }
0x11e8   : > { %p16335_p0 = pnand %p16354_p3, %p22721_p2 }
0x11ea   : > { %16964 = dma.done.wait (!%p16335_p0), %s10504_s3, 1024  }
0x11eb   : > { %16966 = vsyncadd (!%p16335_p0), %s10504_s3, 4294966272  ;;  %s10513_s10 = scalar_lea.sflag [#allocation21], %s10503_s8 }
0x11ec   : > { %16968 = dma.done.wait (!%p16335_p0), %s10513_s10, 2048  }
0x11ed   : > { %16970 = vsyncadd (!%p16335_p0), %s10513_s10, 4294965248  ;;  %s42_s0 = sadd.s32 1, %s17013_s0   ;;  %s22722_s21 = sld [smem:[#allocation33_spill]] }
0x11ee   : > { %p39_p4 = scmp.ge.s32.totalorder %s42_s0, 6   ;;  %s22723_s13 = sld [smem:[#allocation37_spill]] }
0x11ef   : > { %s22724_s15 = sld [smem:[#allocation38_spill]]  ;;  %s22725_s22 = smov %s16981_s23 }
0x11f0   : > { %s22726_s23 = smov %s17448_s19  ;;  %s22727_s24 = smov %s16989_s25 }
0x11f1   : > { %s22728_s25 = smov %s16993_s26  ;;  %s22729_s26 = smov %s17445_s6 }
0x11f2   : > { %s22730_s27 = smov %s17005_s29  ;;  %s22731_s28 = smov %s17009_s30 }
0x11f3   :  { %41 = sbr.rel (!%p39_p4) target bundleno = 34 (0x22), region = 190 }
0x11f4   : > { %s22732_s29 = smov %s22723_s13 }
0x11f5   : > { %s22733_s30 = smov %s22724_s15 }
0x11fa   :  { %10518 = vsyncpa [#allocation6], 1 }
0x11fb   :  { %10520 = vsyncpa [#allocation6 + $0x1], 1 }
0x11fc   :  { %10521 = vsyncpa [#allocation9], 1 }
0x11fd   :  { %10523 = vsyncpa [#allocation9 + $0x1], 1 }
0x11fe   :  { %10524 = vsyncpa [#allocation12], 1 }
0x11ff   :  { %10525 = vsyncpa [#allocation15], 1 }
0x1200   :  { %10526 = vsyncpa [#allocation18], 1 }
0x1201   :  { %10527 = vsyncpa [#allocation7], 1 }
0x1202   :  { %10529 = vsyncpa [#allocation7 + $0x1], 1 }
0x1203   :  { %10530 = vsyncpa [#allocation21], 1 }
0x1204   :  { %10532 = vsyncpa [#allocation21 + $0x1], 1 }

</bundles_post_ra>
